<compile_context>
chip_gen: v7x
topology: tpu7x:2x2x1
jax: 0.10.0
libtpu: 0.0.40
codegen_flags: <defaults>
</compile_context>

<pallas_src>
import math
import functools
from collections import namedtuple

import jax
import jax.numpy as jnp
from jax import lax
from jax.experimental import pallas as pl
from jax.experimental.pallas import tpu as pltpu

_TWO_PI = 2.0 * math.pi

CURLLosses = namedtuple("losses", ["l1", "rgb", "ssim", "cosine_rgb", "hsv", "curl"])


# ---------------------------------------------------------------------------
# deterministic "parameters": the 1-D gaussian SSIM window (module has no weights)
# ---------------------------------------------------------------------------
def _gaussian_1d(size, sigma):
    g = [math.exp(-((x - size // 2) ** 2) / float(2 * sigma ** 2)) for x in range(size)]
    s = sum(g)
    return tuple(v / s for v in g)


# ---------------------------------------------------------------------------
# elementwise color-space helpers (traced inside the Pallas color kernel)
# ---------------------------------------------------------------------------
def _nan_to_zero(x):
    return jnp.where(x != x, jnp.zeros_like(x), x)


def _srgb_to_linear(c):
    lin = c / 12.92
    gam = jnp.exp(2.4 * jnp.log((jnp.maximum(c, 1e-4) + 0.055) / 1.055))
    return jnp.where(c <= 0.04045, lin, gam)


def _lab_f(t):
    eps = 6.0 / 29.0
    lin = t / (3.0 * eps * eps) + 4.0 / 29.0
    cub = jnp.exp(jnp.log(jnp.maximum(t, 1e-4)) / 3.0)
    return jnp.where(t <= eps ** 3, lin, cub)


def _rgb_to_lab(r, g, b):
    rl, gl, bl = _srgb_to_linear(r), _srgb_to_linear(g), _srgb_to_linear(b)
    x = 0.412453 * rl + 0.357580 * gl + 0.180423 * bl
    y = 0.212671 * rl + 0.715160 * gl + 0.072169 * bl
    z = 0.019334 * rl + 0.119193 * gl + 0.950227 * bl
    x = x * (1.0 / 0.950456)
    z = z * (1.0 / 1.088754)
    fx, fy, fz = _lab_f(x), _lab_f(y), _lab_f(z)
    L = (116.0 * fy - 16.0) / 100.0
    a = (500.0 * (fx - fy) / 110.0 + 1.0) / 2.0
    b2 = (200.0 * (fy - fz) / 110.0 + 1.0) / 2.0
    return _nan_to_zero(L), _nan_to_zero(a), _nan_to_zero(b2)


def _rgb_to_hsv(r, g, b):
    r = jnp.clip(r, 1e-9, 1.0)
    g = jnp.clip(g, 1e-9, 1.0)
    b = jnp.clip(b, 1e-9, 1.0)
    mx = jnp.maximum(jnp.maximum(r, g), b)
    mn = jnp.minimum(jnp.minimum(r, g), b)
    df = mx - mn + 1e-10
    h = (((g - b) / df) * (r == mx).astype(r.dtype)
         + (2.0 + (b - r) / df) * (g == mx).astype(r.dtype)
         + (4.0 + (r - g) / df) * (b == mx).astype(r.dtype))
    h = h * 60.0
    h = jnp.where(h < 0.0, h + 360.0, h)
    h = h / 360.0
    s = jnp.where(mx != 0.0, df / mx, jnp.zeros_like(mx))
    v = mx
    return _nan_to_zero(h), _nan_to_zero(s), _nan_to_zero(v)


# ---------------------------------------------------------------------------
# Pallas kernel 1: lane-dense per-image color losses (+ L channel for MS-SSIM)
# input block: (1, C, H*W/128, 128) -> each channel plane is full (8,128) vregs
# ---------------------------------------------------------------------------
def _color_loss_kernel(pred_ref, targ_ref, stats_ref, predL_ref, targL_ref):
    pr, pg, pb = pred_ref[0, 0], pred_ref[0, 1], pred_ref[0, 2]
    tr, tg, tb = targ_ref[0, 0], targ_ref[0, 1], targ_ref[0, 2]

    pL, pa, pbb = [jnp.clip(c, 0.0, 1.0) for c in _rgb_to_lab(pr, pg, pb)]
    tL, ta, tbb = [jnp.clip(c, 0.0, 1.0) for c in _rgb_to_lab(tr, tg, tb)]

    ph, ps, pv = [jnp.clip(c, 0.0, 1.0) for c in _rgb_to_hsv(pr, pg, pb)]
    th, ts, tv = [jnp.clip(c, 0.0, 1.0) for c in _rgb_to_hsv(tr, tg, tb)]

    ph = ph * _TWO_PI
    th = th * _TWO_PI
    p1 = pv * ps * jnp.cos(ph)
    p2 = pv * ps * jnp.sin(ph)
    t1 = tv * ts * jnp.cos(th)
    t2 = tv * ts * jnp.sin(th)

    lab_l1 = (jnp.mean(jnp.abs(pL - tL)) + jnp.mean(jnp.abs(pa - ta))
              + jnp.mean(jnp.abs(pbb - tbb))) / 3.0
    rgb_l1 = (jnp.mean(jnp.abs(pr - tr)) + jnp.mean(jnp.abs(pg - tg))
              + jnp.mean(jnp.abs(pb - tb))) / 3.0
    hsv_l1 = (jnp.mean(jnp.abs(p1 - t1)) + jnp.mean(jnp.abs(p2 - t2))
              + jnp.mean(jnp.abs(pv - tv))) / 3.0

    dot = pr * tr + pg * tg + pb * tb
    n_p = jnp.sqrt(pr * pr + pg * pg + pb * pb)
    n_t = jnp.sqrt(tr * tr + tg * tg + tb * tb)
    cos = dot / (jnp.maximum(n_p, 1e-8) * jnp.maximum(n_t, 1e-8))
    cos_loss = 1.0 - jnp.mean(cos)

    # pack the 4 per-image scalars into one small lane row (single output stream)
    lane = lax.broadcasted_iota(jnp.int32, (1, 8), 1)
    stats = (jnp.where(lane == 0, lab_l1, 0.0)
             + jnp.where(lane == 1, rgb_l1, 0.0)
             + jnp.where(lane == 2, hsv_l1, 0.0)
             + jnp.where(lane == 3, cos_loss, 0.0))
    stats_ref[0] = stats.astype(jnp.float32)
    predL_ref[0] = pL
    targL_ref[0] = tL


def _color_losses(pred_r, targ_r):
    N, C, R, L = pred_r.shape
    return pl.pallas_call(
        _color_loss_kernel,
        grid=(N,),
        in_specs=[pl.BlockSpec((1, C, R, L), lambda i: (i, 0, 0, 0)),
                  pl.BlockSpec((1, C, R, L), lambda i: (i, 0, 0, 0))],
        out_specs=(pl.BlockSpec((1, 1, 8), lambda i: (i, 0, 0)),
                   pl.BlockSpec((1, R, L), lambda i: (i, 0, 0)),
                   pl.BlockSpec((1, R, L), lambda i: (i, 0, 0))),
        out_shape=(jax.ShapeDtypeStruct((N, 1, 8), jnp.float32),
                   jax.ShapeDtypeStruct((N, R, L), jnp.float32),
                   jax.ShapeDtypeStruct((N, R, L), jnp.float32)),
        compiler_params=pltpu.CompilerParams(dimension_semantics=("parallel",)),
    )(pred_r, targ_r)


# ---------------------------------------------------------------------------
# Pallas kernel 2: full MS-SSIM pyramid for one image pair, fused in one call.
# The gaussian conv (zero padding 2) is the separable banded matmul G @ x @ G,
# the 2x2 avg-pool is P @ x @ P^T; every level lives in the fixed HxW canvas
# (top-left corner) with an iota validity mask for the per-level means.
# ---------------------------------------------------------------------------
def _msssim_kernel(i1_ref, i2_ref, out_ref, *, H, W, g1d, levels):
    x1 = i1_ref[0]  # (H, W)
    x2 = i2_ref[0]
    C1 = 0.01 ** 2
    C2 = 0.03 ** 2
    half = len(g1d) // 2

    # full-canvas banded gaussian matrices (symmetric window), built once
    rh = lax.broadcasted_iota(jnp.int32, (H, H), 0)
    ch = lax.broadcasted_iota(jnp.int32, (H, H), 1)
    rw = lax.broadcasted_iota(jnp.int32, (W, W), 0)
    cw = lax.broadcasted_iota(jnp.int32, (W, W), 1)
    band_h = jnp.zeros((H, H), jnp.float32)
    band_w = jnp.zeros((W, W), jnp.float32)
    for k, wv in enumerate(g1d):
        band_h = band_h + jnp.where(ch - rh == k - half, wv, 0.0)
        band_w = band_w + jnp.where(cw - rw == k - half, wv, 0.0)

    row_hw = lax.broadcasted_iota(jnp.int32, (H, W), 0)
    col_hw = lax.broadcasted_iota(jnp.int32, (H, W), 1)

    h, w = H, W
    ssim_vals, cs_vals = [], []
    for lvl in range(levels):
        gl = jnp.where((rh < h) & (ch < h), band_h, 0.0)   # (H, H)
        gr = jnp.where((rw < w) & (cw < w), band_w, 0.0)   # (W, W)

        def conv(f):
            t = jnp.dot(gl, f, preferred_element_type=jnp.float32)
            return jnp.dot(t, gr, preferred_element_type=jnp.float32)

        mu1, mu2 = conv(x1), conv(x2)
        s11, s22, s12 = conv(x1 * x1), conv(x2 * x2), conv(x1 * x2)
        mu1_sq, mu2_sq, mu12 = mu1 * mu1, mu2 * mu2, mu1 * mu2
        sig1, sig2, sig12 = s11 - mu1_sq, s22 - mu2_sq, s12 - mu12
        v1 = 2.0 * sig12 + C2
        v2 = sig1 + sig2 + C2
        ssim_map = ((2.0 * mu12 + C1) * v1) / ((mu1_sq + mu2_sq + C1) * v2)

        mask = ((row_hw < h) & (col_hw < w)).astype(jnp.float32)
        inv_area = 1.0 / float(h * w)
        ssim_vals.append(jnp.sum(ssim_map * mask) * inv_area)
        cs_vals.append(jnp.sum((v1 / v2) * mask) * inv_area)

        if lvl < levels - 1:
            # 2x2 average pooling into the top-left corner of the canvas
            pool_l = jnp.where((rh < h // 2) & ((ch == 2 * rh) | (ch == 2 * rh + 1)),
                               0.5, 0.0)                     # (H, H)
            pool_r = jnp.where((cw < w // 2) & ((rw == 2 * cw) | (rw == 2 * cw + 1)),
                               0.5, 0.0)                     # (W, W)
            x1 = jnp.dot(jnp.dot(pool_l, x1, preferred_element_type=jnp.float32),
                         pool_r, preferred_element_type=jnp.float32)
            x2 = jnp.dot(jnp.dot(pool_l, x2, preferred_element_type=jnp.float32),
                         pool_r, preferred_element_type=jnp.float32)
            h //= 2
            w //= 2

    # pack per-level (ssim, cs) into one (1, 16) row: lanes 0..4 = ssim, 8..12 = cs
    lane = lax.broadcasted_iota(jnp.int32, (1, 16), 1)
    acc = jnp.zeros((1, 16), jnp.float32)
    for k in range(levels):
        acc = acc + jnp.where(lane == k, ssim_vals[k], 0.0)
        acc = acc + jnp.where(lane == 8 + k, cs_vals[k], 0.0)
    out_ref[0] = acc


def _msssim(predL, targL, g1d, levels):
    N, H, W = predL.shape
    kernel = functools.partial(_msssim_kernel, H=H, W=W, g1d=tuple(g1d), levels=levels)
    return pl.pallas_call(
        kernel,
        grid=(N,),
        in_specs=[pl.BlockSpec((1, H, W), lambda i: (i, 0, 0)),
                  pl.BlockSpec((1, H, W), lambda i: (i, 0, 0))],
        out_specs=pl.BlockSpec((1, 1, 16), lambda i: (i, 0, 0)),
        out_shape=jax.ShapeDtypeStruct((N, 1, 16), jnp.float32),
        compiler_params=pltpu.CompilerParams(dimension_semantics=("parallel",)),
    )(predL, targL)


# ---------------------------------------------------------------------------
# CURLLoss.forward
# ---------------------------------------------------------------------------
def curl_loss(predicted_img_batch, target_img_batch, gradient_regulariser,
              ssim_win_size=5, alpha=0.5):
    # alpha is unused in the reference forward pass.
    del alpha
    pred = predicted_img_batch.astype(jnp.float32)
    targ = target_img_batch.astype(jnp.float32)
    N, C, H, W = pred.shape
    HW = H * W
    assert HW % 128 == 0, "H*W must be a multiple of 128 for the lane-dense color kernel"
    R = HW // 128

    # lane-dense view for the elementwise color math (free reshape in XLA)
    stats, predL_flat, targL_flat = _color_losses(pred.reshape(N, C, R, 128),
                                                  targ.reshape(N, C, R, 128))
    lab_l1 = jnp.mean(stats[:, 0, 0])
    rgb_l1 = jnp.mean(stats[:, 0, 1])
    hsv_l1 = jnp.mean(stats[:, 0, 2])
    cos_l = jnp.mean(stats[:, 0, 3])

    # spatial view of the (clamped) L channel for MS-SSIM (free reshape in XLA)
    predL = predL_flat.reshape(N, H, W)
    targL = targL_flat.reshape(N, H, W)

    levels = 5
    g1d = _gaussian_1d(ssim_win_size, 1.5)
    ms = _msssim(predL, targL, g1d, levels)            # (N, 1, 16)
    mssim = (ms[:, 0, 0:levels] + 1.0) / 2.0           # (N, levels)
    mcs = (ms[:, 0, 8:8 + levels] + 1.0) / 2.0         # (N, levels)
    weights = jnp.array([0.0448, 0.2856, 0.3001, 0.2363, 0.1333], jnp.float32)
    msssim = (jnp.prod(mcs[:, :levels - 1] ** weights[None, :levels - 1], axis=1)
              * mssim[:, levels - 1] ** weights[levels - 1])   # (N,)
    ssim_loss = jnp.mean(1.0 - msssim)

    curl = (rgb_l1 + cos_l + lab_l1 + hsv_l1 + 10.0 * ssim_loss
            + 1e-06 * gradient_regulariser) / 6.0

    as11 = lambda x: jnp.reshape(jnp.asarray(x, jnp.float32), (1, 1))
    return CURLLosses(as11(lab_l1), as11(rgb_l1), as11(ssim_loss),
                      as11(cos_l), as11(hsv_l1), as11(curl))


if __name__ == "__main__":
    key = jax.random.PRNGKey(0)
    k1, k2 = jax.random.split(key)
    N, C, H, W = 2, 3, 32, 32          # RGB images in [0, 1], NCHW
    predicted = jax.random.uniform(k1, (N, C, H, W), jnp.float32)
    target = jax.random.uniform(k2, (N, C, H, W), jnp.float32)
    gradient_regulariser = jnp.float32(0.123)

    loss_fn = jax.jit(curl_loss)
    out = loss_fn(predicted, target, gradient_regulariser)
    jax.block_until_ready(out.curl)
    print("KERNEL_OK")
</pallas_src>

<mosaic_0001>
module attributes {stable_mosaic.version = 11 : i64} {
  func.func @_color_loss_kernel(%arg0: i32, %arg1: memref<1x3x8x128xf32, #tpu.memory_space<vmem>>, %arg2: memref<1x3x8x128xf32, #tpu.memory_space<vmem>>, %arg3: memref<1x1x8xf32, #tpu.memory_space<vmem>>, %arg4: memref<1x8x128xf32, #tpu.memory_space<vmem>>, %arg5: memref<1x8x128xf32, #tpu.memory_space<vmem>>) attributes {dimension_semantics = [#tpu.dimension_semantics<parallel>], iteration_bounds = array<i64: 2>, scalar_prefetch = 0 : i64, scratch_operands = 0 : i64, tpu.core_type = #tpu.core_type<tc>, window_params = [{transform_indices = @transform_0, window_bounds = array<i64: 1, 3, 8, 128>}, {transform_indices = @transform_1, window_bounds = array<i64: 1, 3, 8, 128>}, {transform_indices = @transform_2, window_bounds = array<i64: 1, 1, 8>}, {transform_indices = @transform_3, window_bounds = array<i64: 1, 8, 128>}, {transform_indices = @transform_4, window_bounds = array<i64: 1, 8, 128>}]} {
    %c0 = arith.constant 0 : index
    %c0_0 = arith.constant 0 : index
    %c0_1 = arith.constant 0 : index
    %c0_2 = arith.constant 0 : index
    %0 = vector.load %arg1[%c0, %c0_0, %c0_1, %c0_2] : memref<1x3x8x128xf32, #tpu.memory_space<vmem>>, vector<1x1x8x128xf32>
    %1 = vector.shape_cast %0 : vector<1x1x8x128xf32> to vector<8x128xf32>
    %c0_3 = arith.constant 0 : index
    %c1 = arith.constant 1 : index
    %c0_4 = arith.constant 0 : index
    %c0_5 = arith.constant 0 : index
    %2 = vector.load %arg1[%c0_3, %c1, %c0_4, %c0_5] : memref<1x3x8x128xf32, #tpu.memory_space<vmem>>, vector<1x1x8x128xf32>
    %3 = vector.shape_cast %2 : vector<1x1x8x128xf32> to vector<8x128xf32>
    %c0_6 = arith.constant 0 : index
    %c2 = arith.constant 2 : index
    %c0_7 = arith.constant 0 : index
    %c0_8 = arith.constant 0 : index
    %4 = vector.load %arg1[%c0_6, %c2, %c0_7, %c0_8] : memref<1x3x8x128xf32, #tpu.memory_space<vmem>>, vector<1x1x8x128xf32>
    %5 = vector.shape_cast %4 : vector<1x1x8x128xf32> to vector<8x128xf32>
    %c0_9 = arith.constant 0 : index
    %c0_10 = arith.constant 0 : index
    %c0_11 = arith.constant 0 : index
    %c0_12 = arith.constant 0 : index
    %6 = vector.load %arg2[%c0_9, %c0_10, %c0_11, %c0_12] : memref<1x3x8x128xf32, #tpu.memory_space<vmem>>, vector<1x1x8x128xf32>
    %7 = vector.shape_cast %6 : vector<1x1x8x128xf32> to vector<8x128xf32>
    %c0_13 = arith.constant 0 : index
    %c1_14 = arith.constant 1 : index
    %c0_15 = arith.constant 0 : index
    %c0_16 = arith.constant 0 : index
    %8 = vector.load %arg2[%c0_13, %c1_14, %c0_15, %c0_16] : memref<1x3x8x128xf32, #tpu.memory_space<vmem>>, vector<1x1x8x128xf32>
    %9 = vector.shape_cast %8 : vector<1x1x8x128xf32> to vector<8x128xf32>
    %c0_17 = arith.constant 0 : index
    %c2_18 = arith.constant 2 : index
    %c0_19 = arith.constant 0 : index
    %c0_20 = arith.constant 0 : index
    %10 = vector.load %arg2[%c0_17, %c2_18, %c0_19, %c0_20] : memref<1x3x8x128xf32, #tpu.memory_space<vmem>>, vector<1x1x8x128xf32>
    %11 = vector.shape_cast %10 : vector<1x1x8x128xf32> to vector<8x128xf32>
    %cst = arith.constant 1.292000e+01 : f32
    %12 = vector.broadcast %cst : f32 to vector<8x128xf32>
    %13 = arith.divf %1, %12 : vector<8x128xf32>
    %cst_21 = arith.constant 9.99999974E-5 : f32
    %14 = vector.broadcast %cst_21 : f32 to vector<8x128xf32>
    %15 = arith.maximumf %1, %14 : vector<8x128xf32>
    %cst_22 = arith.constant 5.500000e-02 : f32
    %16 = vector.broadcast %cst_22 : f32 to vector<8x128xf32>
    %17 = arith.addf %15, %16 : vector<8x128xf32>
    %cst_23 = arith.constant 1.055000e+00 : f32
    %18 = vector.broadcast %cst_23 : f32 to vector<8x128xf32>
    %19 = arith.divf %17, %18 : vector<8x128xf32>
    %20 = math.log %19 : vector<8x128xf32>
    %cst_24 = arith.constant 2.400000e+00 : f32
    %21 = vector.broadcast %cst_24 : f32 to vector<8x128xf32>
    %22 = arith.mulf %21, %20 : vector<8x128xf32>
    %23 = math.exp %22 : vector<8x128xf32>
    %cst_25 = arith.constant 4.045000e-02 : f32
    %24 = vector.broadcast %cst_25 : f32 to vector<8x128xf32>
    %25 = arith.cmpf ole, %1, %24 : vector<8x128xf32>
    %26 = arith.select %25, %13, %23 : vector<8x128xi1>, vector<8x128xf32>
    %cst_26 = arith.constant 1.292000e+01 : f32
    %27 = vector.broadcast %cst_26 : f32 to vector<8x128xf32>
    %28 = arith.divf %3, %27 : vector<8x128xf32>
    %cst_27 = arith.constant 9.99999974E-5 : f32
    %29 = vector.broadcast %cst_27 : f32 to vector<8x128xf32>
    %30 = arith.maximumf %3, %29 : vector<8x128xf32>
    %cst_28 = arith.constant 5.500000e-02 : f32
    %31 = vector.broadcast %cst_28 : f32 to vector<8x128xf32>
    %32 = arith.addf %30, %31 : vector<8x128xf32>
    %cst_29 = arith.constant 1.055000e+00 : f32
    %33 = vector.broadcast %cst_29 : f32 to vector<8x128xf32>
    %34 = arith.divf %32, %33 : vector<8x128xf32>
    %35 = math.log %34 : vector<8x128xf32>
    %cst_30 = arith.constant 2.400000e+00 : f32
    %36 = vector.broadcast %cst_30 : f32 to vector<8x128xf32>
    %37 = arith.mulf %36, %35 : vector<8x128xf32>
    %38 = math.exp %37 : vector<8x128xf32>
    %cst_31 = arith.constant 4.045000e-02 : f32
    %39 = vector.broadcast %cst_31 : f32 to vector<8x128xf32>
    %40 = arith.cmpf ole, %3, %39 : vector<8x128xf32>
    %41 = arith.select %40, %28, %38 : vector<8x128xi1>, vector<8x128xf32>
    %cst_32 = arith.constant 1.292000e+01 : f32
    %42 = vector.broadcast %cst_32 : f32 to vector<8x128xf32>
    %43 = arith.divf %5, %42 : vector<8x128xf32>
    %cst_33 = arith.constant 9.99999974E-5 : f32
    %44 = vector.broadcast %cst_33 : f32 to vector<8x128xf32>
    %45 = arith.maximumf %5, %44 : vector<8x128xf32>
    %cst_34 = arith.constant 5.500000e-02 : f32
    %46 = vector.broadcast %cst_34 : f32 to vector<8x128xf32>
    %47 = arith.addf %45, %46 : vector<8x128xf32>
    %cst_35 = arith.constant 1.055000e+00 : f32
    %48 = vector.broadcast %cst_35 : f32 to vector<8x128xf32>
    %49 = arith.divf %47, %48 : vector<8x128xf32>
    %50 = math.log %49 : vector<8x128xf32>
    %cst_36 = arith.constant 2.400000e+00 : f32
    %51 = vector.broadcast %cst_36 : f32 to vector<8x128xf32>
    %52 = arith.mulf %51, %50 : vector<8x128xf32>
    %53 = math.exp %52 : vector<8x128xf32>
    %cst_37 = arith.constant 4.045000e-02 : f32
    %54 = vector.broadcast %cst_37 : f32 to vector<8x128xf32>
    %55 = arith.cmpf ole, %5, %54 : vector<8x128xf32>
    %56 = arith.select %55, %43, %53 : vector<8x128xi1>, vector<8x128xf32>
    %cst_38 = arith.constant 4.124530e-01 : f32
    %57 = vector.broadcast %cst_38 : f32 to vector<8x128xf32>
    %58 = arith.mulf %57, %26 : vector<8x128xf32>
    %cst_39 = arith.constant 3.575800e-01 : f32
    %59 = vector.broadcast %cst_39 : f32 to vector<8x128xf32>
    %60 = arith.mulf %59, %41 : vector<8x128xf32>
    %61 = arith.addf %58, %60 : vector<8x128xf32>
    %cst_40 = arith.constant 1.804230e-01 : f32
    %62 = vector.broadcast %cst_40 : f32 to vector<8x128xf32>
    %63 = arith.mulf %62, %56 : vector<8x128xf32>
    %64 = arith.addf %61, %63 : vector<8x128xf32>
    %cst_41 = arith.constant 2.126710e-01 : f32
    %65 = vector.broadcast %cst_41 : f32 to vector<8x128xf32>
    %66 = arith.mulf %65, %26 : vector<8x128xf32>
    %cst_42 = arith.constant 7.151600e-01 : f32
    %67 = vector.broadcast %cst_42 : f32 to vector<8x128xf32>
    %68 = arith.mulf %67, %41 : vector<8x128xf32>
    %69 = arith.addf %66, %68 : vector<8x128xf32>
    %cst_43 = arith.constant 7.216900e-02 : f32
    %70 = vector.broadcast %cst_43 : f32 to vector<8x128xf32>
    %71 = arith.mulf %70, %56 : vector<8x128xf32>
    %72 = arith.addf %69, %71 : vector<8x128xf32>
    %cst_44 = arith.constant 1.933400e-02 : f32
    %73 = vector.broadcast %cst_44 : f32 to vector<8x128xf32>
    %74 = arith.mulf %73, %26 : vector<8x128xf32>
    %cst_45 = arith.constant 1.191930e-01 : f32
    %75 = vector.broadcast %cst_45 : f32 to vector<8x128xf32>
    %76 = arith.mulf %75, %41 : vector<8x128xf32>
    %77 = arith.addf %74, %76 : vector<8x128xf32>
    %cst_46 = arith.constant 9.502270e-01 : f32
    %78 = vector.broadcast %cst_46 : f32 to vector<8x128xf32>
    %79 = arith.mulf %78, %56 : vector<8x128xf32>
    %80 = arith.addf %77, %79 : vector<8x128xf32>
    %cst_47 = arith.constant 1.05212653 : f32
    %81 = vector.broadcast %cst_47 : f32 to vector<8x128xf32>
    %82 = arith.mulf %64, %81 : vector<8x128xf32>
    %cst_48 = arith.constant 0.918481112 : f32
    %83 = vector.broadcast %cst_48 : f32 to vector<8x128xf32>
    %84 = arith.mulf %80, %83 : vector<8x128xf32>
    %cst_49 = arith.constant 0.12841855 : f32
    %85 = vector.broadcast %cst_49 : f32 to vector<8x128xf32>
    %86 = arith.divf %82, %85 : vector<8x128xf32>
    %cst_50 = arith.constant 0.137931034 : f32
    %87 = vector.broadcast %cst_50 : f32 to vector<8x128xf32>
    %88 = arith.addf %86, %87 : vector<8x128xf32>
    %cst_51 = arith.constant 9.99999974E-5 : f32
    %89 = vector.broadcast %cst_51 : f32 to vector<8x128xf32>
    %90 = arith.maximumf %82, %89 : vector<8x128xf32>
    %91 = math.log %90 : vector<8x128xf32>
    %cst_52 = arith.constant 3.000000e+00 : f32
    %92 = vector.broadcast %cst_52 : f32 to vector<8x128xf32>
    %93 = arith.divf %91, %92 : vector<8x128xf32>
    %94 = math.exp %93 : vector<8x128xf32>
    %cst_53 = arith.constant 0.00885645207 : f32
    %95 = vector.broadcast %cst_53 : f32 to vector<8x128xf32>
    %96 = arith.cmpf ole, %82, %95 : vector<8x128xf32>
    %97 = arith.select %96, %88, %94 : vector<8x128xi1>, vector<8x128xf32>
    %cst_54 = arith.constant 0.12841855 : f32
    %98 = vector.broadcast %cst_54 : f32 to vector<8x128xf32>
    %99 = arith.divf %72, %98 : vector<8x128xf32>
    %cst_55 = arith.constant 0.137931034 : f32
    %100 = vector.broadcast %cst_55 : f32 to vector<8x128xf32>
    %101 = arith.addf %99, %100 : vector<8x128xf32>
    %cst_56 = arith.constant 9.99999974E-5 : f32
    %102 = vector.broadcast %cst_56 : f32 to vector<8x128xf32>
    %103 = arith.maximumf %72, %102 : vector<8x128xf32>
    %104 = math.log %103 : vector<8x128xf32>
    %cst_57 = arith.constant 3.000000e+00 : f32
    %105 = vector.broadcast %cst_57 : f32 to vector<8x128xf32>
    %106 = arith.divf %104, %105 : vector<8x128xf32>
    %107 = math.exp %106 : vector<8x128xf32>
    %cst_58 = arith.constant 0.00885645207 : f32
    %108 = vector.broadcast %cst_58 : f32 to vector<8x128xf32>
    %109 = arith.cmpf ole, %72, %108 : vector<8x128xf32>
    %110 = arith.select %109, %101, %107 : vector<8x128xi1>, vector<8x128xf32>
    %cst_59 = arith.constant 0.12841855 : f32
    %111 = vector.broadcast %cst_59 : f32 to vector<8x128xf32>
    %112 = arith.divf %84, %111 : vector<8x128xf32>
    %cst_60 = arith.constant 0.137931034 : f32
    %113 = vector.broadcast %cst_60 : f32 to vector<8x128xf32>
    %114 = arith.addf %112, %113 : vector<8x128xf32>
    %cst_61 = arith.constant 9.99999974E-5 : f32
    %115 = vector.broadcast %cst_61 : f32 to vector<8x128xf32>
    %116 = arith.maximumf %84, %115 : vector<8x128xf32>
    %117 = math.log %116 : vector<8x128xf32>
    %cst_62 = arith.constant 3.000000e+00 : f32
    %118 = vector.broadcast %cst_62 : f32 to vector<8x128xf32>
    %119 = arith.divf %117, %118 : vector<8x128xf32>
    %120 = math.exp %119 : vector<8x128xf32>
    %cst_63 = arith.constant 0.00885645207 : f32
    %121 = vector.broadcast %cst_63 : f32 to vector<8x128xf32>
    %122 = arith.cmpf ole, %84, %121 : vector<8x128xf32>
    %123 = arith.select %122, %114, %120 : vector<8x128xi1>, vector<8x128xf32>
    %cst_64 = arith.constant 1.160000e+02 : f32
    %124 = vector.broadcast %cst_64 : f32 to vector<8x128xf32>
    %125 = arith.mulf %124, %110 : vector<8x128xf32>
    %cst_65 = arith.constant 1.600000e+01 : f32
    %126 = vector.broadcast %cst_65 : f32 to vector<8x128xf32>
    %127 = arith.subf %125, %126 : vector<8x128xf32>
    %cst_66 = arith.constant 1.000000e+02 : f32
    %128 = vector.broadcast %cst_66 : f32 to vector<8x128xf32>
    %129 = arith.divf %127, %128 : vector<8x128xf32>
    %130 = arith.subf %97, %110 : vector<8x128xf32>
    %cst_67 = arith.constant 5.000000e+02 : f32
    %131 = vector.broadcast %cst_67 : f32 to vector<8x128xf32>
    %132 = arith.mulf %131, %130 : vector<8x128xf32>
    %cst_68 = arith.constant 1.100000e+02 : f32
    %133 = vector.broadcast %cst_68 : f32 to vector<8x128xf32>
    %134 = arith.divf %132, %133 : vector<8x128xf32>
    %cst_69 = arith.constant 1.000000e+00 : f32
    %135 = vector.broadcast %cst_69 : f32 to vector<8x128xf32>
    %136 = arith.addf %134, %135 : vector<8x128xf32>
    %cst_70 = arith.constant 2.000000e+00 : f32
    %137 = vector.broadcast %cst_70 : f32 to vector<8x128xf32>
    %138 = arith.divf %136, %137 : vector<8x128xf32>
    %139 = arith.subf %110, %123 : vector<8x128xf32>
    %cst_71 = arith.constant 2.000000e+02 : f32
    %140 = vector.broadcast %cst_71 : f32 to vector<8x128xf32>
    %141 = arith.mulf %140, %139 : vector<8x128xf32>
    %cst_72 = arith.constant 1.100000e+02 : f32
    %142 = vector.broadcast %cst_72 : f32 to vector<8x128xf32>
    %143 = arith.divf %141, %142 : vector<8x128xf32>
    %cst_73 = arith.constant 1.000000e+00 : f32
    %144 = vector.broadcast %cst_73 : f32 to vector<8x128xf32>
    %145 = arith.addf %143, %144 : vector<8x128xf32>
    %cst_74 = arith.constant 2.000000e+00 : f32
    %146 = vector.broadcast %cst_74 : f32 to vector<8x128xf32>
    %147 = arith.divf %145, %146 : vector<8x128xf32>
    %148 = arith.cmpf one, %129, %129 : vector<8x128xf32>
    %cst_75 = arith.constant 0.000000e+00 : f32
    %149 = vector.broadcast %cst_75 : f32 to vector<8x128xf32>
    %150 = arith.select %148, %149, %129 : vector<8x128xi1>, vector<8x128xf32>
    %151 = arith.cmpf one, %138, %138 : vector<8x128xf32>
    %cst_76 = arith.constant 0.000000e+00 : f32
    %152 = vector.broadcast %cst_76 : f32 to vector<8x128xf32>
    %153 = arith.select %151, %152, %138 : vector<8x128xi1>, vector<8x128xf32>
    %154 = arith.cmpf one, %147, %147 : vector<8x128xf32>
    %cst_77 = arith.constant 0.000000e+00 : f32
    %155 = vector.broadcast %cst_77 : f32 to vector<8x128xf32>
    %156 = arith.select %154, %155, %147 : vector<8x128xi1>, vector<8x128xf32>
    %cst_78 = arith.constant 0.000000e+00 : f32
    %cst_79 = arith.constant 1.000000e+00 : f32
    %157 = vector.broadcast %cst_78 : f32 to vector<8x128xf32>
    %158 = arith.maximumf %157, %150 : vector<8x128xf32>
    %159 = vector.broadcast %cst_79 : f32 to vector<8x128xf32>
    %160 = arith.minimumf %159, %158 : vector<8x128xf32>
    %cst_80 = arith.constant 0.000000e+00 : f32
    %cst_81 = arith.constant 1.000000e+00 : f32
    %161 = vector.broadcast %cst_80 : f32 to vector<8x128xf32>
    %162 = arith.maximumf %161, %153 : vector<8x128xf32>
    %163 = vector.broadcast %cst_81 : f32 to vector<8x128xf32>
    %164 = arith.minimumf %163, %162 : vector<8x128xf32>
    %cst_82 = arith.constant 0.000000e+00 : f32
    %cst_83 = arith.constant 1.000000e+00 : f32
    %165 = vector.broadcast %cst_82 : f32 to vector<8x128xf32>
    %166 = arith.maximumf %165, %156 : vector<8x128xf32>
    %167 = vector.broadcast %cst_83 : f32 to vector<8x128xf32>
    %168 = arith.minimumf %167, %166 : vector<8x128xf32>
    %cst_84 = arith.constant 1.292000e+01 : f32
    %169 = vector.broadcast %cst_84 : f32 to vector<8x128xf32>
    %170 = arith.divf %7, %169 : vector<8x128xf32>
    %cst_85 = arith.constant 9.99999974E-5 : f32
    %171 = vector.broadcast %cst_85 : f32 to vector<8x128xf32>
    %172 = arith.maximumf %7, %171 : vector<8x128xf32>
    %cst_86 = arith.constant 5.500000e-02 : f32
    %173 = vector.broadcast %cst_86 : f32 to vector<8x128xf32>
    %174 = arith.addf %172, %173 : vector<8x128xf32>
    %cst_87 = arith.constant 1.055000e+00 : f32
    %175 = vector.broadcast %cst_87 : f32 to vector<8x128xf32>
    %176 = arith.divf %174, %175 : vector<8x128xf32>
    %177 = math.log %176 : vector<8x128xf32>
    %cst_88 = arith.constant 2.400000e+00 : f32
    %178 = vector.broadcast %cst_88 : f32 to vector<8x128xf32>
    %179 = arith.mulf %178, %177 : vector<8x128xf32>
    %180 = math.exp %179 : vector<8x128xf32>
    %cst_89 = arith.constant 4.045000e-02 : f32
    %181 = vector.broadcast %cst_89 : f32 to vector<8x128xf32>
    %182 = arith.cmpf ole, %7, %181 : vector<8x128xf32>
    %183 = arith.select %182, %170, %180 : vector<8x128xi1>, vector<8x128xf32>
    %cst_90 = arith.constant 1.292000e+01 : f32
    %184 = vector.broadcast %cst_90 : f32 to vector<8x128xf32>
    %185 = arith.divf %9, %184 : vector<8x128xf32>
    %cst_91 = arith.constant 9.99999974E-5 : f32
    %186 = vector.broadcast %cst_91 : f32 to vector<8x128xf32>
    %187 = arith.maximumf %9, %186 : vector<8x128xf32>
    %cst_92 = arith.constant 5.500000e-02 : f32
    %188 = vector.broadcast %cst_92 : f32 to vector<8x128xf32>
    %189 = arith.addf %187, %188 : vector<8x128xf32>
    %cst_93 = arith.constant 1.055000e+00 : f32
    %190 = vector.broadcast %cst_93 : f32 to vector<8x128xf32>
    %191 = arith.divf %189, %190 : vector<8x128xf32>
    %192 = math.log %191 : vector<8x128xf32>
    %cst_94 = arith.constant 2.400000e+00 : f32
    %193 = vector.broadcast %cst_94 : f32 to vector<8x128xf32>
    %194 = arith.mulf %193, %192 : vector<8x128xf32>
    %195 = math.exp %194 : vector<8x128xf32>
    %cst_95 = arith.constant 4.045000e-02 : f32
    %196 = vector.broadcast %cst_95 : f32 to vector<8x128xf32>
    %197 = arith.cmpf ole, %9, %196 : vector<8x128xf32>
    %198 = arith.select %197, %185, %195 : vector<8x128xi1>, vector<8x128xf32>
    %cst_96 = arith.constant 1.292000e+01 : f32
    %199 = vector.broadcast %cst_96 : f32 to vector<8x128xf32>
    %200 = arith.divf %11, %199 : vector<8x128xf32>
    %cst_97 = arith.constant 9.99999974E-5 : f32
    %201 = vector.broadcast %cst_97 : f32 to vector<8x128xf32>
    %202 = arith.maximumf %11, %201 : vector<8x128xf32>
    %cst_98 = arith.constant 5.500000e-02 : f32
    %203 = vector.broadcast %cst_98 : f32 to vector<8x128xf32>
    %204 = arith.addf %202, %203 : vector<8x128xf32>
    %cst_99 = arith.constant 1.055000e+00 : f32
    %205 = vector.broadcast %cst_99 : f32 to vector<8x128xf32>
    %206 = arith.divf %204, %205 : vector<8x128xf32>
    %207 = math.log %206 : vector<8x128xf32>
    %cst_100 = arith.constant 2.400000e+00 : f32
    %208 = vector.broadcast %cst_100 : f32 to vector<8x128xf32>
    %209 = arith.mulf %208, %207 : vector<8x128xf32>
    %210 = math.exp %209 : vector<8x128xf32>
    %cst_101 = arith.constant 4.045000e-02 : f32
    %211 = vector.broadcast %cst_101 : f32 to vector<8x128xf32>
    %212 = arith.cmpf ole, %11, %211 : vector<8x128xf32>
    %213 = arith.select %212, %200, %210 : vector<8x128xi1>, vector<8x128xf32>
    %cst_102 = arith.constant 4.124530e-01 : f32
    %214 = vector.broadcast %cst_102 : f32 to vector<8x128xf32>
    %215 = arith.mulf %214, %183 : vector<8x128xf32>
    %cst_103 = arith.constant 3.575800e-01 : f32
    %216 = vector.broadcast %cst_103 : f32 to vector<8x128xf32>
    %217 = arith.mulf %216, %198 : vector<8x128xf32>
    %218 = arith.addf %215, %217 : vector<8x128xf32>
    %cst_104 = arith.constant 1.804230e-01 : f32
    %219 = vector.broadcast %cst_104 : f32 to vector<8x128xf32>
    %220 = arith.mulf %219, %213 : vector<8x128xf32>
    %221 = arith.addf %218, %220 : vector<8x128xf32>
    %cst_105 = arith.constant 2.126710e-01 : f32
    %222 = vector.broadcast %cst_105 : f32 to vector<8x128xf32>
    %223 = arith.mulf %222, %183 : vector<8x128xf32>
    %cst_106 = arith.constant 7.151600e-01 : f32
    %224 = vector.broadcast %cst_106 : f32 to vector<8x128xf32>
    %225 = arith.mulf %224, %198 : vector<8x128xf32>
    %226 = arith.addf %223, %225 : vector<8x128xf32>
    %cst_107 = arith.constant 7.216900e-02 : f32
    %227 = vector.broadcast %cst_107 : f32 to vector<8x128xf32>
    %228 = arith.mulf %227, %213 : vector<8x128xf32>
    %229 = arith.addf %226, %228 : vector<8x128xf32>
    %cst_108 = arith.constant 1.933400e-02 : f32
    %230 = vector.broadcast %cst_108 : f32 to vector<8x128xf32>
    %231 = arith.mulf %230, %183 : vector<8x128xf32>
    %cst_109 = arith.constant 1.191930e-01 : f32
    %232 = vector.broadcast %cst_109 : f32 to vector<8x128xf32>
    %233 = arith.mulf %232, %198 : vector<8x128xf32>
    %234 = arith.addf %231, %233 : vector<8x128xf32>
    %cst_110 = arith.constant 9.502270e-01 : f32
    %235 = vector.broadcast %cst_110 : f32 to vector<8x128xf32>
    %236 = arith.mulf %235, %213 : vector<8x128xf32>
    %237 = arith.addf %234, %236 : vector<8x128xf32>
    %cst_111 = arith.constant 1.05212653 : f32
    %238 = vector.broadcast %cst_111 : f32 to vector<8x128xf32>
    %239 = arith.mulf %221, %238 : vector<8x128xf32>
    %cst_112 = arith.constant 0.918481112 : f32
    %240 = vector.broadcast %cst_112 : f32 to vector<8x128xf32>
    %241 = arith.mulf %237, %240 : vector<8x128xf32>
    %cst_113 = arith.constant 0.12841855 : f32
    %242 = vector.broadcast %cst_113 : f32 to vector<8x128xf32>
    %243 = arith.divf %239, %242 : vector<8x128xf32>
    %cst_114 = arith.constant 0.137931034 : f32
    %244 = vector.broadcast %cst_114 : f32 to vector<8x128xf32>
    %245 = arith.addf %243, %244 : vector<8x128xf32>
    %cst_115 = arith.constant 9.99999974E-5 : f32
    %246 = vector.broadcast %cst_115 : f32 to vector<8x128xf32>
    %247 = arith.maximumf %239, %246 : vector<8x128xf32>
    %248 = math.log %247 : vector<8x128xf32>
    %cst_116 = arith.constant 3.000000e+00 : f32
    %249 = vector.broadcast %cst_116 : f32 to vector<8x128xf32>
    %250 = arith.divf %248, %249 : vector<8x128xf32>
    %251 = math.exp %250 : vector<8x128xf32>
    %cst_117 = arith.constant 0.00885645207 : f32
    %252 = vector.broadcast %cst_117 : f32 to vector<8x128xf32>
    %253 = arith.cmpf ole, %239, %252 : vector<8x128xf32>
    %254 = arith.select %253, %245, %251 : vector<8x128xi1>, vector<8x128xf32>
    %cst_118 = arith.constant 0.12841855 : f32
    %255 = vector.broadcast %cst_118 : f32 to vector<8x128xf32>
    %256 = arith.divf %229, %255 : vector<8x128xf32>
    %cst_119 = arith.constant 0.137931034 : f32
    %257 = vector.broadcast %cst_119 : f32 to vector<8x128xf32>
    %258 = arith.addf %256, %257 : vector<8x128xf32>
    %cst_120 = arith.constant 9.99999974E-5 : f32
    %259 = vector.broadcast %cst_120 : f32 to vector<8x128xf32>
    %260 = arith.maximumf %229, %259 : vector<8x128xf32>
    %261 = math.log %260 : vector<8x128xf32>
    %cst_121 = arith.constant 3.000000e+00 : f32
    %262 = vector.broadcast %cst_121 : f32 to vector<8x128xf32>
    %263 = arith.divf %261, %262 : vector<8x128xf32>
    %264 = math.exp %263 : vector<8x128xf32>
    %cst_122 = arith.constant 0.00885645207 : f32
    %265 = vector.broadcast %cst_122 : f32 to vector<8x128xf32>
    %266 = arith.cmpf ole, %229, %265 : vector<8x128xf32>
    %267 = arith.select %266, %258, %264 : vector<8x128xi1>, vector<8x128xf32>
    %cst_123 = arith.constant 0.12841855 : f32
    %268 = vector.broadcast %cst_123 : f32 to vector<8x128xf32>
    %269 = arith.divf %241, %268 : vector<8x128xf32>
    %cst_124 = arith.constant 0.137931034 : f32
    %270 = vector.broadcast %cst_124 : f32 to vector<8x128xf32>
    %271 = arith.addf %269, %270 : vector<8x128xf32>
    %cst_125 = arith.constant 9.99999974E-5 : f32
    %272 = vector.broadcast %cst_125 : f32 to vector<8x128xf32>
    %273 = arith.maximumf %241, %272 : vector<8x128xf32>
    %274 = math.log %273 : vector<8x128xf32>
    %cst_126 = arith.constant 3.000000e+00 : f32
    %275 = vector.broadcast %cst_126 : f32 to vector<8x128xf32>
    %276 = arith.divf %274, %275 : vector<8x128xf32>
    %277 = math.exp %276 : vector<8x128xf32>
    %cst_127 = arith.constant 0.00885645207 : f32
    %278 = vector.broadcast %cst_127 : f32 to vector<8x128xf32>
    %279 = arith.cmpf ole, %241, %278 : vector<8x128xf32>
    %280 = arith.select %279, %271, %277 : vector<8x128xi1>, vector<8x128xf32>
    %cst_128 = arith.constant 1.160000e+02 : f32
    %281 = vector.broadcast %cst_128 : f32 to vector<8x128xf32>
    %282 = arith.mulf %281, %267 : vector<8x128xf32>
    %cst_129 = arith.constant 1.600000e+01 : f32
    %283 = vector.broadcast %cst_129 : f32 to vector<8x128xf32>
    %284 = arith.subf %282, %283 : vector<8x128xf32>
    %cst_130 = arith.constant 1.000000e+02 : f32
    %285 = vector.broadcast %cst_130 : f32 to vector<8x128xf32>
    %286 = arith.divf %284, %285 : vector<8x128xf32>
    %287 = arith.subf %254, %267 : vector<8x128xf32>
    %cst_131 = arith.constant 5.000000e+02 : f32
    %288 = vector.broadcast %cst_131 : f32 to vector<8x128xf32>
    %289 = arith.mulf %288, %287 : vector<8x128xf32>
    %cst_132 = arith.constant 1.100000e+02 : f32
    %290 = vector.broadcast %cst_132 : f32 to vector<8x128xf32>
    %291 = arith.divf %289, %290 : vector<8x128xf32>
    %cst_133 = arith.constant 1.000000e+00 : f32
    %292 = vector.broadcast %cst_133 : f32 to vector<8x128xf32>
    %293 = arith.addf %291, %292 : vector<8x128xf32>
    %cst_134 = arith.constant 2.000000e+00 : f32
    %294 = vector.broadcast %cst_134 : f32 to vector<8x128xf32>
    %295 = arith.divf %293, %294 : vector<8x128xf32>
    %296 = arith.subf %267, %280 : vector<8x128xf32>
    %cst_135 = arith.constant 2.000000e+02 : f32
    %297 = vector.broadcast %cst_135 : f32 to vector<8x128xf32>
    %298 = arith.mulf %297, %296 : vector<8x128xf32>
    %cst_136 = arith.constant 1.100000e+02 : f32
    %299 = vector.broadcast %cst_136 : f32 to vector<8x128xf32>
    %300 = arith.divf %298, %299 : vector<8x128xf32>
    %cst_137 = arith.constant 1.000000e+00 : f32
    %301 = vector.broadcast %cst_137 : f32 to vector<8x128xf32>
    %302 = arith.addf %300, %301 : vector<8x128xf32>
    %cst_138 = arith.constant 2.000000e+00 : f32
    %303 = vector.broadcast %cst_138 : f32 to vector<8x128xf32>
    %304 = arith.divf %302, %303 : vector<8x128xf32>
    %305 = arith.cmpf one, %286, %286 : vector<8x128xf32>
    %cst_139 = arith.constant 0.000000e+00 : f32
    %306 = vector.broadcast %cst_139 : f32 to vector<8x128xf32>
    %307 = arith.select %305, %306, %286 : vector<8x128xi1>, vector<8x128xf32>
    %308 = arith.cmpf one, %295, %295 : vector<8x128xf32>
    %cst_140 = arith.constant 0.000000e+00 : f32
    %309 = vector.broadcast %cst_140 : f32 to vector<8x128xf32>
    %310 = arith.select %308, %309, %295 : vector<8x128xi1>, vector<8x128xf32>
    %311 = arith.cmpf one, %304, %304 : vector<8x128xf32>
    %cst_141 = arith.constant 0.000000e+00 : f32
    %312 = vector.broadcast %cst_141 : f32 to vector<8x128xf32>
    %313 = arith.select %311, %312, %304 : vector<8x128xi1>, vector<8x128xf32>
    %cst_142 = arith.constant 0.000000e+00 : f32
    %cst_143 = arith.constant 1.000000e+00 : f32
    %314 = vector.broadcast %cst_142 : f32 to vector<8x128xf32>
    %315 = arith.maximumf %314, %307 : vector<8x128xf32>
    %316 = vector.broadcast %cst_143 : f32 to vector<8x128xf32>
    %317 = arith.minimumf %316, %315 : vector<8x128xf32>
    %cst_144 = arith.constant 0.000000e+00 : f32
    %cst_145 = arith.constant 1.000000e+00 : f32
    %318 = vector.broadcast %cst_144 : f32 to vector<8x128xf32>
    %319 = arith.maximumf %318, %310 : vector<8x128xf32>
    %320 = vector.broadcast %cst_145 : f32 to vector<8x128xf32>
    %321 = arith.minimumf %320, %319 : vector<8x128xf32>
    %cst_146 = arith.constant 0.000000e+00 : f32
    %cst_147 = arith.constant 1.000000e+00 : f32
    %322 = vector.broadcast %cst_146 : f32 to vector<8x128xf32>
    %323 = arith.maximumf %322, %313 : vector<8x128xf32>
    %324 = vector.broadcast %cst_147 : f32 to vector<8x128xf32>
    %325 = arith.minimumf %324, %323 : vector<8x128xf32>
    %cst_148 = arith.constant 9.99999971E-10 : f32
    %cst_149 = arith.constant 1.000000e+00 : f32
    %326 = vector.broadcast %cst_148 : f32 to vector<8x128xf32>
    %327 = arith.maximumf %326, %1 : vector<8x128xf32>
    %328 = vector.broadcast %cst_149 : f32 to vector<8x128xf32>
    %329 = arith.minimumf %328, %327 : vector<8x128xf32>
    %cst_150 = arith.constant 9.99999971E-10 : f32
    %cst_151 = arith.constant 1.000000e+00 : f32
    %330 = vector.broadcast %cst_150 : f32 to vector<8x128xf32>
    %331 = arith.maximumf %330, %3 : vector<8x128xf32>
    %332 = vector.broadcast %cst_151 : f32 to vector<8x128xf32>
    %333 = arith.minimumf %332, %331 : vector<8x128xf32>
    %cst_152 = arith.constant 9.99999971E-10 : f32
    %cst_153 = arith.constant 1.000000e+00 : f32
    %334 = vector.broadcast %cst_152 : f32 to vector<8x128xf32>
    %335 = arith.maximumf %334, %5 : vector<8x128xf32>
    %336 = vector.broadcast %cst_153 : f32 to vector<8x128xf32>
    %337 = arith.minimumf %336, %335 : vector<8x128xf32>
    %338 = arith.maximumf %329, %333 : vector<8x128xf32>
    %339 = arith.maximumf %338, %337 : vector<8x128xf32>
    %340 = arith.minimumf %329, %333 : vector<8x128xf32>
    %341 = arith.minimumf %340, %337 : vector<8x128xf32>
    %342 = arith.subf %339, %341 : vector<8x128xf32>
    %cst_154 = arith.constant 1.000000e-10 : f32
    %343 = vector.broadcast %cst_154 : f32 to vector<8x128xf32>
    %344 = arith.addf %342, %343 : vector<8x128xf32>
    %345 = arith.subf %333, %337 : vector<8x128xf32>
    %346 = arith.divf %345, %344 : vector<8x128xf32>
    %347 = arith.cmpf oeq, %329, %339 : vector<8x128xf32>
    %348 = arith.extui %347 : vector<8x128xi1> to vector<8x128xi32>
    %349 = arith.sitofp %348 : vector<8x128xi32> to vector<8x128xf32>
    %350 = arith.mulf %346, %349 : vector<8x128xf32>
    %351 = arith.subf %337, %329 : vector<8x128xf32>
    %352 = arith.divf %351, %344 : vector<8x128xf32>
    %cst_155 = arith.constant 2.000000e+00 : f32
    %353 = vector.broadcast %cst_155 : f32 to vector<8x128xf32>
    %354 = arith.addf %353, %352 : vector<8x128xf32>
    %355 = arith.cmpf oeq, %333, %339 : vector<8x128xf32>
    %356 = arith.extui %355 : vector<8x128xi1> to vector<8x128xi32>
    %357 = arith.sitofp %356 : vector<8x128xi32> to vector<8x128xf32>
    %358 = arith.mulf %354, %357 : vector<8x128xf32>
    %359 = arith.addf %350, %358 : vector<8x128xf32>
    %360 = arith.subf %329, %333 : vector<8x128xf32>
    %361 = arith.divf %360, %344 : vector<8x128xf32>
    %cst_156 = arith.constant 4.000000e+00 : f32
    %362 = vector.broadcast %cst_156 : f32 to vector<8x128xf32>
    %363 = arith.addf %362, %361 : vector<8x128xf32>
    %364 = arith.cmpf oeq, %337, %339 : vector<8x128xf32>
    %365 = arith.extui %364 : vector<8x128xi1> to vector<8x128xi32>
    %366 = arith.sitofp %365 : vector<8x128xi32> to vector<8x128xf32>
    %367 = arith.mulf %363, %366 : vector<8x128xf32>
    %368 = arith.addf %359, %367 : vector<8x128xf32>
    %cst_157 = arith.constant 6.000000e+01 : f32
    %369 = vector.broadcast %cst_157 : f32 to vector<8x128xf32>
    %370 = arith.mulf %368, %369 : vector<8x128xf32>
    %cst_158 = arith.constant 0.000000e+00 : f32
    %371 = vector.broadcast %cst_158 : f32 to vector<8x128xf32>
    %372 = arith.cmpf olt, %370, %371 : vector<8x128xf32>
    %cst_159 = arith.constant 3.600000e+02 : f32
    %373 = vector.broadcast %cst_159 : f32 to vector<8x128xf32>
    %374 = arith.addf %370, %373 : vector<8x128xf32>
    %375 = arith.select %372, %374, %370 : vector<8x128xi1>, vector<8x128xf32>
    %cst_160 = arith.constant 3.600000e+02 : f32
    %376 = vector.broadcast %cst_160 : f32 to vector<8x128xf32>
    %377 = arith.divf %375, %376 : vector<8x128xf32>
    %cst_161 = arith.constant 0.000000e+00 : f32
    %378 = vector.broadcast %cst_161 : f32 to vector<8x128xf32>
    %379 = arith.cmpf one, %339, %378 : vector<8x128xf32>
    %380 = arith.divf %344, %339 : vector<8x128xf32>
    %cst_162 = arith.constant 0.000000e+00 : f32
    %381 = vector.broadcast %cst_162 : f32 to vector<8x128xf32>
    %382 = arith.select %379, %380, %381 : vector<8x128xi1>, vector<8x128xf32>
    %383 = arith.cmpf one, %377, %377 : vector<8x128xf32>
    %cst_163 = arith.constant 0.000000e+00 : f32
    %384 = vector.broadcast %cst_163 : f32 to vector<8x128xf32>
    %385 = arith.select %383, %384, %377 : vector<8x128xi1>, vector<8x128xf32>
    %386 = arith.cmpf one, %382, %382 : vector<8x128xf32>
    %cst_164 = arith.constant 0.000000e+00 : f32
    %387 = vector.broadcast %cst_164 : f32 to vector<8x128xf32>
    %388 = arith.select %386, %387, %382 : vector<8x128xi1>, vector<8x128xf32>
    %389 = arith.cmpf one, %339, %339 : vector<8x128xf32>
    %cst_165 = arith.constant 0.000000e+00 : f32
    %390 = vector.broadcast %cst_165 : f32 to vector<8x128xf32>
    %391 = arith.select %389, %390, %339 : vector<8x128xi1>, vector<8x128xf32>
    %cst_166 = arith.constant 0.000000e+00 : f32
    %cst_167 = arith.constant 1.000000e+00 : f32
    %392 = vector.broadcast %cst_166 : f32 to vector<8x128xf32>
    %393 = arith.maximumf %392, %385 : vector<8x128xf32>
    %394 = vector.broadcast %cst_167 : f32 to vector<8x128xf32>
    %395 = arith.minimumf %394, %393 : vector<8x128xf32>
    %cst_168 = arith.constant 0.000000e+00 : f32
    %cst_169 = arith.constant 1.000000e+00 : f32
    %396 = vector.broadcast %cst_168 : f32 to vector<8x128xf32>
    %397 = arith.maximumf %396, %388 : vector<8x128xf32>
    %398 = vector.broadcast %cst_169 : f32 to vector<8x128xf32>
    %399 = arith.minimumf %398, %397 : vector<8x128xf32>
    %cst_170 = arith.constant 0.000000e+00 : f32
    %cst_171 = arith.constant 1.000000e+00 : f32
    %400 = vector.broadcast %cst_170 : f32 to vector<8x128xf32>
    %401 = arith.maximumf %400, %391 : vector<8x128xf32>
    %402 = vector.broadcast %cst_171 : f32 to vector<8x128xf32>
    %403 = arith.minimumf %402, %401 : vector<8x128xf32>
    %cst_172 = arith.constant 9.99999971E-10 : f32
    %cst_173 = arith.constant 1.000000e+00 : f32
    %404 = vector.broadcast %cst_172 : f32 to vector<8x128xf32>
    %405 = arith.maximumf %404, %7 : vector<8x128xf32>
    %406 = vector.broadcast %cst_173 : f32 to vector<8x128xf32>
    %407 = arith.minimumf %406, %405 : vector<8x128xf32>
    %cst_174 = arith.constant 9.99999971E-10 : f32
    %cst_175 = arith.constant 1.000000e+00 : f32
    %408 = vector.broadcast %cst_174 : f32 to vector<8x128xf32>
    %409 = arith.maximumf %408, %9 : vector<8x128xf32>
    %410 = vector.broadcast %cst_175 : f32 to vector<8x128xf32>
    %411 = arith.minimumf %410, %409 : vector<8x128xf32>
    %cst_176 = arith.constant 9.99999971E-10 : f32
    %cst_177 = arith.constant 1.000000e+00 : f32
    %412 = vector.broadcast %cst_176 : f32 to vector<8x128xf32>
    %413 = arith.maximumf %412, %11 : vector<8x128xf32>
    %414 = vector.broadcast %cst_177 : f32 to vector<8x128xf32>
    %415 = arith.minimumf %414, %413 : vector<8x128xf32>
    %416 = arith.maximumf %407, %411 : vector<8x128xf32>
    %417 = arith.maximumf %416, %415 : vector<8x128xf32>
    %418 = arith.minimumf %407, %411 : vector<8x128xf32>
    %419 = arith.minimumf %418, %415 : vector<8x128xf32>
    %420 = arith.subf %417, %419 : vector<8x128xf32>
    %cst_178 = arith.constant 1.000000e-10 : f32
    %421 = vector.broadcast %cst_178 : f32 to vector<8x128xf32>
    %422 = arith.addf %420, %421 : vector<8x128xf32>
    %423 = arith.subf %411, %415 : vector<8x128xf32>
    %424 = arith.divf %423, %422 : vector<8x128xf32>
    %425 = arith.cmpf oeq, %407, %417 : vector<8x128xf32>
    %426 = arith.extui %425 : vector<8x128xi1> to vector<8x128xi32>
    %427 = arith.sitofp %426 : vector<8x128xi32> to vector<8x128xf32>
    %428 = arith.mulf %424, %427 : vector<8x128xf32>
    %429 = arith.subf %415, %407 : vector<8x128xf32>
    %430 = arith.divf %429, %422 : vector<8x128xf32>
    %cst_179 = arith.constant 2.000000e+00 : f32
    %431 = vector.broadcast %cst_179 : f32 to vector<8x128xf32>
    %432 = arith.addf %431, %430 : vector<8x128xf32>
    %433 = arith.cmpf oeq, %411, %417 : vector<8x128xf32>
    %434 = arith.extui %433 : vector<8x128xi1> to vector<8x128xi32>
    %435 = arith.sitofp %434 : vector<8x128xi32> to vector<8x128xf32>
    %436 = arith.mulf %432, %435 : vector<8x128xf32>
    %437 = arith.addf %428, %436 : vector<8x128xf32>
    %438 = arith.subf %407, %411 : vector<8x128xf32>
    %439 = arith.divf %438, %422 : vector<8x128xf32>
    %cst_180 = arith.constant 4.000000e+00 : f32
    %440 = vector.broadcast %cst_180 : f32 to vector<8x128xf32>
    %441 = arith.addf %440, %439 : vector<8x128xf32>
    %442 = arith.cmpf oeq, %415, %417 : vector<8x128xf32>
    %443 = arith.extui %442 : vector<8x128xi1> to vector<8x128xi32>
    %444 = arith.sitofp %443 : vector<8x128xi32> to vector<8x128xf32>
    %445 = arith.mulf %441, %444 : vector<8x128xf32>
    %446 = arith.addf %437, %445 : vector<8x128xf32>
    %cst_181 = arith.constant 6.000000e+01 : f32
    %447 = vector.broadcast %cst_181 : f32 to vector<8x128xf32>
    %448 = arith.mulf %446, %447 : vector<8x128xf32>
    %cst_182 = arith.constant 0.000000e+00 : f32
    %449 = vector.broadcast %cst_182 : f32 to vector<8x128xf32>
    %450 = arith.cmpf olt, %448, %449 : vector<8x128xf32>
    %cst_183 = arith.constant 3.600000e+02 : f32
    %451 = vector.broadcast %cst_183 : f32 to vector<8x128xf32>
    %452 = arith.addf %448, %451 : vector<8x128xf32>
    %453 = arith.select %450, %452, %448 : vector<8x128xi1>, vector<8x128xf32>
    %cst_184 = arith.constant 3.600000e+02 : f32
    %454 = vector.broadcast %cst_184 : f32 to vector<8x128xf32>
    %455 = arith.divf %453, %454 : vector<8x128xf32>
    %cst_185 = arith.constant 0.000000e+00 : f32
    %456 = vector.broadcast %cst_185 : f32 to vector<8x128xf32>
    %457 = arith.cmpf one, %417, %456 : vector<8x128xf32>
    %458 = arith.divf %422, %417 : vector<8x128xf32>
    %cst_186 = arith.constant 0.000000e+00 : f32
    %459 = vector.broadcast %cst_186 : f32 to vector<8x128xf32>
    %460 = arith.select %457, %458, %459 : vector<8x128xi1>, vector<8x128xf32>
    %461 = arith.cmpf one, %455, %455 : vector<8x128xf32>
    %cst_187 = arith.constant 0.000000e+00 : f32
    %462 = vector.broadcast %cst_187 : f32 to vector<8x128xf32>
    %463 = arith.select %461, %462, %455 : vector<8x128xi1>, vector<8x128xf32>
    %464 = arith.cmpf one, %460, %460 : vector<8x128xf32>
    %cst_188 = arith.constant 0.000000e+00 : f32
    %465 = vector.broadcast %cst_188 : f32 to vector<8x128xf32>
    %466 = arith.select %464, %465, %460 : vector<8x128xi1>, vector<8x128xf32>
    %467 = arith.cmpf one, %417, %417 : vector<8x128xf32>
    %cst_189 = arith.constant 0.000000e+00 : f32
    %468 = vector.broadcast %cst_189 : f32 to vector<8x128xf32>
    %469 = arith.select %467, %468, %417 : vector<8x128xi1>, vector<8x128xf32>
    %cst_190 = arith.constant 0.000000e+00 : f32
    %cst_191 = arith.constant 1.000000e+00 : f32
    %470 = vector.broadcast %cst_190 : f32 to vector<8x128xf32>
    %471 = arith.maximumf %470, %463 : vector<8x128xf32>
    %472 = vector.broadcast %cst_191 : f32 to vector<8x128xf32>
    %473 = arith.minimumf %472, %471 : vector<8x128xf32>
    %cst_192 = arith.constant 0.000000e+00 : f32
    %cst_193 = arith.constant 1.000000e+00 : f32
    %474 = vector.broadcast %cst_192 : f32 to vector<8x128xf32>
    %475 = arith.maximumf %474, %466 : vector<8x128xf32>
    %476 = vector.broadcast %cst_193 : f32 to vector<8x128xf32>
    %477 = arith.minimumf %476, %475 : vector<8x128xf32>
    %cst_194 = arith.constant 0.000000e+00 : f32
    %cst_195 = arith.constant 1.000000e+00 : f32
    %478 = vector.broadcast %cst_194 : f32 to vector<8x128xf32>
    %479 = arith.maximumf %478, %469 : vector<8x128xf32>
    %480 = vector.broadcast %cst_195 : f32 to vector<8x128xf32>
    %481 = arith.minimumf %480, %479 : vector<8x128xf32>
    %cst_196 = arith.constant 6.28318548 : f32
    %482 = vector.broadcast %cst_196 : f32 to vector<8x128xf32>
    %483 = arith.mulf %395, %482 : vector<8x128xf32>
    %cst_197 = arith.constant 6.28318548 : f32
    %484 = vector.broadcast %cst_197 : f32 to vector<8x128xf32>
    %485 = arith.mulf %473, %484 : vector<8x128xf32>
    %486 = arith.mulf %403, %399 : vector<8x128xf32>
    %487 = math.cos %483 : vector<8x128xf32>
    %488 = arith.mulf %486, %487 : vector<8x128xf32>
    %489 = arith.mulf %403, %399 : vector<8x128xf32>
    %490 = math.sin %483 : vector<8x128xf32>
    %491 = arith.mulf %489, %490 : vector<8x128xf32>
    %492 = arith.mulf %481, %477 : vector<8x128xf32>
    %493 = math.cos %485 : vector<8x128xf32>
    %494 = arith.mulf %492, %493 : vector<8x128xf32>
    %495 = arith.mulf %481, %477 : vector<8x128xf32>
    %496 = math.sin %485 : vector<8x128xf32>
    %497 = arith.mulf %495, %496 : vector<8x128xf32>
    %498 = arith.subf %160, %317 : vector<8x128xf32>
    %499 = math.absf %498 : vector<8x128xf32>
    %500 = vector.shape_cast %499 : vector<8x128xf32> to vector<1x8x128xf32>
    %cst_198 = arith.constant dense<0.000000e+00> : vector<1xf32>
    %501 = vector.multi_reduction <add>, %500, %cst_198 [1, 2] : vector<1x8x128xf32> to vector<1xf32>
    %502 = vector.shape_cast %501 : vector<1xf32> to vector<1x1x1xf32>
    %503 = vector.extract %502[0, 0, 0] : f32 from vector<1x1x1xf32>
    %cst_199 = arith.constant 1.024000e+03 : f32
    %504 = arith.divf %503, %cst_199 : f32
    %505 = arith.subf %164, %321 : vector<8x128xf32>
    %506 = math.absf %505 : vector<8x128xf32>
    %507 = vector.shape_cast %506 : vector<8x128xf32> to vector<1x8x128xf32>
    %cst_200 = arith.constant dense<0.000000e+00> : vector<1xf32>
    %508 = vector.multi_reduction <add>, %507, %cst_200 [1, 2] : vector<1x8x128xf32> to vector<1xf32>
    %509 = vector.shape_cast %508 : vector<1xf32> to vector<1x1x1xf32>
    %510 = vector.extract %509[0, 0, 0] : f32 from vector<1x1x1xf32>
    %cst_201 = arith.constant 1.024000e+03 : f32
    %511 = arith.divf %510, %cst_201 : f32
    %512 = arith.addf %504, %511 : f32
    %513 = arith.subf %168, %325 : vector<8x128xf32>
    %514 = math.absf %513 : vector<8x128xf32>
    %515 = vector.shape_cast %514 : vector<8x128xf32> to vector<1x8x128xf32>
    %cst_202 = arith.constant dense<0.000000e+00> : vector<1xf32>
    %516 = vector.multi_reduction <add>, %515, %cst_202 [1, 2] : vector<1x8x128xf32> to vector<1xf32>
    %517 = vector.shape_cast %516 : vector<1xf32> to vector<1x1x1xf32>
    %518 = vector.extract %517[0, 0, 0] : f32 from vector<1x1x1xf32>
    %cst_203 = arith.constant 1.024000e+03 : f32
    %519 = arith.divf %518, %cst_203 : f32
    %520 = arith.addf %512, %519 : f32
    %cst_204 = arith.constant 3.000000e+00 : f32
    %521 = arith.divf %520, %cst_204 : f32
    %522 = arith.subf %1, %7 : vector<8x128xf32>
    %523 = math.absf %522 : vector<8x128xf32>
    %524 = vector.shape_cast %523 : vector<8x128xf32> to vector<1x8x128xf32>
    %cst_205 = arith.constant dense<0.000000e+00> : vector<1xf32>
    %525 = vector.multi_reduction <add>, %524, %cst_205 [1, 2] : vector<1x8x128xf32> to vector<1xf32>
    %526 = vector.shape_cast %525 : vector<1xf32> to vector<1x1x1xf32>
    %527 = vector.extract %526[0, 0, 0] : f32 from vector<1x1x1xf32>
    %cst_206 = arith.constant 1.024000e+03 : f32
    %528 = arith.divf %527, %cst_206 : f32
    %529 = arith.subf %3, %9 : vector<8x128xf32>
    %530 = math.absf %529 : vector<8x128xf32>
    %531 = vector.shape_cast %530 : vector<8x128xf32> to vector<1x8x128xf32>
    %cst_207 = arith.constant dense<0.000000e+00> : vector<1xf32>
    %532 = vector.multi_reduction <add>, %531, %cst_207 [1, 2] : vector<1x8x128xf32> to vector<1xf32>
    %533 = vector.shape_cast %532 : vector<1xf32> to vector<1x1x1xf32>
    %534 = vector.extract %533[0, 0, 0] : f32 from vector<1x1x1xf32>
    %cst_208 = arith.constant 1.024000e+03 : f32
    %535 = arith.divf %534, %cst_208 : f32
    %536 = arith.addf %528, %535 : f32
    %537 = arith.subf %5, %11 : vector<8x128xf32>
    %538 = math.absf %537 : vector<8x128xf32>
    %539 = vector.shape_cast %538 : vector<8x128xf32> to vector<1x8x128xf32>
    %cst_209 = arith.constant dense<0.000000e+00> : vector<1xf32>
    %540 = vector.multi_reduction <add>, %539, %cst_209 [1, 2] : vector<1x8x128xf32> to vector<1xf32>
    %541 = vector.shape_cast %540 : vector<1xf32> to vector<1x1x1xf32>
    %542 = vector.extract %541[0, 0, 0] : f32 from vector<1x1x1xf32>
    %cst_210 = arith.constant 1.024000e+03 : f32
    %543 = arith.divf %542, %cst_210 : f32
    %544 = arith.addf %536, %543 : f32
    %cst_211 = arith.constant 3.000000e+00 : f32
    %545 = arith.divf %544, %cst_211 : f32
    %546 = arith.subf %488, %494 : vector<8x128xf32>
    %547 = math.absf %546 : vector<8x128xf32>
    %548 = vector.shape_cast %547 : vector<8x128xf32> to vector<1x8x128xf32>
    %cst_212 = arith.constant dense<0.000000e+00> : vector<1xf32>
    %549 = vector.multi_reduction <add>, %548, %cst_212 [1, 2] : vector<1x8x128xf32> to vector<1xf32>
    %550 = vector.shape_cast %549 : vector<1xf32> to vector<1x1x1xf32>
    %551 = vector.extract %550[0, 0, 0] : f32 from vector<1x1x1xf32>
    %cst_213 = arith.constant 1.024000e+03 : f32
    %552 = arith.divf %551, %cst_213 : f32
    %553 = arith.subf %491, %497 : vector<8x128xf32>
    %554 = math.absf %553 : vector<8x128xf32>
    %555 = vector.shape_cast %554 : vector<8x128xf32> to vector<1x8x128xf32>
    %cst_214 = arith.constant dense<0.000000e+00> : vector<1xf32>
    %556 = vector.multi_reduction <add>, %555, %cst_214 [1, 2] : vector<1x8x128xf32> to vector<1xf32>
    %557 = vector.shape_cast %556 : vector<1xf32> to vector<1x1x1xf32>
    %558 = vector.extract %557[0, 0, 0] : f32 from vector<1x1x1xf32>
    %cst_215 = arith.constant 1.024000e+03 : f32
    %559 = arith.divf %558, %cst_215 : f32
    %560 = arith.addf %552, %559 : f32
    %561 = arith.subf %403, %481 : vector<8x128xf32>
    %562 = math.absf %561 : vector<8x128xf32>
    %563 = vector.shape_cast %562 : vector<8x128xf32> to vector<1x8x128xf32>
    %cst_216 = arith.constant dense<0.000000e+00> : vector<1xf32>
    %564 = vector.multi_reduction <add>, %563, %cst_216 [1, 2] : vector<1x8x128xf32> to vector<1xf32>
    %565 = vector.shape_cast %564 : vector<1xf32> to vector<1x1x1xf32>
    %566 = vector.extract %565[0, 0, 0] : f32 from vector<1x1x1xf32>
    %cst_217 = arith.constant 1.024000e+03 : f32
    %567 = arith.divf %566, %cst_217 : f32
    %568 = arith.addf %560, %567 : f32
    %cst_218 = arith.constant 3.000000e+00 : f32
    %569 = arith.divf %568, %cst_218 : f32
    %570 = arith.mulf %1, %7 : vector<8x128xf32>
    %571 = arith.mulf %3, %9 : vector<8x128xf32>
    %572 = arith.addf %570, %571 : vector<8x128xf32>
    %573 = arith.mulf %5, %11 : vector<8x128xf32>
    %574 = arith.addf %572, %573 : vector<8x128xf32>
    %575 = arith.mulf %1, %1 : vector<8x128xf32>
    %576 = arith.mulf %3, %3 : vector<8x128xf32>
    %577 = arith.addf %575, %576 : vector<8x128xf32>
    %578 = arith.mulf %5, %5 : vector<8x128xf32>
    %579 = arith.addf %577, %578 : vector<8x128xf32>
    %580 = math.sqrt %579 : vector<8x128xf32>
    %581 = arith.mulf %7, %7 : vector<8x128xf32>
    %582 = arith.mulf %9, %9 : vector<8x128xf32>
    %583 = arith.addf %581, %582 : vector<8x128xf32>
    %584 = arith.mulf %11, %11 : vector<8x128xf32>
    %585 = arith.addf %583, %584 : vector<8x128xf32>
    %586 = math.sqrt %585 : vector<8x128xf32>
    %cst_219 = arith.constant 9.99999993E-9 : f32
    %587 = vector.broadcast %cst_219 : f32 to vector<8x128xf32>
    %588 = arith.maximumf %580, %587 : vector<8x128xf32>
    %cst_220 = arith.constant 9.99999993E-9 : f32
    %589 = vector.broadcast %cst_220 : f32 to vector<8x128xf32>
    %590 = arith.maximumf %586, %589 : vector<8x128xf32>
    %591 = arith.mulf %588, %590 : vector<8x128xf32>
    %592 = arith.divf %574, %591 : vector<8x128xf32>
    %593 = vector.shape_cast %592 : vector<8x128xf32> to vector<1x8x128xf32>
    %cst_221 = arith.constant dense<0.000000e+00> : vector<1xf32>
    %594 = vector.multi_reduction <add>, %593, %cst_221 [1, 2] : vector<1x8x128xf32> to vector<1xf32>
    %595 = vector.shape_cast %594 : vector<1xf32> to vector<1x1x1xf32>
    %596 = vector.extract %595[0, 0, 0] : f32 from vector<1x1x1xf32>
    %cst_222 = arith.constant 1.024000e+03 : f32
    %597 = arith.divf %596, %cst_222 : f32
    %cst_223 = arith.constant 1.000000e+00 : f32
    %598 = arith.subf %cst_223, %597 : f32
    %599 = tpu.iota {dimensions = array<i32: 1>} : vector<1x8xi32>
    %c0_i32 = arith.constant 0 : i32
    %600 = vector.broadcast %c0_i32 : i32 to vector<1x8xi32>
    %601 = arith.cmpi eq, %599, %600 : vector<1x8xi32>
    %cst_224 = arith.constant 0.000000e+00 : f32
    %602 = vector.broadcast %521 : f32 to vector<1x8xf32>
    %603 = vector.broadcast %cst_224 : f32 to vector<1x8xf32>
    %604 = arith.select %601, %602, %603 : vector<1x8xi1>, vector<1x8xf32>
    %c1_i32 = arith.constant 1 : i32
    %605 = vector.broadcast %c1_i32 : i32 to vector<1x8xi32>
    %606 = arith.cmpi eq, %599, %605 : vector<1x8xi32>
    %cst_225 = arith.constant 0.000000e+00 : f32
    %607 = vector.broadcast %545 : f32 to vector<1x8xf32>
    %608 = vector.broadcast %cst_225 : f32 to vector<1x8xf32>
    %609 = arith.select %606, %607, %608 : vector<1x8xi1>, vector<1x8xf32>
    %610 = arith.addf %604, %609 : vector<1x8xf32>
    %c2_i32 = arith.constant 2 : i32
    %611 = vector.broadcast %c2_i32 : i32 to vector<1x8xi32>
    %612 = arith.cmpi eq, %599, %611 : vector<1x8xi32>
    %cst_226 = arith.constant 0.000000e+00 : f32
    %613 = vector.broadcast %569 : f32 to vector<1x8xf32>
    %614 = vector.broadcast %cst_226 : f32 to vector<1x8xf32>
    %615 = arith.select %612, %613, %614 : vector<1x8xi1>, vector<1x8xf32>
    %616 = arith.addf %610, %615 : vector<1x8xf32>
    %c3_i32 = arith.constant 3 : i32
    %617 = vector.broadcast %c3_i32 : i32 to vector<1x8xi32>
    %618 = arith.cmpi eq, %599, %617 : vector<1x8xi32>
    %cst_227 = arith.constant 0.000000e+00 : f32
    %619 = vector.broadcast %598 : f32 to vector<1x8xf32>
    %620 = vector.broadcast %cst_227 : f32 to vector<1x8xf32>
    %621 = arith.select %618, %619, %620 : vector<1x8xi1>, vector<1x8xf32>
    %622 = arith.addf %616, %621 : vector<1x8xf32>
    %c0_228 = arith.constant 0 : index
    %c0_229 = arith.constant 0 : index
    %c0_230 = arith.constant 0 : index
    %623 = vector.load %arg3[%c0_228, %c0_229, %c0_230] : memref<1x1x8xf32, #tpu.memory_space<vmem>>, vector<1x1x8xf32>
    %624 = vector.shape_cast %623 : vector<1x1x8xf32> to vector<1x8xf32>
    %625 = vector.shape_cast %622 : vector<1x8xf32> to vector<1x1x8xf32>
    tpu.vector_store %arg3[%c0_228, %c0_229, %c0_230], %625 {strides = array<i32>} : memref<1x1x8xf32, #tpu.memory_space<vmem>>, vector<1x1x8xf32>,
    %c0_231 = arith.constant 0 : index
    %c0_232 = arith.constant 0 : index
    %c0_233 = arith.constant 0 : index
    %626 = vector.load %arg4[%c0_231, %c0_232, %c0_233] : memref<1x8x128xf32, #tpu.memory_space<vmem>>, vector<1x8x128xf32>
    %627 = vector.shape_cast %626 : vector<1x8x128xf32> to vector<8x128xf32>
    %628 = vector.shape_cast %160 : vector<8x128xf32> to vector<1x8x128xf32>
    tpu.vector_store %arg4[%c0_231, %c0_232, %c0_233], %628 {strides = array<i32>} : memref<1x8x128xf32, #tpu.memory_space<vmem>>, vector<1x8x128xf32>,
    %c0_234 = arith.constant 0 : index
    %c0_235 = arith.constant 0 : index
    %c0_236 = arith.constant 0 : index
    %629 = vector.load %arg5[%c0_234, %c0_235, %c0_236] : memref<1x8x128xf32, #tpu.memory_space<vmem>>, vector<1x8x128xf32>
    %630 = vector.shape_cast %629 : vector<1x8x128xf32> to vector<8x128xf32>
    %631 = vector.shape_cast %317 : vector<8x128xf32> to vector<1x8x128xf32>
    tpu.vector_store %arg5[%c0_234, %c0_235, %c0_236], %631 {strides = array<i32>} : memref<1x8x128xf32, #tpu.memory_space<vmem>>, vector<1x8x128xf32>,
    return
  }
  func.func @transform_0(%arg0: i32) -> (i32, i32, i32, i32) {
    %c0_i32 = arith.constant 0 : i32
    %c0_i32_0 = arith.constant 0 : i32
    %c0_i32_1 = arith.constant 0 : i32
    %c0_i32_2 = arith.constant 0 : i32
    return %arg0, %c0_i32, %c0_i32_0, %c0_i32_1 : i32, i32, i32, i32
  }
  func.func @transform_1(%arg0: i32) -> (i32, i32, i32, i32) {
    %c0_i32 = arith.constant 0 : i32
    %c0_i32_0 = arith.constant 0 : i32
    %c0_i32_1 = arith.constant 0 : i32
    %c0_i32_2 = arith.constant 0 : i32
    return %arg0, %c0_i32, %c0_i32_0, %c0_i32_1 : i32, i32, i32, i32
  }
  func.func @transform_2(%arg0: i32) -> (i32, i32, i32) {
    %c0_i32 = arith.constant 0 : i32
    %c0_i32_0 = arith.constant 0 : i32
    %c0_i32_1 = arith.constant 0 : i32
    return %arg0, %c0_i32, %c0_i32_0 : i32, i32, i32
  }
  func.func @transform_3(%arg0: i32) -> (i32, i32, i32) {
    %c0_i32 = arith.constant 0 : i32
    %c0_i32_0 = arith.constant 0 : i32
    %c0_i32_1 = arith.constant 0 : i32
    return %arg0, %c0_i32, %c0_i32_0 : i32, i32, i32
  }
  func.func @transform_4(%arg0: i32) -> (i32, i32, i32) {
    %c0_i32 = arith.constant 0 : i32
    %c0_i32_0 = arith.constant 0 : i32
    %c0_i32_1 = arith.constant 0 : i32
    return %arg0, %c0_i32, %c0_i32_0 : i32, i32, i32
  }
}

module attributes {stable_mosaic.version = 11 : i64} {
  func.func @_msssim_kernel(%arg0: i32, %arg1: memref<1x32x32xf32, #tpu.memory_space<vmem>>, %arg2: memref<1x32x32xf32, #tpu.memory_space<vmem>>, %arg3: memref<1x1x16xf32, #tpu.memory_space<vmem>>) attributes {dimension_semantics = [#tpu.dimension_semantics<parallel>], iteration_bounds = array<i64: 2>, scalar_prefetch = 0 : i64, scratch_operands = 0 : i64, tpu.core_type = #tpu.core_type<tc>, window_params = [{transform_indices = @transform_0, window_bounds = array<i64: 1, 32, 32>}, {transform_indices = @transform_1, window_bounds = array<i64: 1, 32, 32>}, {transform_indices = @transform_2, window_bounds = array<i64: 1, 1, 16>}]} {
    %c0 = arith.constant 0 : index
    %c0_0 = arith.constant 0 : index
    %c0_1 = arith.constant 0 : index
    %0 = vector.load %arg1[%c0, %c0_0, %c0_1] : memref<1x32x32xf32, #tpu.memory_space<vmem>>, vector<1x32x32xf32>
    %1 = vector.shape_cast %0 : vector<1x32x32xf32> to vector<32x32xf32>
    %c0_2 = arith.constant 0 : index
    %c0_3 = arith.constant 0 : index
    %c0_4 = arith.constant 0 : index
    %2 = vector.load %arg2[%c0_2, %c0_3, %c0_4] : memref<1x32x32xf32, #tpu.memory_space<vmem>>, vector<1x32x32xf32>
    %3 = vector.shape_cast %2 : vector<1x32x32xf32> to vector<32x32xf32>
    %4 = tpu.iota {dimensions = array<i32: 0>} : vector<32x32xi32>
    %5 = tpu.iota {dimensions = array<i32: 1>} : vector<32x32xi32>
    %6 = tpu.iota {dimensions = array<i32: 0>} : vector<32x32xi32>
    %7 = tpu.iota {dimensions = array<i32: 1>} : vector<32x32xi32>
    %cst = arith.constant 0.000000e+00 : f32
    %8 = vector.broadcast %cst : f32 to vector<32x32xf32>
    %cst_5 = arith.constant 0.000000e+00 : f32
    %9 = vector.broadcast %cst_5 : f32 to vector<32x32xf32>
    %10 = arith.subi %5, %4 : vector<32x32xi32>
    %c-2_i32 = arith.constant -2 : i32
    %11 = vector.broadcast %c-2_i32 : i32 to vector<32x32xi32>
    %12 = arith.cmpi eq, %10, %11 : vector<32x32xi32>
    %cst_6 = arith.constant 0.120078385 : f32
    %cst_7 = arith.constant 0.000000e+00 : f32
    %13 = vector.broadcast %cst_6 : f32 to vector<32x32xf32>
    %14 = vector.broadcast %cst_7 : f32 to vector<32x32xf32>
    %15 = arith.select %12, %13, %14 : vector<32x32xi1>, vector<32x32xf32>
    %16 = arith.addf %8, %15 : vector<32x32xf32>
    %17 = arith.subi %7, %6 : vector<32x32xi32>
    %c-2_i32_8 = arith.constant -2 : i32
    %18 = vector.broadcast %c-2_i32_8 : i32 to vector<32x32xi32>
    %19 = arith.cmpi eq, %17, %18 : vector<32x32xi32>
    %cst_9 = arith.constant 0.120078385 : f32
    %cst_10 = arith.constant 0.000000e+00 : f32
    %20 = vector.broadcast %cst_9 : f32 to vector<32x32xf32>
    %21 = vector.broadcast %cst_10 : f32 to vector<32x32xf32>
    %22 = arith.select %19, %20, %21 : vector<32x32xi1>, vector<32x32xf32>
    %23 = arith.addf %9, %22 : vector<32x32xf32>
    %24 = arith.subi %5, %4 : vector<32x32xi32>
    %c-1_i32 = arith.constant -1 : i32
    %25 = vector.broadcast %c-1_i32 : i32 to vector<32x32xi32>
    %26 = arith.cmpi eq, %24, %25 : vector<32x32xi32>
    %cst_11 = arith.constant 0.233880758 : f32
    %cst_12 = arith.constant 0.000000e+00 : f32
    %27 = vector.broadcast %cst_11 : f32 to vector<32x32xf32>
    %28 = vector.broadcast %cst_12 : f32 to vector<32x32xf32>
    %29 = arith.select %26, %27, %28 : vector<32x32xi1>, vector<32x32xf32>
    %30 = arith.addf %16, %29 : vector<32x32xf32>
    %31 = arith.subi %7, %6 : vector<32x32xi32>
    %c-1_i32_13 = arith.constant -1 : i32
    %32 = vector.broadcast %c-1_i32_13 : i32 to vector<32x32xi32>
    %33 = arith.cmpi eq, %31, %32 : vector<32x32xi32>
    %cst_14 = arith.constant 0.233880758 : f32
    %cst_15 = arith.constant 0.000000e+00 : f32
    %34 = vector.broadcast %cst_14 : f32 to vector<32x32xf32>
    %35 = vector.broadcast %cst_15 : f32 to vector<32x32xf32>
    %36 = arith.select %33, %34, %35 : vector<32x32xi1>, vector<32x32xf32>
    %37 = arith.addf %23, %36 : vector<32x32xf32>
    %38 = arith.subi %5, %4 : vector<32x32xi32>
    %c0_i32 = arith.constant 0 : i32
    %39 = vector.broadcast %c0_i32 : i32 to vector<32x32xi32>
    %40 = arith.cmpi eq, %38, %39 : vector<32x32xi32>
    %cst_16 = arith.constant 0.292081714 : f32
    %cst_17 = arith.constant 0.000000e+00 : f32
    %41 = vector.broadcast %cst_16 : f32 to vector<32x32xf32>
    %42 = vector.broadcast %cst_17 : f32 to vector<32x32xf32>
    %43 = arith.select %40, %41, %42 : vector<32x32xi1>, vector<32x32xf32>
    %44 = arith.addf %30, %43 : vector<32x32xf32>
    %45 = arith.subi %7, %6 : vector<32x32xi32>
    %c0_i32_18 = arith.constant 0 : i32
    %46 = vector.broadcast %c0_i32_18 : i32 to vector<32x32xi32>
    %47 = arith.cmpi eq, %45, %46 : vector<32x32xi32>
    %cst_19 = arith.constant 0.292081714 : f32
    %cst_20 = arith.constant 0.000000e+00 : f32
    %48 = vector.broadcast %cst_19 : f32 to vector<32x32xf32>
    %49 = vector.broadcast %cst_20 : f32 to vector<32x32xf32>
    %50 = arith.select %47, %48, %49 : vector<32x32xi1>, vector<32x32xf32>
    %51 = arith.addf %37, %50 : vector<32x32xf32>
    %52 = arith.subi %5, %4 : vector<32x32xi32>
    %c1_i32 = arith.constant 1 : i32
    %53 = vector.broadcast %c1_i32 : i32 to vector<32x32xi32>
    %54 = arith.cmpi eq, %52, %53 : vector<32x32xi32>
    %cst_21 = arith.constant 0.233880758 : f32
    %cst_22 = arith.constant 0.000000e+00 : f32
    %55 = vector.broadcast %cst_21 : f32 to vector<32x32xf32>
    %56 = vector.broadcast %cst_22 : f32 to vector<32x32xf32>
    %57 = arith.select %54, %55, %56 : vector<32x32xi1>, vector<32x32xf32>
    %58 = arith.addf %44, %57 : vector<32x32xf32>
    %59 = arith.subi %7, %6 : vector<32x32xi32>
    %c1_i32_23 = arith.constant 1 : i32
    %60 = vector.broadcast %c1_i32_23 : i32 to vector<32x32xi32>
    %61 = arith.cmpi eq, %59, %60 : vector<32x32xi32>
    %cst_24 = arith.constant 0.233880758 : f32
    %cst_25 = arith.constant 0.000000e+00 : f32
    %62 = vector.broadcast %cst_24 : f32 to vector<32x32xf32>
    %63 = vector.broadcast %cst_25 : f32 to vector<32x32xf32>
    %64 = arith.select %61, %62, %63 : vector<32x32xi1>, vector<32x32xf32>
    %65 = arith.addf %51, %64 : vector<32x32xf32>
    %66 = arith.subi %5, %4 : vector<32x32xi32>
    %c2_i32 = arith.constant 2 : i32
    %67 = vector.broadcast %c2_i32 : i32 to vector<32x32xi32>
    %68 = arith.cmpi eq, %66, %67 : vector<32x32xi32>
    %cst_26 = arith.constant 0.120078385 : f32
    %cst_27 = arith.constant 0.000000e+00 : f32
    %69 = vector.broadcast %cst_26 : f32 to vector<32x32xf32>
    %70 = vector.broadcast %cst_27 : f32 to vector<32x32xf32>
    %71 = arith.select %68, %69, %70 : vector<32x32xi1>, vector<32x32xf32>
    %72 = arith.addf %58, %71 : vector<32x32xf32>
    %73 = arith.subi %7, %6 : vector<32x32xi32>
    %c2_i32_28 = arith.constant 2 : i32
    %74 = vector.broadcast %c2_i32_28 : i32 to vector<32x32xi32>
    %75 = arith.cmpi eq, %73, %74 : vector<32x32xi32>
    %cst_29 = arith.constant 0.120078385 : f32
    %cst_30 = arith.constant 0.000000e+00 : f32
    %76 = vector.broadcast %cst_29 : f32 to vector<32x32xf32>
    %77 = vector.broadcast %cst_30 : f32 to vector<32x32xf32>
    %78 = arith.select %75, %76, %77 : vector<32x32xi1>, vector<32x32xf32>
    %79 = arith.addf %65, %78 : vector<32x32xf32>
    %80 = tpu.iota {dimensions = array<i32: 0>} : vector<32x32xi32>
    %81 = tpu.iota {dimensions = array<i32: 1>} : vector<32x32xi32>
    %c32_i32 = arith.constant 32 : i32
    %82 = vector.broadcast %c32_i32 : i32 to vector<32x32xi32>
    %83 = arith.cmpi slt, %4, %82 : vector<32x32xi32>
    %c32_i32_31 = arith.constant 32 : i32
    %84 = vector.broadcast %c32_i32_31 : i32 to vector<32x32xi32>
    %85 = arith.cmpi slt, %5, %84 : vector<32x32xi32>
    %86 = arith.andi %83, %85 : vector<32x32xi1>
    %cst_32 = arith.constant 0.000000e+00 : f32
    %87 = vector.broadcast %cst_32 : f32 to vector<32x32xf32>
    %88 = arith.select %86, %72, %87 : vector<32x32xi1>, vector<32x32xf32>
    %c32_i32_33 = arith.constant 32 : i32
    %89 = vector.broadcast %c32_i32_33 : i32 to vector<32x32xi32>
    %90 = arith.cmpi slt, %6, %89 : vector<32x32xi32>
    %c32_i32_34 = arith.constant 32 : i32
    %91 = vector.broadcast %c32_i32_34 : i32 to vector<32x32xi32>
    %92 = arith.cmpi slt, %7, %91 : vector<32x32xi32>
    %93 = arith.andi %90, %92 : vector<32x32xi1>
    %cst_35 = arith.constant 0.000000e+00 : f32
    %94 = vector.broadcast %cst_35 : f32 to vector<32x32xf32>
    %95 = arith.select %93, %79, %94 : vector<32x32xi1>, vector<32x32xf32>
    %cst_36 = arith.constant dense<0.000000e+00> : vector<32x32xf32>
    %96 = tpu.matmul %88, %1, %cst_36 {dimension_numbers = #tpu.dot_dimension_numbers<[1], [0], [0], [1], [0, 0, 1, 1], [], []>} : vector<32x32xf32>, vector<32x32xf32>, vector<32x32xf32> -> vector<32x32xf32>
    %cst_37 = arith.constant dense<0.000000e+00> : vector<32x32xf32>
    %97 = tpu.matmul %96, %95, %cst_37 {dimension_numbers = #tpu.dot_dimension_numbers<[1], [0], [0], [1], [0, 0, 1, 1], [], []>} : vector<32x32xf32>, vector<32x32xf32>, vector<32x32xf32> -> vector<32x32xf32>
    %cst_38 = arith.constant dense<0.000000e+00> : vector<32x32xf32>
    %98 = tpu.matmul %88, %3, %cst_38 {dimension_numbers = #tpu.dot_dimension_numbers<[1], [0], [0], [1], [0, 0, 1, 1], [], []>} : vector<32x32xf32>, vector<32x32xf32>, vector<32x32xf32> -> vector<32x32xf32>
    %cst_39 = arith.constant dense<0.000000e+00> : vector<32x32xf32>
    %99 = tpu.matmul %98, %95, %cst_39 {dimension_numbers = #tpu.dot_dimension_numbers<[1], [0], [0], [1], [0, 0, 1, 1], [], []>} : vector<32x32xf32>, vector<32x32xf32>, vector<32x32xf32> -> vector<32x32xf32>
    %100 = arith.mulf %1, %1 : vector<32x32xf32>
    %cst_40 = arith.constant dense<0.000000e+00> : vector<32x32xf32>
    %101 = tpu.matmul %88, %100, %cst_40 {dimension_numbers = #tpu.dot_dimension_numbers<[1], [0], [0], [1], [0, 0, 1, 1], [], []>} : vector<32x32xf32>, vector<32x32xf32>, vector<32x32xf32> -> vector<32x32xf32>
    %cst_41 = arith.constant dense<0.000000e+00> : vector<32x32xf32>
    %102 = tpu.matmul %101, %95, %cst_41 {dimension_numbers = #tpu.dot_dimension_numbers<[1], [0], [0], [1], [0, 0, 1, 1], [], []>} : vector<32x32xf32>, vector<32x32xf32>, vector<32x32xf32> -> vector<32x32xf32>
    %103 = arith.mulf %3, %3 : vector<32x32xf32>
    %cst_42 = arith.constant dense<0.000000e+00> : vector<32x32xf32>
    %104 = tpu.matmul %88, %103, %cst_42 {dimension_numbers = #tpu.dot_dimension_numbers<[1], [0], [0], [1], [0, 0, 1, 1], [], []>} : vector<32x32xf32>, vector<32x32xf32>, vector<32x32xf32> -> vector<32x32xf32>
    %cst_43 = arith.constant dense<0.000000e+00> : vector<32x32xf32>
    %105 = tpu.matmul %104, %95, %cst_43 {dimension_numbers = #tpu.dot_dimension_numbers<[1], [0], [0], [1], [0, 0, 1, 1], [], []>} : vector<32x32xf32>, vector<32x32xf32>, vector<32x32xf32> -> vector<32x32xf32>
    %106 = arith.mulf %1, %3 : vector<32x32xf32>
    %cst_44 = arith.constant dense<0.000000e+00> : vector<32x32xf32>
    %107 = tpu.matmul %88, %106, %cst_44 {dimension_numbers = #tpu.dot_dimension_numbers<[1], [0], [0], [1], [0, 0, 1, 1], [], []>} : vector<32x32xf32>, vector<32x32xf32>, vector<32x32xf32> -> vector<32x32xf32>
    %cst_45 = arith.constant dense<0.000000e+00> : vector<32x32xf32>
    %108 = tpu.matmul %107, %95, %cst_45 {dimension_numbers = #tpu.dot_dimension_numbers<[1], [0], [0], [1], [0, 0, 1, 1], [], []>} : vector<32x32xf32>, vector<32x32xf32>, vector<32x32xf32> -> vector<32x32xf32>
    %109 = arith.mulf %97, %97 : vector<32x32xf32>
    %110 = arith.mulf %99, %99 : vector<32x32xf32>
    %111 = arith.mulf %97, %99 : vector<32x32xf32>
    %112 = arith.subf %102, %109 : vector<32x32xf32>
    %113 = arith.subf %105, %110 : vector<32x32xf32>
    %114 = arith.subf %108, %111 : vector<32x32xf32>
    %cst_46 = arith.constant 2.000000e+00 : f32
    %115 = vector.broadcast %cst_46 : f32 to vector<32x32xf32>
    %116 = arith.mulf %115, %114 : vector<32x32xf32>
    %cst_47 = arith.constant 8.99999984E-4 : f32
    %117 = vector.broadcast %cst_47 : f32 to vector<32x32xf32>
    %118 = arith.addf %116, %117 : vector<32x32xf32>
    %119 = arith.addf %112, %113 : vector<32x32xf32>
    %cst_48 = arith.constant 8.99999984E-4 : f32
    %120 = vector.broadcast %cst_48 : f32 to vector<32x32xf32>
    %121 = arith.addf %119, %120 : vector<32x32xf32>
    %cst_49 = arith.constant 2.000000e+00 : f32
    %122 = vector.broadcast %cst_49 : f32 to vector<32x32xf32>
    %123 = arith.mulf %122, %111 : vector<32x32xf32>
    %cst_50 = arith.constant 9.99999974E-5 : f32
    %124 = vector.broadcast %cst_50 : f32 to vector<32x32xf32>
    %125 = arith.addf %123, %124 : vector<32x32xf32>
    %126 = arith.mulf %125, %118 : vector<32x32xf32>
    %127 = arith.addf %109, %110 : vector<32x32xf32>
    %cst_51 = arith.constant 9.99999974E-5 : f32
    %128 = vector.broadcast %cst_51 : f32 to vector<32x32xf32>
    %129 = arith.addf %127, %128 : vector<32x32xf32>
    %130 = arith.mulf %129, %121 : vector<32x32xf32>
    %131 = arith.divf %126, %130 : vector<32x32xf32>
    %c32_i32_52 = arith.constant 32 : i32
    %132 = vector.broadcast %c32_i32_52 : i32 to vector<32x32xi32>
    %133 = arith.cmpi slt, %80, %132 : vector<32x32xi32>
    %c32_i32_53 = arith.constant 32 : i32
    %134 = vector.broadcast %c32_i32_53 : i32 to vector<32x32xi32>
    %135 = arith.cmpi slt, %81, %134 : vector<32x32xi32>
    %136 = arith.andi %133, %135 : vector<32x32xi1>
    %137 = arith.extui %136 : vector<32x32xi1> to vector<32x32xi32>
    %138 = arith.sitofp %137 : vector<32x32xi32> to vector<32x32xf32>
    %139 = arith.mulf %131, %138 : vector<32x32xf32>
    %140 = vector.shape_cast %139 : vector<32x32xf32> to vector<1x32x32xf32>
    %cst_54 = arith.constant dense<0.000000e+00> : vector<1xf32>
    %141 = vector.multi_reduction <add>, %140, %cst_54 [1, 2] : vector<1x32x32xf32> to vector<1xf32>
    %142 = vector.shape_cast %141 : vector<1xf32> to vector<1x1x1xf32>
    %143 = vector.extract %142[0, 0, 0] : f32 from vector<1x1x1xf32>
    %cst_55 = arith.constant 9.765625E-4 : f32
    %144 = arith.mulf %143, %cst_55 : f32
    %145 = arith.divf %118, %121 : vector<32x32xf32>
    %146 = arith.mulf %145, %138 : vector<32x32xf32>
    %147 = vector.shape_cast %146 : vector<32x32xf32> to vector<1x32x32xf32>
    %cst_56 = arith.constant dense<0.000000e+00> : vector<1xf32>
    %148 = vector.multi_reduction <add>, %147, %cst_56 [1, 2] : vector<1x32x32xf32> to vector<1xf32>
    %149 = vector.shape_cast %148 : vector<1xf32> to vector<1x1x1xf32>
    %150 = vector.extract %149[0, 0, 0] : f32 from vector<1x1x1xf32>
    %cst_57 = arith.constant 9.765625E-4 : f32
    %151 = arith.mulf %150, %cst_57 : f32
    %c16_i32 = arith.constant 16 : i32
    %152 = vector.broadcast %c16_i32 : i32 to vector<32x32xi32>
    %153 = arith.cmpi slt, %4, %152 : vector<32x32xi32>
    %c2_i32_58 = arith.constant 2 : i32
    %154 = vector.broadcast %c2_i32_58 : i32 to vector<32x32xi32>
    %155 = arith.muli %154, %4 : vector<32x32xi32>
    %156 = arith.cmpi eq, %5, %155 : vector<32x32xi32>
    %c2_i32_59 = arith.constant 2 : i32
    %157 = vector.broadcast %c2_i32_59 : i32 to vector<32x32xi32>
    %158 = arith.muli %157, %4 : vector<32x32xi32>
    %c1_i32_60 = arith.constant 1 : i32
    %159 = vector.broadcast %c1_i32_60 : i32 to vector<32x32xi32>
    %160 = arith.addi %158, %159 : vector<32x32xi32>
    %161 = arith.cmpi eq, %5, %160 : vector<32x32xi32>
    %162 = arith.ori %156, %161 : vector<32x32xi1>
    %163 = arith.andi %153, %162 : vector<32x32xi1>
    %cst_61 = arith.constant 5.000000e-01 : f32
    %cst_62 = arith.constant 0.000000e+00 : f32
    %164 = vector.broadcast %cst_61 : f32 to vector<32x32xf32>
    %165 = vector.broadcast %cst_62 : f32 to vector<32x32xf32>
    %166 = arith.select %163, %164, %165 : vector<32x32xi1>, vector<32x32xf32>
    %c16_i32_63 = arith.constant 16 : i32
    %167 = vector.broadcast %c16_i32_63 : i32 to vector<32x32xi32>
    %168 = arith.cmpi slt, %7, %167 : vector<32x32xi32>
    %c2_i32_64 = arith.constant 2 : i32
    %169 = vector.broadcast %c2_i32_64 : i32 to vector<32x32xi32>
    %170 = arith.muli %169, %7 : vector<32x32xi32>
    %171 = arith.cmpi eq, %6, %170 : vector<32x32xi32>
    %c2_i32_65 = arith.constant 2 : i32
    %172 = vector.broadcast %c2_i32_65 : i32 to vector<32x32xi32>
    %173 = arith.muli %172, %7 : vector<32x32xi32>
    %c1_i32_66 = arith.constant 1 : i32
    %174 = vector.broadcast %c1_i32_66 : i32 to vector<32x32xi32>
    %175 = arith.addi %173, %174 : vector<32x32xi32>
    %176 = arith.cmpi eq, %6, %175 : vector<32x32xi32>
    %177 = arith.ori %171, %176 : vector<32x32xi1>
    %178 = arith.andi %168, %177 : vector<32x32xi1>
    %cst_67 = arith.constant 5.000000e-01 : f32
    %cst_68 = arith.constant 0.000000e+00 : f32
    %179 = vector.broadcast %cst_67 : f32 to vector<32x32xf32>
    %180 = vector.broadcast %cst_68 : f32 to vector<32x32xf32>
    %181 = arith.select %178, %179, %180 : vector<32x32xi1>, vector<32x32xf32>
    %cst_69 = arith.constant dense<0.000000e+00> : vector<32x32xf32>
    %182 = tpu.matmul %166, %1, %cst_69 {dimension_numbers = #tpu.dot_dimension_numbers<[1], [0], [0], [1], [0, 0, 1, 1], [], []>} : vector<32x32xf32>, vector<32x32xf32>, vector<32x32xf32> -> vector<32x32xf32>
    %cst_70 = arith.constant dense<0.000000e+00> : vector<32x32xf32>
    %183 = tpu.matmul %182, %181, %cst_70 {dimension_numbers = #tpu.dot_dimension_numbers<[1], [0], [0], [1], [0, 0, 1, 1], [], []>} : vector<32x32xf32>, vector<32x32xf32>, vector<32x32xf32> -> vector<32x32xf32>
    %cst_71 = arith.constant dense<0.000000e+00> : vector<32x32xf32>
    %184 = tpu.matmul %166, %3, %cst_71 {dimension_numbers = #tpu.dot_dimension_numbers<[1], [0], [0], [1], [0, 0, 1, 1], [], []>} : vector<32x32xf32>, vector<32x32xf32>, vector<32x32xf32> -> vector<32x32xf32>
    %cst_72 = arith.constant dense<0.000000e+00> : vector<32x32xf32>
    %185 = tpu.matmul %184, %181, %cst_72 {dimension_numbers = #tpu.dot_dimension_numbers<[1], [0], [0], [1], [0, 0, 1, 1], [], []>} : vector<32x32xf32>, vector<32x32xf32>, vector<32x32xf32> -> vector<32x32xf32>
    %c16_i32_73 = arith.constant 16 : i32
    %186 = vector.broadcast %c16_i32_73 : i32 to vector<32x32xi32>
    %187 = arith.cmpi slt, %4, %186 : vector<32x32xi32>
    %c16_i32_74 = arith.constant 16 : i32
    %188 = vector.broadcast %c16_i32_74 : i32 to vector<32x32xi32>
    %189 = arith.cmpi slt, %5, %188 : vector<32x32xi32>
    %190 = arith.andi %187, %189 : vector<32x32xi1>
    %cst_75 = arith.constant 0.000000e+00 : f32
    %191 = vector.broadcast %cst_75 : f32 to vector<32x32xf32>
    %192 = arith.select %190, %72, %191 : vector<32x32xi1>, vector<32x32xf32>
    %c16_i32_76 = arith.constant 16 : i32
    %193 = vector.broadcast %c16_i32_76 : i32 to vector<32x32xi32>
    %194 = arith.cmpi slt, %6, %193 : vector<32x32xi32>
    %c16_i32_77 = arith.constant 16 : i32
    %195 = vector.broadcast %c16_i32_77 : i32 to vector<32x32xi32>
    %196 = arith.cmpi slt, %7, %195 : vector<32x32xi32>
    %197 = arith.andi %194, %196 : vector<32x32xi1>
    %cst_78 = arith.constant 0.000000e+00 : f32
    %198 = vector.broadcast %cst_78 : f32 to vector<32x32xf32>
    %199 = arith.select %197, %79, %198 : vector<32x32xi1>, vector<32x32xf32>
    %cst_79 = arith.constant dense<0.000000e+00> : vector<32x32xf32>
    %200 = tpu.matmul %192, %183, %cst_79 {dimension_numbers = #tpu.dot_dimension_numbers<[1], [0], [0], [1], [0, 0, 1, 1], [], []>} : vector<32x32xf32>, vector<32x32xf32>, vector<32x32xf32> -> vector<32x32xf32>
    %cst_80 = arith.constant dense<0.000000e+00> : vector<32x32xf32>
    %201 = tpu.matmul %200, %199, %cst_80 {dimension_numbers = #tpu.dot_dimension_numbers<[1], [0], [0], [1], [0, 0, 1, 1], [], []>} : vector<32x32xf32>, vector<32x32xf32>, vector<32x32xf32> -> vector<32x32xf32>
    %cst_81 = arith.constant dense<0.000000e+00> : vector<32x32xf32>
    %202 = tpu.matmul %192, %185, %cst_81 {dimension_numbers = #tpu.dot_dimension_numbers<[1], [0], [0], [1], [0, 0, 1, 1], [], []>} : vector<32x32xf32>, vector<32x32xf32>, vector<32x32xf32> -> vector<32x32xf32>
    %cst_82 = arith.constant dense<0.000000e+00> : vector<32x32xf32>
    %203 = tpu.matmul %202, %199, %cst_82 {dimension_numbers = #tpu.dot_dimension_numbers<[1], [0], [0], [1], [0, 0, 1, 1], [], []>} : vector<32x32xf32>, vector<32x32xf32>, vector<32x32xf32> -> vector<32x32xf32>
    %204 = arith.mulf %183, %183 : vector<32x32xf32>
    %cst_83 = arith.constant dense<0.000000e+00> : vector<32x32xf32>
    %205 = tpu.matmul %192, %204, %cst_83 {dimension_numbers = #tpu.dot_dimension_numbers<[1], [0], [0], [1], [0, 0, 1, 1], [], []>} : vector<32x32xf32>, vector<32x32xf32>, vector<32x32xf32> -> vector<32x32xf32>
    %cst_84 = arith.constant dense<0.000000e+00> : vector<32x32xf32>
    %206 = tpu.matmul %205, %199, %cst_84 {dimension_numbers = #tpu.dot_dimension_numbers<[1], [0], [0], [1], [0, 0, 1, 1], [], []>} : vector<32x32xf32>, vector<32x32xf32>, vector<32x32xf32> -> vector<32x32xf32>
    %207 = arith.mulf %185, %185 : vector<32x32xf32>
    %cst_85 = arith.constant dense<0.000000e+00> : vector<32x32xf32>
    %208 = tpu.matmul %192, %207, %cst_85 {dimension_numbers = #tpu.dot_dimension_numbers<[1], [0], [0], [1], [0, 0, 1, 1], [], []>} : vector<32x32xf32>, vector<32x32xf32>, vector<32x32xf32> -> vector<32x32xf32>
    %cst_86 = arith.constant dense<0.000000e+00> : vector<32x32xf32>
    %209 = tpu.matmul %208, %199, %cst_86 {dimension_numbers = #tpu.dot_dimension_numbers<[1], [0], [0], [1], [0, 0, 1, 1], [], []>} : vector<32x32xf32>, vector<32x32xf32>, vector<32x32xf32> -> vector<32x32xf32>
    %210 = arith.mulf %183, %185 : vector<32x32xf32>
    %cst_87 = arith.constant dense<0.000000e+00> : vector<32x32xf32>
    %211 = tpu.matmul %192, %210, %cst_87 {dimension_numbers = #tpu.dot_dimension_numbers<[1], [0], [0], [1], [0, 0, 1, 1], [], []>} : vector<32x32xf32>, vector<32x32xf32>, vector<32x32xf32> -> vector<32x32xf32>
    %cst_88 = arith.constant dense<0.000000e+00> : vector<32x32xf32>
    %212 = tpu.matmul %211, %199, %cst_88 {dimension_numbers = #tpu.dot_dimension_numbers<[1], [0], [0], [1], [0, 0, 1, 1], [], []>} : vector<32x32xf32>, vector<32x32xf32>, vector<32x32xf32> -> vector<32x32xf32>
    %213 = arith.mulf %201, %201 : vector<32x32xf32>
    %214 = arith.mulf %203, %203 : vector<32x32xf32>
    %215 = arith.mulf %201, %203 : vector<32x32xf32>
    %216 = arith.subf %206, %213 : vector<32x32xf32>
    %217 = arith.subf %209, %214 : vector<32x32xf32>
    %218 = arith.subf %212, %215 : vector<32x32xf32>
    %cst_89 = arith.constant 2.000000e+00 : f32
    %219 = vector.broadcast %cst_89 : f32 to vector<32x32xf32>
    %220 = arith.mulf %219, %218 : vector<32x32xf32>
    %cst_90 = arith.constant 8.99999984E-4 : f32
    %221 = vector.broadcast %cst_90 : f32 to vector<32x32xf32>
    %222 = arith.addf %220, %221 : vector<32x32xf32>
    %223 = arith.addf %216, %217 : vector<32x32xf32>
    %cst_91 = arith.constant 8.99999984E-4 : f32
    %224 = vector.broadcast %cst_91 : f32 to vector<32x32xf32>
    %225 = arith.addf %223, %224 : vector<32x32xf32>
    %cst_92 = arith.constant 2.000000e+00 : f32
    %226 = vector.broadcast %cst_92 : f32 to vector<32x32xf32>
    %227 = arith.mulf %226, %215 : vector<32x32xf32>
    %cst_93 = arith.constant 9.99999974E-5 : f32
    %228 = vector.broadcast %cst_93 : f32 to vector<32x32xf32>
    %229 = arith.addf %227, %228 : vector<32x32xf32>
    %230 = arith.mulf %229, %222 : vector<32x32xf32>
    %231 = arith.addf %213, %214 : vector<32x32xf32>
    %cst_94 = arith.constant 9.99999974E-5 : f32
    %232 = vector.broadcast %cst_94 : f32 to vector<32x32xf32>
    %233 = arith.addf %231, %232 : vector<32x32xf32>
    %234 = arith.mulf %233, %225 : vector<32x32xf32>
    %235 = arith.divf %230, %234 : vector<32x32xf32>
    %c16_i32_95 = arith.constant 16 : i32
    %236 = vector.broadcast %c16_i32_95 : i32 to vector<32x32xi32>
    %237 = arith.cmpi slt, %80, %236 : vector<32x32xi32>
    %c16_i32_96 = arith.constant 16 : i32
    %238 = vector.broadcast %c16_i32_96 : i32 to vector<32x32xi32>
    %239 = arith.cmpi slt, %81, %238 : vector<32x32xi32>
    %240 = arith.andi %237, %239 : vector<32x32xi1>
    %241 = arith.extui %240 : vector<32x32xi1> to vector<32x32xi32>
    %242 = arith.sitofp %241 : vector<32x32xi32> to vector<32x32xf32>
    %243 = arith.mulf %235, %242 : vector<32x32xf32>
    %244 = vector.shape_cast %243 : vector<32x32xf32> to vector<1x32x32xf32>
    %cst_97 = arith.constant dense<0.000000e+00> : vector<1xf32>
    %245 = vector.multi_reduction <add>, %244, %cst_97 [1, 2] : vector<1x32x32xf32> to vector<1xf32>
    %246 = vector.shape_cast %245 : vector<1xf32> to vector<1x1x1xf32>
    %247 = vector.extract %246[0, 0, 0] : f32 from vector<1x1x1xf32>
    %cst_98 = arith.constant 3.906250e-03 : f32
    %248 = arith.mulf %247, %cst_98 : f32
    %249 = arith.divf %222, %225 : vector<32x32xf32>
    %250 = arith.mulf %249, %242 : vector<32x32xf32>
    %251 = vector.shape_cast %250 : vector<32x32xf32> to vector<1x32x32xf32>
    %cst_99 = arith.constant dense<0.000000e+00> : vector<1xf32>
    %252 = vector.multi_reduction <add>, %251, %cst_99 [1, 2] : vector<1x32x32xf32> to vector<1xf32>
    %253 = vector.shape_cast %252 : vector<1xf32> to vector<1x1x1xf32>
    %254 = vector.extract %253[0, 0, 0] : f32 from vector<1x1x1xf32>
    %cst_100 = arith.constant 3.906250e-03 : f32
    %255 = arith.mulf %254, %cst_100 : f32
    %c8_i32 = arith.constant 8 : i32
    %256 = vector.broadcast %c8_i32 : i32 to vector<32x32xi32>
    %257 = arith.cmpi slt, %4, %256 : vector<32x32xi32>
    %c2_i32_101 = arith.constant 2 : i32
    %258 = vector.broadcast %c2_i32_101 : i32 to vector<32x32xi32>
    %259 = arith.muli %258, %4 : vector<32x32xi32>
    %260 = arith.cmpi eq, %5, %259 : vector<32x32xi32>
    %c2_i32_102 = arith.constant 2 : i32
    %261 = vector.broadcast %c2_i32_102 : i32 to vector<32x32xi32>
    %262 = arith.muli %261, %4 : vector<32x32xi32>
    %c1_i32_103 = arith.constant 1 : i32
    %263 = vector.broadcast %c1_i32_103 : i32 to vector<32x32xi32>
    %264 = arith.addi %262, %263 : vector<32x32xi32>
    %265 = arith.cmpi eq, %5, %264 : vector<32x32xi32>
    %266 = arith.ori %260, %265 : vector<32x32xi1>
    %267 = arith.andi %257, %266 : vector<32x32xi1>
    %cst_104 = arith.constant 5.000000e-01 : f32
    %cst_105 = arith.constant 0.000000e+00 : f32
    %268 = vector.broadcast %cst_104 : f32 to vector<32x32xf32>
    %269 = vector.broadcast %cst_105 : f32 to vector<32x32xf32>
    %270 = arith.select %267, %268, %269 : vector<32x32xi1>, vector<32x32xf32>
    %c8_i32_106 = arith.constant 8 : i32
    %271 = vector.broadcast %c8_i32_106 : i32 to vector<32x32xi32>
    %272 = arith.cmpi slt, %7, %271 : vector<32x32xi32>
    %c2_i32_107 = arith.constant 2 : i32
    %273 = vector.broadcast %c2_i32_107 : i32 to vector<32x32xi32>
    %274 = arith.muli %273, %7 : vector<32x32xi32>
    %275 = arith.cmpi eq, %6, %274 : vector<32x32xi32>
    %c2_i32_108 = arith.constant 2 : i32
    %276 = vector.broadcast %c2_i32_108 : i32 to vector<32x32xi32>
    %277 = arith.muli %276, %7 : vector<32x32xi32>
    %c1_i32_109 = arith.constant 1 : i32
    %278 = vector.broadcast %c1_i32_109 : i32 to vector<32x32xi32>
    %279 = arith.addi %277, %278 : vector<32x32xi32>
    %280 = arith.cmpi eq, %6, %279 : vector<32x32xi32>
    %281 = arith.ori %275, %280 : vector<32x32xi1>
    %282 = arith.andi %272, %281 : vector<32x32xi1>
    %cst_110 = arith.constant 5.000000e-01 : f32
    %cst_111 = arith.constant 0.000000e+00 : f32
    %283 = vector.broadcast %cst_110 : f32 to vector<32x32xf32>
    %284 = vector.broadcast %cst_111 : f32 to vector<32x32xf32>
    %285 = arith.select %282, %283, %284 : vector<32x32xi1>, vector<32x32xf32>
    %cst_112 = arith.constant dense<0.000000e+00> : vector<32x32xf32>
    %286 = tpu.matmul %270, %183, %cst_112 {dimension_numbers = #tpu.dot_dimension_numbers<[1], [0], [0], [1], [0, 0, 1, 1], [], []>} : vector<32x32xf32>, vector<32x32xf32>, vector<32x32xf32> -> vector<32x32xf32>
    %cst_113 = arith.constant dense<0.000000e+00> : vector<32x32xf32>
    %287 = tpu.matmul %286, %285, %cst_113 {dimension_numbers = #tpu.dot_dimension_numbers<[1], [0], [0], [1], [0, 0, 1, 1], [], []>} : vector<32x32xf32>, vector<32x32xf32>, vector<32x32xf32> -> vector<32x32xf32>
    %cst_114 = arith.constant dense<0.000000e+00> : vector<32x32xf32>
    %288 = tpu.matmul %270, %185, %cst_114 {dimension_numbers = #tpu.dot_dimension_numbers<[1], [0], [0], [1], [0, 0, 1, 1], [], []>} : vector<32x32xf32>, vector<32x32xf32>, vector<32x32xf32> -> vector<32x32xf32>
    %cst_115 = arith.constant dense<0.000000e+00> : vector<32x32xf32>
    %289 = tpu.matmul %288, %285, %cst_115 {dimension_numbers = #tpu.dot_dimension_numbers<[1], [0], [0], [1], [0, 0, 1, 1], [], []>} : vector<32x32xf32>, vector<32x32xf32>, vector<32x32xf32> -> vector<32x32xf32>
    %c8_i32_116 = arith.constant 8 : i32
    %290 = vector.broadcast %c8_i32_116 : i32 to vector<32x32xi32>
    %291 = arith.cmpi slt, %4, %290 : vector<32x32xi32>
    %c8_i32_117 = arith.constant 8 : i32
    %292 = vector.broadcast %c8_i32_117 : i32 to vector<32x32xi32>
    %293 = arith.cmpi slt, %5, %292 : vector<32x32xi32>
    %294 = arith.andi %291, %293 : vector<32x32xi1>
    %cst_118 = arith.constant 0.000000e+00 : f32
    %295 = vector.broadcast %cst_118 : f32 to vector<32x32xf32>
    %296 = arith.select %294, %72, %295 : vector<32x32xi1>, vector<32x32xf32>
    %c8_i32_119 = arith.constant 8 : i32
    %297 = vector.broadcast %c8_i32_119 : i32 to vector<32x32xi32>
    %298 = arith.cmpi slt, %6, %297 : vector<32x32xi32>
    %c8_i32_120 = arith.constant 8 : i32
    %299 = vector.broadcast %c8_i32_120 : i32 to vector<32x32xi32>
    %300 = arith.cmpi slt, %7, %299 : vector<32x32xi32>
    %301 = arith.andi %298, %300 : vector<32x32xi1>
    %cst_121 = arith.constant 0.000000e+00 : f32
    %302 = vector.broadcast %cst_121 : f32 to vector<32x32xf32>
    %303 = arith.select %301, %79, %302 : vector<32x32xi1>, vector<32x32xf32>
    %cst_122 = arith.constant dense<0.000000e+00> : vector<32x32xf32>
    %304 = tpu.matmul %296, %287, %cst_122 {dimension_numbers = #tpu.dot_dimension_numbers<[1], [0], [0], [1], [0, 0, 1, 1], [], []>} : vector<32x32xf32>, vector<32x32xf32>, vector<32x32xf32> -> vector<32x32xf32>
    %cst_123 = arith.constant dense<0.000000e+00> : vector<32x32xf32>
    %305 = tpu.matmul %304, %303, %cst_123 {dimension_numbers = #tpu.dot_dimension_numbers<[1], [0], [0], [1], [0, 0, 1, 1], [], []>} : vector<32x32xf32>, vector<32x32xf32>, vector<32x32xf32> -> vector<32x32xf32>
    %cst_124 = arith.constant dense<0.000000e+00> : vector<32x32xf32>
    %306 = tpu.matmul %296, %289, %cst_124 {dimension_numbers = #tpu.dot_dimension_numbers<[1], [0], [0], [1], [0, 0, 1, 1], [], []>} : vector<32x32xf32>, vector<32x32xf32>, vector<32x32xf32> -> vector<32x32xf32>
    %cst_125 = arith.constant dense<0.000000e+00> : vector<32x32xf32>
    %307 = tpu.matmul %306, %303, %cst_125 {dimension_numbers = #tpu.dot_dimension_numbers<[1], [0], [0], [1], [0, 0, 1, 1], [], []>} : vector<32x32xf32>, vector<32x32xf32>, vector<32x32xf32> -> vector<32x32xf32>
    %308 = arith.mulf %287, %287 : vector<32x32xf32>
    %cst_126 = arith.constant dense<0.000000e+00> : vector<32x32xf32>
    %309 = tpu.matmul %296, %308, %cst_126 {dimension_numbers = #tpu.dot_dimension_numbers<[1], [0], [0], [1], [0, 0, 1, 1], [], []>} : vector<32x32xf32>, vector<32x32xf32>, vector<32x32xf32> -> vector<32x32xf32>
    %cst_127 = arith.constant dense<0.000000e+00> : vector<32x32xf32>
    %310 = tpu.matmul %309, %303, %cst_127 {dimension_numbers = #tpu.dot_dimension_numbers<[1], [0], [0], [1], [0, 0, 1, 1], [], []>} : vector<32x32xf32>, vector<32x32xf32>, vector<32x32xf32> -> vector<32x32xf32>
    %311 = arith.mulf %289, %289 : vector<32x32xf32>
    %cst_128 = arith.constant dense<0.000000e+00> : vector<32x32xf32>
    %312 = tpu.matmul %296, %311, %cst_128 {dimension_numbers = #tpu.dot_dimension_numbers<[1], [0], [0], [1], [0, 0, 1, 1], [], []>} : vector<32x32xf32>, vector<32x32xf32>, vector<32x32xf32> -> vector<32x32xf32>
    %cst_129 = arith.constant dense<0.000000e+00> : vector<32x32xf32>
    %313 = tpu.matmul %312, %303, %cst_129 {dimension_numbers = #tpu.dot_dimension_numbers<[1], [0], [0], [1], [0, 0, 1, 1], [], []>} : vector<32x32xf32>, vector<32x32xf32>, vector<32x32xf32> -> vector<32x32xf32>
    %314 = arith.mulf %287, %289 : vector<32x32xf32>
    %cst_130 = arith.constant dense<0.000000e+00> : vector<32x32xf32>
    %315 = tpu.matmul %296, %314, %cst_130 {dimension_numbers = #tpu.dot_dimension_numbers<[1], [0], [0], [1], [0, 0, 1, 1], [], []>} : vector<32x32xf32>, vector<32x32xf32>, vector<32x32xf32> -> vector<32x32xf32>
    %cst_131 = arith.constant dense<0.000000e+00> : vector<32x32xf32>
    %316 = tpu.matmul %315, %303, %cst_131 {dimension_numbers = #tpu.dot_dimension_numbers<[1], [0], [0], [1], [0, 0, 1, 1], [], []>} : vector<32x32xf32>, vector<32x32xf32>, vector<32x32xf32> -> vector<32x32xf32>
    %317 = arith.mulf %305, %305 : vector<32x32xf32>
    %318 = arith.mulf %307, %307 : vector<32x32xf32>
    %319 = arith.mulf %305, %307 : vector<32x32xf32>
    %320 = arith.subf %310, %317 : vector<32x32xf32>
    %321 = arith.subf %313, %318 : vector<32x32xf32>
    %322 = arith.subf %316, %319 : vector<32x32xf32>
    %cst_132 = arith.constant 2.000000e+00 : f32
    %323 = vector.broadcast %cst_132 : f32 to vector<32x32xf32>
    %324 = arith.mulf %323, %322 : vector<32x32xf32>
    %cst_133 = arith.constant 8.99999984E-4 : f32
    %325 = vector.broadcast %cst_133 : f32 to vector<32x32xf32>
    %326 = arith.addf %324, %325 : vector<32x32xf32>
    %327 = arith.addf %320, %321 : vector<32x32xf32>
    %cst_134 = arith.constant 8.99999984E-4 : f32
    %328 = vector.broadcast %cst_134 : f32 to vector<32x32xf32>
    %329 = arith.addf %327, %328 : vector<32x32xf32>
    %cst_135 = arith.constant 2.000000e+00 : f32
    %330 = vector.broadcast %cst_135 : f32 to vector<32x32xf32>
    %331 = arith.mulf %330, %319 : vector<32x32xf32>
    %cst_136 = arith.constant 9.99999974E-5 : f32
    %332 = vector.broadcast %cst_136 : f32 to vector<32x32xf32>
    %333 = arith.addf %331, %332 : vector<32x32xf32>
    %334 = arith.mulf %333, %326 : vector<32x32xf32>
    %335 = arith.addf %317, %318 : vector<32x32xf32>
    %cst_137 = arith.constant 9.99999974E-5 : f32
    %336 = vector.broadcast %cst_137 : f32 to vector<32x32xf32>
    %337 = arith.addf %335, %336 : vector<32x32xf32>
    %338 = arith.mulf %337, %329 : vector<32x32xf32>
    %339 = arith.divf %334, %338 : vector<32x32xf32>
    %c8_i32_138 = arith.constant 8 : i32
    %340 = vector.broadcast %c8_i32_138 : i32 to vector<32x32xi32>
    %341 = arith.cmpi slt, %80, %340 : vector<32x32xi32>
    %c8_i32_139 = arith.constant 8 : i32
    %342 = vector.broadcast %c8_i32_139 : i32 to vector<32x32xi32>
    %343 = arith.cmpi slt, %81, %342 : vector<32x32xi32>
    %344 = arith.andi %341, %343 : vector<32x32xi1>
    %345 = arith.extui %344 : vector<32x32xi1> to vector<32x32xi32>
    %346 = arith.sitofp %345 : vector<32x32xi32> to vector<32x32xf32>
    %347 = arith.mulf %339, %346 : vector<32x32xf32>
    %348 = vector.shape_cast %347 : vector<32x32xf32> to vector<1x32x32xf32>
    %cst_140 = arith.constant dense<0.000000e+00> : vector<1xf32>
    %349 = vector.multi_reduction <add>, %348, %cst_140 [1, 2] : vector<1x32x32xf32> to vector<1xf32>
    %350 = vector.shape_cast %349 : vector<1xf32> to vector<1x1x1xf32>
    %351 = vector.extract %350[0, 0, 0] : f32 from vector<1x1x1xf32>
    %cst_141 = arith.constant 1.562500e-02 : f32
    %352 = arith.mulf %351, %cst_141 : f32
    %353 = arith.divf %326, %329 : vector<32x32xf32>
    %354 = arith.mulf %353, %346 : vector<32x32xf32>
    %355 = vector.shape_cast %354 : vector<32x32xf32> to vector<1x32x32xf32>
    %cst_142 = arith.constant dense<0.000000e+00> : vector<1xf32>
    %356 = vector.multi_reduction <add>, %355, %cst_142 [1, 2] : vector<1x32x32xf32> to vector<1xf32>
    %357 = vector.shape_cast %356 : vector<1xf32> to vector<1x1x1xf32>
    %358 = vector.extract %357[0, 0, 0] : f32 from vector<1x1x1xf32>
    %cst_143 = arith.constant 1.562500e-02 : f32
    %359 = arith.mulf %358, %cst_143 : f32
    %c4_i32 = arith.constant 4 : i32
    %360 = vector.broadcast %c4_i32 : i32 to vector<32x32xi32>
    %361 = arith.cmpi slt, %4, %360 : vector<32x32xi32>
    %c2_i32_144 = arith.constant 2 : i32
    %362 = vector.broadcast %c2_i32_144 : i32 to vector<32x32xi32>
    %363 = arith.muli %362, %4 : vector<32x32xi32>
    %364 = arith.cmpi eq, %5, %363 : vector<32x32xi32>
    %c2_i32_145 = arith.constant 2 : i32
    %365 = vector.broadcast %c2_i32_145 : i32 to vector<32x32xi32>
    %366 = arith.muli %365, %4 : vector<32x32xi32>
    %c1_i32_146 = arith.constant 1 : i32
    %367 = vector.broadcast %c1_i32_146 : i32 to vector<32x32xi32>
    %368 = arith.addi %366, %367 : vector<32x32xi32>
    %369 = arith.cmpi eq, %5, %368 : vector<32x32xi32>
    %370 = arith.ori %364, %369 : vector<32x32xi1>
    %371 = arith.andi %361, %370 : vector<32x32xi1>
    %cst_147 = arith.constant 5.000000e-01 : f32
    %cst_148 = arith.constant 0.000000e+00 : f32
    %372 = vector.broadcast %cst_147 : f32 to vector<32x32xf32>
    %373 = vector.broadcast %cst_148 : f32 to vector<32x32xf32>
    %374 = arith.select %371, %372, %373 : vector<32x32xi1>, vector<32x32xf32>
    %c4_i32_149 = arith.constant 4 : i32
    %375 = vector.broadcast %c4_i32_149 : i32 to vector<32x32xi32>
    %376 = arith.cmpi slt, %7, %375 : vector<32x32xi32>
    %c2_i32_150 = arith.constant 2 : i32
    %377 = vector.broadcast %c2_i32_150 : i32 to vector<32x32xi32>
    %378 = arith.muli %377, %7 : vector<32x32xi32>
    %379 = arith.cmpi eq, %6, %378 : vector<32x32xi32>
    %c2_i32_151 = arith.constant 2 : i32
    %380 = vector.broadcast %c2_i32_151 : i32 to vector<32x32xi32>
    %381 = arith.muli %380, %7 : vector<32x32xi32>
    %c1_i32_152 = arith.constant 1 : i32
    %382 = vector.broadcast %c1_i32_152 : i32 to vector<32x32xi32>
    %383 = arith.addi %381, %382 : vector<32x32xi32>
    %384 = arith.cmpi eq, %6, %383 : vector<32x32xi32>
    %385 = arith.ori %379, %384 : vector<32x32xi1>
    %386 = arith.andi %376, %385 : vector<32x32xi1>
    %cst_153 = arith.constant 5.000000e-01 : f32
    %cst_154 = arith.constant 0.000000e+00 : f32
    %387 = vector.broadcast %cst_153 : f32 to vector<32x32xf32>
    %388 = vector.broadcast %cst_154 : f32 to vector<32x32xf32>
    %389 = arith.select %386, %387, %388 : vector<32x32xi1>, vector<32x32xf32>
    %cst_155 = arith.constant dense<0.000000e+00> : vector<32x32xf32>
    %390 = tpu.matmul %374, %287, %cst_155 {dimension_numbers = #tpu.dot_dimension_numbers<[1], [0], [0], [1], [0, 0, 1, 1], [], []>} : vector<32x32xf32>, vector<32x32xf32>, vector<32x32xf32> -> vector<32x32xf32>
    %cst_156 = arith.constant dense<0.000000e+00> : vector<32x32xf32>
    %391 = tpu.matmul %390, %389, %cst_156 {dimension_numbers = #tpu.dot_dimension_numbers<[1], [0], [0], [1], [0, 0, 1, 1], [], []>} : vector<32x32xf32>, vector<32x32xf32>, vector<32x32xf32> -> vector<32x32xf32>
    %cst_157 = arith.constant dense<0.000000e+00> : vector<32x32xf32>
    %392 = tpu.matmul %374, %289, %cst_157 {dimension_numbers = #tpu.dot_dimension_numbers<[1], [0], [0], [1], [0, 0, 1, 1], [], []>} : vector<32x32xf32>, vector<32x32xf32>, vector<32x32xf32> -> vector<32x32xf32>
    %cst_158 = arith.constant dense<0.000000e+00> : vector<32x32xf32>
    %393 = tpu.matmul %392, %389, %cst_158 {dimension_numbers = #tpu.dot_dimension_numbers<[1], [0], [0], [1], [0, 0, 1, 1], [], []>} : vector<32x32xf32>, vector<32x32xf32>, vector<32x32xf32> -> vector<32x32xf32>
    %c4_i32_159 = arith.constant 4 : i32
    %394 = vector.broadcast %c4_i32_159 : i32 to vector<32x32xi32>
    %395 = arith.cmpi slt, %4, %394 : vector<32x32xi32>
    %c4_i32_160 = arith.constant 4 : i32
    %396 = vector.broadcast %c4_i32_160 : i32 to vector<32x32xi32>
    %397 = arith.cmpi slt, %5, %396 : vector<32x32xi32>
    %398 = arith.andi %395, %397 : vector<32x32xi1>
    %cst_161 = arith.constant 0.000000e+00 : f32
    %399 = vector.broadcast %cst_161 : f32 to vector<32x32xf32>
    %400 = arith.select %398, %72, %399 : vector<32x32xi1>, vector<32x32xf32>
    %c4_i32_162 = arith.constant 4 : i32
    %401 = vector.broadcast %c4_i32_162 : i32 to vector<32x32xi32>
    %402 = arith.cmpi slt, %6, %401 : vector<32x32xi32>
    %c4_i32_163 = arith.constant 4 : i32
    %403 = vector.broadcast %c4_i32_163 : i32 to vector<32x32xi32>
    %404 = arith.cmpi slt, %7, %403 : vector<32x32xi32>
    %405 = arith.andi %402, %404 : vector<32x32xi1>
    %cst_164 = arith.constant 0.000000e+00 : f32
    %406 = vector.broadcast %cst_164 : f32 to vector<32x32xf32>
    %407 = arith.select %405, %79, %406 : vector<32x32xi1>, vector<32x32xf32>
    %cst_165 = arith.constant dense<0.000000e+00> : vector<32x32xf32>
    %408 = tpu.matmul %400, %391, %cst_165 {dimension_numbers = #tpu.dot_dimension_numbers<[1], [0], [0], [1], [0, 0, 1, 1], [], []>} : vector<32x32xf32>, vector<32x32xf32>, vector<32x32xf32> -> vector<32x32xf32>
    %cst_166 = arith.constant dense<0.000000e+00> : vector<32x32xf32>
    %409 = tpu.matmul %408, %407, %cst_166 {dimension_numbers = #tpu.dot_dimension_numbers<[1], [0], [0], [1], [0, 0, 1, 1], [], []>} : vector<32x32xf32>, vector<32x32xf32>, vector<32x32xf32> -> vector<32x32xf32>
    %cst_167 = arith.constant dense<0.000000e+00> : vector<32x32xf32>
    %410 = tpu.matmul %400, %393, %cst_167 {dimension_numbers = #tpu.dot_dimension_numbers<[1], [0], [0], [1], [0, 0, 1, 1], [], []>} : vector<32x32xf32>, vector<32x32xf32>, vector<32x32xf32> -> vector<32x32xf32>
    %cst_168 = arith.constant dense<0.000000e+00> : vector<32x32xf32>
    %411 = tpu.matmul %410, %407, %cst_168 {dimension_numbers = #tpu.dot_dimension_numbers<[1], [0], [0], [1], [0, 0, 1, 1], [], []>} : vector<32x32xf32>, vector<32x32xf32>, vector<32x32xf32> -> vector<32x32xf32>
    %412 = arith.mulf %391, %391 : vector<32x32xf32>
    %cst_169 = arith.constant dense<0.000000e+00> : vector<32x32xf32>
    %413 = tpu.matmul %400, %412, %cst_169 {dimension_numbers = #tpu.dot_dimension_numbers<[1], [0], [0], [1], [0, 0, 1, 1], [], []>} : vector<32x32xf32>, vector<32x32xf32>, vector<32x32xf32> -> vector<32x32xf32>
    %cst_170 = arith.constant dense<0.000000e+00> : vector<32x32xf32>
    %414 = tpu.matmul %413, %407, %cst_170 {dimension_numbers = #tpu.dot_dimension_numbers<[1], [0], [0], [1], [0, 0, 1, 1], [], []>} : vector<32x32xf32>, vector<32x32xf32>, vector<32x32xf32> -> vector<32x32xf32>
    %415 = arith.mulf %393, %393 : vector<32x32xf32>
    %cst_171 = arith.constant dense<0.000000e+00> : vector<32x32xf32>
    %416 = tpu.matmul %400, %415, %cst_171 {dimension_numbers = #tpu.dot_dimension_numbers<[1], [0], [0], [1], [0, 0, 1, 1], [], []>} : vector<32x32xf32>, vector<32x32xf32>, vector<32x32xf32> -> vector<32x32xf32>
    %cst_172 = arith.constant dense<0.000000e+00> : vector<32x32xf32>
    %417 = tpu.matmul %416, %407, %cst_172 {dimension_numbers = #tpu.dot_dimension_numbers<[1], [0], [0], [1], [0, 0, 1, 1], [], []>} : vector<32x32xf32>, vector<32x32xf32>, vector<32x32xf32> -> vector<32x32xf32>
    %418 = arith.mulf %391, %393 : vector<32x32xf32>
    %cst_173 = arith.constant dense<0.000000e+00> : vector<32x32xf32>
    %419 = tpu.matmul %400, %418, %cst_173 {dimension_numbers = #tpu.dot_dimension_numbers<[1], [0], [0], [1], [0, 0, 1, 1], [], []>} : vector<32x32xf32>, vector<32x32xf32>, vector<32x32xf32> -> vector<32x32xf32>
    %cst_174 = arith.constant dense<0.000000e+00> : vector<32x32xf32>
    %420 = tpu.matmul %419, %407, %cst_174 {dimension_numbers = #tpu.dot_dimension_numbers<[1], [0], [0], [1], [0, 0, 1, 1], [], []>} : vector<32x32xf32>, vector<32x32xf32>, vector<32x32xf32> -> vector<32x32xf32>
    %421 = arith.mulf %409, %409 : vector<32x32xf32>
    %422 = arith.mulf %411, %411 : vector<32x32xf32>
    %423 = arith.mulf %409, %411 : vector<32x32xf32>
    %424 = arith.subf %414, %421 : vector<32x32xf32>
    %425 = arith.subf %417, %422 : vector<32x32xf32>
    %426 = arith.subf %420, %423 : vector<32x32xf32>
    %cst_175 = arith.constant 2.000000e+00 : f32
    %427 = vector.broadcast %cst_175 : f32 to vector<32x32xf32>
    %428 = arith.mulf %427, %426 : vector<32x32xf32>
    %cst_176 = arith.constant 8.99999984E-4 : f32
    %429 = vector.broadcast %cst_176 : f32 to vector<32x32xf32>
    %430 = arith.addf %428, %429 : vector<32x32xf32>
    %431 = arith.addf %424, %425 : vector<32x32xf32>
    %cst_177 = arith.constant 8.99999984E-4 : f32
    %432 = vector.broadcast %cst_177 : f32 to vector<32x32xf32>
    %433 = arith.addf %431, %432 : vector<32x32xf32>
    %cst_178 = arith.constant 2.000000e+00 : f32
    %434 = vector.broadcast %cst_178 : f32 to vector<32x32xf32>
    %435 = arith.mulf %434, %423 : vector<32x32xf32>
    %cst_179 = arith.constant 9.99999974E-5 : f32
    %436 = vector.broadcast %cst_179 : f32 to vector<32x32xf32>
    %437 = arith.addf %435, %436 : vector<32x32xf32>
    %438 = arith.mulf %437, %430 : vector<32x32xf32>
    %439 = arith.addf %421, %422 : vector<32x32xf32>
    %cst_180 = arith.constant 9.99999974E-5 : f32
    %440 = vector.broadcast %cst_180 : f32 to vector<32x32xf32>
    %441 = arith.addf %439, %440 : vector<32x32xf32>
    %442 = arith.mulf %441, %433 : vector<32x32xf32>
    %443 = arith.divf %438, %442 : vector<32x32xf32>
    %c4_i32_181 = arith.constant 4 : i32
    %444 = vector.broadcast %c4_i32_181 : i32 to vector<32x32xi32>
    %445 = arith.cmpi slt, %80, %444 : vector<32x32xi32>
    %c4_i32_182 = arith.constant 4 : i32
    %446 = vector.broadcast %c4_i32_182 : i32 to vector<32x32xi32>
    %447 = arith.cmpi slt, %81, %446 : vector<32x32xi32>
    %448 = arith.andi %445, %447 : vector<32x32xi1>
    %449 = arith.extui %448 : vector<32x32xi1> to vector<32x32xi32>
    %450 = arith.sitofp %449 : vector<32x32xi32> to vector<32x32xf32>
    %451 = arith.mulf %443, %450 : vector<32x32xf32>
    %452 = vector.shape_cast %451 : vector<32x32xf32> to vector<1x32x32xf32>
    %cst_183 = arith.constant dense<0.000000e+00> : vector<1xf32>
    %453 = vector.multi_reduction <add>, %452, %cst_183 [1, 2] : vector<1x32x32xf32> to vector<1xf32>
    %454 = vector.shape_cast %453 : vector<1xf32> to vector<1x1x1xf32>
    %455 = vector.extract %454[0, 0, 0] : f32 from vector<1x1x1xf32>
    %cst_184 = arith.constant 6.250000e-02 : f32
    %456 = arith.mulf %455, %cst_184 : f32
    %457 = arith.divf %430, %433 : vector<32x32xf32>
    %458 = arith.mulf %457, %450 : vector<32x32xf32>
    %459 = vector.shape_cast %458 : vector<32x32xf32> to vector<1x32x32xf32>
    %cst_185 = arith.constant dense<0.000000e+00> : vector<1xf32>
    %460 = vector.multi_reduction <add>, %459, %cst_185 [1, 2] : vector<1x32x32xf32> to vector<1xf32>
    %461 = vector.shape_cast %460 : vector<1xf32> to vector<1x1x1xf32>
    %462 = vector.extract %461[0, 0, 0] : f32 from vector<1x1x1xf32>
    %cst_186 = arith.constant 6.250000e-02 : f32
    %463 = arith.mulf %462, %cst_186 : f32
    %c2_i32_187 = arith.constant 2 : i32
    %464 = vector.broadcast %c2_i32_187 : i32 to vector<32x32xi32>
    %465 = arith.cmpi slt, %4, %464 : vector<32x32xi32>
    %c2_i32_188 = arith.constant 2 : i32
    %466 = vector.broadcast %c2_i32_188 : i32 to vector<32x32xi32>
    %467 = arith.muli %466, %4 : vector<32x32xi32>
    %468 = arith.cmpi eq, %5, %467 : vector<32x32xi32>
    %c2_i32_189 = arith.constant 2 : i32
    %469 = vector.broadcast %c2_i32_189 : i32 to vector<32x32xi32>
    %470 = arith.muli %469, %4 : vector<32x32xi32>
    %c1_i32_190 = arith.constant 1 : i32
    %471 = vector.broadcast %c1_i32_190 : i32 to vector<32x32xi32>
    %472 = arith.addi %470, %471 : vector<32x32xi32>
    %473 = arith.cmpi eq, %5, %472 : vector<32x32xi32>
    %474 = arith.ori %468, %473 : vector<32x32xi1>
    %475 = arith.andi %465, %474 : vector<32x32xi1>
    %cst_191 = arith.constant 5.000000e-01 : f32
    %cst_192 = arith.constant 0.000000e+00 : f32
    %476 = vector.broadcast %cst_191 : f32 to vector<32x32xf32>
    %477 = vector.broadcast %cst_192 : f32 to vector<32x32xf32>
    %478 = arith.select %475, %476, %477 : vector<32x32xi1>, vector<32x32xf32>
    %c2_i32_193 = arith.constant 2 : i32
    %479 = vector.broadcast %c2_i32_193 : i32 to vector<32x32xi32>
    %480 = arith.cmpi slt, %7, %479 : vector<32x32xi32>
    %c2_i32_194 = arith.constant 2 : i32
    %481 = vector.broadcast %c2_i32_194 : i32 to vector<32x32xi32>
    %482 = arith.muli %481, %7 : vector<32x32xi32>
    %483 = arith.cmpi eq, %6, %482 : vector<32x32xi32>
    %c2_i32_195 = arith.constant 2 : i32
    %484 = vector.broadcast %c2_i32_195 : i32 to vector<32x32xi32>
    %485 = arith.muli %484, %7 : vector<32x32xi32>
    %c1_i32_196 = arith.constant 1 : i32
    %486 = vector.broadcast %c1_i32_196 : i32 to vector<32x32xi32>
    %487 = arith.addi %485, %486 : vector<32x32xi32>
    %488 = arith.cmpi eq, %6, %487 : vector<32x32xi32>
    %489 = arith.ori %483, %488 : vector<32x32xi1>
    %490 = arith.andi %480, %489 : vector<32x32xi1>
    %cst_197 = arith.constant 5.000000e-01 : f32
    %cst_198 = arith.constant 0.000000e+00 : f32
    %491 = vector.broadcast %cst_197 : f32 to vector<32x32xf32>
    %492 = vector.broadcast %cst_198 : f32 to vector<32x32xf32>
    %493 = arith.select %490, %491, %492 : vector<32x32xi1>, vector<32x32xf32>
    %cst_199 = arith.constant dense<0.000000e+00> : vector<32x32xf32>
    %494 = tpu.matmul %478, %391, %cst_199 {dimension_numbers = #tpu.dot_dimension_numbers<[1], [0], [0], [1], [0, 0, 1, 1], [], []>} : vector<32x32xf32>, vector<32x32xf32>, vector<32x32xf32> -> vector<32x32xf32>
    %cst_200 = arith.constant dense<0.000000e+00> : vector<32x32xf32>
    %495 = tpu.matmul %494, %493, %cst_200 {dimension_numbers = #tpu.dot_dimension_numbers<[1], [0], [0], [1], [0, 0, 1, 1], [], []>} : vector<32x32xf32>, vector<32x32xf32>, vector<32x32xf32> -> vector<32x32xf32>
    %cst_201 = arith.constant dense<0.000000e+00> : vector<32x32xf32>
    %496 = tpu.matmul %478, %393, %cst_201 {dimension_numbers = #tpu.dot_dimension_numbers<[1], [0], [0], [1], [0, 0, 1, 1], [], []>} : vector<32x32xf32>, vector<32x32xf32>, vector<32x32xf32> -> vector<32x32xf32>
    %cst_202 = arith.constant dense<0.000000e+00> : vector<32x32xf32>
    %497 = tpu.matmul %496, %493, %cst_202 {dimension_numbers = #tpu.dot_dimension_numbers<[1], [0], [0], [1], [0, 0, 1, 1], [], []>} : vector<32x32xf32>, vector<32x32xf32>, vector<32x32xf32> -> vector<32x32xf32>
    %c2_i32_203 = arith.constant 2 : i32
    %498 = vector.broadcast %c2_i32_203 : i32 to vector<32x32xi32>
    %499 = arith.cmpi slt, %4, %498 : vector<32x32xi32>
    %c2_i32_204 = arith.constant 2 : i32
    %500 = vector.broadcast %c2_i32_204 : i32 to vector<32x32xi32>
    %501 = arith.cmpi slt, %5, %500 : vector<32x32xi32>
    %502 = arith.andi %499, %501 : vector<32x32xi1>
    %cst_205 = arith.constant 0.000000e+00 : f32
    %503 = vector.broadcast %cst_205 : f32 to vector<32x32xf32>
    %504 = arith.select %502, %72, %503 : vector<32x32xi1>, vector<32x32xf32>
    %c2_i32_206 = arith.constant 2 : i32
    %505 = vector.broadcast %c2_i32_206 : i32 to vector<32x32xi32>
    %506 = arith.cmpi slt, %6, %505 : vector<32x32xi32>
    %c2_i32_207 = arith.constant 2 : i32
    %507 = vector.broadcast %c2_i32_207 : i32 to vector<32x32xi32>
    %508 = arith.cmpi slt, %7, %507 : vector<32x32xi32>
    %509 = arith.andi %506, %508 : vector<32x32xi1>
    %cst_208 = arith.constant 0.000000e+00 : f32
    %510 = vector.broadcast %cst_208 : f32 to vector<32x32xf32>
    %511 = arith.select %509, %79, %510 : vector<32x32xi1>, vector<32x32xf32>
    %cst_209 = arith.constant dense<0.000000e+00> : vector<32x32xf32>
    %512 = tpu.matmul %504, %495, %cst_209 {dimension_numbers = #tpu.dot_dimension_numbers<[1], [0], [0], [1], [0, 0, 1, 1], [], []>} : vector<32x32xf32>, vector<32x32xf32>, vector<32x32xf32> -> vector<32x32xf32>
    %cst_210 = arith.constant dense<0.000000e+00> : vector<32x32xf32>
    %513 = tpu.matmul %512, %511, %cst_210 {dimension_numbers = #tpu.dot_dimension_numbers<[1], [0], [0], [1], [0, 0, 1, 1], [], []>} : vector<32x32xf32>, vector<32x32xf32>, vector<32x32xf32> -> vector<32x32xf32>
    %cst_211 = arith.constant dense<0.000000e+00> : vector<32x32xf32>
    %514 = tpu.matmul %504, %497, %cst_211 {dimension_numbers = #tpu.dot_dimension_numbers<[1], [0], [0], [1], [0, 0, 1, 1], [], []>} : vector<32x32xf32>, vector<32x32xf32>, vector<32x32xf32> -> vector<32x32xf32>
    %cst_212 = arith.constant dense<0.000000e+00> : vector<32x32xf32>
    %515 = tpu.matmul %514, %511, %cst_212 {dimension_numbers = #tpu.dot_dimension_numbers<[1], [0], [0], [1], [0, 0, 1, 1], [], []>} : vector<32x32xf32>, vector<32x32xf32>, vector<32x32xf32> -> vector<32x32xf32>
    %516 = arith.mulf %495, %495 : vector<32x32xf32>
    %cst_213 = arith.constant dense<0.000000e+00> : vector<32x32xf32>
    %517 = tpu.matmul %504, %516, %cst_213 {dimension_numbers = #tpu.dot_dimension_numbers<[1], [0], [0], [1], [0, 0, 1, 1], [], []>} : vector<32x32xf32>, vector<32x32xf32>, vector<32x32xf32> -> vector<32x32xf32>
    %cst_214 = arith.constant dense<0.000000e+00> : vector<32x32xf32>
    %518 = tpu.matmul %517, %511, %cst_214 {dimension_numbers = #tpu.dot_dimension_numbers<[1], [0], [0], [1], [0, 0, 1, 1], [], []>} : vector<32x32xf32>, vector<32x32xf32>, vector<32x32xf32> -> vector<32x32xf32>
    %519 = arith.mulf %497, %497 : vector<32x32xf32>
    %cst_215 = arith.constant dense<0.000000e+00> : vector<32x32xf32>
    %520 = tpu.matmul %504, %519, %cst_215 {dimension_numbers = #tpu.dot_dimension_numbers<[1], [0], [0], [1], [0, 0, 1, 1], [], []>} : vector<32x32xf32>, vector<32x32xf32>, vector<32x32xf32> -> vector<32x32xf32>
    %cst_216 = arith.constant dense<0.000000e+00> : vector<32x32xf32>
    %521 = tpu.matmul %520, %511, %cst_216 {dimension_numbers = #tpu.dot_dimension_numbers<[1], [0], [0], [1], [0, 0, 1, 1], [], []>} : vector<32x32xf32>, vector<32x32xf32>, vector<32x32xf32> -> vector<32x32xf32>
    %522 = arith.mulf %495, %497 : vector<32x32xf32>
    %cst_217 = arith.constant dense<0.000000e+00> : vector<32x32xf32>
    %523 = tpu.matmul %504, %522, %cst_217 {dimension_numbers = #tpu.dot_dimension_numbers<[1], [0], [0], [1], [0, 0, 1, 1], [], []>} : vector<32x32xf32>, vector<32x32xf32>, vector<32x32xf32> -> vector<32x32xf32>
    %cst_218 = arith.constant dense<0.000000e+00> : vector<32x32xf32>
    %524 = tpu.matmul %523, %511, %cst_218 {dimension_numbers = #tpu.dot_dimension_numbers<[1], [0], [0], [1], [0, 0, 1, 1], [], []>} : vector<32x32xf32>, vector<32x32xf32>, vector<32x32xf32> -> vector<32x32xf32>
    %525 = arith.mulf %513, %513 : vector<32x32xf32>
    %526 = arith.mulf %515, %515 : vector<32x32xf32>
    %527 = arith.mulf %513, %515 : vector<32x32xf32>
    %528 = arith.subf %518, %525 : vector<32x32xf32>
    %529 = arith.subf %521, %526 : vector<32x32xf32>
    %530 = arith.subf %524, %527 : vector<32x32xf32>
    %cst_219 = arith.constant 2.000000e+00 : f32
    %531 = vector.broadcast %cst_219 : f32 to vector<32x32xf32>
    %532 = arith.mulf %531, %530 : vector<32x32xf32>
    %cst_220 = arith.constant 8.99999984E-4 : f32
    %533 = vector.broadcast %cst_220 : f32 to vector<32x32xf32>
    %534 = arith.addf %532, %533 : vector<32x32xf32>
    %535 = arith.addf %528, %529 : vector<32x32xf32>
    %cst_221 = arith.constant 8.99999984E-4 : f32
    %536 = vector.broadcast %cst_221 : f32 to vector<32x32xf32>
    %537 = arith.addf %535, %536 : vector<32x32xf32>
    %cst_222 = arith.constant 2.000000e+00 : f32
    %538 = vector.broadcast %cst_222 : f32 to vector<32x32xf32>
    %539 = arith.mulf %538, %527 : vector<32x32xf32>
    %cst_223 = arith.constant 9.99999974E-5 : f32
    %540 = vector.broadcast %cst_223 : f32 to vector<32x32xf32>
    %541 = arith.addf %539, %540 : vector<32x32xf32>
    %542 = arith.mulf %541, %534 : vector<32x32xf32>
    %543 = arith.addf %525, %526 : vector<32x32xf32>
    %cst_224 = arith.constant 9.99999974E-5 : f32
    %544 = vector.broadcast %cst_224 : f32 to vector<32x32xf32>
    %545 = arith.addf %543, %544 : vector<32x32xf32>
    %546 = arith.mulf %545, %537 : vector<32x32xf32>
    %547 = arith.divf %542, %546 : vector<32x32xf32>
    %c2_i32_225 = arith.constant 2 : i32
    %548 = vector.broadcast %c2_i32_225 : i32 to vector<32x32xi32>
    %549 = arith.cmpi slt, %80, %548 : vector<32x32xi32>
    %c2_i32_226 = arith.constant 2 : i32
    %550 = vector.broadcast %c2_i32_226 : i32 to vector<32x32xi32>
    %551 = arith.cmpi slt, %81, %550 : vector<32x32xi32>
    %552 = arith.andi %549, %551 : vector<32x32xi1>
    %553 = arith.extui %552 : vector<32x32xi1> to vector<32x32xi32>
    %554 = arith.sitofp %553 : vector<32x32xi32> to vector<32x32xf32>
    %555 = arith.mulf %547, %554 : vector<32x32xf32>
    %556 = vector.shape_cast %555 : vector<32x32xf32> to vector<1x32x32xf32>
    %cst_227 = arith.constant dense<0.000000e+00> : vector<1xf32>
    %557 = vector.multi_reduction <add>, %556, %cst_227 [1, 2] : vector<1x32x32xf32> to vector<1xf32>
    %558 = vector.shape_cast %557 : vector<1xf32> to vector<1x1x1xf32>
    %559 = vector.extract %558[0, 0, 0] : f32 from vector<1x1x1xf32>
    %cst_228 = arith.constant 2.500000e-01 : f32
    %560 = arith.mulf %559, %cst_228 : f32
    %561 = arith.divf %534, %537 : vector<32x32xf32>
    %562 = arith.mulf %561, %554 : vector<32x32xf32>
    %563 = vector.shape_cast %562 : vector<32x32xf32> to vector<1x32x32xf32>
    %cst_229 = arith.constant dense<0.000000e+00> : vector<1xf32>
    %564 = vector.multi_reduction <add>, %563, %cst_229 [1, 2] : vector<1x32x32xf32> to vector<1xf32>
    %565 = vector.shape_cast %564 : vector<1xf32> to vector<1x1x1xf32>
    %566 = vector.extract %565[0, 0, 0] : f32 from vector<1x1x1xf32>
    %cst_230 = arith.constant 2.500000e-01 : f32
    %567 = arith.mulf %566, %cst_230 : f32
    %568 = tpu.iota {dimensions = array<i32: 1>} : vector<1x16xi32>
    %cst_231 = arith.constant 0.000000e+00 : f32
    %569 = vector.broadcast %cst_231 : f32 to vector<1x16xf32>
    %c0_i32_232 = arith.constant 0 : i32
    %570 = vector.broadcast %c0_i32_232 : i32 to vector<1x16xi32>
    %571 = arith.cmpi eq, %568, %570 : vector<1x16xi32>
    %cst_233 = arith.constant 0.000000e+00 : f32
    %572 = vector.broadcast %144 : f32 to vector<1x16xf32>
    %573 = vector.broadcast %cst_233 : f32 to vector<1x16xf32>
    %574 = arith.select %571, %572, %573 : vector<1x16xi1>, vector<1x16xf32>
    %575 = arith.addf %569, %574 : vector<1x16xf32>
    %c8_i32_234 = arith.constant 8 : i32
    %576 = vector.broadcast %c8_i32_234 : i32 to vector<1x16xi32>
    %577 = arith.cmpi eq, %568, %576 : vector<1x16xi32>
    %cst_235 = arith.constant 0.000000e+00 : f32
    %578 = vector.broadcast %151 : f32 to vector<1x16xf32>
    %579 = vector.broadcast %cst_235 : f32 to vector<1x16xf32>
    %580 = arith.select %577, %578, %579 : vector<1x16xi1>, vector<1x16xf32>
    %581 = arith.addf %575, %580 : vector<1x16xf32>
    %c1_i32_236 = arith.constant 1 : i32
    %582 = vector.broadcast %c1_i32_236 : i32 to vector<1x16xi32>
    %583 = arith.cmpi eq, %568, %582 : vector<1x16xi32>
    %cst_237 = arith.constant 0.000000e+00 : f32
    %584 = vector.broadcast %248 : f32 to vector<1x16xf32>
    %585 = vector.broadcast %cst_237 : f32 to vector<1x16xf32>
    %586 = arith.select %583, %584, %585 : vector<1x16xi1>, vector<1x16xf32>
    %587 = arith.addf %581, %586 : vector<1x16xf32>
    %c9_i32 = arith.constant 9 : i32
    %588 = vector.broadcast %c9_i32 : i32 to vector<1x16xi32>
    %589 = arith.cmpi eq, %568, %588 : vector<1x16xi32>
    %cst_238 = arith.constant 0.000000e+00 : f32
    %590 = vector.broadcast %255 : f32 to vector<1x16xf32>
    %591 = vector.broadcast %cst_238 : f32 to vector<1x16xf32>
    %592 = arith.select %589, %590, %591 : vector<1x16xi1>, vector<1x16xf32>
    %593 = arith.addf %587, %592 : vector<1x16xf32>
    %c2_i32_239 = arith.constant 2 : i32
    %594 = vector.broadcast %c2_i32_239 : i32 to vector<1x16xi32>
    %595 = arith.cmpi eq, %568, %594 : vector<1x16xi32>
    %cst_240 = arith.constant 0.000000e+00 : f32
    %596 = vector.broadcast %352 : f32 to vector<1x16xf32>
    %597 = vector.broadcast %cst_240 : f32 to vector<1x16xf32>
    %598 = arith.select %595, %596, %597 : vector<1x16xi1>, vector<1x16xf32>
    %599 = arith.addf %593, %598 : vector<1x16xf32>
    %c10_i32 = arith.constant 10 : i32
    %600 = vector.broadcast %c10_i32 : i32 to vector<1x16xi32>
    %601 = arith.cmpi eq, %568, %600 : vector<1x16xi32>
    %cst_241 = arith.constant 0.000000e+00 : f32
    %602 = vector.broadcast %359 : f32 to vector<1x16xf32>
    %603 = vector.broadcast %cst_241 : f32 to vector<1x16xf32>
    %604 = arith.select %601, %602, %603 : vector<1x16xi1>, vector<1x16xf32>
    %605 = arith.addf %599, %604 : vector<1x16xf32>
    %c3_i32 = arith.constant 3 : i32
    %606 = vector.broadcast %c3_i32 : i32 to vector<1x16xi32>
    %607 = arith.cmpi eq, %568, %606 : vector<1x16xi32>
    %cst_242 = arith.constant 0.000000e+00 : f32
    %608 = vector.broadcast %456 : f32 to vector<1x16xf32>
    %609 = vector.broadcast %cst_242 : f32 to vector<1x16xf32>
    %610 = arith.select %607, %608, %609 : vector<1x16xi1>, vector<1x16xf32>
    %611 = arith.addf %605, %610 : vector<1x16xf32>
    %c11_i32 = arith.constant 11 : i32
    %612 = vector.broadcast %c11_i32 : i32 to vector<1x16xi32>
    %613 = arith.cmpi eq, %568, %612 : vector<1x16xi32>
    %cst_243 = arith.constant 0.000000e+00 : f32
    %614 = vector.broadcast %463 : f32 to vector<1x16xf32>
    %615 = vector.broadcast %cst_243 : f32 to vector<1x16xf32>
    %616 = arith.select %613, %614, %615 : vector<1x16xi1>, vector<1x16xf32>
    %617 = arith.addf %611, %616 : vector<1x16xf32>
    %c4_i32_244 = arith.constant 4 : i32
    %618 = vector.broadcast %c4_i32_244 : i32 to vector<1x16xi32>
    %619 = arith.cmpi eq, %568, %618 : vector<1x16xi32>
    %cst_245 = arith.constant 0.000000e+00 : f32
    %620 = vector.broadcast %560 : f32 to vector<1x16xf32>
    %621 = vector.broadcast %cst_245 : f32 to vector<1x16xf32>
    %622 = arith.select %619, %620, %621 : vector<1x16xi1>, vector<1x16xf32>
    %623 = arith.addf %617, %622 : vector<1x16xf32>
    %c12_i32 = arith.constant 12 : i32
    %624 = vector.broadcast %c12_i32 : i32 to vector<1x16xi32>
    %625 = arith.cmpi eq, %568, %624 : vector<1x16xi32>
    %cst_246 = arith.constant 0.000000e+00 : f32
    %626 = vector.broadcast %567 : f32 to vector<1x16xf32>
    %627 = vector.broadcast %cst_246 : f32 to vector<1x16xf32>
    %628 = arith.select %625, %626, %627 : vector<1x16xi1>, vector<1x16xf32>
    %629 = arith.addf %623, %628 : vector<1x16xf32>
    %c0_247 = arith.constant 0 : index
    %c0_248 = arith.constant 0 : index
    %c0_249 = arith.constant 0 : index
    %630 = vector.load %arg3[%c0_247, %c0_248, %c0_249] : memref<1x1x16xf32, #tpu.memory_space<vmem>>, vector<1x1x16xf32>
    %631 = vector.shape_cast %630 : vector<1x1x16xf32> to vector<1x16xf32>
    %632 = vector.shape_cast %629 : vector<1x16xf32> to vector<1x1x16xf32>
    tpu.vector_store %arg3[%c0_247, %c0_248, %c0_249], %632 {strides = array<i32>} : memref<1x1x16xf32, #tpu.memory_space<vmem>>, vector<1x1x16xf32>,
    return
  }
  func.func @transform_0(%arg0: i32) -> (i32, i32, i32) {
    %c0_i32 = arith.constant 0 : i32
    %c0_i32_0 = arith.constant 0 : i32
    %c0_i32_1 = arith.constant 0 : i32
    return %arg0, %c0_i32, %c0_i32_0 : i32, i32, i32
  }
  func.func @transform_1(%arg0: i32) -> (i32, i32, i32) {
    %c0_i32 = arith.constant 0 : i32
    %c0_i32_0 = arith.constant 0 : i32
    %c0_i32_1 = arith.constant 0 : i32
    return %arg0, %c0_i32, %c0_i32_0 : i32, i32, i32
  }
  func.func @transform_2(%arg0: i32) -> (i32, i32, i32) {
    %c0_i32 = arith.constant 0 : i32
    %c0_i32_0 = arith.constant 0 : i32
    %c0_i32_1 = arith.constant 0 : i32
    return %arg0, %c0_i32, %c0_i32_0 : i32, i32, i32
  }
}

</mosaic_0001>

<bundles_post_ra>
// kernel: curl_loss.2
= control target key start
LH: loop header
LB: loop body
LE: loop exit
PB: predicated region body
PF: predicated region fallthrough
CT: control target
= control target key end

     0   :  { %s1526_s15 = smov 0   ;;  %s1923_s0 = inlined_call_operand.vmem [shape: f32[2,3,8,128], index: 0, kind: input, shape index: {}]   ;;  %s1924_s1 = inlined_call_operand.vmem [shape: f32[2,3,8,128], index: 1, kind: input, shape index: {}]   ;;  %s1925_s2 = inlined_call_operand.vmem [shape: f32[2,1,8], index: 2, kind: output, shape index: {0}]   ;;  %s1926_s3 = inlined_call_operand.vmem [shape: f32[2,8,128], index: 3, kind: output, shape index: {1}]   ;;  %s1927_s4 = inlined_call_operand.vmem [shape: f32[2,8,128], index: 4, kind: output, shape index: {2}]  }
   0x1 LB: > { %s1327_s16 = sadd.s32 4294967295, %s1492_s15   ;;  %p1331_p0 = scmp.ge.s32.totalorder %s1492_s15, 1  ;;  %s1492_s15 = sphi %s1526_s15, %s15_s15  }
   0x2   : > { %p177_p1 = scmp.lt.s32.totalorder %s1492_s15, 3 }
   0x4   : > { %p178_p2 = pnand %p1331_p0, %p177_p1 }
   0x5   : > { %p214_p3 = scmp.lt.s32.totalorder (!%p178_p2), %s1327_s16, 1 }
   0x6   : > { %181 = sbr.rel (%p178_p2) target bundleno = 429 (0x1ad), region = 28 }
   0xd   : > { %s1931_s16 = smov (!%p214_p3, %s1327_s16), 1 }
   0xe   : > { %s1366_s17 = smul.u32 24, %s1931_s16  ;;  %s1334_s24 = sshll.u32 %s1931_s16, 3 }
   0xf   : > { %s230_s27 = scalar_lea.vmem %s1926_s3, %s1334_s24  ;;  %s234_s30 = scalar_lea.vmem %s1927_s4, %s1334_s24 }
  0x10   : > { %s1540_s20 = scalar_lea.vmem %s1923_s0, %s1366_s17  ;;  %s1545_s23 = scalar_lea.vmem %s1924_s1, %s1366_s17 }
  0x11   : > { %v1548_v0 = vld [vmem:[%s1540_s20 + $0x8] sm:$0xff]  ;;  %v1557_v4 = vld [vmem:[%s1540_s20] sm:$0xff]  ;;  %v1569_v18 = vld [vmem:[%s1540_s20 + $0x10] sm:$0xff] }
  0x12   : > { %v1551_v1 = vld [vmem:[%s1545_s23 + $0x8] sm:$0xff]  ;;  %v1560_v5 = vld [vmem:[%s1545_s23] sm:$0xff]  ;;  %v259_v8 = vmax.f32 %v1548_v0, 0.0001  ;;  %v464_v12 = vmax.f32 %v1548_v0, 1e-09 }
  0x13   : > { %v369_v2 = vmax.f32 %v1551_v1, 0.0001  ;;  %v1058_v3 = vsub.f32 %v1548_v0, %v1551_v1  ;;  %v1044_v9 = vsub.f32 %v1557_v4, %v1560_v5  ;;  %v358_v13 = vmax.f32 %v1560_v5, 0.0001  ;;  %v1575_v21 = vld [vmem:[%s1545_s23 + $0x10] sm:$0xff] }
  0x14   : > { %v260_v11 = vadd.f32 0.055, %v259_v8  ;;  %v247_v17 = vmax.f32 %v1557_v4, 0.0001  ;;  %v1571_v19 = vmin.f32 %v464_v12, 1.0  ;;  %v1073_v25 = vsub.f32 %v1569_v18, %v1575_v21 }
  0x15   : > { %v370_v6 = vadd.f32 0.055, %v369_v2  ;;  %v1059_v7 = vand.u32 2147483647, %v1058_v3  ;;  %v1045_v15 = vand.u32 2147483647, %v1044_v9 }
  0x16   : > { %v261_v14 = vmul.f32 0.94786733, %v260_v11  ;;  %v359_v16 = vadd.f32 0.055, %v358_v13  ;;  %v462_v20 = vmax.f32 %v1557_v4, 1e-09 }
  0x17   : > { %v371_v10 = vmul.f32 0.94786733, %v370_v6  ;;  %1060 = vadd.xlane.f32.xlu0 %v1059_v7  ;;  %1046 = vadd.xlane.f32.xlu1 %v1045_v15  ;;  %v248_v23 = vadd.f32 0.055, %v247_v17  ;;  %v270_v24 = vmax.f32 %v1569_v18, 0.0001 }
  0x18   : > { %v360_v22 = vmul.f32 0.94786733, %v359_v16  ;;  %v1580_v26 = vmin.f32 %v462_v20, 1.0  ;;  %v380_v27 = vmax.f32 %v1575_v21, 0.0001 }
  0x19   : > { %1410 = vlog2.f32 %v371_v10  ;;  %v466_v28 = vmax.f32 %v1569_v18, 1e-09  ;;  %v521_v29 = vmax.f32 %v1551_v1, 1e-09  ;;  %v250_v30 = vmul.f32 0.94786733, %v248_v23 }
  0x1a   : > { %1412 = vlog2.f32 %v261_v14  ;;  %v271_v31 = vadd.f32 0.055, %v270_v24  ;;  %v519_v32 = vmax.f32 %v1560_v5, 1e-09  ;;  %v381_v33 = vadd.f32 0.055, %v380_v27 }
  0x1b   : > { %1414 = vlog2.f32 %v360_v22  ;;  %v1074_v34 = vand.u32 2147483647, %v1073_v25  ;;  %v468_v35 = vmax.f32 %v1580_v26, %v1571_v19  ;;  %v1588_v37 = vmin.f32 %v466_v28, 1.0 }
  0x1c   : > { %1416 = vlog2.f32 %v250_v30  ;;  %v272_v36 = vmul.f32 0.94786733, %v271_v31  ;;  %v382_v38 = vmul.f32 0.94786733, %v381_v33  ;;  %v1590_v40 = vmin.f32 %v521_v29, 1.0 }
  0x1d   : > { %1075 = vadd.xlane.f32.xlu1 %v1074_v34  ;;  %v1592_v41 = vmin.f32 %v519_v32, 1.0  ;;  %v523_v43 = vmax.f32 %v1575_v21, 1e-09  ;;  %v1596_v44 = vmax.f32 %v468_v35, %v1588_v37  ;;  %v470_v45 = vmin.f32 %v1580_v26, %v1571_v19 }
  0x1e   : > { %1418 = vlog2.f32 %v272_v36  ;;  %v368_v2 = vmul.f32 0.07739938, %v1551_v1  ;;  %vm377_vm0 = vcmp.le.f32.partialorder %v1551_v1, 0.04045  ;;  %v258_v11 = vmul.f32 0.07739938, %v1548_v0 }
  0x1f   : > { %1420 = vlog2.f32 %v382_v38  ;;  %v471_v49 = vmin.f32 %v470_v45, %v1588_v37  ;;  %v525_v50 = vmax.f32 %v1592_v41, %v1590_v40  ;;  %v1604_v54 = vmin.f32 %v523_v43, 1.0 }
  0x20   : > { %1422 = vrcp.f32 %v1596_v44  ;;  %v527_v57 = vmin.f32 %v1592_v41, %v1590_v40  ;;  %vm267_vm1 = vcmp.le.f32.partialorder %v1548_v0, 0.04045  ;;  %v357_v15 = vmul.f32 0.07739938, %v1560_v5 }
  0x21   : > { %v472_v55 = vsub.f32 %v1596_v44, %v471_v49  ;;  %v1611_v3 = vmax.f32 %v525_v50, %v1604_v54  ;;  %vm366_vm2 = vcmp.le.f32.partialorder %v1560_v5, 0.04045  ;;  %v246_v22 = vmul.f32 0.07739938, %v1557_v4 }
  0x22   : > { %v528_v6 = vmin.f32 %v527_v57, %v1604_v54  ;;  %vm503_vm3 = vcmp.ne.f32.partialorder %v1596_v44, 0.0  ;;  %vm256_vm4 = vcmp.le.f32.partialorder %v1557_v4, 0.04045  ;;  %v474_v25 = vsub.f32 %v1571_v19, %v1588_v37 }
  0x23   : > { %v1411_v39 = vpop.eup %1410  ;;  %v473_v60 = vadd.f32 1e-10, %v472_v55  ;;  %vm477_vm5 = vcmp.eq.f32.partialorder %v1580_v26, %v1596_v44  ;;  %vm484_vm6 = vcmp.eq.f32.partialorder %v1571_v19, %v1596_v44  ;;  %vm492_vm7 = vcmp.eq.f32.partialorder %v1588_v37, %v1596_v44 }
  0x24   : > { %v373_v42 = vmul.f32 0.6931472, %v1411_v39  ;;  %v1413_v46 = vpop.eup %1412  ;;  %v529_v17 = vsub.f32 %v1611_v3, %v528_v6  ;;  %vm511_vm8 = vcmp.ne.f32.partialorder %v1596_v44, %v1596_v44  ;;  %v269_v31 = vmul.f32 0.07739938, %v1569_v18 }
  0x25   : > { %v263_v48 = vmul.f32 0.6931472, %v1413_v46  ;;  %v1415_v51 = vpop.eup %1414  ;;  %vm278_vm9 = vcmp.le.f32.partialorder %v1569_v18, 0.04045  ;;  %v481_v32 = vsub.f32 %v1588_v37, %v1580_v26  ;;  %v489_v33 = vsub.f32 %v1580_v26, %v1571_v19 }
  0x26   : > { %v374_v47 = vmul.f32 2.4, %v373_v42  ;;  %v362_v56 = vmul.f32 0.6931472, %v1415_v51  ;;  %v1417_v58 = vpop.eup %1416  ;;  %v1635_v30 = vadd.f32 1e-10, %v529_v17  ;;  %vm534_vm12 = vcmp.eq.f32.partialorder %v1592_v41, %v1611_v3 }
  0x27   : > { %v264_v53 = vmul.f32 2.4, %v263_v48  ;;  %v252_v62 = vmul.f32 0.6931472, %v1417_v58  ;;  %v379_v36 = vmul.f32 0.07739938, %v1575_v21  ;;  %vm567_vm13 = vcmp.ne.f32.partialorder %v1611_v3, %v1611_v3 }
  0x28   : > { %v375_v52 = vmul.f32 1.442695, %v374_v47  ;;  %v363_v61 = vmul.f32 2.4, %v362_v56  ;;  %v1419_v63 = vpop.eup %1418  ;;  %vm388_vm10 = vcmp.le.f32.partialorder %v1575_v21, 0.04045  ;;  %vm541_vm14 = vcmp.eq.f32.partialorder %v1590_v40, %v1611_v3 }
  0x29   : > { %v265_v59 = vmul.f32 1.442695, %v264_v53  ;;  %v1421_v7 = vpop.eup %1420  ;;  %v253_v9 = vmul.f32 2.4, %v252_v62  ;;  %v274_v10 = vmul.f32 0.6931472, %v1419_v63  ;;  %vm549_vm15 = vcmp.eq.f32.partialorder %v1604_v54, %v1611_v3 }
  0x2a   : > { %1424 = vpow2.f32 %v375_v52  ;;  %v364_v8 = vmul.f32 1.442695, %v363_v61  ;;  %v384_v12 = vmul.f32 0.6931472, %v1421_v7  ;;  %v1423_v20 = vpop.eup %1422  ;;  %v1494_v38 = vmov 0.0  }
  0x2b   : > { %1426 = vpow2.f32 %v265_v59  ;;  %v254_v13 = vmul.f32 1.442695, %v253_v9  ;;  %v275_v14 = vmul.f32 2.4, %v274_v10  ;;  %v505_v27 = vmul.f32 %v1423_v20, %v473_v60 }
  0x2c   : > { %1428 = vrcp.f32 %v473_v60  ;;  %v385_v16 = vmul.f32 2.4, %v384_v12  ;;  %v1342_v39 = vsel %vm477_vm5, 1.0, %v1494_v38  ;;  %v1343_v45 = vsel %vm484_vm6, 1.0, %v1494_v38 }
  0x2d   : > { %1430 = vpow2.f32 %v364_v8  ;;  %v276_v23 = vmul.f32 1.442695, %v275_v14  ;;  %v1631_v29 = vsel %vm503_vm3, %v505_v27, 0.0  ;;  %v1344_v46 = vsel %vm492_vm7, 1.0, %v1494_v38 }
  0x2e   : > { %1432 = vpow2.f32 %v254_v13  ;;  %v386_v24 = vmul.f32 1.442695, %v385_v16  ;;  %v1665_v26 = vsel %vm511_vm8, 0.0, %v1596_v44  ;;  %vm509_vm11 = vcmp.ne.f32.partialorder %v1631_v29, %v1631_v29 }
  0x2f   : > { %1434 = vpow2.f32 %v276_v23 }
  0x30   : > { %1436 = vpow2.f32 %v386_v24 }
  0x31   : > { %1438 = vrcp.f32 %v1635_v30 }
  0x32   : > { %1440 = vrcp.f32 %v1611_v3 }
  0x34   : > { %v1425_v28 = vpop.eup %1424 }
  0x35   : > { %v1427_v34 = vpop.eup %1426  ;;  %v378_v35 = vsel %vm377_vm0, %v368_v2, %v1425_v28  ;;  %vm559_vm0 = vcmp.ne.f32.partialorder %v1611_v3, 0.0 }
  0x36   : > { %v1429_v42 = vpop.eup %1428  ;;  %v268_v43 = vsel %vm267_vm1, %v258_v11, %v1427_v34  ;;  %v396_v47 = vmul.f32 0.71516, %v378_v35  ;;  %v401_v49 = vmul.f32 0.119193, %v378_v35  ;;  %v391_v50 = vmul.f32 0.35758, %v378_v35 }
  0x37   : > { %v476_v48 = vmul.f32 %v1429_v42, %v474_v25  ;;  %v1431_v19 = vpop.eup %1430  ;;  %v482_v51 = vmul.f32 %v1429_v42, %v481_v32  ;;  %v490_v52 = vmul.f32 %v1429_v42, %v489_v33  ;;  %v286_v37 = vmul.f32 0.71516, %v268_v43 }
  0x38   : > { %v367_v53 = vsel %vm366_vm2, %v357_v15, %v1431_v19  ;;  %v291_v55 = vmul.f32 0.119193, %v268_v43  ;;  %v281_v56 = vmul.f32 0.35758, %v268_v43  ;;  %v1433_v44 = vpop.eup %1432  ;;  %v517_v33 = vmax.f32 %v1665_v26, 0.0 }
  0x39   : > { %v395_v57 = vmul.f32 0.212671, %v367_v53  ;;  %v400_v58 = vmul.f32 0.019334, %v367_v53  ;;  %v390_v59 = vmul.f32 0.412453, %v367_v53  ;;  %v257_v60 = vsel %vm256_vm4, %v246_v22, %v1433_v44  ;;  %v1435_v2 = vpop.eup %1434 }
  0x3a   : > { %v480_v61 = vmul.f32 %v1342_v39, %v476_v48  ;;  %v483_v62 = vadd.f32 2.0, %v482_v51  ;;  %v491_v63 = vadd.f32 4.0, %v490_v52  ;;  %v285_v6 = vmul.f32 0.212671, %v257_v60  ;;  %v1437_v10 = vpop.eup %1436 }
  0x3b   : > { %v397_v7 = vadd.f32 %v396_v47, %v395_v57  ;;  %v290_v8 = vmul.f32 0.019334, %v257_v60  ;;  %v402_v9 = vadd.f32 %v401_v49, %v400_v58  ;;  %v279_v11 = vsel %vm278_vm9, %v269_v31, %v1435_v2  ;;  %v1439_v31 = vpop.eup %1438 }
  0x3c   : > { %v280_v12 = vmul.f32 0.412453, %v257_v60  ;;  %v392_v13 = vadd.f32 %v391_v50, %v390_v59  ;;  %v487_v14 = vmul.f32 %v1343_v45, %v483_v62  ;;  %v287_v15 = vadd.f32 %v286_v37, %v285_v6  ;;  %v1441_v49 = vpop.eup %1440 }
  0x3d   : > { %v288_v16 = vmul.f32 0.072169, %v279_v11  ;;  %v389_v17 = vsel %vm388_vm10, %v379_v36, %v1437_v10  ;;  %v292_v20 = vadd.f32 %v291_v55, %v290_v8  ;;  %v293_v23 = vmul.f32 0.950227, %v279_v11 }
  0x3e   : > { %v398_v22 = vmul.f32 0.072169, %v389_v17  ;;  %v403_v24 = vmul.f32 0.950227, %v389_v17  ;;  %v282_v25 = vadd.f32 %v281_v56, %v280_v12  ;;  %v283_v28 = vmul.f32 0.180423, %v279_v11 }
  0x3f   : > { %v1679_v27 = vadd.f32 %v288_v16, %v287_v15  ;;  %v393_v32 = vmul.f32 0.180423, %v389_v17  ;;  %v294_v35 = vadd.f32 %v293_v23, %v292_v20  ;;  %v510_v36 = vsel %vm509_vm11, 0.0, %v1631_v29 }
  0x40   : > { %v1682_v34 = vadd.f32 %v398_v22, %v397_v7  ;;  %v404_v39 = vadd.f32 %v403_v24, %v402_v9  ;;  %v284_v43 = vadd.f32 %v283_v28, %v282_v25  ;;  %v531_v45 = vsub.f32 %v1590_v40, %v1604_v54 }
  0x41   : > { %v311_v42 = vmax.f32 %v1679_v27, 0.0001  ;;  %v394_v47 = vadd.f32 %v393_v32, %v392_v13  ;;  %v488_v48 = vadd.f32 %v487_v14, %v480_v61  ;;  %v495_v19 = vmul.f32 %v1344_v46, %v491_v63 }
  0x42   : > { %v419_v26 = vmax.f32 %v1682_v34, 0.0001  ;;  %v1694_v50 = vmul.f32 0.9184811, %v294_v35  ;;  %v1696_v51 = vmul.f32 0.9184811, %v404_v39  ;;  %v538_v46 = vsub.f32 %v1604_v54, %v1592_v41 }
  0x43   : > { %1442 = vlog2.f32 %v311_v42  ;;  %v515_v29 = vmax.f32 %v510_v36, 0.0  ;;  %v1698_v52 = vmul.f32 1.0521265, %v284_v43  ;;  %v1700_v37 = vmin.f32 %v517_v33, 1.0 }
  0x44   : > { %1444 = vlog2.f32 %v419_v26  ;;  %v321_v53 = vmax.f32 %v1694_v50, 0.0001  ;;  %v1705_v55 = vmul.f32 1.0521265, %v394_v47  ;;  %v429_v56 = vmax.f32 %v1696_v51, 0.0001 }
  0x45   : > { %v496_v44 = vadd.f32 %v495_v19, %v488_v48  ;;  %v546_v57 = vsub.f32 %v1592_v41, %v1590_v40  ;;  %v300_v58 = vmax.f32 %v1698_v52, 0.0001  ;;  %v516_v59 = vmin.f32 %v515_v29, 1.0 }
  0x46   : > { %1446 = vlog2.f32 %v321_v53  ;;  %v568_v60 = vsel %vm567_vm13, 0.0, %v1611_v3  ;;  %v533_v61 = vmul.f32 %v1439_v31, %v531_v45  ;;  %v1345_v62 = vsel %vm534_vm12, 1.0, %v1494_v38 }
  0x47   : > { %1448 = vlog2.f32 %v429_v56  ;;  %v409_v63 = vmax.f32 %v1705_v55, 0.0001  ;;  %v1346_v40 = vsel %vm541_vm14, 1.0, %v1494_v38  ;;  %v497_v54 = vmul.f32 60.0, %v496_v44 }
  0x48   : > { %1450 = vlog2.f32 %v300_v58  ;;  %v539_v2 = vmul.f32 %v1439_v31, %v538_v46  ;;  %v1347_v6 = vsel %vm549_vm15, 1.0, %v1494_v38  ;;  %v573_v7 = vmax.f32 %v568_v60, 0.0 }
  0x49   : > { %1452 = vlog2.f32 %v409_v63  ;;  %v547_v8 = vmul.f32 %v1439_v31, %v546_v57  ;;  %v561_v9 = vmul.f32 %v1441_v49, %v1635_v30  ;;  %v1728_v10 = vmul.f32 %v1700_v37, %v516_v59 }
  0x4a   : > { %vm498_vm1 = vcmp.lt.f32.partialorder %v497_v54, 0.0  ;;  %v499_v41 = vadd.f32 360.0, %v497_v54  ;;  %v537_v11 = vmul.f32 %v1345_v62, %v533_v61  ;;  %v540_v12 = vadd.f32 2.0, %v539_v2 }
  0x4b   : > { %v548_v14 = vadd.f32 4.0, %v547_v8  ;;  %v562_v15 = vsel %vm559_vm0, %v561_v9, 0.0  ;;  %v1730_v32 = vmin.f32 %v573_v7, 1.0  ;;  %v309_v31 = vmul.f32 7.787037, %v1679_v27 }
  0x4c   : > { %v500_v17 = vsel %vm498_vm1, %v499_v41, %v497_v54  ;;  %v544_v20 = vmul.f32 %v1346_v40, %v540_v12  ;;  %vm565_vm2 = vcmp.ne.f32.partialorder %v562_v15, %v562_v15  ;;  %v417_v35 = vmul.f32 7.787037, %v1682_v34 }
  0x4d   : > { %v1443_v13 = vpop.eup %1442  ;;  %v502_v22 = vmul.f32 0.0027777778, %v500_v17  ;;  %v552_v23 = vmul.f32 %v1347_v6, %v548_v14  ;;  %v566_v24 = vsel %vm565_vm2, 0.0, %v562_v15  ;;  %vm317_vm4 = vcmp.le.f32.partialorder %v1679_v27, 0.008856452 }
  0x4e   : > { %v1445_v3 = vpop.eup %1444  ;;  %v313_v16 = vmul.f32 0.6931472, %v1443_v13  ;;  %v545_v25 = vadd.f32 %v544_v20, %v537_v11  ;;  %v571_v28 = vmax.f32 %v566_v24, 0.0  ;;  %vm425_vm6 = vcmp.le.f32.partialorder %v1682_v34, 0.008856452 }
  0x4f   : > { %v421_v38 = vmul.f32 0.6931472, %v1445_v3  ;;  %vm507_vm3 = vcmp.ne.f32.partialorder %v502_v22, %v502_v22  ;;  %v310_v7 = vadd.f32 0.13793103, %v309_v31  ;;  %v319_v13 = vmul.f32 7.787037, %v1694_v50 }
  0x50   : > { %v314_v30 = vmul.f32 0.33333334, %v313_v16  ;;  %v1447_v33 = vpop.eup %1446  ;;  %v508_v45 = vsel %vm507_vm3, 0.0, %v502_v22  ;;  %v553_v26 = vadd.f32 %v552_v23, %v545_v25  ;;  %v572_v29 = vmin.f32 %v571_v28, 1.0 }
  0x51   : > { %v422_v39 = vmul.f32 0.33333334, %v421_v38  ;;  %v1449_v36 = vpop.eup %1448  ;;  %v323_v43 = vmul.f32 0.6931472, %v1447_v33  ;;  %v513_v49 = vmax.f32 %v508_v45, 0.0  ;;  %v1120_v45 = vsub.f32 %v1700_v37, %v1730_v32 }
  0x52   : > { %v315_v42 = vmul.f32 1.442695, %v314_v30  ;;  %v1451_v47 = vpop.eup %1450  ;;  %v431_v19 = vmul.f32 0.6931472, %v1449_v36  ;;  %v554_v56 = vmul.f32 60.0, %v553_v26  ;;  %v1736_v59 = vmul.f32 %v1730_v32, %v572_v29 }
  0x53   : > { %v423_v48 = vmul.f32 1.442695, %v422_v39  ;;  %v324_v53 = vmul.f32 0.33333334, %v323_v43  ;;  %v302_v46 = vmul.f32 0.6931472, %v1451_v47  ;;  %v1453_v44 = vpop.eup %1452 }
  0x54   : > { %1454 = vpow2.f32 %v315_v42  ;;  %v432_v57 = vmul.f32 0.33333334, %v431_v19  ;;  %v514_v58 = vmin.f32 %v513_v49, 1.0  ;;  %v411_v62 = vmul.f32 0.6931472, %v1453_v44 }
  0x55   : > { %1456 = vpow2.f32 %v423_v48  ;;  %v325_v60 = vmul.f32 1.442695, %v324_v53  ;;  %v304_v61 = vmul.f32 0.33333334, %v302_v46  ;;  %vm555_vm5 = vcmp.lt.f32.partialorder %v554_v56, 0.0 }
  0x56   : > { %v433_v63 = vmul.f32 1.442695, %v432_v57  ;;  %v556_v40 = vadd.f32 360.0, %v554_v56  ;;  %v1738_v54 = vmul.f32 6.2831855, %v514_v58 }
  0x57   : > { %1458 = vpow2.f32 %v325_v60  ;;  %v305_v2 = vmul.f32 1.442695, %v304_v61  ;;  %v412_v6 = vmul.f32 0.33333334, %v411_v62  ;;  %v427_v14 = vmul.f32 7.787037, %v1696_v51 }
  0x58   : > { %1460 = vpow2.f32 %v433_v63  ;;  %v557_v8 = vsel %vm555_vm5, %v556_v40, %v554_v56  ;;  %v578_v9 = vand.u32 2147483647, %v1738_v54  ;;  %v581_v12 = vand.u32 2139095040, %v1738_v54 }
  0x59   : > { %1462 = vpow2.f32 %v305_v2  ;;  %v413_v41 = vmul.f32 1.442695, %v412_v6  ;;  %v558_v11 = vmul.f32 0.0027777778, %v557_v8  ;;  %v418_v3 = vadd.f32 0.13793103, %v417_v35 }
  0x5a   : > { %v585_v15 = vand.u32 8388607, %v578_v9  ;;  %v582_v16 = vshrl.u32 %v581_v12, 23  ;;  %vm327_vm8 = vcmp.le.f32.partialorder %v1694_v50, 0.008856452 }
  0x5b   : > { %1464 = vpow2.f32 %v413_v41  ;;  %vm563_vm7 = vcmp.ne.f32.partialorder %v558_v11, %v558_v11  ;;  %v298_v17 = vmul.f32 7.787037, %v1698_v52  ;;  %vm435_vm9 = vcmp.le.f32.partialorder %v1696_v51, 0.008856452 }
  0x5c   : > { %v564_v20 = vsel %vm563_vm7, 0.0, %v558_v11  ;;  %v407_v22 = vmul.f32 7.787037, %v1705_v55  ;;  %v1348_v23 = vadd.s32 4294967169, %v582_v16  ;;  %v320_v25 = vadd.f32 0.13793103, %v319_v13 }
  0x5d   : > { %v428_v28 = vadd.f32 0.13793103, %v427_v14  ;;  %v586_v33 = vor.u32 8388608, %v585_v15  ;;  %v569_v39 = vmax.f32 %v564_v20, 0.0  ;;  %v299_v43 = vadd.f32 0.13793103, %v298_v17 }
  0x5e   : > { %v1455_v38 = vpop.eup %1454  ;;  %v588_v36 = vadd.s32 1, %v1348_v23  ;;  %vm307_vm10 = vcmp.le.f32.partialorder %v1698_v52, 0.008856452  ;;  %v408_v27 = vadd.f32 0.13793103, %v407_v22 }
  0x5f   : > { %v1457_v24 = vpop.eup %1456  ;;  %v318_v30 = vsel %vm317_vm4, %v310_v7, %v1455_v38  ;;  %vm415_vm11 = vcmp.le.f32.partialorder %v1705_v55, 0.008856452  ;;  %v1761_v29 = vshll.u32 %v586_v33, 8  ;;  %v1765_v57 = vmin.f32 %v569_v39, 1.0 }
  0x60   : > { %v329_v31 = vmul.f32 116.0, %v318_v30  ;;  %v426_v35 = vsel %vm425_vm6, %v418_v3, %v1457_v24  ;;  %vm589_vm12 = vcmp.gt.s32.totalorder %v588_v36, 0  ;;  %v1495_v17 = vmov 683565275  }
  0x61   : > { %v437_v42 = vmul.f32 116.0, %v426_v35  ;;  %v1459_v26 = vpop.eup %1458  ;;  %v590_v49 = vsel %vm589_vm12, %v588_v36, 0  ;;  %v1497_v36 = vmov 2131351028  }
  0x62   : > { %v1340_v47 = vadd.f32 -16.0, %v329_v31  ;;  %v1461_v48 = vpop.eup %1460  ;;  %v328_v34 = vsel %vm327_vm8, %v320_v25, %v1459_v26  ;;  %v1769_v62 = vand.u32 31, %v590_v49  ;;  %v1772_v2 = vshrl.u32 %v590_v49, 5 }
  0x63   : > { %v1341_v19 = vadd.f32 -16.0, %v437_v42  ;;  %v1463_v53 = vpop.eup %1462  ;;  %v340_v56 = vsub.f32 %v318_v30, %v328_v34  ;;  %v436_v44 = vsel %vm435_vm9, %v428_v28, %v1461_v48  ;;  %v1496_v25 = vmov 2475754826  }
  0x64   : > { %v332_v46 = vmul.f32 0.01, %v1340_v47  ;;  %v445_v60 = vsub.f32 %v426_v35, %v436_v44  ;;  %v308_v61 = vsel %vm307_vm10, %v299_v43, %v1463_v53  ;;  %v593_v15 = vsub.s32 32, %v1769_v62 }
  0x65   : > { %v439_v58 = vmul.f32 0.01, %v1341_v19  ;;  %v1465_v50 = vpop.eup %1464  ;;  %v341_v63 = vmul.f32 200.0, %v340_v56  ;;  %v333_v40 = vsub.f32 %v308_v61, %v318_v30  ;;  %v595_v20 = vshll.u32 %v1495_v17, %v1769_v62 }
  0x66   : > { %vm345_vm13 = vcmp.ne.f32.partialorder %v332_v46, %v332_v46  ;;  %v446_v51 = vmul.f32 200.0, %v445_v60  ;;  %v416_v7 = vsel %vm415_vm11, %v408_v27, %v1465_v50  ;;  %vm610_vm15 = vcmp.lt.s32.totalorder %v1772_v2, 1 }
  0x67   : > { %v346_v6 = vsel %vm345_vm13, 0.0, %v332_v46  ;;  %vm450_vm14 = vcmp.ne.f32.partialorder %v439_v58, %v439_v58  ;;  %v342_v11 = vmul.f32 0.009090909, %v341_v63  ;;  %v334_v52 = vmul.f32 500.0, %v333_v40 }
  0x68   : > { %v351_v8 = vmax.f32 %v346_v6, 0.0  ;;  %v451_v41 = vsel %vm450_vm14, 0.0, %v439_v58  ;;  %v447_v13 = vmul.f32 0.009090909, %v446_v51  ;;  %v440_v14 = vsub.f32 %v416_v7, %v426_v35 }
  0x69   : > { %v456_v12 = vmax.f32 %v451_v41, 0.0  ;;  %v343_v55 = vadd.f32 1.0, %v342_v11  ;;  %v336_v16 = vmul.f32 0.009090909, %v334_v52  ;;  %v596_v28 = vshrl.u32 %v1496_v25, %v593_v15 }
  0x6a   : > { %v352_v3 = vmin.f32 %v351_v8, 1.0  ;;  %v448_v22 = vadd.f32 1.0, %v447_v13  ;;  %v441_v23 = vmul.f32 500.0, %v440_v14  ;;  %v598_v33 = vshll.u32 %v1496_v25, %v1769_v62 }
  0x6b   : > { %v457_v38 = vmin.f32 %v456_v12, 1.0  ;;  %v344_v24 = vmul.f32 0.5, %v343_v55  ;;  %v337_v30 = vadd.f32 1.0, %v336_v16  ;;  %v599_v42 = vshrl.u32 %v1497_v36, %v593_v15 }
  0x6c   : > { %1204 = vst [vmem:[%s230_s27] sm:$0xff] %v352_v3  ;;  %v449_v35 = vmul.f32 0.5, %v448_v22  ;;  %v442_v39 = vmul.f32 0.009090909, %v441_v23  ;;  %v597_v26 = vor.u32 %v596_v28, %v595_v20  ;;  %v601_v47 = vshll.u32 %v1497_v36, %v1769_v62 }
  0x6d   : > { %v997_v31 = vsub.f32 %v352_v3, %v457_v38  ;;  %1205 = vst [vmem:[%s234_s30] sm:$0xff] %v457_v38  ;;  %vm349_vm0 = vcmp.ne.f32.partialorder %v344_v24, %v344_v24  ;;  %v339_v43 = vmul.f32 0.5, %v337_v30  ;;  %v600_v53 = vor.u32 %v599_v42, %v598_v33 }
  0x6e   : > { %v350_v48 = vsel %vm349_vm0, 0.0, %v344_v24  ;;  %vm454_vm1 = vcmp.ne.f32.partialorder %v449_v35, %v449_v35  ;;  %v443_v19 = vadd.f32 1.0, %v442_v39  ;;  %v1498_v58 = vmov 2102212464  }
  0x6f   : > { %v998_v27 = vand.u32 2147483647, %v997_v31  ;;  %v355_v34 = vmax.f32 %v350_v48, 0.0  ;;  %v455_v49 = vsel %vm454_vm1, 0.0, %v449_v35  ;;  %vm347_vm2 = vcmp.ne.f32.partialorder %v339_v43, %v339_v43 }
  0x70   : > { %v460_v46 = vmax.f32 %v455_v49, 0.0  ;;  %v348_v56 = vsel %vm347_vm2, 0.0, %v339_v43  ;;  %v444_v44 = vmul.f32 0.5, %v443_v19  ;;  %v602_v60 = vshrl.u32 %v1498_v58, %v593_v15 }
  0x71   : > { %999 = vadd.xlane.f32.xlu0 %v998_v27  ;;  %v356_v61 = vmin.f32 %v355_v34, 1.0  ;;  %v353_v50 = vmax.f32 %v348_v56, 0.0  ;;  %v604_v63 = vshll.u32 %v1498_v58, %v1769_v62  ;;  %v1499_v40 = vmov 920167782  }
  0x72   : > { %v605_v6 = vshrl.u32 %v1499_v40, %v593_v15  ;;  %v461_v51 = vmin.f32 %v460_v46, 1.0  ;;  %vm452_vm3 = vcmp.ne.f32.partialorder %v444_v44, %v444_v44  ;;  %v603_v7 = vor.u32 %v602_v60, %v601_v47 }
  0x73   : > { %v607_v8 = vshll.u32 %v1499_v40, %v1769_v62  ;;  %v453_v41 = vsel %vm452_vm3, 0.0, %v444_v44  ;;  %v594_v11 = vshrl.u32 %v1495_v17, %v593_v15  ;;  %v1500_v12 = vmov 1326507024  }
  0x74   : > { %v606_v52 = vor.u32 %v605_v6, %v604_v63  ;;  %v608_v13 = vshrl.u32 %v1500_v12, %v593_v15  ;;  %v1026_v14 = vsub.f32 %v356_v61, %v461_v51  ;;  %v354_v3 = vmin.f32 %v353_v50, 1.0 }
  0x75   : > { %v458_v55 = vmax.f32 %v453_v41, 0.0  ;;  %vm611_vm4 = vcmp.lt.s32.totalorder %v1772_v2, 2  ;;  %vm612_vm5 = vcmp.lt.s32.totalorder %v1772_v2, 3  ;;  %vm613_vm6 = vcmp.lt.s32.totalorder %v1772_v2, 4 }
  0x76   : > { %v609_v16 = vor.u32 %v608_v13, %v607_v8  ;;  %v618_v20 = vsel %vm610_vm15, %v597_v26, %v600_v53  ;;  %v1027_v62 = vand.u32 2147483647, %v1026_v14  ;;  %v615_v22 = vsel %vm613_vm6, %v603_v7, 2102212464 }
  0x77   : > { %v459_v38 = vmin.f32 %v458_v55, 1.0  ;;  %v622_v23 = vsel %vm610_vm15, %v600_v53, %v603_v7  ;;  %v1807_v15 = vmul.f32 6.2831855, %v1765_v57  ;;  %v614_v24 = vsel %vm610_vm15, %v594_v11, %v597_v26 }
  0x78   : > { %v619_v30 = vsel %vm613_vm6, %v606_v52, 920167782  ;;  %v623_v28 = vsel %vm613_vm6, %v609_v16, 1326507024  ;;  %1028 = vadd.xlane.f32.xlu1 %v1027_v62  ;;  %v616_v31 = vsel %vm612_vm5, %v600_v53, %v615_v22  ;;  %vm580_vm15 = vcmp.lt.s32.totalorder %v1738_v54, 0 }
  0x79   : > { %v1011_v33 = vsub.f32 %v354_v3, %v459_v38  ;;  %v620_v35 = vsel %vm612_vm5, %v603_v7, %v619_v30  ;;  %v624_v39 = vsel %vm612_vm5, %v606_v52, %v623_v28  ;;  %v617_v26 = vsel %vm611_vm4, %v614_v24, %v616_v31 }
  0x7a   : > { %v621_v42 = vsel %vm611_vm4, %v618_v20, %v620_v35  ;;  %v625_v43 = vsel %vm611_vm4, %v622_v23, %v624_v39  ;;  %v791_v34 = vand.u32 2139095040, %v1807_v15  ;;  %v633_v53 = vmul.u32 %v1761_v29, %v617_v26 }
  0x7b   : > { %v1012_v47 = vand.u32 2147483647, %v1011_v33  ;;  %v1816_v57 = vmul.u32.u64.low %v1761_v29, %v625_v43  ;;  %v1817_v27 = vmul.u32.u64.high %v1761_v29, %v625_v43, %v1816_v57  ;;  %v788_v61 = vand.u32 2147483647, %v1807_v15 }
  0x7c   : > { %v1822_v48 = vmul.u32.u64.low %v1761_v29, %v621_v42  ;;  %v1823_v19 = vmul.u32.u64.high %v1761_v29, %v621_v42, %v1822_v48  ;;  %v792_v49 = vshrl.u32 %v791_v34, 23  ;;  %vm1874_vm0 = vcmp.le.f32.partialorder %v578_v9, 0.7853982 }
  0x7d   : > { %1013 = vadd.xlane.f32.xlu0 %v1012_v47  ;;  %v795_v29 = vand.u32 8388607, %v788_v61  ;;  %vm790_vm6 = vcmp.lt.s32.totalorder %v1807_v15, 0 }
  0x7e   : > { %vm635_vm7 = vc.u32 %v1817_v27, %v1822_v48  ;;  %v636_v46 = vadd.s32 1, %v1823_v19  ;;  %v1356_v56 = vadd.s32 4294967169, %v792_v49 }
  0x7f   : > { %v796_v23 = vor.u32 8388608, %v795_v29 }
  0x80   : > { %v637_v2 = vsel %vm635_vm7, %v636_v46, %v1823_v19  ;;  %v798_v44 = vadd.s32 1, %v1356_v56  ;;  %vm789_vm7 = vcmp.le.f32.partialorder %v788_v61, 0.7853982 }
  0x81   : > { %v638_v60 = vadd.s32 %v637_v2, %v633_v53  ;;  %v836_v43 = vshll.u32 %v796_v23, 8  ;;  %v1146_v23 = vmul.f32 %v1569_v18, %v1569_v18 }
  0x82   : > { %vm799_vm8 = vcmp.gt.s32.totalorder %v798_v44, 0 }
  0x83   : > { %v639_v50 = vadd.s32 536870912, %v638_v60  ;;  %v800_v63 = vsel %vm799_vm8, %v798_v44, 0  ;;  %v634_v44 = vadd.s32 %v1822_v48, %v1817_v27  ;;  %v1144_v27 = vmul.f32 %v1548_v0, %v1548_v0 }
  0x84   : > { %v802_v6 = vand.u32 31, %v800_v63  ;;  %v801_v52 = vshrl.u32 %v800_v63, 5  ;;  %v1143_v48 = vmul.f32 %v1557_v4, %v1557_v4  ;;  %v1158_v4 = vmul.f32 %v1575_v21, %v1575_v21 }
  0x85   : > { %v1833_v51 = vshrl.u32 %v639_v50, 30 }
  0x86   : > { %v803_v7 = vsub.s32 32, %v802_v6  ;;  %v805_v8 = vshll.u32 %v1495_v17, %v802_v6  ;;  %v808_v41 = vshll.u32 %v1496_v25, %v802_v6  ;;  %v811_v13 = vshll.u32 %v1497_v36, %v802_v6 }
  0x87   : > { %v641_v11 = vshll.u32 %v1833_v51, 30  ;;  %v814_v14 = vshll.u32 %v1498_v58, %v802_v6  ;;  %v817_v20 = vshll.u32 %v1499_v40, %v802_v6  ;;  %vm820_vm9 = vcmp.lt.s32.totalorder %v801_v52, 1 }
  0x88   : > { %v806_v3 = vshrl.u32 %v1496_v25, %v803_v7  ;;  %v809_v55 = vshrl.u32 %v1497_v36, %v803_v7  ;;  %v812_v16 = vshrl.u32 %v1498_v58, %v803_v7  ;;  %v815_v38 = vshrl.u32 %v1499_v40, %v803_v7 }
  0x89   : > { %v642_v62 = vsub.s32 %v638_v60, %v641_v11  ;;  %v818_v22 = vshrl.u32 %v1500_v12, %v803_v7  ;;  %v804_v33 = vshrl.u32 %v1495_v17, %v803_v7  ;;  %vm823_vm10 = vcmp.lt.s32.totalorder %v801_v52, 4 }
  0x8a   : > { %v807_v24 = vor.u32 %v806_v3, %v805_v8  ;;  %v810_v30 = vor.u32 %v809_v55, %v808_v41  ;;  %v813_v31 = vor.u32 %v812_v16, %v811_v13  ;;  %v816_v35 = vor.u32 %v815_v38, %v814_v14 }
  0x8b   : > { %v644_v28 = vsub.s32 0, %v642_v62  ;;  %v819_v39 = vor.u32 %v818_v22, %v817_v20  ;;  %vm822_vm11 = vcmp.lt.s32.totalorder %v801_v52, 3  ;;  %vm821_vm12 = vcmp.lt.s32.totalorder %v801_v52, 2 }
  0x8c   : > { %v825_v36 = vsel %vm823_vm10, %v813_v31, 2102212464  ;;  %v828_v58 = vsel %vm820_vm9, %v807_v24, %v810_v30  ;;  %v829_v42 = vsel %vm823_vm10, %v816_v35, 920167782  ;;  %v824_v12 = vsel %vm820_vm9, %v804_v33, %v807_v24 }
  0x8d   : > { %v1349_v25 = vmin.u32 %v644_v28, %v642_v62  ;;  %v826_v47 = vsel %vm822_vm11, %v810_v30, %v825_v36  ;;  %v832_v57 = vsel %vm820_vm9, %v810_v30, %v813_v31  ;;  %v830_v26 = vsel %vm822_vm11, %v813_v31, %v829_v42 }
  0x8e   : > { %v833_v19 = vsel %vm823_vm10, %v819_v39, 1326507024  ;;  %v831_v17 = vsel %vm821_vm12, %v828_v58, %v830_v26  ;;  %v827_v53 = vsel %vm821_vm12, %v824_v12, %v826_v47  ;;  %v1156_v55 = vmul.f32 %v1551_v1, %v1551_v1 }
  0x8f   : > { %v646_v40 = vclz %v1349_v25  ;;  %v834_v49 = vsel %vm822_vm11, %v816_v35, %v833_v19  ;;  %v1848_v56 = vmul.u32.u64.low %v836_v43, %v831_v17  ;;  %v1849_v2 = vmul.u32.u64.high %v836_v43, %v831_v17, %v1848_v56 }
  0x90   : > { %v835_v46 = vsel %vm821_vm12, %v832_v57, %v834_v49  ;;  %v843_v7 = vmul.u32 %v836_v43, %v827_v53  ;;  %v1155_v16 = vmul.f32 %v1560_v5, %v1560_v5  ;;  %v1145_v22 = vadd.f32 %v1144_v27, %v1143_v48 }
  0x91   : > { %v1350_v34 = vadd.s32 4294967294, %v646_v40  ;;  %v1853_v60 = vmul.u32.u64.low %v836_v43, %v835_v46  ;;  %v1854_v50 = vmul.u32.u64.high %v836_v43, %v835_v46, %v1853_v60  ;;  %v846_v8 = vadd.s32 1, %v1849_v2 }
  0x92   : > { %v1157_v0 = vadd.f32 %v1156_v55, %v1155_v16  ;;  %v1147_v31 = vadd.f32 %v1146_v23, %v1145_v22  ;;  %v664_v26 = vsub.s32 4, %v1833_v51 }
  0x93   : > { %vm1351_vm13 = vcmp.lt.s32.totalorder %v1350_v34, 0  ;;  %vm845_vm14 = vc.u32 %v1854_v50, %v1848_v56  ;;  %v844_v43 = vadd.s32 %v1848_v56, %v1854_v50 }
  0x94   : > { %v649_v63 = vsel %vm1351_vm13, 0, %v1350_v34  ;;  %v847_v13 = vsel %vm845_vm14, %v846_v8, %v1849_v2  ;;  %v1159_v35 = vadd.f32 %v1158_v4, %v1157_v0  ;;  %1466 = vrsqrt.f32 %v1147_v31 }
  0x95   : > { %v650_v6 = vsub.s32 32, %v649_v63  ;;  %v654_v29 = vsub.s32 4294967266, %v649_v63  ;;  %v651_v41 = vshll.u32 %v642_v62, %v649_v63  ;;  %v848_v3 = vadd.s32 %v847_v13, %v843_v7 }
  0x96   : > { %1468 = vrsqrt.f32 %v1159_v35  ;;  %v665_v56 = vsel %vm580_vm15, %v664_v26, %v1833_v51  ;;  %vm1150_vm2 = vcmp.eq.f32.partialorder %v1147_v31, inf  ;;  %vm1162_vm3 = vcmp.eq.f32.partialorder %v1159_v35, inf }
  0x97   : > { %v652_v11 = vshrl.u32 %v634_v44, %v650_v6  ;;  %v655_v52 = vadd.s32 127, %v654_v29  ;;  %v849_v38 = vadd.s32 536870912, %v848_v3  ;;  %v667_v6 = vsel %vm1874_vm0, 0, %v665_v56  ;;  %v1485_v56 = vld [vmem:[%s1545_s23 + $0x10] sm:$0xff] }
  0x98   : > { %vm1152_vm4 = vcmp.eq.f32.partialorder %v1147_v31, 0.0  ;;  %v1153_v7 = vand.u32 2147483648, %v1147_v31  ;;  %vm1164_vm5 = vcmp.eq.f32.partialorder %v1159_v35, 0.0  ;;  %v1165_v8 = vand.u32 2147483648, %v1159_v35 }
  0x99   : > { %v656_v14 = vshll.u32 %v655_v52, 23  ;;  %v653_v20 = vor.u32 %v652_v11, %v651_v41  ;;  %v850_v24 = vshrl.u32 %v849_v38, 30  ;;  %v775_v52 = vadd.s32 3, %v667_v6 }
  0x9a   : > { %v671_v22 = vand.u32 3, %v667_v6  ;;  %vm670_vm14 = vweird.f32 %v1738_v54 }
  0x9b   : > { %v657_v62 = vor.u32 4788187, %v656_v14  ;;  %v660_v28 = vcvt.s32.f32 %v653_v20  ;;  %v851_v33 = vshll.u32 %v850_v24, 30  ;;  %v874_v63 = vsub.s32 4, %v850_v24 }
  0x9c   : > { %vm673_vm10 = vcmp.eq.s32.totalorder %v671_v22, 0  ;;  %vm676_vm11 = vcmp.eq.s32.totalorder %v671_v22, 2  ;;  %vm672_vm13 = vcmp.lt.s32.totalorder %v671_v22, 2 }
  0x9d   : > { %v658_v30 = vand.u32 2147483647, %v657_v62  ;;  %v852_v1 = vsub.s32 %v848_v3, %v851_v33  ;;  %v875_v13 = vsel %vm790_vm6, %v874_v63, %v850_v24  ;;  %v776_v62 = vand.u32 3, %v775_v52 }
  0x9e   : > { %v1467_v9 = vpop.eup %1466  ;;  %v877_v16 = vsel %vm789_vm7, 0, %v875_v13 }
  0x9f   : > { %v661_v39 = vmul.f32 %v660_v28, %v658_v30  ;;  %v854_v5 = vsub.s32 0, %v852_v1  ;;  %v1149_v60 = vmul.f32 %v1467_v9, %v1147_v31  ;;  %v985_v4 = vadd.s32 3, %v877_v16 }
  0xa0   : > { %v1469_v49 = vpop.eup %1468  ;;  %vm778_vm8 = vcmp.eq.s32.totalorder %v776_v62, 0  ;;  %vm781_vm9 = vcmp.eq.s32.totalorder %v776_v62, 2  ;;  %vm777_vm12 = vcmp.lt.s32.totalorder %v776_v62, 2  ;;  %v881_v33 = vand.u32 3, %v877_v16 }
  0xa1   : > { %v1357_v25 = vmin.u32 %v854_v5, %v852_v1  ;;  %v662_v36 = vxor.u32 2147483648, %v661_v39  ;;  %v1161_v50 = vmul.f32 %v1469_v49, %v1159_v35  ;;  %v1151_v51 = vsel %vm1150_vm2, %v1147_v31, %v1149_v60 }
  0xa2   : > { %v1154_v48 = vsel %vm1152_vm4, %v1153_v7, %v1151_v51  ;;  %v986_v28 = vand.u32 3, %v985_v4  ;;  %vm882_vm2 = vcmp.lt.s32.totalorder %v881_v33, 2 }
  0xa3   : > { %v856_v58 = vclz %v1357_v25  ;;  %v663_v42 = vsel %vm580_vm15, %v662_v36, %v661_v39  ;;  %v1163_v11 = vsel %vm1162_vm3, %v1159_v35, %v1161_v50  ;;  %v1167_v23 = vmax.f32 %v1154_v48, 1e-08  ;;  %v1480_v36 = vld [vmem:[%s1540_s20] sm:$0xff] }
  0xa4   : > { %v666_v19 = vsel %vm1874_vm0, %v1738_v54, %v663_v42  ;;  %v1166_v14 = vsel %vm1164_vm5, %v1165_v8, %v1163_v11  ;;  %vm991_vm15 = vcmp.eq.s32.totalorder %v986_v28, 2  ;;  %vm886_vm0 = vcmp.eq.s32.totalorder %v881_v33, 2  ;;  %v1482_v42 = vld [vmem:[%s1540_s20 + $0x8] sm:$0xff]  ;;  %v1047_v48 = vpop.xlane.xlu1 %1046 }
  0xa5   : > { %v1358_v18 = vadd.s32 4294967294, %v856_v58  ;;  %1470 = vcosq.f32 %v666_v19  ;;  %v1168_v0 = vmax.f32 %v1166_v14, 1e-08  ;;  %v1481_v58 = vld [vmem:[%s1545_s23] sm:$0xff]  ;;  %vm883_vm3 = vcmp.eq.s32.totalorder %v881_v33, 0 }
  0xa6   : > { %1472 = vsinq.f32 %v666_v19  ;;  %vm987_vm4 = vcmp.lt.s32.totalorder %v986_v28, 2  ;;  %vm880_vm5 = vweird.f32 %v1807_v15 }
  0xa7   : > { %vm1359_vm1 = vcmp.lt.s32.totalorder %v1358_v18, 0  ;;  %v1169_v61 = vmul.f32 %v1168_v0, %v1167_v23 }
  0xa8   : > { %v859_v40 = vsel %vm1359_vm1, 0, %v1358_v18  ;;  %v1138_v18 = vmul.f32 %v1481_v58, %v1480_v36  ;;  %vm988_vm1 = vcmp.eq.s32.totalorder %v986_v28, 0 }
  0xa9   : > { %v860_v12 = vsub.s32 32, %v859_v40  ;;  %v861_v47 = vshll.u32 %v852_v1, %v859_v40  ;;  %v864_v57 = vsub.s32 4294967266, %v859_v40 }
  0xab   : > { %v862_v34 = vshrl.u32 %v844_v43, %v860_v12  ;;  %v865_v17 = vadd.s32 127, %v864_v57  ;;  %v1483_v43 = vld [vmem:[%s1545_s23 + $0x8] sm:$0xff] }
  0xac   : > { %v1139_v40 = vmul.f32 %v1483_v43, %v1482_v42 }
  0xad   : > { %v863_v53 = vor.u32 %v862_v34, %v861_v47  ;;  %v866_v46 = vshll.u32 %v865_v17, 23 }
  0xaf   : > { %v867_v2 = vor.u32 4788187, %v866_v46  ;;  %v870_v44 = vcvt.s32.f32 %v863_v53  ;;  %v1471_v3 = vpop.eup %1470  ;;  %v1140_v53 = vadd.f32 %v1139_v40, %v1138_v18  ;;  %v1484_v46 = vld [vmem:[%s1540_s20 + $0x10] sm:$0xff] }
  0xb0   : > { %v1473_v20 = vpop.eup %1472  ;;  %v677_v30 = vxor.u32 2147483648, %v1471_v3 }
  0xb1   : > { %v868_v29 = vand.u32 2147483647, %v867_v2  ;;  %v674_v24 = vxor.u32 2147483648, %v1473_v20  ;;  %v1141_v2 = vmul.f32 %v1485_v56, %v1484_v46 }
  0xb2   : > { %v783_v1 = vsel %vm781_vm9, %v677_v30, %v1473_v20  ;;  %v678_v39 = vsel %vm676_vm11, %v677_v30, %v1473_v20 }
  0xb3   : > { %v871_v41 = vmul.f32 %v870_v44, %v868_v29  ;;  %v780_v31 = vsel %vm778_vm8, %v1471_v3, %v674_v24  ;;  %v675_v35 = vsel %vm673_vm10, %v1471_v3, %v674_v24  ;;  %vm1202_vm10 = vcmask 57344  }
  0xb4   : > { %v784_v5 = vsel %vm777_vm12, %v780_v31, %v783_v1  ;;  %v679_v25 = vsel %vm672_vm13, %v675_v35, %v678_v39 }
  0xb5   : > { %v872_v27 = vxor.u32 2147483648, %v871_v41  ;;  %v785_v57 = vsel %vm670_vm14, nan, %v784_v5  ;;  %v680_v19 = vsel %vm670_vm14, nan, %v679_v25 }
  0xb6   : > { %v786_v44 = vmul.f32 %v785_v57, %v1728_v10  ;;  %v681_v50 = vmul.f32 %v680_v19, %v1728_v10  ;;  %v1121_v10 = vand.u32 2147483647, %v1120_v45 }
  0xb7   : > { %v873_v55 = vsel %vm790_vm6, %v872_v27, %v871_v41  ;;  %v1142_v41 = vadd.f32 %v1141_v2, %v1140_v53  ;;  %v1061_v27 = vpop.xlane.xlu0 %1060 }
  0xb8   : > { %v876_v38 = vsel %vm789_vm7, %v1807_v15, %v873_v55  ;;  %v1048_v55 = vrot.slane %v1047_v48, 4  ;;  %v1062_v20 = vrot.slane %v1061_v27, 4 }
  0xb9   : > { %1474 = vcosq.f32 %v876_v38 }
  0xba   : > { %1476 = vsinq.f32 %v876_v38  ;;  %v1049_v22 = vadd.f32 %v1048_v55, %v1047_v48  ;;  %v1063_v0 = vadd.f32 %v1062_v20, %v1061_v27 }
  0xbb   : > { %1478 = vrcp.f32 %v1169_v61 }
  0xbc   : > { %v1050_v32 = vrot.slane %v1049_v22, 2  ;;  %v1064_v28 = vrot.slane %v1063_v0, 2 }
  0xbe   : > { %v1051_v25 = vadd.f32 %v1050_v32, %v1049_v22  ;;  %v1065_v36 = vadd.f32 %v1064_v28, %v1063_v0 }
  0xc0   : > { %v1052_v43 = vrot.slane %v1051_v25, 1  ;;  %v1066_v40 = vrot.slane %v1065_v36, 1 }
  0xc2   : > { %v1053_v19 = vadd.f32 %v1052_v43, %v1051_v25 }
  0xc3   : > { %v1475_v21 = vpop.eup %1474 }
  0xc4   : > { %v1477_v12 = vpop.eup %1476  ;;  %v887_v47 = vxor.u32 2147483648, %v1475_v21 }
  0xc5   : > { %v884_v26 = vxor.u32 2147483648, %v1477_v12  ;;  %v1479_v51 = vpop.eup %1478 }
  0xc6   : > { %v993_v9 = vsel %vm991_vm15, %v887_v47, %v1477_v12  ;;  %v888_v34 = vsel %vm886_vm0, %v887_v47, %v1477_v12  ;;  %v1171_v13 = vmul.f32 %v1479_v51, %v1142_v41 }
  0xc7   : > { %v990_v17 = vsel %vm988_vm1, %v1475_v21, %v884_v26  ;;  %v885_v49 = vsel %vm883_vm3, %v1475_v21, %v884_v26 }
  0xc8   : > { %v994_v60 = vsel %vm987_vm4, %v990_v17, %v993_v9  ;;  %v889_v54 = vsel %vm882_vm2, %v885_v49, %v888_v34  ;;  %v1067_v9 = vadd.f32 %v1066_v40, %v1065_v36 }
  0xc9   : > { %v995_v63 = vsel %vm880_vm5, nan, %v994_v60  ;;  %v890_v6 = vsel %vm880_vm5, nan, %v889_v54 }
  0xca   : > { %v996_v15 = vmul.f32 %v995_v63, %v1736_v59  ;;  %v891_v29 = vmul.f32 %v890_v6, %v1736_v59  ;;  %v1076_v59 = vpop.xlane.xlu1 %1075 }
  0xcb   : > { %v1077_v62 = vrot.slane %v1076_v59, 4 }
  0xcc   : > { %v1105_v7 = vsub.f32 %v786_v44, %v996_v15  ;;  %v1091_v8 = vsub.f32 %v681_v50, %v891_v29 }
  0xcd   : > { %v1078_v24 = vadd.f32 %v1077_v62, %v1076_v59 }
  0xce   : > { %v1106_v11 = vand.u32 2147483647, %v1105_v7  ;;  %v1092_v52 = vand.u32 2147483647, %v1091_v8 }
  0xcf   : > { %v1079_v31 = vrot.slane %v1078_v24, 2 }
  0xd0   : > { %1107 = vadd.xlane.f32.xlu1 %v1106_v11  ;;  %1093 = vadd.xlane.f32.xlu0 %v1092_v52 }
  0xd1   : > { %v1080_v18 = vadd.f32 %v1079_v31, %v1078_v24 }
  0xd3   : > { %v1081_v47 = vrot.slane %v1080_v18, 1 }
  0xd4   : > { %1172 = vadd.xlane.f32.xlu1 %v1171_v13  ;;  %1122 = vadd.xlane.f32.xlu0 %v1121_v10 }
  0xd5   : > { %v1082_v34 = vadd.f32 %v1081_v47, %v1080_v18 }
  0xfe   : > { %v1000_v14 = vpop.xlane.xlu0 %999 }
  0xff   : > { %v1001_v3 = vrot.slane %v1000_v14, 4 }
 0x101   : > { %v1002_v16 = vadd.f32 %v1001_v3, %v1000_v14 }
 0x103   : > { %v1003_v38 = vrot.slane %v1002_v16, 2 }
 0x105   : > { %v1004_v23 = vadd.f32 %v1003_v38, %v1002_v16  ;;  %v1029_v4 = vpop.xlane.xlu1 %1028  ;;  %v1185_v16 = vlaneseq }
 0x106   : > { %v1030_v30 = vrot.slane %v1029_v4, 4 }
 0x107   : > { %v1005_v37 = vrot.slane %v1004_v23, 1  ;;  %v1186_v20 = vand.u32 127, %v1185_v16 }
 0x108   : > { %v1031_v45 = vadd.f32 %v1030_v30, %v1029_v4 }
 0x109   : > { %v1006_v61 = vadd.f32 %v1005_v37, %v1004_v23  ;;  %vm1187_vm6 = vcmp.eq.s32.totalorder %v1186_v20, 0  ;;  %vm1190_vm7 = vcmp.eq.s32.totalorder %v1186_v20, 1  ;;  %vm1194_vm8 = vcmp.eq.s32.totalorder %v1186_v20, 2 }
 0x10a   : > { %v1014_v33 = vpop.xlane.xlu0 %1013  ;;  %v1032_v1 = vrot.slane %v1031_v45, 2  ;;  %vm1198_vm9 = vcmp.eq.s32.totalorder %v1186_v20, 3 }
 0x10b   : > { %v1015_v35 = vrot.slane %v1014_v33, 4  ;;  %1375 = vpush %v1006_v61 }
 0x10c   : > { %v1033_v5 = vadd.f32 %v1032_v1, %v1031_v45 }
 0x10d   : > { %v1016_v39 = vadd.f32 %v1015_v35, %v1014_v33 }
 0x10e   : > { %v1034_v21 = vrot.slane %v1033_v5, 1 }
 0x10f   : > { %v1017_v58 = vrot.slane %v1016_v39, 2 }
 0x110   : > { %v1035_v57 = vadd.f32 %v1034_v21, %v1033_v5 }
 0x111   : > { %v1018_v42 = vadd.f32 %v1017_v58, %v1016_v39 }
 0x113   : > { %v1019_v12 = vrot.slane %v1018_v42, 1 }
 0x115   : > { %v1020_v26 = vadd.f32 %v1019_v12, %v1018_v42 }
 0x117   : > { %1377 = vpush %v1020_v26 }
 0x118   : > { %1379 = vpush %v1035_v57 }
 0x119   : > { %1381 = vpush %v1053_v19 }
 0x11a   : > { %1383 = vpush %v1067_v9 }
 0x11b   : > { %1385 = vpush %v1082_v34 }
 0x13c   : > { %s1376_s5 = spop %1375 }
 0x13d   : > { %s1010_s9 = smul.f32 0.0009765625, %s1376_s5 }
 0x148   : > { %s1378_s6 = spop %1377 }
 0x149   : > { %s1380_s7 = spop %1379  ;;  %s1024_s11 = smul.f32 0.0009765625, %s1378_s6 }
 0x14a   : > { %s1382_s8 = spop %1381  ;;  %s1039_s18 = smul.f32 0.0009765625, %s1380_s7 }
 0x14b   : > { %s1384_s10 = spop %1383  ;;  %s1057_s12 = smul.f32 0.0009765625, %s1382_s8 }
 0x14c   : > { %s1071_s13 = smul.f32 0.0009765625, %s1384_s10  ;;  %s1386_s14 = spop %1385 }
 0x14d   : > { %s1025_s17 = sadd.f32 %s1024_s11, %s1010_s9  ;;  %s1086_s20 = smul.f32 0.0009765625, %s1386_s14 }
 0x14e   : > { %s1072_s19 = sadd.f32 %s1071_s13, %s1057_s12  ;;  %s226_s13 = scalar_lea.vmem %s1925_s2, %s1931_s16 }
 0x14f   : > { %s1040_s21 = sadd.f32 %s1039_s18, %s1025_s17 }
 0x150   : > { %s1087_s22 = sadd.f32 %s1086_s20, %s1072_s19 }
 0x151   : > { %s1043_s23 = smul.f32 0.33333334, %s1040_s21 }
 0x152   : > { %s1090_s24 = smul.f32 0.33333334, %s1087_s22 }
 0x153   : > { %v1188_v62 = vstv %s1043_s23 }
 0x154   : > { %v1191_v38 = vstv %s1090_s24  ;;  %v1189_v22 = vsel %vm1187_vm6, %v1188_v62, 0.0 }
 0x155   : > { %v1192_v23 = vsel %vm1190_vm7, %v1191_v38, 0.0 }
 0x156   : > { %v1193_v0 = vadd.f32 %v1192_v23, %v1189_v22 }
 0x15d   : > { %v1108_v17 = vpop.xlane.xlu1 %1107  ;;  %v1094_v49 = vpop.xlane.xlu0 %1093 }
 0x15e   : > { %v1109_v53 = vrot.slane %v1108_v17, 4  ;;  %v1095_v46 = vrot.slane %v1094_v49, 4 }
 0x160   : > { %v1110_v56 = vadd.f32 %v1109_v53, %v1108_v17  ;;  %v1096_v2 = vadd.f32 %v1095_v46, %v1094_v49 }
 0x161   : > { %v1173_v44 = vpop.xlane.xlu1 %1172  ;;  %v1123_v60 = vpop.xlane.xlu0 %1122 }
 0x162   : > { %v1111_v50 = vrot.slane %v1110_v56, 2  ;;  %v1097_v54 = vrot.slane %v1096_v2, 2  ;;  %v1174_v63 = vrot.slane %v1173_v44, 4  ;;  %v1124_v6 = vrot.slane %v1123_v60, 4 }
 0x164   : > { %v1175_v15 = vadd.f32 %v1174_v63, %v1173_v44  ;;  %v1125_v29 = vadd.f32 %v1124_v6, %v1123_v60  ;;  %v1098_v7 = vadd.f32 %v1097_v54, %v1096_v2  ;;  %v1112_v8 = vadd.f32 %v1111_v50, %v1110_v56 }
 0x166   : > { %v1176_v41 = vrot.slane %v1175_v15, 2  ;;  %v1126_v51 = vrot.slane %v1125_v29, 2  ;;  %v1099_v11 = vrot.slane %v1098_v7, 1  ;;  %v1113_v52 = vrot.slane %v1112_v8, 1 }
 0x168   : > { %v1177_v13 = vadd.f32 %v1176_v41, %v1175_v15  ;;  %v1127_v10 = vadd.f32 %v1126_v51, %v1125_v29  ;;  %v1100_v27 = vadd.f32 %v1099_v11, %v1098_v7  ;;  %v1114_v48 = vadd.f32 %v1113_v52, %v1112_v8 }
 0x16a   : > { %1387 = vpush %v1100_v27  ;;  %v1128_v14 = vrot.slane %v1127_v10, 1  ;;  %v1178_v3 = vrot.slane %v1177_v13, 1 }
 0x16b   : > { %1389 = vpush %v1114_v48 }
 0x16c   : > { %v1129_v59 = vadd.f32 %v1128_v14, %v1127_v10  ;;  %v1179_v55 = vadd.f32 %v1178_v3, %v1177_v13 }
 0x16e   : > { %1391 = vpush %v1129_v59 }
 0x16f   : > { %1393 = vpush %v1179_v55 }
 0x19b   : > { %s1388_s25 = spop %1387 }
 0x19c   : > { %s1104_s26 = smul.f32 0.0009765625, %s1388_s25  ;;  %s1390_s27 = spop %1389 }
 0x19d   : > { %s1118_s28 = smul.f32 0.0009765625, %s1390_s27 }
 0x19f   : > { %s1119_s29 = sadd.f32 %s1118_s28, %s1104_s26  ;;  %s1392_s30 = spop %1391 }
 0x1a0   : > { %s1133_s5 = smul.f32 0.0009765625, %s1392_s30  ;;  %s1394_s6 = spop %1393 }
 0x1a1   : > { %s1183_s7 = smul.f32 0.0009765625, %s1394_s6 }
 0x1a2   : > { %s1134_s8 = sadd.f32 %s1133_s5, %s1119_s29 }
 0x1a3   : > { %s1184_s9 = ssub.f32 1.0, %s1183_s7 }
 0x1a4   : > { %s1137_s10 = smul.f32 0.33333334, %s1134_s8 }
 0x1a5   : > { %v1199_v24 = vstv %s1184_s9 }
 0x1a6   : > { %v1195_v4 = vstv %s1137_s10  ;;  %v1200_v32 = vsel %vm1198_vm9, %v1199_v24, 0.0 }
 0x1a7   : > { %v1196_v30 = vsel %vm1194_vm8, %v1195_v4, 0.0 }
 0x1a8   : > { %v1197_v37 = vadd.f32 %v1196_v30, %v1193_v0 }
 0x1aa   : > { %v1201_v45 = vadd.f32 %v1200_v32, %v1197_v37 }
 0x1ac   : > { %1203 = vst.msk [vmem:[%s226_s13] sm:$0x1] %vm1202_vm10, %v1201_v45 }
 0x1ad PF: > { %s15_s15 = sadd.s32 1, %s1492_s15  }
 0x1ae   : > { %p12_p4 = scmp.ge.s32.totalorder %s15_s15, 4  }
 0x1b0   :  { %14 = sbr.rel (!%p12_p4) target bundleno = 1 (0x1), region = 89 }

// kernel: curl_loss.3
= control target key start
LH: loop header
LB: loop body
LE: loop exit
PB: predicated region body
PF: predicated region fallthrough
CT: control target
= control target key end

     0   :  { %s9454_s9 = smov 0   ;;  %s10585_s0 = inlined_call_operand.vmem [shape: f32[2,32,32], index: 0, kind: input, shape index: {}]   ;;  %s10586_s1 = inlined_call_operand.vmem [shape: f32[2,32,32], index: 1, kind: input, shape index: {}]   ;;  %s10587_s2 = inlined_call_operand.vmem [shape: f32[2,1,16], index: 2, kind: output, shape index: {}]  }
   0x1 LB: > { %s7328_s10 = sadd.s32 4294967295, %s9435_s9   ;;  %p7332_p0 = scmp.ge.s32.totalorder %s9435_s9, 1  ;;  %s9435_s9 = sphi %s9454_s9, %s12_s9  }
   0x2   : > { %p122_p1 = scmp.lt.s32.totalorder %s9435_s9, 3 }
   0x4   : > { %p123_p2 = pnand %p7332_p0, %p122_p1 }
   0x5   : > { %p147_p3 = scmp.lt.s32.totalorder (!%p123_p2), %s7328_s10, 1  ;;  %v168_v0 = vlaneseq (!%p123_p2)  ;;  %vm252_vm3 = vcmask (!%p123_p2), 261120   ;;  %v9437_v13 = vmov (!%p123_p2), 0.0  }
   0x6   : > { %126 = sbr.rel (%p123_p2) target bundleno = 2635 (0xa4b), region = 28 }
   0x7   : > { %v9464_v1 = vshrl.u32 (!%p123_p2), %v168_v0, 7  ;;  %v9466_v2 = vand.u32 (!%p123_p2), 127, %v168_v0 }
   0x9   : > { %v175_v3 = vsub.s32 (!%p123_p2), %v9466_v2, %v9464_v1  ;;  %v9472_v4 = vadd.s32 (!%p123_p2), 8, %v9464_v1  ;;  %v9478_v5 = vadd.s32 (!%p123_p2), 16, %v9464_v1  ;;  %v9481_v6 = vadd.s32 (!%p123_p2), 24, %v9464_v1 }
   0xa   : > { %vm243_vm11 = vcmp.lt.s32.totalorder (!%p123_p2), %v9466_v2, 32 }
   0xb   : > { %vm179_vm0 = vcmp.eq.s32.totalorder (!%p123_p2), %v175_v3, 4294967294  ;;  %vm191_vm1 = vcmp.eq.s32.totalorder (!%p123_p2), %v175_v3, 4294967295  ;;  %vm203_vm2 = vcmp.eq.s32.totalorder (!%p123_p2), %v175_v3, 0  ;;  %v176_v10 = vsub.s32 (!%p123_p2), %v9466_v2, %v9472_v4 }
   0xc   : > { %v183_v14 = vsel (!%p123_p2), %vm179_vm0, 0.120078385, %v9437_v13  ;;  %v195_v15 = vsel (!%p123_p2), %vm191_vm1, 0.23388076, %v9437_v13  ;;  %vm215_vm4 = vcmp.eq.s32.totalorder (!%p123_p2), %v175_v3, 1  ;;  %vm227_vm5 = vcmp.eq.s32.totalorder (!%p123_p2), %v175_v3, 2  ;;  %vm9562_vm0 = vmpackc.low (!%p123_p2), %vm243_vm11, %vm243_vm11 }
   0xd   : > { %s10623_s10 = smov (!%p147_p3, %s7328_s10), 1  ;;  %v199_v17 = vadd.f32 %v195_v15, %v183_v14  ;;  %v207_v18 = vsel %vm203_vm2, 0.2920817, %v9437_v13  ;;  %v219_v19 = vsel %vm215_vm4, 0.23388076, %v9437_v13  ;;  %vm180_vm6 = vcmp.eq.s32.totalorder %v176_v10, 4294967294 }
   0xe   : > { %s7612_s11 = sshll.u32 %s10623_s10, 5  ;;  %vm192_vm7 = vcmp.eq.s32.totalorder %v176_v10, 4294967295  ;;  %vm204_vm8 = vcmp.eq.s32.totalorder %v176_v10, 0  ;;  %v231_v23 = vsel %vm227_vm5, 0.120078385, %v9437_v13  ;;  %vm216_vm9 = vcmp.eq.s32.totalorder %v176_v10, 1 }
   0xf   : > { %s151_s14 = scalar_lea.vmem %s10585_s0, %s7612_s11  ;;  %s156_s17 = scalar_lea.vmem %s10586_s1, %s7612_s11  ;;  %v211_v22 = vadd.f32 %v207_v18, %v199_v17  ;;  %v184_v24 = vsel %vm180_vm6, 0.120078385, %v9437_v13  ;;  %v196_v25 = vsel %vm192_vm7, 0.23388076, %v9437_v13  ;;  %v208_v27 = vsel %vm204_vm8, 0.2920817, %v9437_v13 }
  0x10   : > { %v9483_v7 = vld [vmem:[%s151_s14] sm:$0xff]  ;;  %v9485_v8 = vld [vmem:[%s151_s14 + $0x8] sm:$0xff]  ;;  %v9487_v9 = vld [vmem:[%s151_s14 + $0x10] sm:$0xff]  ;;  %v200_v26 = vadd.f32 %v196_v25, %v184_v24  ;;  %vm228_vm10 = vcmp.eq.s32.totalorder %v176_v10, 2  ;;  %v220_v31 = vsel %vm216_vm9, 0.23388076, %v9437_v13  ;;  %v177_v35 = vsub.s32 %v9466_v2, %v9478_v5 }
  0x11   : > { %v9496_v11 = vpack.c.bf16 %v9485_v8, %v9483_v7  ;;  %v9498_v12 = vld [vmem:[%s151_s14 + $0x18] sm:$0xff]  ;;  %v9509_v20 = vld [vmem:[%s156_s17] sm:$0xff]  ;;  %v9511_v21 = vld [vmem:[%s156_s17 + $0x8] sm:$0xff]  ;;  %v223_v30 = vadd.f32 %v219_v19, %v211_v22  ;;  %v232_v34 = vsel %vm228_vm10, 0.120078385, %v9437_v13  ;;  %v178_v36 = vsub.s32 %v9466_v2, %v9481_v6  ;;  %s159_s14 = scalar_lea.vmem %s10587_s2, %s10623_s10 }
  0x12   : > { %v9504_v16 = vpack.c.bf16 %v9498_v12, %v9487_v9  ;;  %v9519_v28 = vld [vmem:[%s156_s17 + $0x10] sm:$0xff]  ;;  %v9521_v29 = vld [vmem:[%s156_s17 + $0x18] sm:$0xff]  ;;  %v9527_v32 = vpack.c.bf16 %v9511_v21, %v9509_v20  ;;  %v212_v33 = vadd.f32 %v208_v27, %v200_v26  ;;  %v629_v39 = vmul.f32 %v9483_v7, %v9483_v7 }
  0x13   : > { %8902 = vmatprep.subr.bf16.mxu0 %v9496_v11  ;;  %v9535_v37 = vadd.f32 %v231_v23, %v223_v30  ;;  %v9539_v38 = vpack.c.bf16 %v9521_v29, %v9519_v28  ;;  %v630_v40 = vmul.f32 %v9485_v8, %v9485_v8  ;;  %vm181_vm12 = vcmp.eq.s32.totalorder %v177_v35, 4294967294 }
  0x14   : > { %8904 = vmatpush3.bf16.msra.mxu0 %v9496_v11  ;;  %v224_v41 = vadd.f32 %v220_v31, %v212_v33  ;;  %vm193_vm13 = vcmp.eq.s32.totalorder %v177_v35, 4294967295  ;;  %vm205_vm14 = vcmp.eq.s32.totalorder %v177_v35, 0  ;;  %v185_v43 = vsel %vm181_vm12, 0.120078385, %v9437_v13 }
  0x15   : > { %8906 = vmatprep.subr.bf16.mxu0 %v9504_v16  ;;  %v9549_v42 = vsel %vm243_vm11, %v9535_v37, 0.0  ;;  %v197_v44 = vsel %vm193_vm13, 0.23388076, %v9437_v13  ;;  %vm217_vm15 = vcmp.eq.s32.totalorder %v177_v35, 1  ;;  %v209_v47 = vsel %vm205_vm14, 0.2920817, %v9437_v13 }
  0x16   : > { %8095 = vmatprep.mubr.msk.f32.mxu0 %vm252_vm3, %v9549_v42  ;;  %v9555_v45 = vadd.f32 %v232_v34, %v224_v41  ;;  %v201_v46 = vadd.f32 %v197_v44, %v185_v43  ;;  %v221_v48 = vsel %vm217_vm15, 0.23388076, %v9437_v13  ;;  %vm229_vm1 = vcmp.eq.s32.totalorder %v177_v35, 2 }
  0x17   : > { %vm182_vm2 = vcmp.eq.s32.totalorder %v178_v36, 4294967294  ;;  %vm194_vm4 = vcmp.eq.s32.totalorder %v178_v36, 4294967295  ;;  %vm206_vm5 = vcmp.eq.s32.totalorder %v178_v36, 0  ;;  %v233_v53 = vsel %vm229_vm1, 0.120078385, %v9437_v13 }
  0x18   : > { %8908 = vmatpush3.bf16.msra.mxu0 %v9504_v16  ;;  %v9569_v50 = vsel %vm243_vm11, %v9555_v45, 0.0  ;;  %v9573_v51 = vpack.c.bf16 %v9555_v45, %v9535_v37  ;;  %v213_v52 = vadd.f32 %v209_v47, %v201_v46  ;;  %v186_v54 = vsel %vm182_vm2, 0.120078385, %v9437_v13 }
  0x19   : > { %8922 = vmatprep.subr.bf16.mxu0 %v9527_v32  ;;  %v198_v55 = vsel %vm194_vm4, 0.23388076, %v9437_v13  ;;  %v210_v56 = vsel %vm206_vm5, 0.2920817, %v9437_v13  ;;  %vm218_vm6 = vcmp.eq.s32.totalorder %v178_v36, 1  ;;  %vm230_vm7 = vcmp.eq.s32.totalorder %v178_v36, 2 }
  0x1a   : > { %v225_v57 = vadd.f32 %v221_v48, %v213_v52  ;;  %v202_v58 = vadd.f32 %v198_v55, %v186_v54  ;;  %8911 = vmatprep.subr.msk.bf16.mxu1 %vm9562_vm0, %v9573_v51  ;;  %v222_v59 = vsel %vm218_vm6, 0.23388076, %v9437_v13  ;;  %v8941_v60 = vpack.c.bf16 %v630_v40, %v629_v39 }
  0x1b   : > { %8096 = vmatmul.mubr.msk.f32.vlgmr.msra.gmra.mrb[0].mxu0 %vm252_vm3, %v9569_v50  ;;  %8914 = vmatpush3.bf16.msk.msra.mxu1 %vm9562_vm0, %v9573_v51  ;;  %v234_v63 = vsel %vm230_vm7, 0.120078385, %v9437_v13  ;;  %v631_v14 = vmul.f32 %v9487_v9, %v9487_v9  ;;  %v632_v15 = vmul.f32 %v9498_v12, %v9498_v12  ;;  %v815_v22 = vmul.f32 %v9509_v20, %v9509_v20 }
  0x1c   : > { %8924 = vmatpush3.bf16.msra.mxu0 %v9527_v32  ;;  %v237_v61 = vadd.f32 %v233_v53, %v225_v57  ;;  %v214_v62 = vadd.f32 %v210_v56, %v202_v58  ;;  %v816_v23 = vmul.f32 %v9511_v21, %v9511_v21  ;;  %v817_v25 = vmul.f32 %v9519_v28, %v9519_v28 }
  0x1d   : > { %8926 = vmatprep.subr.bf16.mxu0 %v9539_v38  ;;  %v8945_v19 = vpack.c.bf16 %v632_v15, %v631_v14  ;;  %v818_v26 = vmul.f32 %v9521_v29, %v9521_v29  ;;  %v1001_v30 = vmul.f32 %v9509_v20, %v9483_v7  ;;  %v1002_v31 = vmul.f32 %v9511_v21, %v9485_v8 }
  0x1e   : > { %v9593_v0 = vsel %vm243_vm11, %v237_v61, 0.0  ;;  %v226_v3 = vadd.f32 %v222_v59, %v214_v62  ;;  %v8961_v24 = vpack.c.bf16 %v816_v23, %v815_v22  ;;  %v1003_v34 = vmul.f32 %v9519_v28, %v9487_v9 }
  0x1f   : > { %8098 = vmatprep.mubr.msk.f32.mxu0 %vm252_vm3, %v9593_v0  ;;  %v8965_v27 = vpack.c.bf16 %v818_v26, %v817_v25  ;;  %v8981_v33 = vpack.c.bf16 %v1002_v31, %v1001_v30  ;;  %v1004_v35 = vmul.f32 %v9521_v29, %v9498_v12  ;;  %v1321_v7 = vmul.u32 2, %v9464_v1 }
  0x20   : > { %8928 = vmatpush3.bf16.msra.mxu0 %v9539_v38  ;;  %v238_v10 = vadd.f32 %v234_v63, %v226_v3  ;;  %v1322_v20 = vmul.u32 2, %v9472_v4  ;;  %v1350_v40 = vmul.u32 2, %v9466_v2  ;;  %vm1349_vm5 = vcmp.lt.s32.totalorder %v9466_v2, 16 }
  0x21   : > { %8942 = vmatprep.subr.bf16.mxu0 %v8941_v60  ;;  %v8985_v8 = vpack.c.bf16 %v1004_v35, %v1003_v34  ;;  %v1329_v21 = vadd.s32 1, %v1321_v7  ;;  %vm1325_vm8 = vcmp.eq.s32.totalorder %v9466_v2, %v1321_v7  ;;  %v9438_v59 = vmov 0.5|0.5  }
  0x22   : > { %v251_v17 = vsel %vm243_vm11, %v238_v10, 0.0  ;;  %v9604_v18 = vpack.c.bf16 %v238_v10, %v237_v61  ;;  %v1330_v9 = vadd.s32 1, %v1322_v20  ;;  %vm1326_vm12 = vcmp.eq.s32.totalorder %v9466_v2, %v1322_v20 }
  0x23   : > { %8099 = vmatmul.mubr.msk.f32.gmra.mrb[2].mxu0 %vm252_vm3, %v251_v17  ;;  %vm1333_vm9 = vcmp.eq.s32.totalorder %v9466_v2, %v1329_v21  ;;  %v1355_v43 = vadd.s32 1, %v1350_v40  ;;  %vm1351_vm15 = vcmp.eq.s32.totalorder %v9464_v1, %v1350_v40  ;;  %vm1352_vm2 = vcmp.eq.s32.totalorder %v9472_v4, %v1350_v40 }
  0x24   : > { %8123 = vmatprep.mubr.msk.f32.mxu0 %vm252_vm3, %v9549_v42  ;;  %8917 = vmatprep.subr.msk.bf16.mxu1 %vm9562_vm0, %v9604_v18  ;;  %vm9660_vm10 = vmor %vm1325_vm8, %vm1333_vm9  ;;  %vm1334_vm13 = vcmp.eq.s32.totalorder %v9466_v2, %v1330_v9  ;;  %vm1353_vm8 = vcmp.eq.s32.totalorder %v9478_v5, %v1350_v40 }
  0x25   : > { %8920 = vmatpush3.bf16.msk.msra.mxu1 %vm9562_vm0, %v9604_v18  ;;  %v9675_v28 = vsel %vm9660_vm10, 0.5, %v9437_v13  ;;  %vm1338_vm14 = vmor %vm1326_vm12, %vm1334_vm13  ;;  %vm1356_vm1 = vcmp.eq.s32.totalorder %v9464_v1, %v1355_v43  ;;  %vm1357_vm4 = vcmp.eq.s32.totalorder %v9472_v4, %v1355_v43  ;;  %vm1358_vm9 = vcmp.eq.s32.totalorder %v9478_v5, %v1355_v43 }
  0x26   : > { %8931 = vmatprep.subr.msk.bf16.mxu1 %vm9562_vm0, %v9573_v51  ;;  %vm9741_vm6 = vmor %vm1351_vm15, %vm1356_vm1  ;;  %vm1354_vm13 = vcmp.eq.s32.totalorder %v9481_v6, %v1350_v40 }
  0x27   : > { %8124 = vmatmul.mubr.msk.f32.vlgmr.msra.gmra.mrb[4].mxu0 %vm252_vm3, %v9569_v50  ;;  %vm9746_vm7 = vmor %vm1352_vm2, %vm1357_vm4 }
  0x28   : > { %8944 = vmatpush3.bf16.msra.mxu0 %v8941_v60  ;;  %8126 = vmatprep.mubr.msk.f32.mxu0 %vm252_vm3, %v9593_v0  ;;  %vm1364_vm12 = vmand %vm1349_vm5, %vm9741_vm6 }
  0x29   : > { %8946 = vmatprep.subr.bf16.mxu0 %v8945_v19  ;;  %vm1365_vm15 = vmand %vm1349_vm5, %vm9746_vm7 }
  0x2a   : > { %vm9770_vm1 = vmor %vm1353_vm8, %vm1358_vm9 }
  0x2b   : > { %8127 = vmatmul.mubr.msk.f32.gmra.mrb[6].mxu0 %vm252_vm3, %v251_v17  ;;  %vm9784_vm4 = vmpackc.low %vm1365_vm15, %vm1364_vm12 }
  0x2c   : > { %8948 = vmatpush3.bf16.msra.mxu0 %v8945_v19  ;;  %8151 = vmatprep.mubr.msk.f32.mxu0 %vm252_vm3, %v9549_v42  ;;  %vm1366_vm8 = vmand %vm1349_vm5, %vm9770_vm1 }
  0x2d   : > { %8962 = vmatprep.subr.bf16.mxu0 %v8961_v24 }
  0x2f   : > { %8152 = vmatmul.mubr.msk.f32.vlgmr.msra.gmra.mrb[8].mxu0 %vm252_vm3, %v9569_v50 }
  0x30   : > { %8964 = vmatpush3.bf16.msra.mxu0 %v8961_v24  ;;  %8154 = vmatprep.mubr.msk.f32.mxu0 %vm252_vm3, %v9593_v0 }
  0x31   : > { %8966 = vmatprep.subr.bf16.mxu0 %v8965_v27 }
  0x33   : > { %8155 = vmatmul.mubr.msk.f32.gmra.mrb[10].mxu0 %vm252_vm3, %v251_v17 }
  0x34   : > { %8968 = vmatpush3.bf16.msra.mxu0 %v8965_v27  ;;  %8179 = vmatprep.mubr.msk.f32.mxu0 %vm252_vm3, %v9549_v42 }
  0x35   : > { %8982 = vmatprep.subr.bf16.mxu0 %v8981_v33 }
  0x37   : > { %8180 = vmatmul.mubr.msk.f32.vlgmr.msra.gmra.mrb[12].mxu0 %vm252_vm3, %v9569_v50 }
  0x38   : > { %8984 = vmatpush3.bf16.msra.mxu0 %v8981_v33  ;;  %8182 = vmatprep.mubr.msk.f32.mxu0 %vm252_vm3, %v9593_v0 }
  0x39   : > { %8986 = vmatprep.subr.bf16.mxu0 %v8985_v8 }
  0x3b   : > { %8183 = vmatmul.mubr.msk.f32.gmra.mrb[14].mxu0 %vm252_vm3, %v251_v17 }
  0x3c   : > { %8988 = vmatpush3.bf16.msra.mxu0 %v8985_v8  ;;  %8207 = vmatprep.mubr.msk.f32.mxu0 %vm252_vm3, %v9549_v42 }
  0x3d   : > { %9002 = vmatprep.subr.bf16.mxu0 %v9496_v11 }
  0x3f   : > { %8208 = vmatmul.mubr.msk.f32.vlgmr.msra.gmra.mrb[16].mxu0 %vm252_vm3, %v9569_v50 }
  0x40   : > { %9004 = vmatpush3.bf16.msra.mxu0 %v9496_v11  ;;  %8210 = vmatprep.mubr.msk.f32.mxu0 %vm252_vm3, %v9593_v0  ;;  %v1346_v11 = vsel %vm1338_vm14, 0.5, %v9437_v13  ;;  %vm1359_vm14 = vcmp.eq.s32.totalorder %v9481_v6, %v1355_v43 }
  0x41   : > { %9006 = vmatprep.subr.bf16.mxu0 %v9504_v16  ;;  %vm9777_vm2 = vmor %vm1354_vm13, %vm1359_vm14 }
  0x42   : > { %vm1367_vm9 = vmand %vm1349_vm5, %vm9777_vm2 }
  0x43   : > { %8211 = vmatmul.mubr.msk.f32.gmra.mrb[18].mxu0 %vm252_vm3, %v251_v17  ;;  %vm9805_vm12 = vmpackc.low %vm1367_vm9, %vm1366_vm8 }
  0x44   : > { %9008 = vmatpush3.bf16.msra.mxu0 %v9504_v16  ;;  %8235 = vmatprep.mubr.msk.f32.mxu0 %vm252_vm3, %v9675_v28 }
  0x45   : > { %9018 = vmatprep.subr.bf16.mxu0 %v9527_v32 }
  0x47   : > { %8236 = vmatmul.mubr.msk.f32.vlgmr.msra.gmra.mrb[20].mxu0 %vm252_vm3, %v1346_v11 }
  0x48   : > { %9020 = vmatpush3.bf16.msra.mxu0 %v9527_v32  ;;  %8238 = vmatprep.mubr.f32.mxu0 %v9437_v13 }
  0x49   : > { %9022 = vmatprep.subr.bf16.mxu0 %v9539_v38 }
  0x4b   : > { %8239 = vmatmul.mubr.f32.gmra.mrb[22].mxu0 %v9437_v13 }
  0x4c   : > { %9024 = vmatpush3.bf16.msra.mxu0 %v9539_v38  ;;  %8263 = vmatprep.mubr.msk.f32.mxu0 %vm252_vm3, %v9675_v28 }
  0x4f   : > { %8264 = vmatmul.mubr.msk.f32.vlgmr.msra.gmra.mrb[24].mxu0 %vm252_vm3, %v1346_v11 }
  0x50   : > { %8266 = vmatprep.mubr.f32.mxu0 %v9437_v13 }
  0x53   : > { %8267 = vmatmul.mubr.f32.gmra.mrb[26].mxu0 %v9437_v13 }
  0xee   : > { %v8097_v16 = vpop.f32.mrb[0].mxu0 }
  0xef   : > { %v331_v29 = vpop.f32.mrb[1].mxu0 }
  0xf0   : > { %8109 = vmatprep.mubr.msk.f32.mxu1 %vm252_vm3, %v331_v29 }
  0xf1   : > { %8110 = vmatmul.mubr.msk.f32.vlgmr.msra.gmra.mrb[0].mxu1 %vm252_vm3, %v8097_v16 }
  0xf2   : > { %8934 = vmatpush3.bf16.msk.msra.mxu1 %vm9562_vm0, %v9573_v51 }
  0xf3   : > { %8937 = vmatprep.subr.msk.bf16.mxu1 %vm9562_vm0, %v9604_v18 }
  0xf6   : > { %8940 = vmatpush3.bf16.msk.msra.mxu1 %vm9562_vm0, %v9604_v18  ;;  %v8100_v32 = vpop.f32.mrb[2].mxu0 }
  0xf7   : > { %8951 = vmatprep.subr.msk.bf16.mxu1 %vm9562_vm0, %v9573_v51  ;;  %v341_v36 = vpop.f32.mrb[3].mxu0 }
  0xf8   : > { %8112 = vmatprep.mubr.msk.f32.mxu1 %vm252_vm3, %v341_v36 }
  0xf9   : > { %8113 = vmatmul.mubr.msk.f32.gmra.mrb[2].mxu1 %vm252_vm3, %v8100_v32 }
  0xfa   : > { %v8125_v38 = vpop.f32.mrb[4].mxu0 }
  0xfb   : > { %v513_v39 = vpop.f32.mrb[5].mxu0 }
  0xfc   : > { %8137 = vmatprep.mubr.msk.f32.mxu1 %vm252_vm3, %v513_v39 }
  0xfd   : > { %8138 = vmatmul.mubr.msk.f32.vlgmr.msra.gmra.mrb[4].mxu1 %vm252_vm3, %v8125_v38 }
  0xfe   : > { %v8128_v41 = vpop.f32.mrb[6].mxu0  ;;  %8954 = vmatpush3.bf16.msk.msra.mxu1 %vm9562_vm0, %v9573_v51 }
  0xff   : > { %v523_v42 = vpop.f32.mrb[7].mxu0  ;;  %8957 = vmatprep.subr.msk.bf16.mxu1 %vm9562_vm0, %v9604_v18 }
 0x100   : > { %8140 = vmatprep.mubr.msk.f32.mxu1 %vm252_vm3, %v523_v42 }
 0x101   : > { %8141 = vmatmul.mubr.msk.f32.gmra.mrb[6].mxu1 %vm252_vm3, %v8128_v41 }
 0x102   : > { %v8153_v44 = vpop.f32.mrb[8].mxu0  ;;  %8960 = vmatpush3.bf16.msk.msra.mxu1 %vm9562_vm0, %v9604_v18 }
 0x103   : > { %v699_v46 = vpop.f32.mrb[9].mxu0  ;;  %8971 = vmatprep.subr.msk.bf16.mxu1 %vm9562_vm0, %v9573_v51 }
 0x104   : > { %8165 = vmatprep.mubr.msk.f32.mxu1 %vm252_vm3, %v699_v46 }
 0x105   : > { %8166 = vmatmul.mubr.msk.f32.vlgmr.msra.gmra.mrb[8].mxu1 %vm252_vm3, %v8153_v44 }
 0x106   : > { %v8156_v47 = vpop.f32.mrb[10].mxu0  ;;  %8974 = vmatpush3.bf16.msk.msra.mxu1 %vm9562_vm0, %v9573_v51 }
 0x107   : > { %v709_v48 = vpop.f32.mrb[11].mxu0  ;;  %8977 = vmatprep.subr.msk.bf16.mxu1 %vm9562_vm0, %v9604_v18 }
 0x108   : > { %8168 = vmatprep.mubr.msk.f32.mxu1 %vm252_vm3, %v709_v48 }
 0x109   : > { %8169 = vmatmul.mubr.msk.f32.gmra.mrb[10].mxu1 %vm252_vm3, %v8156_v47 }
 0x10a   : > { %v8181_v4 = vpop.f32.mrb[12].mxu0  ;;  %8980 = vmatpush3.bf16.msk.msra.mxu1 %vm9562_vm0, %v9604_v18 }
 0x10b   : > { %v885_v53 = vpop.f32.mrb[13].mxu0  ;;  %8991 = vmatprep.subr.msk.bf16.mxu1 %vm9562_vm0, %v9573_v51 }
 0x10c   : > { %8193 = vmatprep.mubr.msk.f32.mxu1 %vm252_vm3, %v885_v53 }
 0x10d   : > { %8194 = vmatmul.mubr.msk.f32.vlgmr.msra.gmra.mrb[12].mxu1 %vm252_vm3, %v8181_v4 }
 0x10e   : > { %v8184_v54 = vpop.f32.mrb[14].mxu0  ;;  %8994 = vmatpush3.bf16.msk.msra.mxu1 %vm9562_vm0, %v9573_v51 }
 0x10f   : > { %v895_v55 = vpop.f32.mrb[15].mxu0  ;;  %8997 = vmatprep.subr.msk.bf16.mxu1 %vm9562_vm0, %v9604_v18 }
 0x110   : > { %8196 = vmatprep.mubr.msk.f32.mxu1 %vm252_vm3, %v895_v55 }
 0x111   : > { %8197 = vmatmul.mubr.msk.f32.gmra.mrb[14].mxu1 %vm252_vm3, %v8184_v54 }
 0x112   : > { %v8209_v57 = vpop.f32.mrb[16].mxu0  ;;  %9000 = vmatpush3.bf16.msk.msra.mxu1 %vm9562_vm0, %v9604_v18  ;;  %v9844_v18 = vsel %vm1349_vm5, %v9535_v37, 0.0  ;;  %vm2832_vm0 = vcmp.lt.s32.totalorder %v9466_v2, 8 }
 0x113   : > { %v1071_v58 = vpop.f32.mrb[17].mxu0  ;;  %9010 = vmatprep.subr.msk.bf16.mxu1 %vm9784_vm4, %v9438_v59  ;;  %8291 = vmatprep.mubr.msk.f32.mxu0 %vm252_vm3, %v9844_v18  ;;  %vm2833_vm13 = vmand %vm2832_vm0, %vm9741_vm6 }
 0x114   : > { %8221 = vmatprep.mubr.msk.f32.mxu1 %vm252_vm3, %v1071_v58  ;;  %vm2834_vm14 = vmand %vm2832_vm0, %vm9746_vm7 }
 0x115   : > { %8222 = vmatmul.mubr.msk.f32.vlgmr.msra.gmra.mrb[16].mxu1 %vm252_vm3, %v8209_v57  ;;  %vm9988_vm15 = vmpackc.low %vm2834_vm14, %vm2833_vm13 }
 0x116   : > { %v8212_v61 = vpop.f32.mrb[18].mxu0  ;;  %9012 = vmatpush3.bf16.msk.msra.mxu1 %vm9784_vm4, %v9438_v59  ;;  %vm2836_vm8 = vmand %vm2832_vm0, %vm9777_vm2 }
 0x117   : > { %v1081_v49 = vpop.f32.mrb[19].mxu0  ;;  %9014 = vmatprep.subr.msk.bf16.mxu1 %vm9805_vm12, %v9438_v59 }
 0x118   : > { %8224 = vmatprep.mubr.msk.f32.mxu1 %vm252_vm3, %v1081_v49 }
 0x119   : > { %8225 = vmatmul.mubr.msk.f32.gmra.mrb[18].mxu1 %vm252_vm3, %v8212_v61 }
 0x11a   : > { %v8237_v62 = vpop.f32.mrb[20].mxu0  ;;  %9016 = vmatpush3.bf16.msk.msra.mxu1 %vm9805_vm12, %v9438_v59 }
 0x11b   : > { %v1450_v63 = vpop.f32.mrb[21].mxu0  ;;  %9026 = vmatprep.subr.msk.bf16.mxu1 %vm9784_vm4, %v9438_v59 }
 0x11c   : > { %8249 = vmatprep.mubr.msk.f32.mxu1 %vm252_vm3, %v1450_v63 }
 0x11d   : > { %8250 = vmatmul.mubr.msk.f32.vlgmr.msra.gmra.mrb[20].mxu1 %vm252_vm3, %v8237_v62 }
 0x11e   : > { %v8240_v0 = vpop.f32.mrb[22].mxu0  ;;  %9028 = vmatpush3.bf16.msk.msra.mxu1 %vm9784_vm4, %v9438_v59  ;;  %vm2835_vm4 = vmand %vm2832_vm0, %vm9770_vm1 }
 0x11f   : > { %v1460_v3 = vpop.f32.mrb[23].mxu0  ;;  %9030 = vmatprep.subr.msk.bf16.mxu1 %vm9805_vm12, %v9438_v59  ;;  %vm10010_vm9 = vmpackc.low %vm2836_vm8, %vm2835_vm4 }
 0x120   : > { %8252 = vmatprep.mubr.msk.f32.mxu1 %vm252_vm3, %v1460_v3 }
 0x121   : > { %8253 = vmatmul.mubr.msk.f32.gmra.mrb[22].mxu1 %vm252_vm3, %v8240_v0 }
 0x122   : > { %v8265_v10 = vpop.f32.mrb[24].mxu0  ;;  %9032 = vmatpush3.bf16.msk.msra.mxu1 %vm9805_vm12, %v9438_v59 }
 0x123   : > { %v1632_v14 = vpop.f32.mrb[25].mxu0 }
 0x124   : > { %8277 = vmatprep.mubr.msk.f32.mxu1 %vm252_vm3, %v1632_v14 }
 0x125   : > { %8278 = vmatmul.mubr.msk.f32.vlgmr.msra.gmra.mrb[24].mxu1 %vm252_vm3, %v8265_v10 }
 0x126   : > { %v8268_v15 = vpop.f32.mrb[26].mxu0 }
 0x127   : > { %v1642_v17 = vpop.f32.mrb[27].mxu0 }
 0x128   : > { %8280 = vmatprep.mubr.msk.f32.mxu1 %vm252_vm3, %v1642_v17 }
 0x129   : > { %8281 = vmatmul.mubr.msk.f32.gmra.mrb[26].mxu1 %vm252_vm3, %v8268_v15 }
 0x1c4   : > { %v8111_v19 = vpop.f32.mrb[0].mxu1 }
 0x1c5   : > { %v428_v22 = vpop.f32.mrb[1].mxu1  ;;  %v1188_v26 = vmul.f32 %v8111_v19, %v8111_v19 }
 0x1c6   : > { %v1187_v33 = vmul.f32 %v428_v22, %v428_v22 }
 0x1cc   : > { %v8114_v23 = vpop.f32.mrb[2].mxu1 }
 0x1cd   : > { %v438_v24 = vpop.f32.mrb[3].mxu1  ;;  %v1190_v21 = vmul.f32 %v8114_v23, %v8114_v23 }
 0x1ce   : > { %v1189_v29 = vmul.f32 %v438_v24, %v438_v24 }
 0x1d0   : > { %v8139_v25 = vpop.f32.mrb[4].mxu1 }
 0x1d1   : > { %v1192_v27 = vmul.f32 %v8139_v25, %v8139_v25  ;;  %v1196_v30 = vmul.f32 %v8139_v25, %v8111_v19  ;;  %v610_v31 = vpop.f32.mrb[5].mxu1 }
 0x1d2   : > { %v1191_v34 = vmul.f32 %v610_v31, %v610_v31  ;;  %v1195_v35 = vmul.f32 %v610_v31, %v428_v22 }
 0x1d3   : > { %v1240_v7 = vadd.f32 %v1192_v27, %v1188_v26  ;;  %v1228_v10 = vmul.f32 2.0, %v1196_v30 }
 0x1d4   : > { %v1239_v8 = vadd.f32 %v1191_v34, %v1187_v33  ;;  %v8142_v20 = vpop.f32.mrb[6].mxu1  ;;  %v1227_v17 = vmul.f32 2.0, %v1195_v35 }
 0x1d5   : > { %v1194_v9 = vmul.f32 %v8142_v20, %v8142_v20  ;;  %v9848_v11 = vmul.f32 %v8142_v20, %v8114_v23  ;;  %v620_v16 = vpop.f32.mrb[7].mxu1  ;;  %v1244_v60 = vadd.f32 0.0001, %v1240_v7  ;;  %v1232_v7 = vadd.f32 0.0001, %v1228_v10 }
 0x1d6   : > { %v1193_v32 = vmul.f32 %v620_v16, %v620_v16  ;;  %v9850_v36 = vmul.f32 %v620_v16, %v438_v24  ;;  %v1243_v63 = vadd.f32 0.0001, %v1239_v8 }
 0x1d7   : > { %v1242_v38 = vadd.f32 %v1194_v9, %v1190_v21 }
 0x1d8   : > { %v1241_v39 = vadd.f32 %v1193_v32, %v1189_v29  ;;  %v8167_v40 = vpop.f32.mrb[8].mxu1 }
 0x1d9   : > { %v1200_v41 = vsub.f32 %v8167_v40, %v1188_v26  ;;  %v796_v42 = vpop.f32.mrb[9].mxu1  ;;  %v1246_v24 = vadd.f32 0.0001, %v1242_v38  ;;  %v1231_v40 = vadd.f32 0.0001, %v1227_v17 }
 0x1da   : > { %v1199_v43 = vsub.f32 %v796_v42, %v1187_v33  ;;  %v1245_v31 = vadd.f32 0.0001, %v1241_v39 }
 0x1dc   : > { %v8170_v44 = vpop.f32.mrb[10].mxu1 }
 0x1dd   : > { %v1202_v46 = vsub.f32 %v8170_v44, %v1190_v21  ;;  %v806_v47 = vpop.f32.mrb[11].mxu1  ;;  %v1230_v21 = vmul.f32 2.0, %v9848_v11 }
 0x1de   : > { %v1201_v48 = vsub.f32 %v806_v47, %v1189_v29 }
 0x1df   : > { %v1234_v44 = vadd.f32 0.0001, %v1230_v21 }
 0x1e0   : > { %v8195_v4 = vpop.f32.mrb[12].mxu1 }
 0x1e1   : > { %v1204_v53 = vsub.f32 %v8195_v4, %v1192_v27  ;;  %v982_v54 = vpop.f32.mrb[13].mxu1 }
 0x1e2   : > { %v1203_v55 = vsub.f32 %v982_v54, %v1191_v34  ;;  %v7397_v54 = vsel %vm243_vm11, 1.0, %v9437_v13  ;;  %vm9922_vm11 = vmpackc.low %vm1349_vm5, %vm1349_vm5 }
 0x1e3   : > { %v1220_v56 = vadd.f32 %v1204_v53, %v1200_v41  ;;  %9043 = vmatprep.subr.msk.bf16.mxu1 %vm9922_vm11, %v9573_v51 }
 0x1e4   : > { %v1219_v57 = vadd.f32 %v1203_v55, %v1199_v43  ;;  %v8198_v58 = vpop.f32.mrb[14].mxu1  ;;  %9046 = vmatpush3.bf16.msk.msra.mxu1 %vm9922_vm11, %v9573_v51 }
 0x1e5   : > { %v1224_v61 = vadd.f32 0.0009, %v1220_v56  ;;  %v1206_v49 = vsub.f32 %v8198_v58, %v1194_v9  ;;  %v992_v62 = vpop.f32.mrb[15].mxu1  ;;  %9057 = vmatprep.subr.msk.bf16.mxu1 %vm9922_vm11, %v9573_v51 }
 0x1e6   : > { %v1223_v0 = vadd.f32 0.0009, %v1219_v57  ;;  %v1205_v3 = vsub.f32 %v992_v62, %v1193_v32  ;;  %v1229_v32 = vmul.f32 2.0, %v9850_v36 }
 0x1e7   : > { %v1248_v14 = vmul.f32 %v1244_v60, %v1224_v61  ;;  %9349 = vrcp.f32 %v1224_v61  ;;  %v1222_v15 = vadd.f32 %v1206_v49, %v1202_v46 }
 0x1e8   : > { %v1247_v19 = vmul.f32 %v1243_v63, %v1223_v0  ;;  %9351 = vrcp.f32 %v1223_v0  ;;  %v1221_v22 = vadd.f32 %v1205_v3, %v1201_v48  ;;  %v8223_v23 = vpop.f32.mrb[16].mxu1  ;;  %v1233_v53 = vadd.f32 0.0001, %v1229_v32 }
 0x1e9   : > { %9353 = vrcp.f32 %v1248_v14  ;;  %v1226_v25 = vadd.f32 0.0009, %v1222_v15  ;;  %v1208_v26 = vsub.f32 %v8223_v23, %v1196_v30  ;;  %v1168_v27 = vpop.f32.mrb[17].mxu1 }
 0x1ea   : > { %9355 = vrcp.f32 %v1247_v19  ;;  %v1225_v33 = vadd.f32 0.0009, %v1221_v22  ;;  %v1207_v34 = vsub.f32 %v1168_v27, %v1195_v35 }
 0x1eb   : > { %v1250_v8 = vmul.f32 %v1246_v24, %v1226_v25  ;;  %9357 = vrcp.f32 %v1226_v25  ;;  %v1212_v20 = vmul.f32 2.0, %v1208_v26  ;;  %v9868_v26 = vsel %vm1349_vm5, %v9555_v45, 0.0 }
 0x1ec   : > { %v1249_v9 = vmul.f32 %v1245_v31, %v1225_v33  ;;  %9359 = vrcp.f32 %v1225_v33  ;;  %v1211_v16 = vmul.f32 2.0, %v1207_v34  ;;  %v8226_v29 = vpop.f32.mrb[18].mxu1 }
 0x1ed   : > { %9361 = vrcp.f32 %v1250_v8  ;;  %v1216_v38 = vadd.f32 0.0009, %v1212_v20  ;;  %v1210_v30 = vsub.f32 %v8226_v29, %v9848_v11  ;;  %v1178_v39 = vpop.f32.mrb[19].mxu1 }
 0x1ee   : > { %9363 = vrcp.f32 %v1249_v9  ;;  %v1215_v35 = vadd.f32 0.0009, %v1211_v16  ;;  %v1209_v41 = vsub.f32 %v1178_v39, %v9850_v36 }
 0x1ef   : > { %v1236_v42 = vmul.f32 %v1232_v7, %v1216_v38  ;;  %v1214_v43 = vmul.f32 2.0, %v1210_v30 }
 0x1f0   : > { %v1235_v46 = vmul.f32 %v1231_v40, %v1215_v35  ;;  %v1213_v47 = vmul.f32 2.0, %v1209_v41  ;;  %v8251_v48 = vpop.f32.mrb[20].mxu1 }
 0x1f1   : > { %v9350_v4 = vpop.eup %9349  ;;  %v1218_v55 = vadd.f32 0.0009, %v1214_v43  ;;  %v2133_v11 = vmul.f32 %v8251_v48, %v8251_v48  ;;  %v1547_v56 = vpop.f32.mrb[21].mxu1 }
 0x1f2   : > { %v9352_v57 = vpop.eup %9351  ;;  %v1291_v58 = vmul.f32 %v9350_v4, %v1216_v38  ;;  %v1217_v60 = vadd.f32 0.0009, %v1213_v47  ;;  %v9859_v61 = vpack.c.bf16 %v8251_v48, %v1547_v56  ;;  %v2132_v36 = vmul.f32 %v1547_v56, %v1547_v56 }
 0x1f3   : > { %v9354_v49 = vpop.eup %9353  ;;  %v1289_v62 = vmul.f32 %v9352_v57, %v1215_v35  ;;  %v1238_v63 = vmul.f32 %v1234_v44, %v1218_v55 }
 0x1f4   : > { %v9356_v0 = vpop.eup %9355  ;;  %v1254_v3 = vmul.f32 %v9354_v49, %v1236_v42  ;;  %v1297_v10 = vmul.f32 %v7397_v54, %v1291_v58  ;;  %v1237_v14 = vmul.f32 %v1233_v53, %v1217_v60  ;;  %v8254_v15 = vpop.f32.mrb[22].mxu1  ;;  %9034 = vmatprep.subr.bf16.mxu0 %v9859_v61  ;;  %v9862_v17 = vpack.c.bf16 %v2133_v11, %v2132_v36 }
 0x1f5   : > { %v9358_v19 = vpop.eup %9357  ;;  %v1252_v22 = vmul.f32 %v9356_v0, %v1235_v46  ;;  %v1296_v23 = vmul.f32 %v7397_v54, %v1289_v62  ;;  %v2135_v24 = vmul.f32 %v8254_v15, %v8254_v15  ;;  %v1557_v25 = vpop.f32.mrb[23].mxu1  ;;  %9036 = vmatpush3.bf16.msra.mxu0 %v9859_v61 }
 0x1f6   : > { %v9360_v27 = vpop.eup %9359  ;;  %v1295_v31 = vmul.f32 %v9358_v19, %v1218_v55  ;;  %v9870_v33 = vpack.c.bf16 %v8254_v15, %v1557_v25  ;;  %v2134_v34 = vmul.f32 %v1557_v25, %v1557_v25  ;;  %v1268_v7 = vmul.f32 %v7397_v54, %v1254_v3 }
 0x1f7   : > { %v9362_v8 = vpop.eup %9361  ;;  %v1293_v20 = vmul.f32 %v9360_v27, %v1217_v60  ;;  %v1267_v21 = vmul.f32 %v7397_v54, %v1252_v22  ;;  %v1300_v9 = vsel %vm252_vm3, %v1296_v23, 0.0  ;;  %v1301_v16 = vsel %vm252_vm3, %v1297_v10, 0.0 }
 0x1f8   : > { %v9364_v29 = vpop.eup %9363  ;;  %v8279_v32 = vpop.f32.mrb[24].mxu1  ;;  %9038 = vmatprep.subr.bf16.mxu0 %v9870_v33  ;;  %v1258_v38 = vmul.f32 %v9362_v8, %v1238_v63  ;;  %v1272_v45 = vsel %vm252_vm3, %v1268_v7, 0.0  ;;  %v9065_v30 = vpack.c.bf16 %v2135_v24, %v2134_v34  ;;  %v1299_v39 = vmul.f32 %v7397_v54, %v1295_v31 }
 0x1f9   : > { %v1256_v40 = vmul.f32 %v9364_v29, %v1237_v14  ;;  %v1298_v35 = vmul.f32 %v7397_v54, %v1293_v20  ;;  %v2319_v41 = vmul.f32 %v8279_v32, %v8279_v32  ;;  %v2505_v42 = vmul.f32 %v8279_v32, %v8251_v48  ;;  %v1729_v43 = vpop.f32.mrb[25].mxu1  ;;  %9040 = vmatpush3.bf16.msra.mxu0 %v9870_v33 }
 0x1fa   : > { %v9877_v44 = vpack.c.bf16 %v8279_v32, %v1729_v43  ;;  %v2318_v46 = vmul.f32 %v1729_v43, %v1729_v43  ;;  %v2504_v47 = vmul.f32 %v1729_v43, %v1547_v56  ;;  %v1270_v4 = vmul.f32 %v7397_v54, %v1258_v38 }
 0x1fb   : > { %v1269_v53 = vmul.f32 %v7397_v54, %v1256_v40  ;;  %v1271_v55 = vsel %vm252_vm3, %v1267_v21, 0.0  ;;  %v1302_v11 = vadd.f32 %v1301_v16, %v1300_v9  ;;  %v1303_v57 = vsel %vm252_vm3, %v1298_v35, 0.0 }
 0x1fc   : > { %v8282_v58 = vpop.f32.mrb[26].mxu1  ;;  %8292 = vmatmul.mubr.msk.f32.vlgmr.msra.gmra.mrb[28].mxu0 %vm252_vm3, %v9868_v26  ;;  %9048 = vmatprep.subr.bf16.mxu0 %v9877_v44  ;;  %v1273_v48 = vadd.f32 %v1272_v45, %v1271_v55  ;;  %v1305_v60 = vsel %vm252_vm3, %v1299_v39, 0.0  ;;  %v9075_v36 = vpack.c.bf16 %v2319_v41, %v2318_v46  ;;  %v1276_v19 = vsel %vm252_vm3, %v1270_v4, 0.0 }
 0x1fd   : > { %v2321_v49 = vmul.f32 %v8282_v58, %v8282_v58  ;;  %v2507_v62 = vmul.f32 %v8282_v58, %v8254_v15  ;;  %v1739_v56 = vpop.f32.mrb[27].mxu1  ;;  %9050 = vmatpush3.bf16.msra.mxu0 %v9877_v44  ;;  %8294 = vmatprep.mubr.f32.mxu0 %v9437_v13  ;;  %v1274_v54 = vsel %vm252_vm3, %v1269_v53, 0.0  ;;  %v1304_v63 = vadd.f32 %v1303_v57, %v1302_v11 }
 0x1fe   : > { %v9051_v0 = vpack.c.bf16 %v8282_v58, %v1739_v56  ;;  %v2320_v3 = vmul.f32 %v1739_v56, %v1739_v56  ;;  %v2506_v10 = vmul.f32 %v1739_v56, %v1557_v25  ;;  %v1275_v14 = vadd.f32 %v1274_v54, %v1273_v48 }
 0x1ff   : > { %v1306_v22 = vadd.f32 %v1305_v60, %v1304_v63  ;;  %v9089_v23 = vpack.c.bf16 %v2505_v42, %v2504_v47 }
 0x200   : > { %8295 = vmatmul.mubr.f32.gmra.mrb[30].mxu0 %v9437_v13  ;;  %9052 = vmatprep.subr.bf16.mxu0 %v9051_v0  ;;  %v1277_v15 = vadd.f32 %v1276_v19, %v1275_v14  ;;  %v9079_v24 = vpack.c.bf16 %v2321_v49, %v2320_v3  ;;  %v9093_v27 = vpack.c.bf16 %v2507_v62, %v2506_v10  ;;  %v10058_v3 = vsel %vm2832_vm0, %v9535_v37, 0.0 }
 0x201   : > { %9054 = vmatpush3.bf16.msra.mxu0 %v9051_v0  ;;  %8315 = vmatprep.mubr.msk.f32.mxu0 %vm252_vm3, %v9844_v18 }
 0x202   : > { %9062 = vmatprep.subr.bf16.mxu0 %v9862_v17  ;;  %1278 = vadd.xlane.f32.xlu0 %v1277_v15 }
 0x204   : > { %8316 = vmatmul.mubr.msk.f32.vlgmr.msra.gmra.mrb[32].mxu0 %vm252_vm3, %v9868_v26 }
 0x205   : > { %9064 = vmatpush3.bf16.msra.mxu0 %v9862_v17  ;;  %8318 = vmatprep.mubr.f32.mxu0 %v9437_v13 }
 0x206   : > { %9066 = vmatprep.subr.bf16.mxu0 %v9065_v30  ;;  %1307 = vadd.xlane.f32.xlu0 %v1306_v22 }
 0x208   : > { %8319 = vmatmul.mubr.f32.gmra.mrb[34].mxu0 %v9437_v13 }
 0x209   : > { %9068 = vmatpush3.bf16.msra.mxu0 %v9065_v30  ;;  %8339 = vmatprep.mubr.msk.f32.mxu0 %vm252_vm3, %v9844_v18 }
 0x20a   : > { %9076 = vmatprep.subr.bf16.mxu0 %v9075_v36 }
 0x20c   : > { %8340 = vmatmul.mubr.msk.f32.vlgmr.msra.gmra.mrb[36].mxu0 %vm252_vm3, %v9868_v26 }
 0x20d   : > { %9078 = vmatpush3.bf16.msra.mxu0 %v9075_v36  ;;  %8342 = vmatprep.mubr.f32.mxu0 %v9437_v13 }
 0x20e   : > { %9080 = vmatprep.subr.bf16.mxu0 %v9079_v24 }
 0x210   : > { %8343 = vmatmul.mubr.f32.gmra.mrb[38].mxu0 %v9437_v13 }
 0x211   : > { %9082 = vmatpush3.bf16.msra.mxu0 %v9079_v24  ;;  %8363 = vmatprep.mubr.msk.f32.mxu0 %vm252_vm3, %v9844_v18 }
 0x212   : > { %9090 = vmatprep.subr.bf16.mxu0 %v9089_v23 }
 0x214   : > { %8364 = vmatmul.mubr.msk.f32.vlgmr.msra.gmra.mrb[40].mxu0 %vm252_vm3, %v9868_v26 }
 0x215   : > { %9092 = vmatpush3.bf16.msra.mxu0 %v9089_v23  ;;  %8366 = vmatprep.mubr.f32.mxu0 %v9437_v13 }
 0x216   : > { %9094 = vmatprep.subr.bf16.mxu0 %v9093_v27 }
 0x218   : > { %8367 = vmatmul.mubr.f32.gmra.mrb[42].mxu0 %v9437_v13 }
 0x219   : > { %9096 = vmatpush3.bf16.msra.mxu0 %v9093_v27  ;;  %8387 = vmatprep.mubr.msk.f32.mxu0 %vm252_vm3, %v9844_v18 }
 0x21a   : > { %9104 = vmatprep.subr.bf16.mxu0 %v9859_v61 }
 0x21c   : > { %8388 = vmatmul.mubr.msk.f32.vlgmr.msra.gmra.mrb[44].mxu0 %vm252_vm3, %v9868_v26 }
 0x21d   : > { %9106 = vmatpush3.bf16.msra.mxu0 %v9859_v61  ;;  %8390 = vmatprep.mubr.f32.mxu0 %v9437_v13 }
 0x21e   : > { %9108 = vmatprep.subr.bf16.mxu0 %v9870_v33 }
 0x220   : > { %8391 = vmatmul.mubr.f32.gmra.mrb[46].mxu0 %v9437_v13 }
 0x221   : > { %9110 = vmatpush3.bf16.msra.mxu0 %v9870_v33  ;;  %8411 = vmatprep.mubr.msk.f32.mxu0 %vm252_vm3, %v9675_v28 }
 0x222   : > { %9120 = vmatprep.subr.bf16.mxu0 %v9877_v44 }
 0x224   : > { %8412 = vmatmul.mubr.f32.vlgmr.msra.gmra.mrb[48].mxu0 %v9437_v13 }
 0x225   : > { %9122 = vmatpush3.bf16.msra.mxu0 %v9877_v44  ;;  %8414 = vmatprep.mubr.f32.mxu0 %v9437_v13 }
 0x226   : > { %9124 = vmatprep.subr.bf16.mxu0 %v9051_v0 }
 0x228   : > { %8415 = vmatmul.mubr.f32.gmra.mrb[50].mxu0 %v9437_v13 }
 0x229   : > { %9126 = vmatpush3.bf16.msra.mxu0 %v9051_v0  ;;  %8439 = vmatprep.mubr.msk.f32.mxu0 %vm252_vm3, %v9675_v28 }
 0x22c   : > { %8440 = vmatmul.mubr.f32.vlgmr.msra.gmra.mrb[52].mxu0 %v9437_v13 }
 0x22d   : > { %8442 = vmatprep.mubr.f32.mxu0 %v9437_v13 }
 0x230   : > { %8443 = vmatmul.mubr.f32.gmra.mrb[54].mxu0 %v9437_v13 }
 0x231   : > { %8467 = vmatprep.mubr.msk.f32.mxu0 %vm252_vm3, %v10058_v3 }
 0x28f   : > { %v1279_v18 = vpop.xlane.xlu0 %1278 }
 0x290   : > { %v1280_v61 = vrot.slane %v1279_v18, 4 }
 0x292   : > { %v1281_v25 = vadd.f32 %v1280_v61, %v1279_v18 }
 0x293   : > { %v1308_v26 = vpop.xlane.xlu0 %1307 }
 0x294   : > { %v1282_v31 = vrot.slane %v1281_v25, 2  ;;  %v1309_v33 = vrot.slane %v1308_v26, 4 }
 0x296   : > { %v1310_v34 = vadd.f32 %v1309_v33, %v1308_v26  ;;  %v1283_v7 = vadd.f32 %v1282_v31, %v1281_v25 }
 0x298   : > { %v1311_v8 = vrot.slane %v1310_v34, 2  ;;  %v1284_v20 = vrot.slane %v1283_v7, 1 }
 0x29a   : > { %v1285_v21 = vadd.f32 %v1284_v20, %v1283_v7  ;;  %v1312_v9 = vadd.f32 %v1311_v8, %v1310_v34 }
 0x29c   : > { %9319 = vpush %v1285_v21  ;;  %v1313_v28 = vrot.slane %v1312_v9, 1 }
 0x29e   : > { %v1314_v16 = vadd.f32 %v1313_v28, %v1312_v9 }
 0x2a0   : > { %9321 = vpush %v1314_v16 }
 0x2cd   : > { %s9320_s18 = spop %9319 }
 0x2ce   : > { %s1287_s22 = smul.f32 0.0009765625, %s9320_s18 }
 0x2cf   : > { %v8293_v29 = vpop.f32.mrb[28].mxu0 }
 0x2d0   : > { %v1834_v32 = vpop.f32.mrb[29].mxu0 }
 0x2d1   : > { %8301 = vmatprep.mubr.msk.f32.mxu1 %vm252_vm3, %v1834_v32  ;;  %s9322_s19 = spop %9321 }
 0x2d2   : > { %8302 = vmatmul.mubr.msk.f32.vlgmr.msra.gmra.mrb[28].mxu1 %vm252_vm3, %v8293_v29  ;;  %s1316_s21 = smul.f32 0.0009765625, %s9322_s19 }
 0x2d3   : > { %v8296_v38 = vpop.f32.mrb[30].mxu0  ;;  %9060 = vmatpush3.bf16.msk.msra.mxu1 %vm9922_vm11, %v9573_v51 }
 0x2d4   : > { %v1844_v45 = vpop.f32.mrb[31].mxu0  ;;  %9071 = vmatprep.subr.msk.bf16.mxu1 %vm9922_vm11, %v9573_v51 }
 0x2d5   : > { %8304 = vmatprep.mubr.msk.f32.mxu1 %vm252_vm3, %v1844_v45 }
 0x2d6   : > { %8305 = vmatmul.mubr.msk.f32.gmra.mrb[30].mxu1 %vm252_vm3, %v8296_v38 }
 0x2d7   : > { %v8317_v30 = vpop.f32.mrb[32].mxu0 }
 0x2d8   : > { %v2016_v39 = vpop.f32.mrb[33].mxu0 }
 0x2d9   : > { %8325 = vmatprep.mubr.msk.f32.mxu1 %vm252_vm3, %v2016_v39 }
 0x2da   : > { %8326 = vmatmul.mubr.msk.f32.vlgmr.msra.gmra.mrb[32].mxu1 %vm252_vm3, %v8317_v30 }
 0x2db   : > { %v8320_v40 = vpop.f32.mrb[34].mxu0  ;;  %9074 = vmatpush3.bf16.msk.msra.mxu1 %vm9922_vm11, %v9573_v51 }
 0x2dc   : > { %v2026_v35 = vpop.f32.mrb[35].mxu0  ;;  %9085 = vmatprep.subr.msk.bf16.mxu1 %vm9922_vm11, %v9573_v51 }
 0x2dd   : > { %8328 = vmatprep.mubr.msk.f32.mxu1 %vm252_vm3, %v2026_v35 }
 0x2de   : > { %8329 = vmatmul.mubr.msk.f32.gmra.mrb[34].mxu1 %vm252_vm3, %v8320_v40 }
 0x2df   : > { %v8341_v41 = vpop.f32.mrb[36].mxu0 }
 0x2e0   : > { %v2202_v42 = vpop.f32.mrb[37].mxu0 }
 0x2e1   : > { %8349 = vmatprep.mubr.msk.f32.mxu1 %vm252_vm3, %v2202_v42 }
 0x2e2   : > { %8350 = vmatmul.mubr.msk.f32.vlgmr.msra.gmra.mrb[36].mxu1 %vm252_vm3, %v8341_v41 }
 0x2e3   : > { %v8344_v43 = vpop.f32.mrb[38].mxu0  ;;  %9088 = vmatpush3.bf16.msk.msra.mxu1 %vm9922_vm11, %v9573_v51 }
 0x2e4   : > { %v2212_v44 = vpop.f32.mrb[39].mxu0  ;;  %9099 = vmatprep.subr.msk.bf16.mxu1 %vm9922_vm11, %v9573_v51 }
 0x2e5   : > { %8352 = vmatprep.mubr.msk.f32.mxu1 %vm252_vm3, %v2212_v44 }
 0x2e6   : > { %8353 = vmatmul.mubr.msk.f32.gmra.mrb[38].mxu1 %vm252_vm3, %v8344_v43 }
 0x2e7   : > { %v8365_v46 = vpop.f32.mrb[40].mxu0 }
 0x2e8   : > { %v2388_v47 = vpop.f32.mrb[41].mxu0 }
 0x2e9   : > { %8373 = vmatprep.mubr.msk.f32.mxu1 %vm252_vm3, %v2388_v47 }
 0x2ea   : > { %8374 = vmatmul.mubr.msk.f32.vlgmr.msra.gmra.mrb[40].mxu1 %vm252_vm3, %v8365_v46 }
 0x2eb   : > { %v8368_v53 = vpop.f32.mrb[42].mxu0  ;;  %9102 = vmatpush3.bf16.msk.msra.mxu1 %vm9922_vm11, %v9573_v51  ;;  %vm4301_vm11 = vcmp.lt.s32.totalorder %v9466_v2, 4 }
 0x2ec   : > { %v2398_v55 = vpop.f32.mrb[43].mxu0  ;;  %9112 = vmatprep.subr.msk.bf16.mxu1 %vm9988_vm15, %v9438_v59  ;;  %vm4302_vm13 = vmand %vm4301_vm11, %vm9741_vm6 }
 0x2ed   : > { %8376 = vmatprep.mubr.msk.f32.mxu1 %vm252_vm3, %v2398_v55  ;;  %vm4303_vm14 = vmand %vm4301_vm11, %vm9746_vm7 }
 0x2ee   : > { %8377 = vmatmul.mubr.msk.f32.gmra.mrb[42].mxu1 %vm252_vm3, %v8368_v53  ;;  %vm4304_vm4 = vmand %vm4301_vm11, %vm9770_vm1 }
 0x2ef   : > { %v8389_v51 = vpop.f32.mrb[44].mxu0  ;;  %vm4305_vm8 = vmand %vm4301_vm11, %vm9777_vm2 }
 0x2f0   : > { %v2574_v11 = vpop.f32.mrb[45].mxu0 }
 0x2f1   : > { %8397 = vmatprep.mubr.msk.f32.mxu1 %vm252_vm3, %v2574_v11 }
 0x2f2   : > { %8398 = vmatmul.mubr.msk.f32.vlgmr.msra.gmra.mrb[44].mxu1 %vm252_vm3, %v8389_v51 }
 0x2f3   : > { %v8392_v58 = vpop.f32.mrb[46].mxu0  ;;  %9114 = vmatpush3.bf16.msk.msra.mxu1 %vm9988_vm15, %v9438_v59 }
 0x2f4   : > { %v2584_v48 = vpop.f32.mrb[47].mxu0  ;;  %9116 = vmatprep.subr.msk.bf16.mxu1 %vm10010_vm9, %v9438_v59 }
 0x2f5   : > { %8400 = vmatprep.mubr.msk.f32.mxu1 %vm252_vm3, %v2584_v48 }
 0x2f6   : > { %8401 = vmatmul.mubr.msk.f32.gmra.mrb[46].mxu1 %vm252_vm3, %v8392_v58 }
 0x2f7   : > { %v8413_v60 = vpop.f32.mrb[48].mxu0  ;;  %9118 = vmatpush3.bf16.msk.msra.mxu1 %vm10010_vm9, %v9438_v59 }
 0x2f8   : > { %v2919_v36 = vpop.f32.mrb[49].mxu0  ;;  %9128 = vmatprep.subr.msk.bf16.mxu1 %vm9988_vm15, %v9438_v59 }
 0x2f9   : > { %8425 = vmatprep.mubr.msk.f32.mxu1 %vm252_vm3, %v2919_v36 }
 0x2fa   : > { %8426 = vmatmul.mubr.msk.f32.vlgmr.msra.gmra.mrb[48].mxu1 %vm252_vm3, %v8413_v60 }
 0x2fb   : > { %v8416_v49 = vpop.f32.mrb[50].mxu0  ;;  %9130 = vmatpush3.bf16.msk.msra.mxu1 %vm9988_vm15, %v9438_v59  ;;  %vm10180_vm15 = vmpackc.low %vm4303_vm14, %vm4302_vm13 }
 0x2fc   : > { %v2929_v62 = vpop.f32.mrb[51].mxu0  ;;  %9132 = vmatprep.subr.msk.bf16.mxu1 %vm10010_vm9, %v9438_v59 }
 0x2fd   : > { %8428 = vmatprep.mubr.msk.f32.mxu1 %vm252_vm3, %v2929_v62 }
 0x2fe   : > { %8429 = vmatmul.mubr.msk.f32.gmra.mrb[50].mxu1 %vm252_vm3, %v8416_v49 }
 0x2ff   : > { %v8441_v56 = vpop.f32.mrb[52].mxu0  ;;  %9134 = vmatpush3.bf16.msk.msra.mxu1 %vm10010_vm9, %v9438_v59  ;;  %vm10202_vm9 = vmpackc.low %vm4305_vm8, %vm4304_vm4  ;;  %vm7235_vm4 = vcmp.eq.s32.totalorder %v9466_v2, 1  ;;  %vm7239_vm8 = vcmp.eq.s32.totalorder %v9466_v2, 9 }
 0x300   : > { %v3101_v54 = vpop.f32.mrb[53].mxu0  ;;  %8473 = vmatprep.subr.msk.mxu1 %vm2832_vm0, %v9535_v37 }
 0x301   : > { %8453 = vmatprep.mubr.msk.f32.mxu1 %vm252_vm3, %v3101_v54 }
 0x302   : > { %8454 = vmatmul.mubr.msk.f32.vlgmr.msra.gmra.mrb[52].mxu1 %vm252_vm3, %v8441_v56 }
 0x303   : > { %v8444_v63 = vpop.f32.mrb[54].mxu0  ;;  %8474 = vmatpush3.msk.msra.mxu1 %vm2832_vm0, %v9535_v37 }
 0x304   : > { %v3111_v0 = vpop.f32.mrb[55].mxu0  ;;  %8495 = vmatprep.subr.msk.mxu1 %vm2832_vm0, %v9535_v37 }
 0x305   : > { %8456 = vmatprep.mubr.msk.f32.mxu1 %vm252_vm3, %v3111_v0 }
 0x306   : > { %8457 = vmatmul.mubr.msk.f32.gmra.mrb[54].mxu1 %vm252_vm3, %v8444_v63 }
 0x3a5   : > { %v8303_v10 = vpop.f32.mrb[28].mxu1 }
 0x3a6   : > { %v1931_v14 = vpop.f32.mrb[29].mxu1  ;;  %v2691_v15 = vmul.f32 %v8303_v10, %v8303_v10 }
 0x3a7   : > { %v2690_v18 = vmul.f32 %v1931_v14, %v1931_v14 }
 0x3a9   : > { %v8306_v19 = vpop.f32.mrb[30].mxu1 }
 0x3aa   : > { %v1941_v22 = vpop.f32.mrb[31].mxu1  ;;  %v2693_v34 = vmul.f32 %v8306_v19, %v8306_v19 }
 0x3ab   : > { %v2692_v21 = vmul.f32 %v1941_v22, %v1941_v22 }
 0x3ad   : > { %v8327_v23 = vpop.f32.mrb[32].mxu1 }
 0x3ae   : > { %v2695_v24 = vmul.f32 %v8327_v23, %v8327_v23  ;;  %v2699_v27 = vmul.f32 %v8327_v23, %v8303_v10  ;;  %v2113_v17 = vpop.f32.mrb[33].mxu1 }
 0x3af   : > { %v2694_v61 = vmul.f32 %v2113_v17, %v2113_v17  ;;  %v2698_v25 = vmul.f32 %v2113_v17, %v1931_v14 }
 0x3b0   : > { %v2743_v26 = vadd.f32 %v2695_v24, %v2691_v15  ;;  %v2731_v36 = vmul.f32 2.0, %v2699_v27 }
 0x3b1   : > { %v2742_v31 = vadd.f32 %v2694_v61, %v2690_v18  ;;  %v8330_v33 = vpop.f32.mrb[34].mxu1  ;;  %v2730_v56 = vmul.f32 2.0, %v2698_v25 }
 0x3b2   : > { %v2697_v7 = vmul.f32 %v8330_v33, %v8330_v33  ;;  %v10062_v8 = vmul.f32 %v8330_v33, %v8306_v19  ;;  %v2123_v20 = vpop.f32.mrb[35].mxu1  ;;  %v2747_v55 = vadd.f32 0.0001, %v2743_v26  ;;  %v2735_v17 = vadd.f32 0.0001, %v2731_v36 }
 0x3b3   : > { %v2696_v9 = vmul.f32 %v2123_v20, %v2123_v20  ;;  %v10064_v28 = vmul.f32 %v2123_v20, %v1941_v22  ;;  %v2746_v58 = vadd.f32 0.0001, %v2742_v31 }
 0x3b4   : > { %v2745_v16 = vadd.f32 %v2697_v7, %v2693_v34  ;;  %v2733_v26 = vmul.f32 2.0, %v10062_v8 }
 0x3b5   : > { %v2744_v29 = vadd.f32 %v2696_v9, %v2692_v21  ;;  %v8351_v32 = vpop.f32.mrb[36].mxu1 }
 0x3b6   : > { %v2703_v38 = vsub.f32 %v8351_v32, %v2691_v15  ;;  %v2299_v45 = vpop.f32.mrb[37].mxu1  ;;  %v2749_v10 = vadd.f32 0.0001, %v2745_v16 }
 0x3b7   : > { %v2702_v30 = vsub.f32 %v2299_v45, %v2690_v18  ;;  %v2748_v23 = vadd.f32 0.0001, %v2744_v29 }
 0x3b9   : > { %v8354_v39 = vpop.f32.mrb[38].mxu1 }
 0x3ba   : > { %v2705_v40 = vsub.f32 %v8354_v39, %v2693_v34  ;;  %v2309_v35 = vpop.f32.mrb[39].mxu1 }
 0x3bb   : > { %v2704_v41 = vsub.f32 %v2309_v35, %v2692_v21 }
 0x3bd   : > { %v8375_v42 = vpop.f32.mrb[40].mxu1 }
 0x3be   : > { %v2707_v43 = vsub.f32 %v8375_v42, %v2695_v24  ;;  %v2485_v44 = vpop.f32.mrb[41].mxu1 }
 0x3bf   : > { %v2706_v46 = vsub.f32 %v2485_v44, %v2694_v61 }
 0x3c0   : > { %v2723_v47 = vadd.f32 %v2707_v43, %v2703_v38  ;;  %v2737_v38 = vadd.f32 0.0001, %v2733_v26 }
 0x3c1   : > { %v2722_v4 = vadd.f32 %v2706_v46, %v2702_v30  ;;  %v8378_v53 = vpop.f32.mrb[42].mxu1 }
 0x3c2   : > { %v2727_v51 = vadd.f32 0.0009, %v2723_v47  ;;  %v2709_v11 = vsub.f32 %v8378_v53, %v2697_v7  ;;  %v2495_v57 = vpop.f32.mrb[43].mxu1  ;;  %v2732_v7 = vmul.f32 2.0, %v10064_v28 }
 0x3c3   : > { %v2726_v48 = vadd.f32 0.0009, %v2722_v4  ;;  %v2708_v60 = vsub.f32 %v2495_v57, %v2696_v9  ;;  %v2734_v9 = vadd.f32 0.0001, %v2730_v56 }
 0x3c4   : > { %v2751_v49 = vmul.f32 %v2747_v55, %v2727_v51  ;;  %9365 = vrcp.f32 %v2727_v51  ;;  %v2725_v62 = vadd.f32 %v2709_v11, %v2705_v40  ;;  %v2736_v35 = vadd.f32 0.0001, %v2732_v7 }
 0x3c5   : > { %v2750_v54 = vmul.f32 %v2746_v58, %v2726_v48  ;;  %9367 = vrcp.f32 %v2726_v48  ;;  %v2724_v63 = vadd.f32 %v2708_v60, %v2704_v41  ;;  %v8399_v0 = vpop.f32.mrb[44].mxu1  ;;  %v7461_v41 = vsel %vm1349_vm5, 1.0, %v9437_v13 }
 0x3c6   : > { %9369 = vrcp.f32 %v2751_v49  ;;  %v2729_v14 = vadd.f32 0.0009, %v2725_v62  ;;  %v2711_v19 = vsub.f32 %v8399_v0, %v2699_v27  ;;  %v2671_v22 = vpop.f32.mrb[45].mxu1  ;;  %vm4289_vm5 = vcmp.lt.s32.totalorder %v9464_v1, 4 }
 0x3c7   : > { %9371 = vrcp.f32 %v2750_v54  ;;  %v2728_v15 = vadd.f32 0.0009, %v2724_v63  ;;  %v2710_v24 = vsub.f32 %v2671_v22, %v2698_v25  ;;  %vm4293_vm12 = vmand %vm4289_vm5, %vm9660_vm10 }
 0x3c8   : > { %v2753_v18 = vmul.f32 %v2749_v10, %v2729_v14  ;;  %9373 = vrcp.f32 %v2729_v14  ;;  %v2715_v61 = vmul.f32 2.0, %v2711_v19 }
 0x3c9   : > { %v2752_v31 = vmul.f32 %v2748_v23, %v2728_v15  ;;  %9375 = vrcp.f32 %v2728_v15  ;;  %v2714_v33 = vmul.f32 2.0, %v2710_v24  ;;  %v8402_v34 = vpop.f32.mrb[46].mxu1 }
 0x3ca   : > { %9377 = vrcp.f32 %v2753_v18  ;;  %v2719_v20 = vadd.f32 0.0009, %v2715_v61  ;;  %v2713_v27 = vsub.f32 %v8402_v34, %v10062_v8  ;;  %v2681_v21 = vpop.f32.mrb[47].mxu1 }
 0x3cb   : > { %9379 = vrcp.f32 %v2752_v31  ;;  %v2718_v25 = vadd.f32 0.0009, %v2714_v33  ;;  %v2712_v16 = vsub.f32 %v2681_v21, %v10064_v28 }
 0x3cc   : > { %v2739_v29 = vmul.f32 %v2735_v17, %v2719_v20  ;;  %v2717_v32 = vmul.f32 2.0, %v2713_v27 }
 0x3cd   : > { %v2738_v45 = vmul.f32 %v2734_v9, %v2718_v25  ;;  %v2716_v30 = vmul.f32 2.0, %v2712_v16  ;;  %v8427_v39 = vpop.f32.mrb[48].mxu1 }
 0x3ce   : > { %v9366_v40 = vpop.eup %9365  ;;  %v2721_v42 = vadd.f32 0.0009, %v2717_v32  ;;  %v3602_v8 = vmul.f32 %v8427_v39, %v8427_v39  ;;  %v3016_v43 = vpop.f32.mrb[49].mxu1 }
 0x3cf   : > { %v9368_v44 = vpop.eup %9367  ;;  %v2794_v46 = vmul.f32 %v9366_v40, %v2719_v20  ;;  %v2720_v47 = vadd.f32 0.0009, %v2716_v30  ;;  %v10073_v4 = vpack.c.bf16 %v8427_v39, %v3016_v43  ;;  %v3601_v28 = vmul.f32 %v3016_v43, %v3016_v43 }
 0x3d0   : > { %v9370_v53 = vpop.eup %9369  ;;  %v2792_v55 = vmul.f32 %v9368_v44, %v2718_v25  ;;  %v2741_v51 = vmul.f32 %v2737_v38, %v2721_v42 }
 0x3d1   : > { %v9372_v11 = vpop.eup %9371  ;;  %v2757_v57 = vmul.f32 %v9370_v53, %v2739_v29  ;;  %v2800_v58 = vmul.f32 %v7461_v41, %v2794_v46  ;;  %v2740_v48 = vmul.f32 %v2736_v35, %v2720_v47  ;;  %v8430_v60 = vpop.f32.mrb[50].mxu1  ;;  %9136 = vmatprep.subr.bf16.mxu0 %v10073_v4  ;;  %v10076_v36 = vpack.c.bf16 %v3602_v8, %v3601_v28 }
 0x3d2   : > { %v9374_v49 = vpop.eup %9373  ;;  %v2755_v62 = vmul.f32 %v9372_v11, %v2738_v45  ;;  %v2799_v56 = vmul.f32 %v7461_v41, %v2792_v55  ;;  %v3604_v54 = vmul.f32 %v8430_v60, %v8430_v60  ;;  %v3026_v63 = vpop.f32.mrb[51].mxu1  ;;  %9138 = vmatpush3.bf16.msra.mxu0 %v10073_v4 }
 0x3d3   : > { %v9376_v0 = vpop.eup %9375  ;;  %v2798_v10 = vmul.f32 %v9374_v49, %v2721_v42  ;;  %v10079_v14 = vpack.c.bf16 %v8430_v60, %v3026_v63  ;;  %v3603_v19 = vmul.f32 %v3026_v63, %v3026_v63  ;;  %v2771_v22 = vmul.f32 %v7461_v41, %v2757_v57 }
 0x3d4   : > { %v9378_v23 = vpop.eup %9377  ;;  %v2796_v15 = vmul.f32 %v9376_v0, %v2720_v47  ;;  %v2770_v24 = vmul.f32 %v7461_v41, %v2755_v62  ;;  %v2803_v17 = vsel %vm252_vm3, %v2799_v56, 0.0  ;;  %v2804_v18 = vsel %vm252_vm3, %v2800_v58, 0.0 }
 0x3d5   : > { %v9380_v61 = vpop.eup %9379  ;;  %v2802_v26 = vmul.f32 0.0, %v2798_v10  ;;  %v8455_v31 = vpop.f32.mrb[52].mxu1  ;;  %9140 = vmatprep.subr.bf16.mxu0 %v10079_v14  ;;  %v2761_v33 = vmul.f32 %v9378_v23, %v2741_v51  ;;  %v2775_v34 = vsel %vm252_vm3, %v2771_v22, 0.0  ;;  %v9155_v7 = vpack.c.bf16 %v3604_v54, %v3603_v19 }
 0x3d6   : > { %v2801_v20 = vmul.f32 0.0, %v2796_v15  ;;  %v3788_v27 = vmul.f32 %v8455_v31, %v8455_v31  ;;  %v3974_v21 = vmul.f32 %v8455_v31, %v8427_v39  ;;  %v3198_v9 = vpop.f32.mrb[53].mxu1  ;;  %9142 = vmatpush3.bf16.msra.mxu0 %v10079_v14  ;;  %v2759_v25 = vmul.f32 %v9380_v61, %v2740_v48 }
 0x3d7   : > { %v10086_v16 = vpack.c.bf16 %v8455_v31, %v3198_v9  ;;  %v3787_v29 = vmul.f32 %v3198_v9, %v3198_v9  ;;  %v3973_v32 = vmul.f32 %v3198_v9, %v3016_v43  ;;  %v2773_v38 = vmul.f32 0.0, %v2761_v33 }
 0x3d8   : > { %v2772_v45 = vmul.f32 0.0, %v2759_v25  ;;  %v2774_v30 = vsel %vm252_vm3, %v2770_v24, 0.0  ;;  %v2805_v40 = vadd.f32 %v2804_v18, %v2803_v17  ;;  %v2806_v35 = vsel %vm252_vm3, %v2801_v20, 0.0 }
 0x3d9   : > { %v8458_v41 = vpop.f32.mrb[54].mxu1  ;;  %8468 = vmatmul.mubr.f32.vlgmr.msra.gmra.mrb[56].mxu0 %v9437_v13  ;;  %9144 = vmatprep.subr.bf16.mxu0 %v10086_v16  ;;  %v2776_v39 = vadd.f32 %v2775_v34, %v2774_v30  ;;  %v2808_v42 = vsel %vm252_vm3, %v2802_v26, 0.0  ;;  %v9159_v8 = vpack.c.bf16 %v3788_v27, %v3787_v29  ;;  %v2779_v57 = vsel %vm252_vm3, %v2773_v38, 0.0 }
 0x3da   : > { %v3790_v44 = vmul.f32 %v8458_v41, %v8458_v41  ;;  %v3976_v46 = vmul.f32 %v8458_v41, %v8430_v60  ;;  %v3208_v47 = vpop.f32.mrb[55].mxu1  ;;  %9146 = vmatpush3.bf16.msra.mxu0 %v10086_v16  ;;  %8470 = vmatprep.mubr.f32.mxu0 %v9437_v13  ;;  %v2777_v43 = vsel %vm252_vm3, %v2772_v45, 0.0  ;;  %v2807_v28 = vadd.f32 %v2806_v35, %v2805_v40 }
 0x3db   : > { %v9147_v53 = vpack.c.bf16 %v8458_v41, %v3208_v47  ;;  %v3789_v55 = vmul.f32 %v3208_v47, %v3208_v47  ;;  %v3975_v51 = vmul.f32 %v3208_v47, %v3026_v63  ;;  %v2778_v11 = vadd.f32 %v2777_v43, %v2776_v39 }
 0x3dc   : > { %v2809_v58 = vadd.f32 %v2808_v42, %v2807_v28  ;;  %v9167_v48 = vpack.c.bf16 %v3974_v21, %v3973_v32 }
 0x3dd   : > { %8471 = vmatmul.mubr.f32.gmra.mrb[58].mxu0 %v9437_v13  ;;  %9148 = vmatprep.subr.bf16.mxu0 %v9147_v53  ;;  %v2780_v60 = vadd.f32 %v2779_v57, %v2778_v11  ;;  %v9163_v49 = vpack.c.bf16 %v3790_v44, %v3789_v55  ;;  %v9171_v62 = vpack.c.bf16 %v3976_v46, %v3975_v51 }
 0x3de   : > { %9150 = vmatpush3.bf16.msra.mxu0 %v9147_v53  ;;  %8489 = vmatprep.mubr.msk.f32.mxu0 %vm252_vm3, %v10058_v3 }
 0x3df   : > { %9152 = vmatprep.subr.bf16.mxu0 %v10076_v36  ;;  %2781 = vadd.xlane.f32.xlu1 %v2780_v60 }
 0x3e1   : > { %8490 = vmatmul.mubr.f32.vlgmr.msra.gmra.mrb[60].mxu0 %v9437_v13 }
 0x3e2   : > { %9154 = vmatpush3.bf16.msra.mxu0 %v10076_v36  ;;  %8492 = vmatprep.mubr.f32.mxu0 %v9437_v13  ;;  %v4297_v36 = vsel %vm4293_vm12, 0.5, %v9437_v13  ;;  %vm10235_vm12 = vmand %vm4289_vm5, %vm4301_vm11 }
 0x3e3   : > { %9156 = vmatprep.subr.bf16.mxu0 %v9155_v7  ;;  %2810 = vadd.xlane.f32.xlu1 %v2809_v58  ;;  %v10258_v51 = vsel %vm10235_vm12, %v9535_v37, 0.0 }
 0x3e5   : > { %8493 = vmatmul.mubr.f32.gmra.mrb[62].mxu0 %v9437_v13 }
 0x3e6   : > { %9158 = vmatpush3.bf16.msra.mxu0 %v9155_v7  ;;  %8511 = vmatprep.mubr.msk.f32.mxu0 %vm252_vm3, %v10058_v3 }
 0x3e7   : > { %9160 = vmatprep.subr.bf16.mxu0 %v9159_v8 }
 0x3e9   : > { %8512 = vmatmul.mubr.f32.vlgmr.msra.gmra.mrb[64].mxu0 %v9437_v13 }
 0x3ea   : > { %9162 = vmatpush3.bf16.msra.mxu0 %v9159_v8  ;;  %8514 = vmatprep.mubr.f32.mxu0 %v9437_v13 }
 0x3eb   : > { %9164 = vmatprep.subr.bf16.mxu0 %v9163_v49 }
 0x3ed   : > { %8515 = vmatmul.mubr.f32.gmra.mrb[66].mxu0 %v9437_v13 }
 0x3ee   : > { %9166 = vmatpush3.bf16.msra.mxu0 %v9163_v49  ;;  %8533 = vmatprep.mubr.msk.f32.mxu0 %vm252_vm3, %v10058_v3 }
 0x3ef   : > { %9168 = vmatprep.subr.bf16.mxu0 %v9167_v48 }
 0x3f1   : > { %8534 = vmatmul.mubr.f32.vlgmr.msra.gmra.mrb[68].mxu0 %v9437_v13 }
 0x3f2   : > { %9170 = vmatpush3.bf16.msra.mxu0 %v9167_v48  ;;  %8536 = vmatprep.mubr.f32.mxu0 %v9437_v13 }
 0x3f3   : > { %9172 = vmatprep.subr.bf16.mxu0 %v9171_v62 }
 0x3f5   : > { %8537 = vmatmul.mubr.f32.gmra.mrb[70].mxu0 %v9437_v13 }
 0x3f6   : > { %9174 = vmatpush3.bf16.msra.mxu0 %v9171_v62  ;;  %8555 = vmatprep.mubr.msk.f32.mxu0 %vm252_vm3, %v10058_v3 }
 0x3f7   : > { %9176 = vmatprep.subr.bf16.mxu0 %v10073_v4 }
 0x3f9   : > { %8556 = vmatmul.mubr.f32.vlgmr.msra.gmra.mrb[72].mxu0 %v9437_v13 }
 0x3fa   : > { %9178 = vmatpush3.bf16.msra.mxu0 %v10073_v4  ;;  %8558 = vmatprep.mubr.f32.mxu0 %v9437_v13 }
 0x3fb   : > { %9180 = vmatprep.subr.bf16.mxu0 %v10079_v14 }
 0x3fd   : > { %8559 = vmatmul.mubr.f32.gmra.mrb[74].mxu0 %v9437_v13 }
 0x3fe   : > { %9182 = vmatpush3.bf16.msra.mxu0 %v10079_v14  ;;  %8577 = vmatprep.mubr.msk.f32.mxu0 %vm252_vm3, %v4297_v36 }
 0x3ff   : > { %9192 = vmatprep.subr.bf16.mxu0 %v10086_v16 }
 0x401   : > { %8578 = vmatmul.mubr.f32.vlgmr.msra.gmra.mrb[76].mxu0 %v9437_v13 }
 0x402   : > { %9194 = vmatpush3.bf16.msra.mxu0 %v10086_v16  ;;  %8580 = vmatprep.mubr.f32.mxu0 %v9437_v13 }
 0x403   : > { %9196 = vmatprep.subr.bf16.mxu0 %v9147_v53 }
 0x405   : > { %8581 = vmatmul.mubr.f32.gmra.mrb[78].mxu0 %v9437_v13 }
 0x406   : > { %9198 = vmatpush3.bf16.msra.mxu0 %v9147_v53  ;;  %8605 = vmatprep.mubr.msk.f32.mxu0 %vm252_vm3, %v4297_v36 }
 0x409   : > { %8606 = vmatmul.mubr.f32.vlgmr.msra.gmra.mrb[80].mxu0 %v9437_v13 }
 0x40a   : > { %8608 = vmatprep.mubr.f32.mxu0 %v9437_v13 }
 0x40d   : > { %8609 = vmatmul.mubr.f32.gmra.mrb[82].mxu0 %v9437_v13 }
 0x40e   : > { %8633 = vmatprep.mubr.msk.f32.mxu0 %vm252_vm3, %v10258_v51 }
 0x46c   : > { %v2782_v3 = vpop.xlane.xlu1 %2781 }
 0x46d   : > { %v2783_v4 = vrot.slane %v2782_v3, 4 }
 0x46f   : > { %v2784_v56 = vadd.f32 %v2783_v4, %v2782_v3 }
 0x470   : > { %v2811_v54 = vpop.xlane.xlu1 %2810 }
 0x471   : > { %v2785_v63 = vrot.slane %v2784_v56, 2  ;;  %v2812_v0 = vrot.slane %v2811_v54, 4 }
 0x473   : > { %v2813_v10 = vadd.f32 %v2812_v0, %v2811_v54  ;;  %v2786_v14 = vadd.f32 %v2785_v63, %v2784_v56 }
 0x475   : > { %v2814_v19 = vrot.slane %v2813_v10, 2  ;;  %v2787_v22 = vrot.slane %v2786_v14, 1 }
 0x477   : > { %v2788_v23 = vadd.f32 %v2787_v22, %v2786_v14  ;;  %v2815_v15 = vadd.f32 %v2814_v19, %v2813_v10 }
 0x479   : > { %9323 = vpush %v2788_v23  ;;  %v2816_v24 = vrot.slane %v2815_v15, 1 }
 0x47b   : > { %v2817_v17 = vadd.f32 %v2816_v24, %v2815_v15 }
 0x47d   : > { %9325 = vpush %v2817_v17 }
 0x4aa   : > { %s9324_s20 = spop %9323 }
 0x4ab   : > { %s2790_s24 = smul.f32 0.00390625, %s9324_s20 }
 0x4ac   : > { %v8469_v18 = vpop.f32.mrb[56].mxu0 }
 0x4ad   : > { %v3303_v61 = vpop.f32.mrb[57].mxu0 }
 0x4ae   : > { %8475 = vmatprep.mubr.msk.f32.mxu1 %vm252_vm3, %v3303_v61  ;;  %s9326_s23 = spop %9325 }
 0x4af   : > { %8476 = vmatmul.mubr.msk.f32.vlgmr.msra.gmra.mrb[56].mxu1 %vm252_vm3, %v8469_v18  ;;  %s2819_s26 = smul.f32 0.00390625, %s9326_s23 }
 0x4b0   : > { %v8472_v26 = vpop.f32.mrb[58].mxu0  ;;  %8496 = vmatpush3.msk.msra.mxu1 %vm2832_vm0, %v9535_v37 }
 0x4b1   : > { %v3313_v31 = vpop.f32.mrb[59].mxu0  ;;  %8517 = vmatprep.subr.msk.mxu1 %vm2832_vm0, %v9535_v37 }
 0x4b2   : > { %8478 = vmatprep.mubr.msk.f32.mxu1 %vm252_vm3, %v3313_v31 }
 0x4b3   : > { %8479 = vmatmul.mubr.msk.f32.gmra.mrb[58].mxu1 %vm252_vm3, %v8472_v26 }
 0x4b4   : > { %v8491_v33 = vpop.f32.mrb[60].mxu0 }
 0x4b5   : > { %v3485_v34 = vpop.f32.mrb[61].mxu0 }
 0x4b6   : > { %8497 = vmatprep.mubr.msk.f32.mxu1 %vm252_vm3, %v3485_v34 }
 0x4b7   : > { %8498 = vmatmul.mubr.msk.f32.vlgmr.msra.gmra.mrb[60].mxu1 %vm252_vm3, %v8491_v33 }
 0x4b8   : > { %v8494_v7 = vpop.f32.mrb[62].mxu0  ;;  %8518 = vmatpush3.msk.msra.mxu1 %vm2832_vm0, %v9535_v37 }
 0x4b9   : > { %v3495_v20 = vpop.f32.mrb[63].mxu0  ;;  %8539 = vmatprep.subr.msk.mxu1 %vm2832_vm0, %v9535_v37 }
 0x4ba   : > { %8500 = vmatprep.mubr.msk.f32.mxu1 %vm252_vm3, %v3495_v20 }
 0x4bb   : > { %8501 = vmatmul.mubr.msk.f32.gmra.mrb[62].mxu1 %vm252_vm3, %v8494_v7 }
 0x4bc   : > { %v8513_v27 = vpop.f32.mrb[64].mxu0 }
 0x4bd   : > { %v3671_v21 = vpop.f32.mrb[65].mxu0 }
 0x4be   : > { %8519 = vmatprep.mubr.msk.f32.mxu1 %vm252_vm3, %v3671_v21 }
 0x4bf   : > { %8520 = vmatmul.mubr.msk.f32.vlgmr.msra.gmra.mrb[64].mxu1 %vm252_vm3, %v8513_v27 }
 0x4c0   : > { %v8516_v9 = vpop.f32.mrb[66].mxu0  ;;  %8540 = vmatpush3.msk.msra.mxu1 %vm2832_vm0, %v9535_v37 }
 0x4c1   : > { %v3681_v25 = vpop.f32.mrb[67].mxu0  ;;  %8561 = vmatprep.subr.msk.mxu1 %vm2832_vm0, %v9535_v37 }
 0x4c2   : > { %8522 = vmatprep.mubr.msk.f32.mxu1 %vm252_vm3, %v3681_v25 }
 0x4c3   : > { %8523 = vmatmul.mubr.msk.f32.gmra.mrb[66].mxu1 %vm252_vm3, %v8516_v9 }
 0x4c4   : > { %v8535_v16 = vpop.f32.mrb[68].mxu0 }
 0x4c5   : > { %v3857_v29 = vpop.f32.mrb[69].mxu0 }
 0x4c6   : > { %8541 = vmatprep.mubr.msk.f32.mxu1 %vm252_vm3, %v3857_v29 }
 0x4c7   : > { %8542 = vmatmul.mubr.msk.f32.vlgmr.msra.gmra.mrb[68].mxu1 %vm252_vm3, %v8535_v16 }
 0x4c8   : > { %v8538_v38 = vpop.f32.mrb[70].mxu0  ;;  %8562 = vmatpush3.msk.msra.mxu1 %vm2832_vm0, %v9535_v37 }
 0x4c9   : > { %v3867_v45 = vpop.f32.mrb[71].mxu0  ;;  %9184 = vmatprep.subr.msk.bf16.mxu1 %vm10180_vm15, %v9438_v59 }
 0x4ca   : > { %8544 = vmatprep.mubr.msk.f32.mxu1 %vm252_vm3, %v3867_v45 }
 0x4cb   : > { %8545 = vmatmul.mubr.msk.f32.gmra.mrb[70].mxu1 %vm252_vm3, %v8538_v38 }
 0x4cc   : > { %v8557_v30 = vpop.f32.mrb[72].mxu0 }
 0x4cd   : > { %v4043_v40 = vpop.f32.mrb[73].mxu0 }
 0x4ce   : > { %8563 = vmatprep.mubr.msk.f32.mxu1 %vm252_vm3, %v4043_v40 }
 0x4cf   : > { %8564 = vmatmul.mubr.msk.f32.vlgmr.msra.gmra.mrb[72].mxu1 %vm252_vm3, %v8557_v30 }
 0x4d0   : > { %v8560_v41 = vpop.f32.mrb[74].mxu0  ;;  %9186 = vmatpush3.bf16.msk.msra.mxu1 %vm10180_vm15, %v9438_v59 }
 0x4d1   : > { %v4053_v39 = vpop.f32.mrb[75].mxu0  ;;  %9188 = vmatprep.subr.msk.bf16.mxu1 %vm10202_vm9, %v9438_v59 }
 0x4d2   : > { %8566 = vmatprep.mubr.msk.f32.mxu1 %vm252_vm3, %v4053_v39 }
 0x4d3   : > { %8567 = vmatmul.mubr.msk.f32.gmra.mrb[74].mxu1 %vm252_vm3, %v8560_v41 }
 0x4d4   : > { %v8579_v42 = vpop.f32.mrb[76].mxu0  ;;  %9190 = vmatpush3.bf16.msk.msra.mxu1 %vm10202_vm9, %v9438_v59 }
 0x4d5   : > { %v4388_v8 = vpop.f32.mrb[77].mxu0  ;;  %9200 = vmatprep.subr.msk.bf16.mxu1 %vm10180_vm15, %v9438_v59 }
 0x4d6   : > { %8591 = vmatprep.mubr.msk.f32.mxu1 %vm252_vm3, %v4388_v8 }
 0x4d7   : > { %8592 = vmatmul.mubr.msk.f32.vlgmr.msra.gmra.mrb[76].mxu1 %vm252_vm3, %v8579_v42 }
 0x4d8   : > { %v8582_v44 = vpop.f32.mrb[78].mxu0  ;;  %9202 = vmatpush3.bf16.msk.msra.mxu1 %vm10180_vm15, %v9438_v59 }
 0x4d9   : > { %v4398_v46 = vpop.f32.mrb[79].mxu0  ;;  %9204 = vmatprep.subr.msk.bf16.mxu1 %vm10202_vm9, %v9438_v59 }
 0x4da   : > { %8594 = vmatprep.mubr.msk.f32.mxu1 %vm252_vm3, %v4398_v46 }
 0x4db   : > { %8595 = vmatmul.mubr.msk.f32.gmra.mrb[78].mxu1 %vm252_vm3, %v8582_v44 }
 0x4dc   : > { %v8607_v43 = vpop.f32.mrb[80].mxu0  ;;  %9206 = vmatpush3.bf16.msk.msra.mxu1 %vm10202_vm9, %v9438_v59  ;;  %vm7243_vm9 = vcmp.eq.s32.totalorder %v9466_v2, 2 }
 0x4dd   : > { %v4570_v28 = vpop.f32.mrb[81].mxu0  ;;  %8639 = vmatprep.subr.msk.mxu1 %vm10235_vm12, %v9535_v37 }
 0x4de   : > { %8619 = vmatprep.mubr.msk.f32.mxu1 %vm252_vm3, %v4570_v28 }
 0x4df   : > { %8620 = vmatmul.mubr.msk.f32.vlgmr.msra.gmra.mrb[80].mxu1 %vm252_vm3, %v8607_v43 }
 0x4e0   : > { %v8610_v53 = vpop.f32.mrb[82].mxu0  ;;  %8640 = vmatpush3.msk.msra.mxu1 %vm10235_vm12, %v9535_v37 }
 0x4e1   : > { %v4580_v55 = vpop.f32.mrb[83].mxu0  ;;  %8661 = vmatprep.subr.msk.mxu1 %vm10235_vm12, %v9535_v37 }
 0x4e2   : > { %8622 = vmatprep.mubr.msk.f32.mxu1 %vm252_vm3, %v4580_v55 }
 0x4e3   : > { %8623 = vmatmul.mubr.msk.f32.gmra.mrb[82].mxu1 %vm252_vm3, %v8610_v53 }
 0x582   : > { %v8477_v11 = vpop.f32.mrb[56].mxu1 }
 0x583   : > { %v3400_v57 = vpop.f32.mrb[57].mxu1  ;;  %v4160_v49 = vmul.f32 %v8477_v11, %v8477_v11 }
 0x584   : > { %v4159_v4 = vmul.f32 %v3400_v57, %v3400_v57 }
 0x586   : > { %v8480_v58 = vpop.f32.mrb[58].mxu1 }
 0x587   : > { %v3410_v48 = vpop.f32.mrb[59].mxu1  ;;  %v4162_v14 = vmul.f32 %v8480_v58, %v8480_v58 }
 0x588   : > { %v4161_v15 = vmul.f32 %v3410_v48, %v3410_v48 }
 0x58a   : > { %v8499_v60 = vpop.f32.mrb[60].mxu1 }
 0x58b   : > { %v4164_v62 = vmul.f32 %v8499_v60, %v8499_v60  ;;  %v4168_v36 = vmul.f32 %v8499_v60, %v8477_v11  ;;  %v3582_v3 = vpop.f32.mrb[61].mxu1 }
 0x58c   : > { %v4163_v56 = vmul.f32 %v3582_v3, %v3582_v3  ;;  %v4167_v54 = vmul.f32 %v3582_v3, %v3400_v57 }
 0x58d   : > { %v4212_v63 = vadd.f32 %v4164_v62, %v4160_v49  ;;  %v4200_v44 = vmul.f32 2.0, %v4168_v36 }
 0x58e   : > { %v4211_v0 = vadd.f32 %v4163_v56, %v4159_v4  ;;  %v8502_v10 = vpop.f32.mrb[62].mxu1  ;;  %v4199_v28 = vmul.f32 2.0, %v4167_v54 }
 0x58f   : > { %v4166_v19 = vmul.f32 %v8502_v10, %v8502_v10  ;;  %v10262_v22 = vmul.f32 %v8502_v10, %v8480_v58  ;;  %v3592_v23 = vpop.f32.mrb[63].mxu1  ;;  %v4216_v30 = vadd.f32 0.0001, %v4212_v63 }
 0x590   : > { %v4165_v24 = vmul.f32 %v3592_v23, %v3592_v23  ;;  %v10264_v17 = vmul.f32 %v3592_v23, %v3410_v48  ;;  %v4215_v39 = vadd.f32 0.0001, %v4211_v0 }
 0x591   : > { %v4214_v18 = vadd.f32 %v4166_v19, %v4162_v14  ;;  %v4202_v0 = vmul.f32 2.0, %v10262_v22 }
 0x592   : > { %v4213_v61 = vadd.f32 %v4165_v24, %v4161_v15  ;;  %v8521_v26 = vpop.f32.mrb[64].mxu1  ;;  %v4201_v23 = vmul.f32 2.0, %v10264_v17 }
 0x593   : > { %v4172_v31 = vsub.f32 %v8521_v26, %v4160_v49  ;;  %v3768_v33 = vpop.f32.mrb[65].mxu1  ;;  %v4218_v57 = vadd.f32 0.0001, %v4214_v18  ;;  %v4203_v18 = vadd.f32 0.0001, %v4199_v28 }
 0x594   : > { %v4171_v34 = vsub.f32 %v3768_v33, %v4159_v4  ;;  %v4217_v49 = vadd.f32 0.0001, %v4213_v61  ;;  %v4204_v4 = vadd.f32 0.0001, %v4200_v44  ;;  %v4206_v33 = vadd.f32 0.0001, %v4202_v0 }
 0x596   : > { %v8524_v7 = vpop.f32.mrb[66].mxu1 }
 0x597   : > { %v4174_v20 = vsub.f32 %v8524_v7, %v4162_v14  ;;  %v3778_v27 = vpop.f32.mrb[67].mxu1 }
 0x598   : > { %v4173_v21 = vsub.f32 %v3778_v27, %v4161_v15 }
 0x59a   : > { %v8543_v9 = vpop.f32.mrb[68].mxu1 }
 0x59b   : > { %v4176_v25 = vsub.f32 %v8543_v9, %v4164_v62  ;;  %v3954_v16 = vpop.f32.mrb[69].mxu1  ;;  %v7511_v9 = vsel %vm2832_vm0, 1.0, %v9437_v13  ;;  %vm5758_vm0 = vcmp.lt.s32.totalorder %v9464_v1, 2 }
 0x59c   : > { %v4175_v29 = vsub.f32 %v3954_v16, %v4163_v56  ;;  %vm5762_vm5 = vmand %vm5758_vm0, %vm9660_vm10  ;;  %vm5770_vm10 = vcmp.lt.s32.totalorder %v9466_v2, 2 }
 0x59d   : > { %v4192_v32 = vadd.f32 %v4176_v25, %v4172_v31  ;;  %vm5771_vm11 = vmand %vm5770_vm10, %vm9741_vm6 }
 0x59e   : > { %v4191_v38 = vadd.f32 %v4175_v29, %v4171_v34  ;;  %v8546_v45 = vpop.f32.mrb[70].mxu1  ;;  %vm5772_vm13 = vmand %vm5770_vm10, %vm9746_vm7 }
 0x59f   : > { %v4196_v40 = vadd.f32 0.0009, %v4192_v32  ;;  %v4178_v35 = vsub.f32 %v8546_v45, %v4166_v19  ;;  %v3964_v41 = vpop.f32.mrb[71].mxu1  ;;  %vm10380_vm14 = vmpackc.low %vm5772_vm13, %vm5771_vm11  ;;  %vm7263_vm11 = vcmp.eq.s32.totalorder %v9466_v2, 12  ;;  %vm7267_vm13 = vcmask 122880  }
 0x5a0   : > { %v4195_v42 = vadd.f32 0.0009, %v4191_v38  ;;  %v4177_v8 = vsub.f32 %v3964_v41, %v4165_v24  ;;  %vm5773_vm6 = vmand %vm5770_vm10, %vm9770_vm1 }
 0x5a1   : > { %v4220_v46 = vmul.f32 %v4216_v30, %v4196_v40  ;;  %9381 = vrcp.f32 %v4196_v40  ;;  %v4194_v43 = vadd.f32 %v4178_v35, %v4174_v20  ;;  %vm5774_vm7 = vmand %vm5770_vm10, %vm9777_vm2  ;;  %vm7227_vm2 = vcmp.eq.s32.totalorder %v9466_v2, 0 }
 0x5a2   : > { %v4219_v53 = vmul.f32 %v4215_v39, %v4195_v42  ;;  %9383 = vrcp.f32 %v4195_v42  ;;  %v4193_v55 = vadd.f32 %v4177_v8, %v4173_v21  ;;  %v8565_v11 = vpop.f32.mrb[72].mxu1  ;;  %v4205_v21 = vadd.f32 0.0001, %v4201_v23  ;;  %vm10402_vm15 = vmpackc.low %vm5774_vm7, %vm5773_vm6 }
 0x5a3   : > { %9385 = vrcp.f32 %v4220_v46  ;;  %v4198_v58 = vadd.f32 0.0009, %v4194_v43  ;;  %v4180_v48 = vsub.f32 %v8565_v11, %v4168_v36  ;;  %v4140_v60 = vpop.f32.mrb[73].mxu1  ;;  %vm10435_vm1 = vmand %vm5758_vm0, %vm5770_vm10  ;;  %vm7251_vm0 = vcmp.eq.s32.totalorder %v9466_v2, 3 }
 0x5a4   : > { %9387 = vrcp.f32 %v4219_v53  ;;  %v4197_v62 = vadd.f32 0.0009, %v4193_v55  ;;  %v4179_v3 = vsub.f32 %v4140_v60, %v4167_v54  ;;  %vm7259_vm10 = vcmp.eq.s32.totalorder %v9466_v2, 4 }
 0x5a5   : > { %v4222_v56 = vmul.f32 %v4218_v57, %v4198_v58  ;;  %9389 = vrcp.f32 %v4198_v58  ;;  %v4184_v63 = vmul.f32 2.0, %v4180_v48 }
 0x5a6   : > { %v4221_v10 = vmul.f32 %v4217_v49, %v4197_v62  ;;  %9391 = vrcp.f32 %v4197_v62  ;;  %v4183_v14 = vmul.f32 2.0, %v4179_v3  ;;  %v8568_v19 = vpop.f32.mrb[74].mxu1 }
 0x5a7   : > { %9393 = vrcp.f32 %v4222_v56  ;;  %v4188_v15 = vadd.f32 0.0009, %v4184_v63  ;;  %v4182_v36 = vsub.f32 %v8568_v19, %v10262_v22  ;;  %v4150_v24 = vpop.f32.mrb[75].mxu1 }
 0x5a8   : > { %9395 = vrcp.f32 %v4221_v10  ;;  %v4187_v54 = vadd.f32 0.0009, %v4183_v14  ;;  %v4181_v61 = vsub.f32 %v4150_v24, %v10264_v17 }
 0x5a9   : > { %v4208_v26 = vmul.f32 %v4204_v4, %v4188_v15  ;;  %v4186_v31 = vmul.f32 2.0, %v4182_v36 }
 0x5aa   : > { %v4207_v34 = vmul.f32 %v4203_v18, %v4187_v54  ;;  %v4185_v7 = vmul.f32 2.0, %v4181_v61  ;;  %v8593_v20 = vpop.f32.mrb[76].mxu1 }
 0x5ab   : > { %v9382_v27 = vpop.eup %9381  ;;  %v4190_v25 = vadd.f32 0.0009, %v4186_v31  ;;  %v5071_v22 = vmul.f32 %v8593_v20, %v8593_v20  ;;  %v4485_v16 = vpop.f32.mrb[77].mxu1 }
 0x5ac   : > { %v9384_v29 = vpop.eup %9383  ;;  %v4263_v32 = vmul.f32 %v9382_v27, %v4188_v15  ;;  %v4189_v38 = vadd.f32 0.0009, %v4185_v7  ;;  %v10273_v45 = vpack.c.bf16 %v8593_v20, %v4485_v16  ;;  %v5070_v17 = vmul.f32 %v4485_v16, %v4485_v16 }
 0x5ad   : > { %v9386_v30 = vpop.eup %9385  ;;  %v4261_v40 = vmul.f32 %v9384_v29, %v4187_v54  ;;  %v4210_v35 = vmul.f32 %v4206_v33, %v4190_v25 }
 0x5ae   : > { %v9388_v41 = vpop.eup %9387  ;;  %v4226_v39 = vmul.f32 %v9386_v30, %v4208_v26  ;;  %v4269_v42 = vmul.f32 0.0, %v4263_v32  ;;  %v4209_v8 = vmul.f32 %v4205_v21, %v4189_v38  ;;  %v8596_v44 = vpop.f32.mrb[78].mxu1  ;;  %9208 = vmatprep.subr.bf16.mxu0 %v10273_v45  ;;  %v10276_v46 = vpack.c.bf16 %v5071_v22, %v5070_v17 }
 0x5af   : > { %v9390_v43 = vpop.eup %9389  ;;  %v4224_v28 = vmul.f32 %v9388_v41, %v4207_v34  ;;  %v4268_v53 = vmul.f32 %v7511_v9, %v4261_v40  ;;  %v4495_v55 = vpop.f32.mrb[79].mxu1  ;;  %9210 = vmatpush3.bf16.msra.mxu0 %v10273_v45  ;;  %v5073_v4 = vmul.f32 %v8596_v44, %v8596_v44 }
 0x5b0   : > { %v9392_v11 = vpop.eup %9391  ;;  %v4240_v57 = vmul.f32 0.0, %v4226_v39  ;;  %v4273_v58 = vsel %vm252_vm3, %v4269_v42, 0.0  ;;  %v4267_v48 = vmul.f32 %v9390_v43, %v4190_v25  ;;  %v10280_v60 = vpack.c.bf16 %v8596_v44, %v4495_v55 }
 0x5b1   : > { %v9394_v49 = vpop.eup %9393  ;;  %v4239_v62 = vmul.f32 %v7511_v9, %v4224_v28  ;;  %v4265_v3 = vmul.f32 %v9392_v11, %v4189_v38  ;;  %v4272_v56 = vsel %vm252_vm3, %v4268_v53, 0.0  ;;  %v5072_v10 = vmul.f32 %v4495_v55, %v4495_v55 }
 0x5b2   : > { %v9396_v63 = vpop.eup %9395  ;;  %v4271_v0 = vmul.f32 0.0, %v4267_v48  ;;  %v8621_v14 = vpop.f32.mrb[80].mxu1  ;;  %9212 = vmatprep.subr.bf16.mxu0 %v10280_v60  ;;  %v4274_v19 = vadd.f32 %v4273_v58, %v4272_v56  ;;  %v4230_v23 = vmul.f32 %v9394_v49, %v4210_v35  ;;  %v4244_v54 = vsel %vm252_vm3, %v4240_v57, 0.0 }
 0x5b3   : > { %v4228_v15 = vmul.f32 %v9396_v63, %v4209_v8  ;;  %v4270_v36 = vmul.f32 0.0, %v4265_v3  ;;  %v5443_v24 = vmul.f32 %v8621_v14, %v8593_v20  ;;  %v4667_v18 = vpop.f32.mrb[81].mxu1  ;;  %9214 = vmatpush3.bf16.msra.mxu0 %v10280_v60  ;;  %v5257_v61 = vmul.f32 %v8621_v14, %v8621_v14 }
 0x5b4   : > { %v10286_v26 = vpack.c.bf16 %v8621_v14, %v4667_v18  ;;  %v5442_v31 = vmul.f32 %v4667_v18, %v4485_v16  ;;  %v5256_v34 = vmul.f32 %v4667_v18, %v4667_v18  ;;  %v4243_v27 = vsel %vm252_vm3, %v4239_v62, 0.0 }
 0x5b5   : > { %v4241_v33 = vmul.f32 0.0, %v4228_v15  ;;  %v4275_v7 = vsel %vm252_vm3, %v4270_v36, 0.0  ;;  %v4242_v9 = vmul.f32 0.0, %v4230_v23  ;;  %v4245_v25 = vadd.f32 %v4244_v54, %v4243_v27 }
 0x5b6   : > { %v8624_v21 = vpop.f32.mrb[82].mxu1  ;;  %8634 = vmatmul.mubr.f32.vlgmr.msra.gmra.mrb[84].mxu0 %v9437_v13  ;;  %9216 = vmatprep.subr.bf16.mxu0 %v10286_v26  ;;  %v4276_v20 = vadd.f32 %v4275_v7, %v4274_v19  ;;  %v9227_v22 = vpack.c.bf16 %v5073_v4, %v5072_v10  ;;  %v4277_v16 = vsel %vm252_vm3, %v4271_v0, 0.0  ;;  %v9231_v42 = vpack.c.bf16 %v5257_v61, %v5256_v34 }
 0x5b7   : > { %v5259_v29 = vmul.f32 %v8624_v21, %v8624_v21  ;;  %v5445_v32 = vmul.f32 %v8624_v21, %v8596_v44  ;;  %v4677_v38 = vpop.f32.mrb[83].mxu1  ;;  %9218 = vmatpush3.bf16.msra.mxu0 %v10286_v26  ;;  %8636 = vmatprep.mubr.f32.mxu0 %v9437_v13  ;;  %v4246_v17 = vsel %vm252_vm3, %v4241_v33, 0.0  ;;  %v9239_v8 = vpack.c.bf16 %v5443_v24, %v5442_v31 }
 0x5b8   : > { %v9219_v30 = vpack.c.bf16 %v8624_v21, %v4677_v38  ;;  %v5258_v40 = vmul.f32 %v4677_v38, %v4677_v38  ;;  %v5444_v35 = vmul.f32 %v4677_v38, %v4495_v55  ;;  %v4278_v41 = vadd.f32 %v4277_v16, %v4276_v20 }
 0x5b9   : > { %v4247_v39 = vadd.f32 %v4246_v17, %v4245_v25  ;;  %v4248_v44 = vsel %vm252_vm3, %v4242_v9, 0.0 }
 0x5ba   : > { %8637 = vmatmul.mubr.f32.gmra.mrb[86].mxu0 %v9437_v13  ;;  %9220 = vmatprep.subr.bf16.mxu0 %v9219_v30  ;;  %v9235_v43 = vpack.c.bf16 %v5259_v29, %v5258_v40  ;;  %v9243_v28 = vpack.c.bf16 %v5445_v32, %v5444_v35 }
 0x5bb   : > { %4279 = vadd.xlane.f32.xlu1 %v4278_v41  ;;  %9222 = vmatpush3.bf16.msra.mxu0 %v9219_v30  ;;  %v4249_v53 = vadd.f32 %v4248_v44, %v4247_v39 }
 0x5bc   : > { %9224 = vmatprep.subr.bf16.mxu0 %v10276_v46  ;;  %8655 = vmatprep.mubr.msk.f32.mxu0 %vm252_vm3, %v10258_v51 }
 0x5bd   : > { %4250 = vadd.xlane.f32.xlu0 %v4249_v53 }
 0x5be   : > { %8656 = vmatmul.mubr.f32.vlgmr.msra.gmra.mrb[88].mxu0 %v9437_v13 }
 0x5bf   : > { %9226 = vmatpush3.bf16.msra.mxu0 %v10276_v46  ;;  %8658 = vmatprep.mubr.f32.mxu0 %v9437_v13  ;;  %v5766_v46 = vsel %vm5762_vm5, 0.5, %v9437_v13  ;;  %vm7255_vm5 = vcmp.eq.s32.totalorder %v9466_v2, 11 }
 0x5c0   : > { %9228 = vmatprep.subr.bf16.mxu0 %v9227_v22 }
 0x5c2   : > { %8659 = vmatmul.mubr.f32.gmra.mrb[90].mxu0 %v9437_v13 }
 0x5c3   : > { %9230 = vmatpush3.bf16.msra.mxu0 %v9227_v22  ;;  %8677 = vmatprep.mubr.msk.f32.mxu0 %vm252_vm3, %v10258_v51 }
 0x5c4   : > { %9232 = vmatprep.subr.bf16.mxu0 %v9231_v42 }
 0x5c6   : > { %8678 = vmatmul.mubr.f32.vlgmr.msra.gmra.mrb[92].mxu0 %v9437_v13 }
 0x5c7   : > { %9234 = vmatpush3.bf16.msra.mxu0 %v9231_v42  ;;  %8680 = vmatprep.mubr.f32.mxu0 %v9437_v13 }
 0x5c8   : > { %9236 = vmatprep.subr.bf16.mxu0 %v9235_v43 }
 0x5ca   : > { %8681 = vmatmul.mubr.f32.gmra.mrb[94].mxu0 %v9437_v13 }
 0x5cb   : > { %9238 = vmatpush3.bf16.msra.mxu0 %v9235_v43  ;;  %8699 = vmatprep.mubr.msk.f32.mxu0 %vm252_vm3, %v10258_v51 }
 0x5cc   : > { %9240 = vmatprep.subr.bf16.mxu0 %v9239_v8 }
 0x5ce   : > { %8700 = vmatmul.mubr.f32.vlgmr.msra.gmra.mrb[96].mxu0 %v9437_v13 }
 0x5cf   : > { %9242 = vmatpush3.bf16.msra.mxu0 %v9239_v8  ;;  %8702 = vmatprep.mubr.f32.mxu0 %v9437_v13 }
 0x5d0   : > { %9244 = vmatprep.subr.bf16.mxu0 %v9243_v28 }
 0x5d2   : > { %8703 = vmatmul.mubr.f32.gmra.mrb[98].mxu0 %v9437_v13 }
 0x5d3   : > { %9246 = vmatpush3.bf16.msra.mxu0 %v9243_v28  ;;  %8721 = vmatprep.mubr.msk.f32.mxu0 %vm252_vm3, %v10258_v51 }
 0x5d4   : > { %9248 = vmatprep.subr.bf16.mxu0 %v10273_v45 }
 0x5d6   : > { %8722 = vmatmul.mubr.f32.vlgmr.msra.gmra.mrb[100].mxu0 %v9437_v13 }
 0x5d7   : > { %9250 = vmatpush3.bf16.msra.mxu0 %v10273_v45  ;;  %8724 = vmatprep.mubr.f32.mxu0 %v9437_v13 }
 0x5d8   : > { %9252 = vmatprep.subr.bf16.mxu0 %v10280_v60 }
 0x5da   : > { %8725 = vmatmul.mubr.f32.gmra.mrb[102].mxu0 %v9437_v13 }
 0x5db   : > { %9254 = vmatpush3.bf16.msra.mxu0 %v10280_v60  ;;  %8743 = vmatprep.mubr.msk.f32.mxu0 %vm252_vm3, %v5766_v46 }
 0x5dc   : > { %9264 = vmatprep.subr.bf16.mxu0 %v10286_v26 }
 0x5de   : > { %8744 = vmatmul.mubr.f32.vlgmr.msra.gmra.mrb[104].mxu0 %v9437_v13 }
 0x5df   : > { %9266 = vmatpush3.bf16.msra.mxu0 %v10286_v26  ;;  %8746 = vmatprep.mubr.f32.mxu0 %v9437_v13 }
 0x5e0   : > { %9268 = vmatprep.subr.bf16.mxu0 %v9219_v30 }
 0x5e2   : > { %8747 = vmatmul.mubr.f32.gmra.mrb[106].mxu0 %v9437_v13 }
 0x5e3   : > { %9270 = vmatpush3.bf16.msra.mxu0 %v9219_v30  ;;  %8771 = vmatprep.mubr.msk.f32.mxu0 %vm252_vm3, %v5766_v46 }
 0x5e6   : > { %8772 = vmatmul.mubr.f32.vlgmr.msra.gmra.mrb[108].mxu0 %v9437_v13 }
 0x5e7   : > { %8774 = vmatprep.mubr.f32.mxu0 %v9437_v13 }
 0x5ea   : > { %8775 = vmatmul.mubr.f32.gmra.mrb[110].mxu0 %v9437_v13 }
 0x648   : > { %v4280_v12 = vpop.xlane.xlu1 %4279 }
 0x649   : > { %v4281_v51 = vrot.slane %v4280_v12, 4 }
 0x64a   : > { %v4251_v45 = vpop.xlane.xlu0 %4250 }
 0x64b   : > { %v4282_v55 = vadd.f32 %v4281_v51, %v4280_v12  ;;  %v4252_v11 = vrot.slane %v4251_v45, 4 }
 0x64d   : > { %v4283_v57 = vrot.slane %v4282_v55, 2  ;;  %v4253_v58 = vadd.f32 %v4252_v11, %v4251_v45 }
 0x64f   : > { %v4254_v48 = vrot.slane %v4253_v58, 2  ;;  %v4284_v60 = vadd.f32 %v4283_v57, %v4282_v55 }
 0x651   : > { %v4255_v49 = vadd.f32 %v4254_v48, %v4253_v58  ;;  %v4285_v62 = vrot.slane %v4284_v60, 1 }
 0x653   : > { %v4256_v3 = vrot.slane %v4255_v49, 1  ;;  %v4286_v56 = vadd.f32 %v4285_v62, %v4284_v60 }
 0x655   : > { %v4257_v4 = vadd.f32 %v4256_v3, %v4255_v49 }
 0x657   : > { %9327 = vpush %v4257_v4 }
 0x658   : > { %9329 = vpush %v4286_v56 }
 0x688   : > { %s9328_s25 = spop %9327 }
 0x689   : > { %v8635_v63 = vpop.f32.mrb[84].mxu0  ;;  %s4259_s27 = smul.f32 0.015625, %s9328_s25  ;;  %s9330_s28 = spop %9329 }
 0x68a   : > { %v4772_v0 = vpop.f32.mrb[85].mxu0  ;;  %s4288_s30 = smul.f32 0.015625, %s9330_s28 }
 0x68b   : > { %8641 = vmatprep.mubr.msk.f32.mxu1 %vm252_vm3, %v4772_v0 }
 0x68c   : > { %8642 = vmatmul.mubr.msk.f32.vlgmr.msra.gmra.mrb[84].mxu1 %vm252_vm3, %v8635_v63 }
 0x68d   : > { %v8638_v10 = vpop.f32.mrb[86].mxu0  ;;  %8662 = vmatpush3.msk.msra.mxu1 %vm10235_vm12, %v9535_v37 }
 0x68e   : > { %v4782_v14 = vpop.f32.mrb[87].mxu0  ;;  %8683 = vmatprep.subr.msk.mxu1 %vm10235_vm12, %v9535_v37 }
 0x68f   : > { %8644 = vmatprep.mubr.msk.f32.mxu1 %vm252_vm3, %v4782_v14 }
 0x690   : > { %8645 = vmatmul.mubr.msk.f32.gmra.mrb[86].mxu1 %vm252_vm3, %v8638_v10 }
 0x691   : > { %v8657_v19 = vpop.f32.mrb[88].mxu0 }
 0x692   : > { %v4954_v23 = vpop.f32.mrb[89].mxu0 }
 0x693   : > { %8663 = vmatprep.mubr.msk.f32.mxu1 %vm252_vm3, %v4954_v23 }
 0x694   : > { %8664 = vmatmul.mubr.msk.f32.vlgmr.msra.gmra.mrb[88].mxu1 %vm252_vm3, %v8657_v19 }
 0x695   : > { %v8660_v15 = vpop.f32.mrb[90].mxu0  ;;  %8684 = vmatpush3.msk.msra.mxu1 %vm10235_vm12, %v9535_v37 }
 0x696   : > { %v4964_v36 = vpop.f32.mrb[91].mxu0  ;;  %8705 = vmatprep.subr.msk.mxu1 %vm10235_vm12, %v9535_v37 }
 0x697   : > { %8666 = vmatprep.mubr.msk.f32.mxu1 %vm252_vm3, %v4964_v36 }
 0x698   : > { %8667 = vmatmul.mubr.msk.f32.gmra.mrb[90].mxu1 %vm252_vm3, %v8660_v15 }
 0x699   : > { %v8679_v24 = vpop.f32.mrb[92].mxu0 }
 0x69a   : > { %v5140_v18 = vpop.f32.mrb[93].mxu0 }
 0x69b   : > { %8685 = vmatprep.mubr.msk.f32.mxu1 %vm252_vm3, %v5140_v18 }
 0x69c   : > { %8686 = vmatmul.mubr.msk.f32.vlgmr.msra.gmra.mrb[92].mxu1 %vm252_vm3, %v8679_v24 }
 0x69d   : > { %v8682_v54 = vpop.f32.mrb[94].mxu0  ;;  %8706 = vmatpush3.msk.msra.mxu1 %vm10235_vm12, %v9535_v37 }
 0x69e   : > { %v5150_v61 = vpop.f32.mrb[95].mxu0  ;;  %8727 = vmatprep.subr.msk.mxu1 %vm10235_vm12, %v9535_v37 }
 0x69f   : > { %8688 = vmatprep.mubr.msk.f32.mxu1 %vm252_vm3, %v5150_v61 }
 0x6a0   : > { %8689 = vmatmul.mubr.msk.f32.gmra.mrb[94].mxu1 %vm252_vm3, %v8682_v54 }
 0x6a1   : > { %v8701_v26 = vpop.f32.mrb[96].mxu0 }
 0x6a2   : > { %v5326_v31 = vpop.f32.mrb[97].mxu0 }
 0x6a3   : > { %8707 = vmatprep.mubr.msk.f32.mxu1 %vm252_vm3, %v5326_v31 }
 0x6a4   : > { %8708 = vmatmul.mubr.msk.f32.vlgmr.msra.gmra.mrb[96].mxu1 %vm252_vm3, %v8701_v26 }
 0x6a5   : > { %v8704_v50 = vpop.f32.mrb[98].mxu0  ;;  %8728 = vmatpush3.msk.msra.mxu1 %vm10235_vm12, %v9535_v37 }
 0x6a6   : > { %v5336_v34 = vpop.f32.mrb[99].mxu0  ;;  %9256 = vmatprep.subr.msk.bf16.mxu1 %vm10380_vm14, %v9438_v59 }
 0x6a7   : > { %8710 = vmatprep.mubr.msk.f32.mxu1 %vm252_vm3, %v5336_v34 }
 0x6a8   : > { %8711 = vmatmul.mubr.msk.f32.gmra.mrb[98].mxu1 %vm252_vm3, %v8704_v50 }
 0x6a9   : > { %v8723_v52 = vpop.f32.mrb[100].mxu0 }
 0x6aa   : > { %v5512_v7 = vpop.f32.mrb[101].mxu0 }
 0x6ab   : > { %8729 = vmatprep.mubr.msk.f32.mxu1 %vm252_vm3, %v5512_v7 }
 0x6ac   : > { %8730 = vmatmul.mubr.msk.f32.vlgmr.msra.gmra.mrb[100].mxu1 %vm252_vm3, %v8723_v52 }
 0x6ad   : > { %v8726_v5 = vpop.f32.mrb[102].mxu0  ;;  %9258 = vmatpush3.bf16.msk.msra.mxu1 %vm10380_vm14, %v9438_v59 }
 0x6ae   : > { %v5522_v21 = vpop.f32.mrb[103].mxu0  ;;  %9260 = vmatprep.subr.msk.bf16.mxu1 %vm10402_vm15, %v9438_v59 }
 0x6af   : > { %8732 = vmatprep.mubr.msk.f32.mxu1 %vm252_vm3, %v5522_v21 }
 0x6b0   : > { %8733 = vmatmul.mubr.msk.f32.gmra.mrb[102].mxu1 %vm252_vm3, %v8726_v5 }
 0x6b1   : > { %v8745_v6 = vpop.f32.mrb[104].mxu0  ;;  %9262 = vmatpush3.bf16.msk.msra.mxu1 %vm10402_vm15, %v9438_v59 }
 0x6b2   : > { %v5857_v20 = vpop.f32.mrb[105].mxu0  ;;  %9272 = vmatprep.subr.msk.bf16.mxu1 %vm10380_vm14, %v9438_v59 }
 0x6b3   : > { %8757 = vmatprep.mubr.msk.f32.mxu1 %vm252_vm3, %v5857_v20 }
 0x6b4   : > { %8758 = vmatmul.mubr.msk.f32.vlgmr.msra.gmra.mrb[104].mxu1 %vm252_vm3, %v8745_v6 }
 0x6b5   : > { %v8748_v9 = vpop.f32.mrb[106].mxu0  ;;  %9274 = vmatpush3.bf16.msk.msra.mxu1 %vm10380_vm14, %v9438_v59 }
 0x6b6   : > { %v5867_v25 = vpop.f32.mrb[107].mxu0  ;;  %9276 = vmatprep.subr.msk.bf16.mxu1 %vm10402_vm15, %v9438_v59 }
 0x6b7   : > { %8760 = vmatprep.mubr.msk.f32.mxu1 %vm252_vm3, %v5867_v25 }
 0x6b8   : > { %8761 = vmatmul.mubr.msk.f32.gmra.mrb[106].mxu1 %vm252_vm3, %v8748_v9 }
 0x6b9   : > { %v8773_v29 = vpop.f32.mrb[108].mxu0  ;;  %9278 = vmatpush3.bf16.msk.msra.mxu1 %vm10402_vm15, %v9438_v59  ;;  %v10458_v59 = vsel %vm10435_vm1, %v9535_v37, 0.0 }
 0x6ba   : > { %v6039_v32 = vpop.f32.mrb[109].mxu0  ;;  %8805 = vmatprep.subr.msk.mxu1 %vm10435_vm1, %v9535_v37  ;;  %8799 = vmatprep.mubr.msk.f32.mxu0 %vm252_vm3, %v10458_v59 }
 0x6bb   : > { %8785 = vmatprep.mubr.msk.f32.mxu1 %vm252_vm3, %v6039_v32 }
 0x6bc   : > { %8786 = vmatmul.mubr.msk.f32.vlgmr.msra.gmra.mrb[108].mxu1 %vm252_vm3, %v8773_v29 }
 0x6bd   : > { %v8776_v38 = vpop.f32.mrb[110].mxu0  ;;  %8806 = vmatpush3.msk.msra.mxu1 %vm10435_vm1, %v9535_v37 }
 0x6be   : > { %v6049_v1 = vpop.f32.mrb[111].mxu0  ;;  %8827 = vmatprep.subr.msk.mxu1 %vm10435_vm1, %v9535_v37 }
 0x6bf   : > { %8788 = vmatprep.mubr.msk.f32.mxu1 %vm252_vm3, %v6049_v1 }
 0x6c0   : > { %8789 = vmatmul.mubr.msk.f32.gmra.mrb[110].mxu1 %vm252_vm3, %v8776_v38 }
 0x75f   : > { %v8643_v16 = vpop.f32.mrb[84].mxu1 }
 0x760   : > { %v4869_v17 = vpop.f32.mrb[85].mxu1  ;;  %v5629_v41 = vmul.f32 %v8643_v16, %v8643_v16 }
 0x761   : > { %v5628_v44 = vmul.f32 %v4869_v17, %v4869_v17 }
 0x763   : > { %v8646_v30 = vpop.f32.mrb[86].mxu1 }
 0x764   : > { %v4879_v40 = vpop.f32.mrb[87].mxu1  ;;  %v5631_v51 = vmul.f32 %v8646_v30, %v8646_v30 }
 0x765   : > { %v5630_v57 = vmul.f32 %v4879_v40, %v4879_v40 }
 0x767   : > { %v8665_v35 = vpop.f32.mrb[88].mxu1 }
 0x768   : > { %v5633_v39 = vmul.f32 %v8665_v35, %v8665_v35  ;;  %v5637_v42 = vmul.f32 %v8665_v35, %v8643_v16  ;;  %v5051_v8 = vpop.f32.mrb[89].mxu1 }
 0x769   : > { %v5632_v43 = vmul.f32 %v5051_v8, %v5051_v8  ;;  %v5636_v28 = vmul.f32 %v5051_v8, %v4869_v17 }
 0x76a   : > { %v5681_v53 = vadd.f32 %v5633_v39, %v5629_v41  ;;  %v5669_v7 = vmul.f32 2.0, %v5637_v42 }
 0x76b   : > { %v5680_v46 = vadd.f32 %v5632_v43, %v5628_v44  ;;  %v8668_v12 = vpop.f32.mrb[90].mxu1  ;;  %v5668_v21 = vmul.f32 2.0, %v5636_v28 }
 0x76c   : > { %v5635_v45 = vmul.f32 %v8668_v12, %v8668_v12  ;;  %v10462_v55 = vmul.f32 %v8668_v12, %v8646_v30  ;;  %v5061_v11 = vpop.f32.mrb[91].mxu1  ;;  %v5685_v61 = vadd.f32 0.0001, %v5681_v53  ;;  %v5673_v30 = vadd.f32 0.0001, %v5669_v7 }
 0x76d   : > { %v5634_v58 = vmul.f32 %v5061_v11, %v5061_v11  ;;  %v10464_v48 = vmul.f32 %v5061_v11, %v4879_v40  ;;  %v5684_v50 = vadd.f32 0.0001, %v5680_v46  ;;  %v5672_v12 = vadd.f32 0.0001, %v5668_v21 }
 0x76e   : > { %v5683_v60 = vadd.f32 %v5635_v45, %v5631_v51 }
 0x76f   : > { %v5682_v49 = vadd.f32 %v5634_v58, %v5630_v57  ;;  %v8687_v62 = vpop.f32.mrb[92].mxu1 }
 0x770   : > { %v5641_v3 = vsub.f32 %v8687_v62, %v5629_v41  ;;  %v5237_v4 = vpop.f32.mrb[93].mxu1  ;;  %v5687_v25 = vadd.f32 0.0001, %v5683_v60  ;;  %v5671_v41 = vmul.f32 2.0, %v10462_v55 }
 0x771   : > { %v5640_v56 = vsub.f32 %v5237_v4, %v5628_v44  ;;  %v5686_v1 = vadd.f32 0.0001, %v5682_v49  ;;  %v7560_v4 = vsel %vm10235_vm12, 1.0, %v9437_v13  ;;  %vm7247_vm12 = vcmp.eq.s32.totalorder %v9466_v2, 10 }
 0x773   : > { %v8690_v63 = vpop.f32.mrb[94].mxu1 }
 0x774   : > { %v5643_v0 = vsub.f32 %v8690_v63, %v5631_v51  ;;  %v5247_v10 = vpop.f32.mrb[95].mxu1 }
 0x775   : > { %v5642_v14 = vsub.f32 %v5247_v10, %v5630_v57  ;;  %v5675_v57 = vadd.f32 0.0001, %v5671_v41 }
 0x777   : > { %v8709_v19 = vpop.f32.mrb[96].mxu1 }
 0x778   : > { %v5645_v23 = vsub.f32 %v8709_v19, %v5633_v39  ;;  %v5423_v15 = vpop.f32.mrb[97].mxu1 }
 0x779   : > { %v5644_v36 = vsub.f32 %v5423_v15, %v5632_v43  ;;  %v5670_v43 = vmul.f32 2.0, %v10464_v48 }
 0x77a   : > { %v5661_v24 = vadd.f32 %v5645_v23, %v5641_v3 }
 0x77b   : > { %v5660_v18 = vadd.f32 %v5644_v36, %v5640_v56  ;;  %v8712_v54 = vpop.f32.mrb[98].mxu1  ;;  %v5674_v3 = vadd.f32 0.0001, %v5670_v43 }
 0x77c   : > { %v5665_v26 = vadd.f32 0.0009, %v5661_v24  ;;  %v5647_v31 = vsub.f32 %v8712_v54, %v5635_v45  ;;  %v5433_v33 = vpop.f32.mrb[99].mxu1 }
 0x77d   : > { %v5664_v34 = vadd.f32 0.0009, %v5660_v18  ;;  %v5646_v52 = vsub.f32 %v5433_v33, %v5634_v58 }
 0x77e   : > { %v5689_v27 = vmul.f32 %v5685_v61, %v5665_v26  ;;  %9397 = vrcp.f32 %v5665_v26  ;;  %v5663_v5 = vadd.f32 %v5647_v31, %v5643_v0 }
 0x77f   : > { %v5688_v6 = vmul.f32 %v5684_v50, %v5664_v34  ;;  %9399 = vrcp.f32 %v5664_v34  ;;  %v5662_v20 = vadd.f32 %v5646_v52, %v5642_v14  ;;  %v8731_v9 = vpop.f32.mrb[100].mxu1 }
 0x780   : > { %9401 = vrcp.f32 %v5689_v27  ;;  %v5667_v29 = vadd.f32 0.0009, %v5663_v5  ;;  %v5649_v32 = vsub.f32 %v8731_v9, %v5637_v42  ;;  %v5609_v38 = vpop.f32.mrb[101].mxu1 }
 0x781   : > { %9403 = vrcp.f32 %v5688_v6  ;;  %v5666_v16 = vadd.f32 0.0009, %v5662_v20  ;;  %v5648_v17 = vsub.f32 %v5609_v38, %v5636_v28 }
 0x782   : > { %v5691_v40 = vmul.f32 %v5687_v25, %v5667_v29  ;;  %9405 = vrcp.f32 %v5667_v29  ;;  %v5653_v35 = vmul.f32 2.0, %v5649_v32 }
 0x783   : > { %v5690_v39 = vmul.f32 %v5686_v1, %v5666_v16  ;;  %9407 = vrcp.f32 %v5666_v16  ;;  %v5652_v8 = vmul.f32 2.0, %v5648_v17  ;;  %v8734_v44 = vpop.f32.mrb[102].mxu1 }
 0x784   : > { %9409 = vrcp.f32 %v5691_v40  ;;  %v5657_v53 = vadd.f32 0.0009, %v5653_v35  ;;  %v5651_v42 = vsub.f32 %v8734_v44, %v10462_v55  ;;  %v5619_v46 = vpop.f32.mrb[103].mxu1 }
 0x785   : > { %9411 = vrcp.f32 %v5690_v39  ;;  %v5656_v28 = vadd.f32 0.0009, %v5652_v8  ;;  %v5650_v51 = vsub.f32 %v5619_v46, %v10464_v48 }
 0x786   : > { %v5677_v45 = vmul.f32 %v5673_v30, %v5657_v53  ;;  %v5655_v11 = vmul.f32 2.0, %v5651_v42 }
 0x787   : > { %v5676_v58 = vmul.f32 %v5672_v12, %v5656_v28  ;;  %v5654_v60 = vmul.f32 2.0, %v5650_v51  ;;  %v8759_v49 = vpop.f32.mrb[104].mxu1 }
 0x788   : > { %v9398_v62 = vpop.eup %9397  ;;  %v5659_v56 = vadd.f32 0.0009, %v5655_v11  ;;  %v6540_v55 = vmul.f32 %v8759_v49, %v8759_v49  ;;  %v5954_v63 = vpop.f32.mrb[105].mxu1 }
 0x789   : > { %v9400_v0 = vpop.eup %9399  ;;  %v5732_v10 = vmul.f32 %v9398_v62, %v5657_v53  ;;  %v5658_v14 = vadd.f32 0.0009, %v5654_v60  ;;  %v9279_v19 = vpack.c.bf16 %v8759_v49, %v5954_v63  ;;  %v6539_v48 = vmul.f32 %v5954_v63, %v5954_v63 }
 0x78a   : > { %v9402_v23 = vpop.eup %9401  ;;  %v5730_v15 = vmul.f32 %v9400_v0, %v5656_v28  ;;  %v5679_v36 = vmul.f32 %v5675_v57, %v5659_v56 }
 0x78b   : > { %v9404_v24 = vpop.eup %9403  ;;  %v5695_v18 = vmul.f32 %v9402_v23, %v5677_v45  ;;  %v5738_v54 = vmul.f32 0.0, %v5732_v10  ;;  %v5678_v61 = vmul.f32 %v5674_v3, %v5658_v14  ;;  %v8762_v26 = vpop.f32.mrb[106].mxu1  ;;  %9280 = vmatprep.subr.bf16.mxu0 %v9279_v19  ;;  %v10473_v31 = vpack.c.bf16 %v6540_v55, %v6539_v48 }
 0x78c   : > { %v9406_v47 = vpop.eup %9405  ;;  %v5693_v33 = vmul.f32 %v9404_v24, %v5676_v58  ;;  %v5737_v50 = vmul.f32 %v7560_v4, %v5730_v15  ;;  %v5964_v34 = vpop.f32.mrb[107].mxu1  ;;  %9282 = vmatpush3.bf16.msra.mxu0 %v9279_v19  ;;  %v6542_v25 = vmul.f32 %v8762_v26, %v8762_v26 }
 0x78d   : > { %v9408_v52 = vpop.eup %9407  ;;  %v5709_v7 = vmul.f32 0.0, %v5695_v18  ;;  %v5742_v27 = vsel %vm252_vm3, %v5738_v54, 0.0  ;;  %v5736_v5 = vmul.f32 %v9406_v47, %v5659_v56  ;;  %v9283_v21 = vpack.c.bf16 %v8762_v26, %v5964_v34 }
 0x78e   : > { %v9410_v6 = vpop.eup %9409  ;;  %v5708_v20 = vmul.f32 %v7560_v4, %v5693_v33  ;;  %v5734_v9 = vmul.f32 %v9408_v52, %v5658_v14  ;;  %v5741_v29 = vsel %vm252_vm3, %v5737_v50, 0.0  ;;  %v6541_v1 = vmul.f32 %v5964_v34, %v5964_v34 }
 0x78f   : > { %v9412_v32 = vpop.eup %9411  ;;  %v5740_v38 = vmul.f32 0.0, %v5736_v5  ;;  %v8787_v16 = vpop.f32.mrb[108].mxu1  ;;  %9284 = vmatprep.subr.bf16.mxu0 %v9283_v21  ;;  %v5743_v17 = vadd.f32 %v5742_v27, %v5741_v29  ;;  %v5699_v30 = vmul.f32 %v9410_v6, %v5679_v36  ;;  %v5713_v8 = vsel %vm252_vm3, %v5709_v7, 0.0 }
 0x790   : > { %v5697_v40 = vmul.f32 %v9412_v32, %v5678_v61  ;;  %v5739_v35 = vmul.f32 0.0, %v5734_v9  ;;  %v6912_v41 = vmul.f32 %v8787_v16, %v8759_v49  ;;  %v6136_v39 = vpop.f32.mrb[109].mxu1  ;;  %9286 = vmatpush3.bf16.msra.mxu0 %v9283_v21  ;;  %v6726_v44 = vmul.f32 %v8787_v16, %v8787_v16 }
 0x791   : > { %v9287_v43 = vpack.c.bf16 %v8787_v16, %v6136_v39  ;;  %v6911_v53 = vmul.f32 %v6136_v39, %v5954_v63  ;;  %v6725_v46 = vmul.f32 %v6136_v39, %v6136_v39  ;;  %v5712_v28 = vsel %vm252_vm3, %v5708_v20, 0.0 }
 0x792   : > { %v5710_v42 = vmul.f32 0.0, %v5697_v40  ;;  %v5744_v12 = vsel %vm252_vm3, %v5739_v35, 0.0  ;;  %v5711_v11 = vmul.f32 0.0, %v5699_v30  ;;  %v5714_v57 = vadd.f32 %v5713_v8, %v5712_v28 }
 0x793   : > { %v8790_v51 = vpop.f32.mrb[110].mxu1  ;;  %8800 = vmatmul.mubr.f32.vlgmr.msra.gmra.mrb[112].mxu0 %v9437_v13  ;;  %9288 = vmatprep.subr.bf16.mxu0 %v9287_v43  ;;  %v5745_v45 = vadd.f32 %v5744_v12, %v5743_v17  ;;  %v9299_v58 = vpack.c.bf16 %v6542_v25, %v6541_v1  ;;  %v5746_v3 = vsel %vm252_vm3, %v5740_v38, 0.0  ;;  %v9303_v14 = vpack.c.bf16 %v6726_v44, %v6725_v46 }
 0x794   : > { %v6728_v60 = vmul.f32 %v8790_v51, %v8790_v51  ;;  %v6914_v49 = vmul.f32 %v8790_v51, %v8762_v26  ;;  %v6146_v62 = vpop.f32.mrb[111].mxu1  ;;  %9290 = vmatpush3.bf16.msra.mxu0 %v9287_v43  ;;  %8802 = vmatprep.mubr.f32.mxu0 %v9437_v13  ;;  %v5715_v4 = vsel %vm252_vm3, %v5710_v42, 0.0  ;;  %v9311_v19 = vpack.c.bf16 %v6912_v41, %v6911_v53 }
 0x795   : > { %v9291_v56 = vpack.c.bf16 %v8790_v51, %v6146_v62  ;;  %v6727_v55 = vmul.f32 %v6146_v62, %v6146_v62  ;;  %v6913_v63 = vmul.f32 %v6146_v62, %v5964_v34  ;;  %v5747_v0 = vadd.f32 %v5746_v3, %v5745_v45 }
 0x796   : > { %v5716_v10 = vadd.f32 %v5715_v4, %v5714_v57  ;;  %v5717_v48 = vsel %vm252_vm3, %v5711_v11, 0.0 }
 0x797   : > { %8803 = vmatmul.mubr.f32.gmra.mrb[114].mxu0 %v9437_v13  ;;  %9292 = vmatprep.subr.bf16.mxu0 %v9291_v56  ;;  %v9307_v23 = vpack.c.bf16 %v6728_v60, %v6727_v55  ;;  %v9315_v15 = vpack.c.bf16 %v6914_v49, %v6913_v63 }
 0x798   : > { %5748 = vadd.xlane.f32.xlu1 %v5747_v0  ;;  %9294 = vmatpush3.bf16.msra.mxu0 %v9291_v56  ;;  %v5718_v36 = vadd.f32 %v5717_v48, %v5716_v10 }
 0x799   : > { %9296 = vmatprep.subr.bf16.mxu0 %v10473_v31  ;;  %8821 = vmatprep.mubr.msk.f32.mxu0 %vm252_vm3, %v10458_v59 }
 0x79a   : > { %5719 = vadd.xlane.f32.xlu0 %v5718_v36 }
 0x79b   : > { %8822 = vmatmul.mubr.f32.vlgmr.msra.gmra.mrb[116].mxu0 %v9437_v13 }
 0x79c   : > { %9298 = vmatpush3.bf16.msra.mxu0 %v10473_v31  ;;  %8824 = vmatprep.mubr.f32.mxu0 %v9437_v13 }
 0x79d   : > { %9300 = vmatprep.subr.bf16.mxu0 %v9299_v58 }
 0x79f   : > { %8825 = vmatmul.mubr.f32.gmra.mrb[118].mxu0 %v9437_v13 }
 0x7a0   : > { %9302 = vmatpush3.bf16.msra.mxu0 %v9299_v58  ;;  %8843 = vmatprep.mubr.msk.f32.mxu0 %vm252_vm3, %v10458_v59 }
 0x7a1   : > { %9304 = vmatprep.subr.bf16.mxu0 %v9303_v14 }
 0x7a3   : > { %8844 = vmatmul.mubr.f32.vlgmr.msra.gmra.mrb[120].mxu0 %v9437_v13 }
 0x7a4   : > { %9306 = vmatpush3.bf16.msra.mxu0 %v9303_v14  ;;  %8846 = vmatprep.mubr.f32.mxu0 %v9437_v13 }
 0x7a5   : > { %9308 = vmatprep.subr.bf16.mxu0 %v9307_v23 }
 0x7a7   : > { %8847 = vmatmul.mubr.f32.gmra.mrb[122].mxu0 %v9437_v13 }
 0x7a8   : > { %9310 = vmatpush3.bf16.msra.mxu0 %v9307_v23  ;;  %8865 = vmatprep.mubr.msk.f32.mxu0 %vm252_vm3, %v10458_v59 }
 0x7a9   : > { %9312 = vmatprep.subr.bf16.mxu0 %v9311_v19 }
 0x7ab   : > { %8866 = vmatmul.mubr.f32.vlgmr.msra.gmra.mrb[124].mxu0 %v9437_v13 }
 0x7ac   : > { %9314 = vmatpush3.bf16.msra.mxu0 %v9311_v19  ;;  %8868 = vmatprep.mubr.f32.mxu0 %v9437_v13 }
 0x7ad   : > { %9316 = vmatprep.subr.bf16.mxu0 %v9315_v15 }
 0x7af   : > { %8869 = vmatmul.mubr.f32.gmra.mrb[126].mxu0 %v9437_v13 }
 0x7b0   : > { %9318 = vmatpush3.bf16.msra.mxu0 %v9315_v15  ;;  %8887 = vmatprep.mubr.msk.f32.mxu0 %vm252_vm3, %v10458_v59 }
 0x7b3   : > { %8888 = vmatmul.mubr.f32.vlgmr.msra.gmra.mrb[128].mxu0 %v9437_v13 }
 0x7b4   : > { %8890 = vmatprep.mubr.f32.mxu0 %v9437_v13 }
 0x7b7   : > { %8891 = vmatmul.mubr.f32.gmra.mrb[130].mxu0 %v9437_v13 }
 0x825   : > { %v5749_v24 = vpop.xlane.xlu1 %5748 }
 0x826   : > { %v5750_v18 = vrot.slane %v5749_v24, 4 }
 0x827   : > { %v5720_v54 = vpop.xlane.xlu0 %5719 }
 0x828   : > { %v5751_v61 = vadd.f32 %v5750_v18, %v5749_v24  ;;  %v5721_v26 = vrot.slane %v5720_v54, 4 }
 0x82a   : > { %v5752_v31 = vrot.slane %v5751_v61, 2  ;;  %v5722_v47 = vadd.f32 %v5721_v26, %v5720_v54 }
 0x82c   : > { %v5723_v33 = vrot.slane %v5722_v47, 2  ;;  %v5753_v50 = vadd.f32 %v5752_v31, %v5751_v61 }
 0x82e   : > { %v5724_v34 = vadd.f32 %v5723_v33, %v5722_v47  ;;  %v5754_v52 = vrot.slane %v5753_v50, 1 }
 0x830   : > { %v5725_v7 = vrot.slane %v5724_v34, 1  ;;  %v5755_v59 = vadd.f32 %v5754_v52, %v5753_v50 }
 0x832   : > { %v5726_v27 = vadd.f32 %v5725_v7, %v5724_v34 }
 0x834   : > { %9331 = vpush %v5726_v27 }
 0x835   : > { %9333 = vpush %v5755_v59 }
 0x865   : > { %s9332_s29 = spop %9331 }
 0x866   : > { %v8801_v5 = vpop.f32.mrb[112].mxu0  ;;  %s5728_s3 = smul.f32 0.0625, %s9332_s29  ;;  %s9334_s4 = spop %9333 }
 0x867   : > { %v6241_v21 = vpop.f32.mrb[113].mxu0  ;;  %s5757_s5 = smul.f32 0.0625, %s9334_s4 }
 0x868   : > { %8807 = vmatprep.mubr.msk.f32.mxu1 %vm252_vm3, %v6241_v21 }
 0x869   : > { %8808 = vmatmul.mubr.msk.f32.vlgmr.msra.gmra.mrb[112].mxu1 %vm252_vm3, %v8801_v5 }
 0x86a   : > { %v8804_v6 = vpop.f32.mrb[114].mxu0  ;;  %8828 = vmatpush3.msk.msra.mxu1 %vm10435_vm1, %v9535_v37 }
 0x86b   : > { %v6251_v20 = vpop.f32.mrb[115].mxu0  ;;  %8849 = vmatprep.subr.msk.mxu1 %vm10435_vm1, %v9535_v37 }
 0x86c   : > { %8810 = vmatprep.mubr.msk.f32.mxu1 %vm252_vm3, %v6251_v20 }
 0x86d   : > { %8811 = vmatmul.mubr.msk.f32.gmra.mrb[114].mxu1 %vm252_vm3, %v8804_v6 }
 0x86e   : > { %v8823_v9 = vpop.f32.mrb[116].mxu0 }
 0x86f   : > { %v6423_v25 = vpop.f32.mrb[117].mxu0 }
 0x870   : > { %8829 = vmatprep.mubr.msk.f32.mxu1 %vm252_vm3, %v6423_v25 }
 0x871   : > { %8830 = vmatmul.mubr.msk.f32.vlgmr.msra.gmra.mrb[116].mxu1 %vm252_vm3, %v8823_v9 }
 0x872   : > { %v8826_v29 = vpop.f32.mrb[118].mxu0  ;;  %8850 = vmatpush3.msk.msra.mxu1 %vm10435_vm1, %v9535_v37 }
 0x873   : > { %v6433_v32 = vpop.f32.mrb[119].mxu0  ;;  %8871 = vmatprep.subr.msk.mxu1 %vm10435_vm1, %v9535_v37 }
 0x874   : > { %8832 = vmatprep.mubr.msk.f32.mxu1 %vm252_vm3, %v6433_v32 }
 0x875   : > { %8833 = vmatmul.mubr.msk.f32.gmra.mrb[118].mxu1 %vm252_vm3, %v8826_v29 }
 0x876   : > { %v8845_v38 = vpop.f32.mrb[120].mxu0 }
 0x877   : > { %v6609_v1 = vpop.f32.mrb[121].mxu0 }
 0x878   : > { %8851 = vmatprep.mubr.msk.f32.mxu1 %vm252_vm3, %v6609_v1 }
 0x879   : > { %8852 = vmatmul.mubr.msk.f32.vlgmr.msra.gmra.mrb[120].mxu1 %vm252_vm3, %v8845_v38 }
 0x87a   : > { %v8848_v16 = vpop.f32.mrb[122].mxu0  ;;  %8872 = vmatpush3.msk.msra.mxu1 %vm10435_vm1, %v9535_v37 }
 0x87b   : > { %v6619_v17 = vpop.f32.mrb[123].mxu0  ;;  %8893 = vmatprep.subr.msk.mxu1 %vm10435_vm1, %v9535_v37 }
 0x87c   : > { %8854 = vmatprep.mubr.msk.f32.mxu1 %vm252_vm3, %v6619_v17 }
 0x87d   : > { %8855 = vmatmul.mubr.msk.f32.gmra.mrb[122].mxu1 %vm252_vm3, %v8848_v16 }
 0x87e   : > { %v8867_v30 = vpop.f32.mrb[124].mxu0 }
 0x87f   : > { %v6795_v40 = vpop.f32.mrb[125].mxu0 }
 0x880   : > { %8873 = vmatprep.mubr.msk.f32.mxu1 %vm252_vm3, %v6795_v40 }
 0x881   : > { %8874 = vmatmul.mubr.msk.f32.vlgmr.msra.gmra.mrb[124].mxu1 %vm252_vm3, %v8867_v30 }
 0x882   : > { %v8870_v35 = vpop.f32.mrb[126].mxu0  ;;  %8894 = vmatpush3.msk.msra.mxu1 %vm10435_vm1, %v9535_v37 }
 0x883   : > { %v6805_v41 = vpop.f32.mrb[127].mxu0 }
 0x884   : > { %8876 = vmatprep.mubr.msk.f32.mxu1 %vm252_vm3, %v6805_v41 }
 0x885   : > { %8877 = vmatmul.mubr.msk.f32.gmra.mrb[126].mxu1 %vm252_vm3, %v8870_v35 }
 0x886   : > { %v8889_v39 = vpop.f32.mrb[128].mxu0 }
 0x887   : > { %v6981_v8 = vpop.f32.mrb[129].mxu0 }
 0x888   : > { %8895 = vmatprep.mubr.msk.f32.mxu1 %vm252_vm3, %v6981_v8 }
 0x889   : > { %8896 = vmatmul.mubr.msk.f32.vlgmr.msra.gmra.mrb[128].mxu1 %vm252_vm3, %v8889_v39 }
 0x88a   : > { %v8892_v44 = vpop.f32.mrb[130].mxu0 }
 0x88b   : > { %v6991_v43 = vpop.f32.mrb[131].mxu0 }
 0x88c   : > { %8898 = vmatprep.mubr.msk.f32.mxu1 %vm252_vm3, %v6991_v43 }
 0x88d   : > { %8899 = vmatmul.mubr.msk.f32.gmra.mrb[130].mxu1 %vm252_vm3, %v8892_v44 }
 0x93c   : > { %v8809_v53 = vpop.f32.mrb[112].mxu1 }
 0x93d   : > { %v6338_v42 = vpop.f32.mrb[113].mxu1  ;;  %v7098_v28 = vmul.f32 %v8809_v53, %v8809_v53 }
 0x93e   : > { %v7097_v57 = vmul.f32 %v6338_v42, %v6338_v42 }
 0x940   : > { %v8812_v37 = vpop.f32.mrb[114].mxu1 }
 0x941   : > { %v6348_v46 = vpop.f32.mrb[115].mxu1  ;;  %v7100_v4 = vmul.f32 %v8812_v37, %v8812_v37 }
 0x942   : > { %v7099_v0 = vmul.f32 %v6348_v46, %v6348_v46 }
 0x944   : > { %v8831_v12 = vpop.f32.mrb[116].mxu1 }
 0x945   : > { %v7102_v51 = vmul.f32 %v8831_v12, %v8831_v12  ;;  %v7106_v45 = vmul.f32 %v8831_v12, %v8809_v53  ;;  %v6520_v11 = vpop.f32.mrb[117].mxu1 }
 0x946   : > { %v7101_v58 = vmul.f32 %v6520_v11, %v6520_v11  ;;  %v7105_v60 = vmul.f32 %v6520_v11, %v6338_v42 }
 0x947   : > { %v7150_v49 = vadd.f32 %v7102_v51, %v7098_v28  ;;  %v7138_v25 = vmul.f32 2.0, %v7106_v45 }
 0x948   : > { %v7149_v62 = vadd.f32 %v7101_v58, %v7097_v57  ;;  %v8834_v3 = vpop.f32.mrb[118].mxu1  ;;  %v7137_v38 = vmul.f32 2.0, %v7105_v60 }
 0x949   : > { %v7104_v56 = vmul.f32 %v8834_v3, %v8834_v3  ;;  %v10549_v55 = vmul.f32 %v8834_v3, %v8812_v37  ;;  %v6530_v63 = vpop.f32.mrb[119].mxu1  ;;  %v7154_v27 = vadd.f32 0.0001, %v7150_v49  ;;  %v7142_v43 = vadd.f32 0.0001, %v7138_v25 }
 0x94a   : > { %v7103_v10 = vmul.f32 %v6530_v63, %v6530_v63  ;;  %v10551_v14 = vmul.f32 %v6530_v63, %v6348_v46  ;;  %v7153_v6 = vadd.f32 0.0001, %v7149_v62  ;;  %v7141_v37 = vadd.f32 0.0001, %v7137_v38 }
 0x94b   : > { %v7152_v19 = vadd.f32 %v7104_v56, %v7100_v4 }
 0x94c   : > { %v7151_v48 = vadd.f32 %v7103_v10, %v7099_v0  ;;  %v8853_v23 = vpop.f32.mrb[120].mxu1 }
 0x94d   : > { %v7110_v15 = vsub.f32 %v8853_v23, %v7098_v28  ;;  %v6706_v36 = vpop.f32.mrb[121].mxu1  ;;  %v7156_v30 = vadd.f32 0.0001, %v7152_v19 }
 0x94e   : > { %v7109_v24 = vsub.f32 %v6706_v36, %v7097_v57  ;;  %v7155_v39 = vadd.f32 0.0001, %v7151_v48 }
 0x950   : > { %v8856_v18 = vpop.f32.mrb[122].mxu1 }
 0x951   : > { %v7112_v54 = vsub.f32 %v8856_v18, %v7100_v4  ;;  %v6716_v61 = vpop.f32.mrb[123].mxu1 }
 0x952   : > { %v7111_v26 = vsub.f32 %v6716_v61, %v7099_v0 }
 0x954   : > { %v8875_v31 = vpop.f32.mrb[124].mxu1 }
 0x955   : > { %v7114_v47 = vsub.f32 %v8875_v31, %v7102_v51  ;;  %v6892_v33 = vpop.f32.mrb[125].mxu1  ;;  %v7140_v51 = vmul.f32 2.0, %v10549_v55 }
 0x956   : > { %v7113_v50 = vsub.f32 %v6892_v33, %v7101_v58  ;;  %v7139_v58 = vmul.f32 2.0, %v10551_v14 }
 0x957   : > { %v7130_v34 = vadd.f32 %v7114_v47, %v7110_v15  ;;  %v7144_v0 = vadd.f32 0.0001, %v7140_v51 }
 0x958   : > { %v7129_v52 = vadd.f32 %v7113_v50, %v7109_v24  ;;  %v8878_v7 = vpop.f32.mrb[126].mxu1  ;;  %v7143_v48 = vadd.f32 0.0001, %v7139_v58 }
 0x959   : > { %v7134_v59 = vadd.f32 0.0009, %v7130_v34  ;;  %v7116_v5 = vsub.f32 %v8878_v7, %v7104_v56  ;;  %v6902_v21 = vpop.f32.mrb[127].mxu1 }
 0x95a   : > { %v7133_v20 = vadd.f32 0.0009, %v7129_v52  ;;  %v7115_v9 = vsub.f32 %v6902_v21, %v7103_v10 }
 0x95b   : > { %v7158_v29 = vmul.f32 %v7154_v27, %v7134_v59  ;;  %9413 = vrcp.f32 %v7134_v59  ;;  %v7132_v32 = vadd.f32 %v7116_v5, %v7112_v54 }
 0x95c   : > { %v7157_v1 = vmul.f32 %v7153_v6, %v7133_v20  ;;  %9415 = vrcp.f32 %v7133_v20  ;;  %v7131_v16 = vadd.f32 %v7115_v9, %v7111_v26  ;;  %v8897_v17 = vpop.f32.mrb[128].mxu1 }
 0x95d   : > { %9417 = vrcp.f32 %v7158_v29  ;;  %v7136_v40 = vadd.f32 0.0009, %v7132_v32  ;;  %v7118_v35 = vsub.f32 %v8897_v17, %v7106_v45  ;;  %v7078_v41 = vpop.f32.mrb[129].mxu1 }
 0x95e   : > { %9419 = vrcp.f32 %v7157_v1  ;;  %v7135_v8 = vadd.f32 0.0009, %v7131_v16  ;;  %v7117_v44 = vsub.f32 %v7078_v41, %v7105_v60 }
 0x95f   : > { %v7160_v53 = vmul.f32 %v7156_v30, %v7136_v40  ;;  %9421 = vrcp.f32 %v7136_v40  ;;  %v7122_v42 = vmul.f32 2.0, %v7118_v35 }
 0x960   : > { %v7159_v46 = vmul.f32 %v7155_v39, %v7135_v8  ;;  %9423 = vrcp.f32 %v7135_v8  ;;  %v7121_v12 = vmul.f32 2.0, %v7117_v44  ;;  %v8900_v28 = vpop.f32.mrb[130].mxu1 }
 0x961   : > { %9425 = vrcp.f32 %v7160_v53  ;;  %v7126_v11 = vadd.f32 0.0009, %v7122_v42  ;;  %v7120_v45 = vsub.f32 %v8900_v28, %v10549_v55  ;;  %v7088_v57 = vpop.f32.mrb[131].mxu1  ;;  %v7609_v55 = vsel %vm10435_vm1, 1.0, %v9437_v13 }
 0x962   : > { %9427 = vrcp.f32 %v7159_v46  ;;  %v7125_v60 = vadd.f32 0.0009, %v7121_v12  ;;  %v7119_v49 = vsub.f32 %v7088_v57, %v10551_v14 }
 0x963   : > { %v7146_v62 = vmul.f32 %v7142_v43, %v7126_v11  ;;  %v7124_v3 = vmul.f32 2.0, %v7120_v45 }
 0x964   : > { %v7145_v4 = vmul.f32 %v7141_v37, %v7125_v60  ;;  %v7123_v56 = vmul.f32 2.0, %v7119_v49 }
 0x965   : > { %v9414_v63 = vpop.eup %9413  ;;  %v7128_v10 = vadd.f32 0.0009, %v7124_v3  ;;  %v7228_v3 = vstv %s1287_s22 }
 0x966   : > { %v9416_v19 = vpop.eup %9415  ;;  %v7201_v23 = vmul.f32 %v9414_v63, %v7126_v11  ;;  %v7127_v15 = vadd.f32 0.0009, %v7123_v56  ;;  %v7240_v63 = vstv %s2819_s26 }
 0x967   : > { %v9418_v36 = vpop.eup %9417  ;;  %v7199_v24 = vmul.f32 %v9416_v19, %v7125_v60  ;;  %v7148_v18 = vmul.f32 %v7144_v0, %v7128_v10  ;;  %v7229_v0 = vsel %vm7227_vm2, %v7228_v3, 0.0 }
 0x968   : > { %v9420_v54 = vpop.eup %9419  ;;  %v7164_v14 = vmul.f32 %v9418_v36, %v7146_v62  ;;  %v7207_v61 = vmul.f32 0.0, %v7201_v23  ;;  %v7147_v26 = vmul.f32 %v7143_v48, %v7127_v15  ;;  %v7232_v62 = vstv %s1316_s21 }
 0x969   : > { %v9422_v31 = vpop.eup %9421  ;;  %v7162_v47 = vmul.f32 %v9420_v54, %v7145_v4  ;;  %v7206_v33 = vmul.f32 %v7609_v55, %v7199_v24  ;;  %v7236_v4 = vstv %s2790_s24  ;;  %v7244_v48 = vstv %s4259_s27 }
 0x96a   : > { %v9424_v50 = vpop.eup %9423  ;;  %v7178_v34 = vmul.f32 0.0, %v7164_v14  ;;  %v7211_v52 = vsel %vm252_vm3, %v7207_v61, 0.0  ;;  %v7205_v7 = vmul.f32 %v9422_v31, %v7128_v10  ;;  %v7237_v10 = vsel %vm7235_vm4, %v7236_v4, 0.0 }
 0x96b   : > { %v9426_v27 = vpop.eup %9425  ;;  %v7177_v59 = vmul.f32 %v7609_v55, %v7162_v47  ;;  %v7203_v22 = vmul.f32 %v9424_v50, %v7127_v15  ;;  %v7210_v13 = vsel %vm252_vm3, %v7206_v33, 0.0  ;;  %v7241_v23 = vsel %vm7239_vm8, %v7240_v63, 0.0 }
 0x96c   : > { %v9428_v5 = vpop.eup %9427  ;;  %v7212_v21 = vadd.f32 %v7211_v52, %v7210_v13  ;;  %v7168_v6 = vmul.f32 %v9426_v27, %v7148_v18  ;;  %v7182_v20 = vsel %vm252_vm3, %v7178_v34, 0.0  ;;  %v7209_v9 = vmul.f32 0.0, %v7205_v7 }
 0x96d   : > { %v7166_v25 = vmul.f32 %v9428_v5, %v7147_v26  ;;  %v7208_v29 = vmul.f32 0.0, %v7203_v22  ;;  %v7181_v32 = vsel %vm252_vm3, %v7177_v59, 0.0  ;;  %v7245_v15 = vsel %vm7243_vm9, %v7244_v48, 0.0 }
 0x96e   : > { %v7183_v38 = vadd.f32 %v7182_v20, %v7181_v32  ;;  %v7180_v17 = vmul.f32 0.0, %v7168_v6  ;;  %v7215_v40 = vsel %vm252_vm3, %v7209_v9, 0.0  ;;  %v7248_v18 = vstv %s4288_s30 }
 0x96f   : > { %v7179_v1 = vmul.f32 0.0, %v7166_v25  ;;  %v7213_v16 = vsel %vm252_vm3, %v7208_v29, 0.0  ;;  %v7252_v54 = vstv %s5728_s3  ;;  %v7249_v14 = vsel %vm7247_vm12, %v7248_v18, 0.0 }
 0x970   : > { %v7214_v30 = vadd.f32 %v7213_v16, %v7212_v21  ;;  %v7186_v8 = vsel %vm252_vm3, %v7180_v17, 0.0  ;;  %v7253_v61 = vsel %vm7251_vm0, %v7252_v54, 0.0  ;;  %v7256_v47 = vstv %s5757_s5 }
 0x971   : > { %v7184_v35 = vsel %vm252_vm3, %v7179_v1, 0.0  ;;  %vm7231_vm3 = vcmp.eq.s32.totalorder %v9466_v2, 8  ;;  %v7257_v33 = vsel %vm7255_vm5, %v7256_v47, 0.0 }
 0x972   : > { %v7216_v41 = vadd.f32 %v7215_v40, %v7214_v30  ;;  %v7185_v39 = vadd.f32 %v7184_v35, %v7183_v38  ;;  %v7233_v56 = vsel %vm7231_vm3, %v7232_v62, 0.0 }
 0x973   : > { %v7234_v19 = vadd.f32 %v7233_v56, %v7229_v0 }
 0x974   : > { %7217 = vadd.xlane.f32.xlu1 %v7216_v41  ;;  %v7187_v44 = vadd.f32 %v7186_v8, %v7185_v39 }
 0x975   : > { %v7238_v55 = vadd.f32 %v7237_v10, %v7234_v19 }
 0x976   : > { %7188 = vadd.xlane.f32.xlu0 %v7187_v44 }
 0x977   : > { %v7242_v36 = vadd.f32 %v7241_v23, %v7238_v55 }
 0x979   : > { %v7246_v24 = vadd.f32 %v7245_v15, %v7242_v36 }
 0x97b   : > { %v7250_v26 = vadd.f32 %v7249_v14, %v7246_v24 }
 0x97d   : > { %v7254_v31 = vadd.f32 %v7253_v61, %v7250_v26 }
 0x97f   : > { %v7258_v50 = vadd.f32 %v7257_v33, %v7254_v31 }
 0xa01   : > { %v7218_v43 = vpop.xlane.xlu1 %7217 }
 0xa02   : > { %v7219_v53 = vrot.slane %v7218_v43, 4 }
 0xa03   : > { %v7189_v42 = vpop.xlane.xlu0 %7188 }
 0xa04   : > { %v7220_v37 = vadd.f32 %v7219_v53, %v7218_v43  ;;  %v7190_v46 = vrot.slane %v7189_v42, 4 }
 0xa06   : > { %v7221_v12 = vrot.slane %v7220_v37, 2  ;;  %v7191_v28 = vadd.f32 %v7190_v46, %v7189_v42 }
 0xa08   : > { %v7222_v51 = vadd.f32 %v7221_v12, %v7220_v37  ;;  %v7192_v11 = vrot.slane %v7191_v28, 2 }
 0xa0a   : > { %v7193_v45 = vadd.f32 %v7192_v11, %v7191_v28  ;;  %v7223_v57 = vrot.slane %v7222_v51, 1 }
 0xa0c   : > { %v7194_v58 = vrot.slane %v7193_v45, 1  ;;  %v7224_v49 = vadd.f32 %v7223_v57, %v7222_v51 }
 0xa0e   : > { %v7195_v60 = vadd.f32 %v7194_v58, %v7193_v45 }
 0xa10   : > { %9335 = vpush %v7195_v60 }
 0xa11   : > { %9337 = vpush %v7224_v49 }
 0xa41   : > { %s9336_s6 = spop %9335 }
 0xa42   : > { %s7197_s7 = smul.f32 0.25, %s9336_s6  ;;  %s9338_s8 = spop %9337 }
 0xa43   : > { %s7226_s11 = smul.f32 0.25, %s9338_s8 }
 0xa44   : > { %v7260_v34 = vstv %s7197_s7 }
 0xa45   : > { %v7261_v52 = vsel %vm7259_vm10, %v7260_v34, 0.0  ;;  %v7264_v7 = vstv %s7226_s11 }
 0xa46   : > { %v7262_v27 = vadd.f32 %v7261_v52, %v7258_v50  ;;  %v7265_v59 = vsel %vm7263_vm11, %v7264_v7, 0.0 }
 0xa48   : > { %v7266_v22 = vadd.f32 %v7265_v59, %v7262_v27 }
 0xa4a   : > { %7268 = vst.msk [vmem:[%s159_s14] sm:$0x1] %vm7267_vm13, %v7266_v22 }
 0xa4b PF: > { %s12_s9 = sadd.s32 1, %s9435_s9  }
 0xa4c   : > { %p9_p4 = scmp.ge.s32.totalorder %s12_s9, 4  }
 0xa4e   :  { %11 = sbr.rel (!%p9_p4) target bundleno = 1 (0x1), region = 61 }

</bundles_post_ra>
